<compile_context>
chip_gen: v6e
topology: v6e:2x2x1
jax: 0.10.0
libtpu: 0.0.40
codegen_flags: <defaults>
</compile_context>

<pallas_src>
import functools
import math

import jax
import jax.numpy as jnp
from jax import lax
from jax.experimental import pallas as pl
from jax.experimental.pallas import tpu as pltpu


def _vmem_limit_bytes():
    """Per-generation scoped-VMEM request: ~104 MiB on 128 MiB parts, ~52 MiB on v7x."""
    cap = None
    try:
        cap = int(pltpu.get_tpu_info().vmem_capacity_bytes)
    except Exception:
        try:
            kind = jax.devices()[0].device_kind.lower()
            cap = (64 << 20) if ("v7" in kind or "7x" in kind) else (128 << 20)
        except Exception:
            cap = 64 << 20
    return (104 << 20) if cap >= (100 << 20) else (52 << 20)


def _reg_head_kernel(x_hbm, maskl_ref, maskr_ref, *refs, L, TH, W, H, AR, couts):
    """Fused REGHead forward for one (batch, row-tile) grid step.

    x_hbm    : (N, (T*TH + 2L)*W, Cin_p) bf16, HBM (manual DMA; L zero rows top, >=L bottom)
    maskl_ref: (max_rw, 1) f32 -- 0 where flattened position is image column 0
    maskr_ref: (max_rw, 1) f32 -- 0 where flattened position is image column W-1
    refs     : w_0, b_0, ..., w_{L-1}, b_{L-1},  # w: (3, Cin_p, 3*Cout_p) bf16, b: (1, Cout_p) f32
               out_ref,                           # (TH*W, AR) f32
               xbuf, act_a, act_b, sem            # scratch
    """
    ws = [refs[2 * i] for i in range(L)]
    bs = [refs[2 * i + 1] for i in range(L)]
    out_ref = refs[2 * L]
    xbuf, act_a, act_b, sem = refs[2 * L + 1:2 * L + 5]
    acts = (act_a, act_b)

    n = pl.program_id(0)
    t = pl.program_id(1)
    T = pl.num_programs(1)

    rows_in = TH + 2 * L            # input rows (with halo) this tile needs
    win = rows_in * W               # flattened window length

    def _start(tile, slot):
        pltpu.make_async_copy(
            x_hbm.at[n, pl.ds(tile * TH * W, win), :],
            xbuf.at[slot],
            sem.at[slot],
        ).start()

    # Prime the pipeline at the first tile of every image.  The inner grid axis is
    # "arbitrary" (sequential per core), so this is safe under megacore partitioning
    # of the batch axis.
    @pl.when(t == 0)
    def _():
        _start(0, 0)

    slot = lax.rem(t, 2)
    # Wait for this tile's input window.
    pltpu.make_async_copy(
        x_hbm.at[n, pl.ds(t * TH * W, win), :], xbuf.at[slot], sem.at[slot]
    ).wait()

    # Prefetch the next tile's window of this image while we compute.
    @pl.when(t + 1 < T)
    def _():
        _start(t + 1, 1 - slot)

    def conv3x3(read, w_ref, b_ref, r_out, cout, relu):
        """SAME 3x3 conv on a flattened (rows*W, Cin) window (row halo already present).

        One wide MXU matmul per dy (dx taps concatenated along the output axis);
        the dx accumulators are lane-aligned slices of the wide f32 result.
        """
        rw = r_out * W
        wide = jnp.dot(read(0, rw), w_ref[0], preferred_element_type=jnp.float32)
        for dy in (1, 2):
            wide = wide + jnp.dot(read(dy * W, rw), w_ref[dy],
                                  preferred_element_type=jnp.float32)
        a_l = wide[:, 0:cout]            # dx = 0 (left tap)
        a_c = wide[:, cout:2 * cout]     # dx = 1 (center)
        a_r = wide[:, 2 * cout:3 * cout]  # dx = 2 (right tap)
        # Column taps: a roll of the flattened f32 accumulator gives the +-1 column
        # neighbour; positions that would read the image's left/right zero padding
        # are killed with precomputed 0/1 masks (plain multiplies, no compares).
        m_l = maskl_ref[pl.ds(0, rw), :]
        m_r = maskr_ref[pl.ds(0, rw), :]
        y = (a_c + b_ref[...]
             + pltpu.roll(a_l, shift=1, axis=0) * m_l
             + pltpu.roll(a_r, shift=rw - 1, axis=0) * m_r)   # shift=rw-1 == roll by -1
        if relu:
            y = jnp.maximum(y, 0.0)
        return y

    # Layer 0 reads straight out of the DMA'd input window.
    read = lambda off, ln: xbuf[slot, pl.ds(off, ln), :]
    r_in = rows_in
    for l in range(L):
        r_out = r_in - 2
        y = conv3x3(read, ws[l], bs[l], r_out, couts[l], relu=(l < L - 1))
        if l == L - 1:
            out_ref[...] = y[:, :AR].astype(out_ref.dtype)     # direct AR-wide store
        else:
            # Rows of this intermediate that lie outside the image are the *zero
            # padding* of the next conv; force them to exactly 0 (a valid conv over
            # padded input + bias would otherwise make them nonzero).  Also covers
            # rows past H for a ragged last tile.
            halo = L - 1 - l
            top_bad = jnp.maximum(0, halo - t * TH)
            bot_bad = jnp.maximum(0, t * TH + TH + halo - H)
            k = lax.broadcasted_iota(jnp.int32, (r_out * W, 1), 0)
            ok = (k >= top_bad * W) & (k < (r_out - bot_bad) * W)
            y = jnp.where(ok, y, 0.0)

            dst = acts[l % 2]
            dst[pl.ds(0, r_out * W), :] = y.astype(dst.dtype)
            read = (lambda off, ln, _d=dst: _d[pl.ds(off, ln), :])
        r_in = r_out


def reg_head_forward(x_nchw, params, num_anchors, num_regress, *, tile_h=None):
    """REGHead forward.  x_nchw: (N, Cin, H, W) float32 (PyTorch layout)."""
    convs = params["convs"]
    head_w, head_b = params["head"]
    assert len(convs) >= 1
    N, Cin, H, W = x_nchw.shape
    F = convs[0][0].shape[-1]
    L = len(convs) + 1
    AR = num_anchors * num_regress

    pad128 = lambda c: ((c + 127) // 128) * 128
    Cin_p, F_p, Ch_p = pad128(Cin), pad128(F), pad128(AR)
    Cmax_p = max(F_p, Ch_p)
    cins = [Cin_p] + [F_p] * (L - 1)
    couts = [F_p] * (L - 1) + [Ch_p]

    # ---- per-generation VMEM budget and row-tile selection ----
    vmem_cap_limit = _vmem_limit_bytes()
    wbytes = sum(3 * ci * 3 * co * 2 for ci, co in zip(cins, couts))   # wide bf16 weights
    bbytes = sum(co * 4 for co in couts)

    def est(TH):
        rows_in = TH + 2 * L
        rw = (TH + 2 * (L - 1)) * W
        return (2 * rows_in * W * Cin_p * 2        # double-buffered input window (bf16)
                + 2 * rw * F_p * 2                 # activation ping/pong (bf16)
                + 2 * TH * W * AR * 4              # double-buffered output block (f32)
                + 2 * (wbytes + bbytes)            # pipeline-buffered weights/biases
                + 2 * 2 * rw * 4                   # edge-column masks
                + 6 * rw * Cmax_p * 4)             # live f32 accumulators / temps

    step = 8 // math.gcd(W, 8)                     # keeps (TH*W) % 8 == 0
    if tile_h is None:
        budget = int(vmem_cap_limit * 0.65)
        cands = list(range(step, H, step)) + [H]
        TH = cands[0]
        for c in cands:                            # est() is monotone in TH
            if est(c) <= budget:
                TH = c
    else:
        TH = int(tile_h)
        assert TH >= 1
        assert TH >= H or (TH * W) % 8 == 0, "tile_h*W must be a multiple of 8"
    TH = min(TH, H)
    T = -(-H // TH)                                # cdiv; last tile may be ragged
    rows_in = TH + 2 * L
    max_rw = (TH + 2 * (L - 1)) * W                # largest intermediate (flattened)

    # ---- input: NCHW -> NHWC, bf16, zero pad rows (halo) + channels, flatten rows*W ----
    # transpose + cast + pad + reshape fuse into a single XLA pass over the input.
    x = jnp.transpose(x_nchw, (0, 2, 3, 1)).astype(jnp.bfloat16)
    x = jnp.pad(x, ((0, 0), (L, L + T * TH - H), (0, 0), (0, Cin_p - Cin)))
    x = x.reshape(N, (T * TH + 2 * L) * W, Cin_p)

    # ---- weights: pad channels to 128 multiples, concat dx taps -> (3, Cin_p, 3*Cout_p) bf16 ----
    w_raw = [w for w, _ in convs] + [head_w]
    b_raw = [b for _, b in convs] + [head_b]
    w_list, b_list = [], []
    for wl, bl, ci, co in zip(w_raw, b_raw, cins, couts):
        w = jnp.pad(wl, ((0, 0), (0, 0), (0, ci - wl.shape[2]), (0, co - wl.shape[3])))
        wide = jnp.concatenate([w[:, 0], w[:, 1], w[:, 2]], axis=-1)   # (3, ci, 3*co)
        w_list.append(wide.astype(jnp.bfloat16))
        b_list.append(jnp.pad(bl, ((0, co - bl.shape[0]),)).reshape(1, co).astype(jnp.float32))

    # 0/1 edge-column masks (precomputed -> no in-kernel integer div/mod).
    col = jnp.arange(max_rw, dtype=jnp.int32) % W
    mask_l = (col != 0).astype(jnp.float32)[:, None]
    mask_r = (col != (W - 1)).astype(jnp.float32)[:, None]

    in_specs = [
        pl.BlockSpec(memory_space=pl.ANY),                      # input stays in HBM
        pl.BlockSpec((max_rw, 1), lambda n, t: (0, 0)),
        pl.BlockSpec((max_rw, 1), lambda n, t: (0, 0)),
    ]
    inputs = [x, mask_l, mask_r]
    for w, b in zip(w_list, b_list):
        in_specs.append(pl.BlockSpec(w.shape, lambda n, t: (0, 0, 0)))
        in_specs.append(pl.BlockSpec(b.shape, lambda n, t: (0, 0)))
        inputs += [w, b]

    scratch_shapes = [
        pltpu.VMEM((2, rows_in * W, Cin_p), jnp.bfloat16),   # double-buffered input window
        pltpu.VMEM((max_rw, F_p), jnp.bfloat16),             # activation ping
        pltpu.VMEM((max_rw, F_p), jnp.bfloat16),             # activation pong
        pltpu.SemaphoreType.DMA((2,)),
    ]

    vmem_limit = int(min(vmem_cap_limit, max(int(est(TH) * 1.4) + (8 << 20), 24 << 20)))

    kernel = functools.partial(_reg_head_kernel, L=L, TH=TH, W=W, H=H, AR=AR,
                               couts=tuple(couts))
    out = pl.pallas_call(
        kernel,
        out_shape=jax.ShapeDtypeStruct((N, H * W, AR), jnp.float32),
        grid_spec=pltpu.PrefetchScalarGridSpec(
            num_scalar_prefetch=0,
            grid=(N, T),
            in_specs=in_specs,
            out_specs=pl.BlockSpec((None, TH * W, AR), lambda n, t: (n, t, 0)),
            scratch_shapes=scratch_shapes,
        ),
        compiler_params=pltpu.CompilerParams(
            dimension_semantics=("parallel", "arbitrary"),
            vmem_limit_bytes=vmem_limit,
        ),
    )(*inputs)

    # (N, H*W, AR) -> PyTorch permute(0,2,3,1).reshape(N, -1, num_regress); no HBM slice pass.
    return out.reshape(N, H * W * num_anchors, num_regress)


def init_reg_head_params(key, in_channels, feat_channels, num_stacked,
                         num_anchors, num_regress, *, zero_head=True,
                         random_bias=False):
    """Parameters matching REGHead.init_weights: conv weights ~ N(0, sqrt(2/(9*Cout))).

    PyTorch zero-inits the head conv (zero_head=True).  The self-test uses
    zero_head=False and random biases so the no-ReLU head path and bias adds are
    actually validated.
    """
    params = {"convs": [], "head": None}
    chns = in_channels
    for _ in range(num_stacked):
        key, wk, bk = jax.random.split(key, 3)
        std = math.sqrt(2.0 / (3 * 3 * feat_channels))
        w = jax.random.normal(wk, (3, 3, chns, feat_channels), jnp.float32) * std
        if random_bias:
            b = jax.random.uniform(bk, (feat_channels,), jnp.float32, -0.1, 0.1)
        else:
            b = jnp.zeros((feat_channels,), jnp.float32)
        params["convs"].append((w, b))
        chns = feat_channels
    head_out = num_anchors * num_regress
    if zero_head:
        wh = jnp.zeros((3, 3, feat_channels, head_out), jnp.float32)
        bh = jnp.zeros((head_out,), jnp.float32)
    else:
        key, wk, bk = jax.random.split(key, 3)
        std = math.sqrt(2.0 / (3 * 3 * head_out))
        wh = jax.random.normal(wk, (3, 3, feat_channels, head_out), jnp.float32) * std
        bh = jax.random.uniform(bk, (head_out,), jnp.float32, -0.1, 0.1)
    params["head"] = (wh, bh)
    return params


def _reference_forward(x_nchw, params, num_anchors, num_regress):
    """Pure-JAX reference mirroring the kernel's bf16-operand / f32-accumulate numerics."""
    def q(a):  # bf16 rounding, math in f32
        return a.astype(jnp.bfloat16).astype(jnp.float32)

    x = q(jnp.transpose(x_nchw, (0, 2, 3, 1)))
    dn = lax.conv_dimension_numbers(x.shape, params["convs"][0][0].shape,
                                    ("NHWC", "HWIO", "NHWC"))

    def conv(x, w, b):
        y = lax.conv_general_dilated(x, q(w), (1, 1), "SAME",
                                     dimension_numbers=dn,
                                     precision=lax.Precision.HIGHEST)
        return y + b[None, None, None, :]

    for w, b in params["convs"]:
        x = q(jnp.maximum(conv(x, w, b), 0.0))
    wh, bh = params["head"]
    x = conv(x, wh, bh)
    N, H, W, _ = x.shape
    return x.reshape(N, H * W * num_anchors, num_regress)


if __name__ == "__main__":
    # Small shapes consistent with the module.
    in_channels, feat_channels = 4, 8
    num_stacked, num_anchors, num_regress = 2, 3, 4
    N, H, W = 2, 16, 16

    key = jax.random.PRNGKey(0)
    key, xk = jax.random.split(key)
    x = jax.random.normal(xk, (N, in_channels, H, W), jnp.float32)   # NCHW like PyTorch

    # NOTE: PyTorch's REGHead zero-inits the head conv; the test uses a random head
    # (and random biases) so the relu=False head path is actually validated.
    params = init_reg_head_params(key, in_channels, feat_channels, num_stacked,
                                  num_anchors, num_regress,
                                  zero_head=False, random_bias=True)

    out = reg_head_forward(x, params, num_anchors, num_regress)
    out = jax.block_until_ready(out)

    ref = _reference_forward(x, params, num_anchors, num_regress)
    assert out.shape == (N, H * W * num_anchors, num_regress), out.shape
    max_err = float(jnp.max(jnp.abs(out - ref)))
    assert jnp.allclose(out, ref, atol=1e-2, rtol=1e-2), f"mismatch (max |err|={max_err})"

    print("KERNEL_OK")
</pallas_src>

<mosaic_0001>
module attributes {stable_mosaic.version = 11 : i64} {
  func.func @_reg_head_kernel(%arg0: i32, %arg1: i32, %arg2: memref<2x352x128xbf16, #tpu.memory_space<any>>, %arg3: memref<320x1xf32, #tpu.memory_space<vmem>>, %arg4: memref<320x1xf32, #tpu.memory_space<vmem>>, %arg5: memref<3x128x384xbf16, #tpu.memory_space<vmem>>, %arg6: memref<1x128xf32, #tpu.memory_space<vmem>>, %arg7: memref<3x128x384xbf16, #tpu.memory_space<vmem>>, %arg8: memref<1x128xf32, #tpu.memory_space<vmem>>, %arg9: memref<3x128x384xbf16, #tpu.memory_space<vmem>>, %arg10: memref<1x128xf32, #tpu.memory_space<vmem>>, %arg11: memref<1x256x12xf32, #tpu.memory_space<vmem>>, %arg12: memref<2x352x128xbf16, #tpu.memory_space<vmem>>, %arg13: memref<320x128xbf16, #tpu.memory_space<vmem>>, %arg14: memref<320x128xbf16, #tpu.memory_space<vmem>>, %arg15: memref<2x!tpu.dma_semaphore, #tpu.memory_space<semaphore_mem>>) attributes {dimension_semantics = [#tpu.dimension_semantics<parallel>, #tpu.dimension_semantics<arbitrary>], iteration_bounds = array<i64: 2, 1>, scalar_prefetch = 0 : i64, scratch_operands = 4 : i64, tpu.core_type = #tpu.core_type<tc>, window_params = [{}, {pipeline_mode = #tpu.pipeline_mode<synchronous>, transform_indices = @transform_1, window_bounds = array<i64: 320, 1>}, {pipeline_mode = #tpu.pipeline_mode<synchronous>, transform_indices = @transform_2, window_bounds = array<i64: 320, 1>}, {pipeline_mode = #tpu.pipeline_mode<synchronous>, transform_indices = @transform_3, window_bounds = array<i64: 3, 128, 384>}, {pipeline_mode = #tpu.pipeline_mode<synchronous>, transform_indices = @transform_4, window_bounds = array<i64: 1, 128>}, {pipeline_mode = #tpu.pipeline_mode<synchronous>, transform_indices = @transform_5, window_bounds = array<i64: 3, 128, 384>}, {pipeline_mode = #tpu.pipeline_mode<synchronous>, transform_indices = @transform_6, window_bounds = array<i64: 1, 128>}, {pipeline_mode = #tpu.pipeline_mode<synchronous>, transform_indices = @transform_7, window_bounds = array<i64: 3, 128, 384>}, {pipeline_mode = #tpu.pipeline_mode<synchronous>, transform_indices = @transform_8, window_bounds = array<i64: 1, 128>}, {transform_indices = @transform_9, window_bounds = array<i64: 1, 256, 12>}]} {
    %c0_i32 = arith.constant 0 : i32
    %0 = arith.cmpi eq, %arg1, %c0_i32 : i32
    %1 = arith.extui %0 : i1 to i32
    %c0_i32_0 = arith.constant 0 : i32
    %2 = arith.cmpi ne, %1, %c0_i32_0 : i32
    scf.if %2 {
      %c0_i32_107 = arith.constant 0 : i32
      %c0_i32_108 = arith.constant 0 : i32
      %c0_i32_109 = arith.constant 0 : i32
      %c0_i32_110 = arith.constant 0 : i32
      %166 = tpu.memref_slice %arg2[%arg0, %c0_i32_109, %c0_i32_110] : memref<2x352x128xbf16, #tpu.memory_space<any>> -> memref<1x352x128xbf16, #tpu.memory_space<any>>
      %167 = tpu.memref_squeeze %166 : memref<1x352x128xbf16, #tpu.memory_space<any>> -> memref<352x128xbf16, #tpu.memory_space<any>>
      %c0_i32_111 = arith.constant 0 : i32
      %c0_i32_112 = arith.constant 0 : i32
      %168 = tpu.memref_slice %arg12[%c0_i32_107, %c0_i32_111, %c0_i32_112] : memref<2x352x128xbf16, #tpu.memory_space<vmem>> -> memref<1x352x128xbf16, #tpu.memory_space<vmem>>
      %169 = tpu.memref_squeeze %168 : memref<1x352x128xbf16, #tpu.memory_space<vmem>> -> memref<352x128xbf16, #tpu.memory_space<vmem>>
      %170 = tpu.memref_slice %arg15[%c0_i32_108] : memref<2x!tpu.dma_semaphore, #tpu.memory_space<semaphore_mem>> -> memref<1x!tpu.dma_semaphore, #tpu.memory_space<semaphore_mem>>
      %171 = tpu.memref_squeeze %170 : memref<1x!tpu.dma_semaphore, #tpu.memory_space<semaphore_mem>> -> memref<!tpu.dma_semaphore, #tpu.memory_space<semaphore_mem>>
      tpu.enqueue_dma source(%167 : memref<352x128xbf16, #tpu.memory_space<any>>) target(%169 : memref<352x128xbf16, #tpu.memory_space<vmem>>) target_semaphore(%171 : memref<!tpu.dma_semaphore, #tpu.memory_space<semaphore_mem>>)
    } else {
    }
    %c2_i32 = arith.constant 2 : i32
    %3 = arith.remsi %arg1, %c2_i32 : i32
    %c16_i32 = arith.constant 16 : i32
    %4 = arith.muli %arg1, %c16_i32 : i32
    %c16_i32_1 = arith.constant 16 : i32
    %5 = arith.muli %4, %c16_i32_1 : i32
    %c0_i32_2 = arith.constant 0 : i32
    %6 = tpu.memref_slice %arg2[%arg0, %5, %c0_i32_2] : memref<2x352x128xbf16, #tpu.memory_space<any>> -> memref<1x352x128xbf16, #tpu.memory_space<any>>
    %7 = tpu.memref_squeeze %6 : memref<1x352x128xbf16, #tpu.memory_space<any>> -> memref<352x128xbf16, #tpu.memory_space<any>>
    %c0_i32_3 = arith.constant 0 : i32
    %c0_i32_4 = arith.constant 0 : i32
    %8 = tpu.memref_slice %arg12[%3, %c0_i32_3, %c0_i32_4] : memref<2x352x128xbf16, #tpu.memory_space<vmem>> -> memref<1x352x128xbf16, #tpu.memory_space<vmem>>
    %9 = tpu.memref_squeeze %8 : memref<1x352x128xbf16, #tpu.memory_space<vmem>> -> memref<352x128xbf16, #tpu.memory_space<vmem>>
    %10 = tpu.memref_slice %arg15[%3] : memref<2x!tpu.dma_semaphore, #tpu.memory_space<semaphore_mem>> -> memref<1x!tpu.dma_semaphore, #tpu.memory_space<semaphore_mem>>
    %11 = tpu.memref_squeeze %10 : memref<1x!tpu.dma_semaphore, #tpu.memory_space<semaphore_mem>> -> memref<!tpu.dma_semaphore, #tpu.memory_space<semaphore_mem>>
    tpu.wait_dma2 semaphore(%11 : memref<!tpu.dma_semaphore, #tpu.memory_space<semaphore_mem>>) src(%7 : memref<352x128xbf16, #tpu.memory_space<any>>) dst(%9 : memref<352x128xbf16, #tpu.memory_space<vmem>>)
    %c1_i32 = arith.constant 1 : i32
    %12 = arith.addi %arg1, %c1_i32 : i32
    %c1_i32_5 = arith.constant 1 : i32
    %13 = arith.cmpi slt, %12, %c1_i32_5 : i32
    %14 = arith.extui %13 : i1 to i32
    %c0_i32_6 = arith.constant 0 : i32
    %15 = arith.cmpi ne, %14, %c0_i32_6 : i32
    scf.if %15 {
      %c1_i32_107 = arith.constant 1 : i32
      %166 = arith.addi %arg1, %c1_i32_107 : i32
      %c1_i32_108 = arith.constant 1 : i32
      %167 = arith.subi %c1_i32_108, %3 : i32
      %c16_i32_109 = arith.constant 16 : i32
      %168 = arith.muli %166, %c16_i32_109 : i32
      %c16_i32_110 = arith.constant 16 : i32
      %169 = arith.muli %168, %c16_i32_110 : i32
      %c0_i32_111 = arith.constant 0 : i32
      %170 = tpu.memref_slice %arg2[%arg0, %169, %c0_i32_111] : memref<2x352x128xbf16, #tpu.memory_space<any>> -> memref<1x352x128xbf16, #tpu.memory_space<any>>
      %171 = tpu.memref_squeeze %170 : memref<1x352x128xbf16, #tpu.memory_space<any>> -> memref<352x128xbf16, #tpu.memory_space<any>>
      %c0_i32_112 = arith.constant 0 : i32
      %c0_i32_113 = arith.constant 0 : i32
      %172 = tpu.memref_slice %arg12[%167, %c0_i32_112, %c0_i32_113] : memref<2x352x128xbf16, #tpu.memory_space<vmem>> -> memref<1x352x128xbf16, #tpu.memory_space<vmem>>
      %173 = tpu.memref_squeeze %172 : memref<1x352x128xbf16, #tpu.memory_space<vmem>> -> memref<352x128xbf16, #tpu.memory_space<vmem>>
      %174 = tpu.memref_slice %arg15[%167] : memref<2x!tpu.dma_semaphore, #tpu.memory_space<semaphore_mem>> -> memref<1x!tpu.dma_semaphore, #tpu.memory_space<semaphore_mem>>
      %175 = tpu.memref_squeeze %174 : memref<1x!tpu.dma_semaphore, #tpu.memory_space<semaphore_mem>> -> memref<!tpu.dma_semaphore, #tpu.memory_space<semaphore_mem>>
      tpu.enqueue_dma source(%171 : memref<352x128xbf16, #tpu.memory_space<any>>) target(%173 : memref<352x128xbf16, #tpu.memory_space<vmem>>) target_semaphore(%175 : memref<!tpu.dma_semaphore, #tpu.memory_space<semaphore_mem>>)
    } else {
    }
    %16 = arith.index_cast %3 : i32 to index
    %c0 = arith.constant 0 : index
    %c0_7 = arith.constant 0 : index
    %17 = vector.load %arg12[%16, %c0, %c0_7] : memref<2x352x128xbf16, #tpu.memory_space<vmem>>, vector<1x320x128xbf16>
    %18 = vector.shape_cast %17 : vector<1x320x128xbf16> to vector<320x128xbf16>
    %c0_8 = arith.constant 0 : index
    %c0_9 = arith.constant 0 : index
    %c0_10 = arith.constant 0 : index
    %19 = vector.load %arg5[%c0_8, %c0_9, %c0_10] : memref<3x128x384xbf16, #tpu.memory_space<vmem>>, vector<1x128x384xbf16>
    %20 = vector.shape_cast %19 : vector<1x128x384xbf16> to vector<128x384xbf16>
    %cst = arith.constant dense<0.000000e+00> : vector<320x384xf32>
    %21 = tpu.matmul %18, %20, %cst {dimension_numbers = #tpu.dot_dimension_numbers<[1], [0], [0], [1], [0, 0, 1, 1], [], []>} : vector<320x128xbf16>, vector<128x384xbf16>, vector<320x384xf32> -> vector<320x384xf32>
    %22 = arith.index_cast %3 : i32 to index
    %c16 = arith.constant 16 : index
    %c0_11 = arith.constant 0 : index
    %23 = vector.load %arg12[%22, %c16, %c0_11] : memref<2x352x128xbf16, #tpu.memory_space<vmem>>, vector<1x320x128xbf16>
    %24 = vector.shape_cast %23 : vector<1x320x128xbf16> to vector<320x128xbf16>
    %c1 = arith.constant 1 : index
    %c0_12 = arith.constant 0 : index
    %c0_13 = arith.constant 0 : index
    %25 = vector.load %arg5[%c1, %c0_12, %c0_13] : memref<3x128x384xbf16, #tpu.memory_space<vmem>>, vector<1x128x384xbf16>
    %26 = vector.shape_cast %25 : vector<1x128x384xbf16> to vector<128x384xbf16>
    %cst_14 = arith.constant dense<0.000000e+00> : vector<320x384xf32>
    %27 = tpu.matmul %24, %26, %cst_14 {dimension_numbers = #tpu.dot_dimension_numbers<[1], [0], [0], [1], [0, 0, 1, 1], [], []>} : vector<320x128xbf16>, vector<128x384xbf16>, vector<320x384xf32> -> vector<320x384xf32>
    %28 = arith.addf %21, %27 : vector<320x384xf32>
    %29 = arith.index_cast %3 : i32 to index
    %c32 = arith.constant 32 : index
    %c0_15 = arith.constant 0 : index
    %30 = vector.load %arg12[%29, %c32, %c0_15] : memref<2x352x128xbf16, #tpu.memory_space<vmem>>, vector<1x320x128xbf16>
    %31 = vector.shape_cast %30 : vector<1x320x128xbf16> to vector<320x128xbf16>
    %c2 = arith.constant 2 : index
    %c0_16 = arith.constant 0 : index
    %c0_17 = arith.constant 0 : index
    %32 = vector.load %arg5[%c2, %c0_16, %c0_17] : memref<3x128x384xbf16, #tpu.memory_space<vmem>>, vector<1x128x384xbf16>
    %33 = vector.shape_cast %32 : vector<1x128x384xbf16> to vector<128x384xbf16>
    %cst_18 = arith.constant dense<0.000000e+00> : vector<320x384xf32>
    %34 = tpu.matmul %31, %33, %cst_18 {dimension_numbers = #tpu.dot_dimension_numbers<[1], [0], [0], [1], [0, 0, 1, 1], [], []>} : vector<320x128xbf16>, vector<128x384xbf16>, vector<320x384xf32> -> vector<320x384xf32>
    %35 = arith.addf %28, %34 : vector<320x384xf32>
    %36 = vector.extract_strided_slice %35 {offsets = [0, 0], sizes = [320, 128], strides = [1, 1]} : vector<320x384xf32> to vector<320x128xf32>
    %37 = vector.extract_strided_slice %35 {offsets = [0, 128], sizes = [320, 128], strides = [1, 1]} : vector<320x384xf32> to vector<320x128xf32>
    %38 = vector.extract_strided_slice %35 {offsets = [0, 256], sizes = [320, 128], strides = [1, 1]} : vector<320x384xf32> to vector<320x128xf32>
    %c0_19 = arith.constant 0 : index
    %c0_20 = arith.constant 0 : index
    %39 = vector.load %arg3[%c0_19, %c0_20] : memref<320x1xf32, #tpu.memory_space<vmem>>, vector<320x1xf32>
    %c0_21 = arith.constant 0 : index
    %c0_22 = arith.constant 0 : index
    %40 = vector.load %arg4[%c0_21, %c0_22] : memref<320x1xf32, #tpu.memory_space<vmem>>, vector<320x1xf32>
    %c0_23 = arith.constant 0 : index
    %c0_24 = arith.constant 0 : index
    %41 = vector.load %arg6[%c0_23, %c0_24] : memref<1x128xf32, #tpu.memory_space<vmem>>, vector<1x128xf32>
    %42 = vector.broadcast %41 : vector<1x128xf32> to vector<320x128xf32>
    %43 = arith.addf %37, %42 : vector<320x128xf32>
    %c1_i32_25 = arith.constant 1 : i32
    %44 = tpu.dynamic_rotate %36 by %c1_i32_25 dim 0 : vector<320x128xf32>, i32 -> vector<320x128xf32>
    %45 = vector.broadcast %39 : vector<320x1xf32> to vector<320x128xf32>
    %46 = arith.mulf %44, %45 : vector<320x128xf32>
    %47 = arith.addf %43, %46 : vector<320x128xf32>
    %c319_i32 = arith.constant 319 : i32
    %48 = tpu.dynamic_rotate %38 by %c319_i32 dim 0 : vector<320x128xf32>, i32 -> vector<320x128xf32>
    %49 = vector.broadcast %40 : vector<320x1xf32> to vector<320x128xf32>
    %50 = arith.mulf %48, %49 : vector<320x128xf32>
    %51 = arith.addf %47, %50 : vector<320x128xf32>
    %cst_26 = arith.constant 0.000000e+00 : f32
    %52 = vector.broadcast %cst_26 : f32 to vector<320x128xf32>
    %53 = arith.maximumf %51, %52 : vector<320x128xf32>
    %c16_i32_27 = arith.constant 16 : i32
    %54 = arith.muli %arg1, %c16_i32_27 : i32
    %c2_i32_28 = arith.constant 2 : i32
    %55 = arith.subi %c2_i32_28, %54 : i32
    %c0_i32_29 = arith.constant 0 : i32
    %56 = arith.maxsi %c0_i32_29, %55 : i32
    %c16_i32_30 = arith.constant 16 : i32
    %57 = arith.muli %arg1, %c16_i32_30 : i32
    %c16_i32_31 = arith.constant 16 : i32
    %58 = arith.addi %57, %c16_i32_31 : i32
    %c2_i32_32 = arith.constant 2 : i32
    %59 = arith.addi %58, %c2_i32_32 : i32
    %c16_i32_33 = arith.constant 16 : i32
    %60 = arith.subi %59, %c16_i32_33 : i32
    %c0_i32_34 = arith.constant 0 : i32
    %61 = arith.maxsi %c0_i32_34, %60 : i32
    %62 = tpu.iota {dimensions = array<i32: 0>} : vector<320x1xi32>
    %c16_i32_35 = arith.constant 16 : i32
    %63 = arith.muli %56, %c16_i32_35 : i32
    %64 = vector.broadcast %63 : i32 to vector<320x1xi32>
    %65 = arith.cmpi sge, %62, %64 : vector<320x1xi32>
    %c20_i32 = arith.constant 20 : i32
    %66 = arith.subi %c20_i32, %61 : i32
    %c16_i32_36 = arith.constant 16 : i32
    %67 = arith.muli %66, %c16_i32_36 : i32
    %68 = vector.broadcast %67 : i32 to vector<320x1xi32>
    %69 = arith.cmpi slt, %62, %68 : vector<320x1xi32>
    %70 = arith.andi %65, %69 : vector<320x1xi1>
    %cst_37 = arith.constant 0.000000e+00 : f32
    %71 = vector.shape_cast %70 : vector<320x1xi1> to vector<320x1xi1>
    %72 = vector.broadcast %71 : vector<320x1xi1> to vector<320x128xi1>
    %73 = vector.broadcast %cst_37 : f32 to vector<320x128xf32>
    %74 = arith.select %72, %53, %73 : vector<320x128xi1>, vector<320x128xf32>
    %75 = arith.truncf %74 : vector<320x128xf32> to vector<320x128xbf16>
    %c0_38 = arith.constant 0 : index
    %c0_39 = arith.constant 0 : index
    %76 = vector.load %arg13[%c0_38, %c0_39] : memref<320x128xbf16, #tpu.memory_space<vmem>>, vector<320x128xbf16>
    tpu.vector_store %arg13[%c0_38, %c0_39], %75 {strides = array<i32>} : memref<320x128xbf16, #tpu.memory_space<vmem>>, vector<320x128xbf16>,
    %c0_40 = arith.constant 0 : index
    %c0_41 = arith.constant 0 : index
    %77 = vector.load %arg13[%c0_40, %c0_41] : memref<320x128xbf16, #tpu.memory_space<vmem>>, vector<288x128xbf16>
    %c0_42 = arith.constant 0 : index
    %c0_43 = arith.constant 0 : index
    %c0_44 = arith.constant 0 : index
    %78 = vector.load %arg7[%c0_42, %c0_43, %c0_44] : memref<3x128x384xbf16, #tpu.memory_space<vmem>>, vector<1x128x384xbf16>
    %79 = vector.shape_cast %78 : vector<1x128x384xbf16> to vector<128x384xbf16>
    %cst_45 = arith.constant dense<0.000000e+00> : vector<288x384xf32>
    %80 = tpu.matmul %77, %79, %cst_45 {dimension_numbers = #tpu.dot_dimension_numbers<[1], [0], [0], [1], [0, 0, 1, 1], [], []>} : vector<288x128xbf16>, vector<128x384xbf16>, vector<288x384xf32> -> vector<288x384xf32>
    %c16_46 = arith.constant 16 : index
    %c0_47 = arith.constant 0 : index
    %81 = vector.load %arg13[%c16_46, %c0_47] : memref<320x128xbf16, #tpu.memory_space<vmem>>, vector<288x128xbf16>
    %c1_48 = arith.constant 1 : index
    %c0_49 = arith.constant 0 : index
    %c0_50 = arith.constant 0 : index
    %82 = vector.load %arg7[%c1_48, %c0_49, %c0_50] : memref<3x128x384xbf16, #tpu.memory_space<vmem>>, vector<1x128x384xbf16>
    %83 = vector.shape_cast %82 : vector<1x128x384xbf16> to vector<128x384xbf16>
    %cst_51 = arith.constant dense<0.000000e+00> : vector<288x384xf32>
    %84 = tpu.matmul %81, %83, %cst_51 {dimension_numbers = #tpu.dot_dimension_numbers<[1], [0], [0], [1], [0, 0, 1, 1], [], []>} : vector<288x128xbf16>, vector<128x384xbf16>, vector<288x384xf32> -> vector<288x384xf32>
    %85 = arith.addf %80, %84 : vector<288x384xf32>
    %c32_52 = arith.constant 32 : index
    %c0_53 = arith.constant 0 : index
    %86 = vector.load %arg13[%c32_52, %c0_53] : memref<320x128xbf16, #tpu.memory_space<vmem>>, vector<288x128xbf16>
    %c2_54 = arith.constant 2 : index
    %c0_55 = arith.constant 0 : index
    %c0_56 = arith.constant 0 : index
    %87 = vector.load %arg7[%c2_54, %c0_55, %c0_56] : memref<3x128x384xbf16, #tpu.memory_space<vmem>>, vector<1x128x384xbf16>
    %88 = vector.shape_cast %87 : vector<1x128x384xbf16> to vector<128x384xbf16>
    %cst_57 = arith.constant dense<0.000000e+00> : vector<288x384xf32>
    %89 = tpu.matmul %86, %88, %cst_57 {dimension_numbers = #tpu.dot_dimension_numbers<[1], [0], [0], [1], [0, 0, 1, 1], [], []>} : vector<288x128xbf16>, vector<128x384xbf16>, vector<288x384xf32> -> vector<288x384xf32>
    %90 = arith.addf %85, %89 : vector<288x384xf32>
    %91 = vector.extract_strided_slice %90 {offsets = [0, 0], sizes = [288, 128], strides = [1, 1]} : vector<288x384xf32> to vector<288x128xf32>
    %92 = vector.extract_strided_slice %90 {offsets = [0, 128], sizes = [288, 128], strides = [1, 1]} : vector<288x384xf32> to vector<288x128xf32>
    %93 = vector.extract_strided_slice %90 {offsets = [0, 256], sizes = [288, 128], strides = [1, 1]} : vector<288x384xf32> to vector<288x128xf32>
    %c0_58 = arith.constant 0 : index
    %c0_59 = arith.constant 0 : index
    %94 = vector.load %arg3[%c0_58, %c0_59] : memref<320x1xf32, #tpu.memory_space<vmem>>, vector<288x1xf32>
    %c0_60 = arith.constant 0 : index
    %c0_61 = arith.constant 0 : index
    %95 = vector.load %arg4[%c0_60, %c0_61] : memref<320x1xf32, #tpu.memory_space<vmem>>, vector<288x1xf32>
    %c0_62 = arith.constant 0 : index
    %c0_63 = arith.constant 0 : index
    %96 = vector.load %arg8[%c0_62, %c0_63] : memref<1x128xf32, #tpu.memory_space<vmem>>, vector<1x128xf32>
    %97 = vector.broadcast %96 : vector<1x128xf32> to vector<288x128xf32>
    %98 = arith.addf %92, %97 : vector<288x128xf32>
    %c1_i32_64 = arith.constant 1 : i32
    %99 = tpu.dynamic_rotate %91 by %c1_i32_64 dim 0 : vector<288x128xf32>, i32 -> vector<288x128xf32>
    %100 = vector.broadcast %94 : vector<288x1xf32> to vector<288x128xf32>
    %101 = arith.mulf %99, %100 : vector<288x128xf32>
    %102 = arith.addf %98, %101 : vector<288x128xf32>
    %c287_i32 = arith.constant 287 : i32
    %103 = tpu.dynamic_rotate %93 by %c287_i32 dim 0 : vector<288x128xf32>, i32 -> vector<288x128xf32>
    %104 = vector.broadcast %95 : vector<288x1xf32> to vector<288x128xf32>
    %105 = arith.mulf %103, %104 : vector<288x128xf32>
    %106 = arith.addf %102, %105 : vector<288x128xf32>
    %cst_65 = arith.constant 0.000000e+00 : f32
    %107 = vector.broadcast %cst_65 : f32 to vector<288x128xf32>
    %108 = arith.maximumf %106, %107 : vector<288x128xf32>
    %c16_i32_66 = arith.constant 16 : i32
    %109 = arith.muli %arg1, %c16_i32_66 : i32
    %c1_i32_67 = arith.constant 1 : i32
    %110 = arith.subi %c1_i32_67, %109 : i32
    %c0_i32_68 = arith.constant 0 : i32
    %111 = arith.maxsi %c0_i32_68, %110 : i32
    %c16_i32_69 = arith.constant 16 : i32
    %112 = arith.muli %arg1, %c16_i32_69 : i32
    %c16_i32_70 = arith.constant 16 : i32
    %113 = arith.addi %112, %c16_i32_70 : i32
    %c1_i32_71 = arith.constant 1 : i32
    %114 = arith.addi %113, %c1_i32_71 : i32
    %c16_i32_72 = arith.constant 16 : i32
    %115 = arith.subi %114, %c16_i32_72 : i32
    %c0_i32_73 = arith.constant 0 : i32
    %116 = arith.maxsi %c0_i32_73, %115 : i32
    %117 = tpu.iota {dimensions = array<i32: 0>} : vector<288x1xi32>
    %c16_i32_74 = arith.constant 16 : i32
    %118 = arith.muli %111, %c16_i32_74 : i32
    %119 = vector.broadcast %118 : i32 to vector<288x1xi32>
    %120 = arith.cmpi sge, %117, %119 : vector<288x1xi32>
    %c18_i32 = arith.constant 18 : i32
    %121 = arith.subi %c18_i32, %116 : i32
    %c16_i32_75 = arith.constant 16 : i32
    %122 = arith.muli %121, %c16_i32_75 : i32
    %123 = vector.broadcast %122 : i32 to vector<288x1xi32>
    %124 = arith.cmpi slt, %117, %123 : vector<288x1xi32>
    %125 = arith.andi %120, %124 : vector<288x1xi1>
    %cst_76 = arith.constant 0.000000e+00 : f32
    %126 = vector.shape_cast %125 : vector<288x1xi1> to vector<288x1xi1>
    %127 = vector.broadcast %126 : vector<288x1xi1> to vector<288x128xi1>
    %128 = vector.broadcast %cst_76 : f32 to vector<288x128xf32>
    %129 = arith.select %127, %108, %128 : vector<288x128xi1>, vector<288x128xf32>
    %130 = arith.truncf %129 : vector<288x128xf32> to vector<288x128xbf16>
    %c0_77 = arith.constant 0 : index
    %c0_78 = arith.constant 0 : index
    %131 = vector.load %arg14[%c0_77, %c0_78] : memref<320x128xbf16, #tpu.memory_space<vmem>>, vector<288x128xbf16>
    tpu.vector_store %arg14[%c0_77, %c0_78], %130 {strides = array<i32>} : memref<320x128xbf16, #tpu.memory_space<vmem>>, vector<288x128xbf16>,
    %c0_79 = arith.constant 0 : index
    %c0_80 = arith.constant 0 : index
    %132 = vector.load %arg14[%c0_79, %c0_80] : memref<320x128xbf16, #tpu.memory_space<vmem>>, vector<256x128xbf16>
    %c0_81 = arith.constant 0 : index
    %c0_82 = arith.constant 0 : index
    %c0_83 = arith.constant 0 : index
    %133 = vector.load %arg9[%c0_81, %c0_82, %c0_83] : memref<3x128x384xbf16, #tpu.memory_space<vmem>>, vector<1x128x384xbf16>
    %134 = vector.shape_cast %133 : vector<1x128x384xbf16> to vector<128x384xbf16>
    %cst_84 = arith.constant dense<0.000000e+00> : vector<256x384xf32>
    %135 = tpu.matmul %132, %134, %cst_84 {dimension_numbers = #tpu.dot_dimension_numbers<[1], [0], [0], [1], [0, 0, 1, 1], [], []>} : vector<256x128xbf16>, vector<128x384xbf16>, vector<256x384xf32> -> vector<256x384xf32>
    %c16_85 = arith.constant 16 : index
    %c0_86 = arith.constant 0 : index
    %136 = vector.load %arg14[%c16_85, %c0_86] : memref<320x128xbf16, #tpu.memory_space<vmem>>, vector<256x128xbf16>
    %c1_87 = arith.constant 1 : index
    %c0_88 = arith.constant 0 : index
    %c0_89 = arith.constant 0 : index
    %137 = vector.load %arg9[%c1_87, %c0_88, %c0_89] : memref<3x128x384xbf16, #tpu.memory_space<vmem>>, vector<1x128x384xbf16>
    %138 = vector.shape_cast %137 : vector<1x128x384xbf16> to vector<128x384xbf16>
    %cst_90 = arith.constant dense<0.000000e+00> : vector<256x384xf32>
    %139 = tpu.matmul %136, %138, %cst_90 {dimension_numbers = #tpu.dot_dimension_numbers<[1], [0], [0], [1], [0, 0, 1, 1], [], []>} : vector<256x128xbf16>, vector<128x384xbf16>, vector<256x384xf32> -> vector<256x384xf32>
    %140 = arith.addf %135, %139 : vector<256x384xf32>
    %c32_91 = arith.constant 32 : index
    %c0_92 = arith.constant 0 : index
    %141 = vector.load %arg14[%c32_91, %c0_92] : memref<320x128xbf16, #tpu.memory_space<vmem>>, vector<256x128xbf16>
    %c2_93 = arith.constant 2 : index
    %c0_94 = arith.constant 0 : index
    %c0_95 = arith.constant 0 : index
    %142 = vector.load %arg9[%c2_93, %c0_94, %c0_95] : memref<3x128x384xbf16, #tpu.memory_space<vmem>>, vector<1x128x384xbf16>
    %143 = vector.shape_cast %142 : vector<1x128x384xbf16> to vector<128x384xbf16>
    %cst_96 = arith.constant dense<0.000000e+00> : vector<256x384xf32>
    %144 = tpu.matmul %141, %143, %cst_96 {dimension_numbers = #tpu.dot_dimension_numbers<[1], [0], [0], [1], [0, 0, 1, 1], [], []>} : vector<256x128xbf16>, vector<128x384xbf16>, vector<256x384xf32> -> vector<256x384xf32>
    %145 = arith.addf %140, %144 : vector<256x384xf32>
    %146 = vector.extract_strided_slice %145 {offsets = [0, 0], sizes = [256, 128], strides = [1, 1]} : vector<256x384xf32> to vector<256x128xf32>
    %147 = vector.extract_strided_slice %145 {offsets = [0, 128], sizes = [256, 128], strides = [1, 1]} : vector<256x384xf32> to vector<256x128xf32>
    %148 = vector.extract_strided_slice %145 {offsets = [0, 256], sizes = [256, 128], strides = [1, 1]} : vector<256x384xf32> to vector<256x128xf32>
    %c0_97 = arith.constant 0 : index
    %c0_98 = arith.constant 0 : index
    %149 = vector.load %arg3[%c0_97, %c0_98] : memref<320x1xf32, #tpu.memory_space<vmem>>, vector<256x1xf32>
    %c0_99 = arith.constant 0 : index
    %c0_100 = arith.constant 0 : index
    %150 = vector.load %arg4[%c0_99, %c0_100] : memref<320x1xf32, #tpu.memory_space<vmem>>, vector<256x1xf32>
    %c0_101 = arith.constant 0 : index
    %c0_102 = arith.constant 0 : index
    %151 = vector.load %arg10[%c0_101, %c0_102] : memref<1x128xf32, #tpu.memory_space<vmem>>, vector<1x128xf32>
    %152 = vector.broadcast %151 : vector<1x128xf32> to vector<256x128xf32>
    %153 = arith.addf %147, %152 : vector<256x128xf32>
    %c1_i32_103 = arith.constant 1 : i32
    %154 = tpu.dynamic_rotate %146 by %c1_i32_103 dim 0 : vector<256x128xf32>, i32 -> vector<256x128xf32>
    %155 = vector.broadcast %149 : vector<256x1xf32> to vector<256x128xf32>
    %156 = arith.mulf %154, %155 : vector<256x128xf32>
    %157 = arith.addf %153, %156 : vector<256x128xf32>
    %c255_i32 = arith.constant 255 : i32
    %158 = tpu.dynamic_rotate %148 by %c255_i32 dim 0 : vector<256x128xf32>, i32 -> vector<256x128xf32>
    %159 = vector.broadcast %150 : vector<256x1xf32> to vector<256x128xf32>
    %160 = arith.mulf %158, %159 : vector<256x128xf32>
    %161 = arith.addf %157, %160 : vector<256x128xf32>
    %162 = vector.extract_strided_slice %161 {offsets = [0, 0], sizes = [256, 12], strides = [1, 1]} : vector<256x128xf32> to vector<256x12xf32>
    %c0_104 = arith.constant 0 : index
    %c0_105 = arith.constant 0 : index
    %c0_106 = arith.constant 0 : index
    %163 = vector.load %arg11[%c0_104, %c0_105, %c0_106] : memref<1x256x12xf32, #tpu.memory_space<vmem>>, vector<1x256x12xf32>
    %164 = vector.shape_cast %163 : vector<1x256x12xf32> to vector<256x12xf32>
    %165 = vector.shape_cast %162 : vector<256x12xf32> to vector<1x256x12xf32>
    tpu.vector_store %arg11[%c0_104, %c0_105, %c0_106], %165 {strides = array<i32>} : memref<1x256x12xf32, #tpu.memory_space<vmem>>, vector<1x256x12xf32>,
    return
  }
  func.func @transform_1(%arg0: i32, %arg1: i32) -> (i32, i32) {
    %c0_i32 = arith.constant 0 : i32
    %c0_i32_0 = arith.constant 0 : i32
    %c0_i32_1 = arith.constant 0 : i32
    return %c0_i32, %c0_i32_0 : i32, i32
  }
  func.func @transform_2(%arg0: i32, %arg1: i32) -> (i32, i32) {
    %c0_i32 = arith.constant 0 : i32
    %c0_i32_0 = arith.constant 0 : i32
    %c0_i32_1 = arith.constant 0 : i32
    return %c0_i32, %c0_i32_0 : i32, i32
  }
  func.func @transform_3(%arg0: i32, %arg1: i32) -> (i32, i32, i32) {
    %c0_i32 = arith.constant 0 : i32
    %c0_i32_0 = arith.constant 0 : i32
    %c0_i32_1 = arith.constant 0 : i32
    %c0_i32_2 = arith.constant 0 : i32
    return %c0_i32, %c0_i32_0, %c0_i32_1 : i32, i32, i32
  }
  func.func @transform_4(%arg0: i32, %arg1: i32) -> (i32, i32) {
    %c0_i32 = arith.constant 0 : i32
    %c0_i32_0 = arith.constant 0 : i32
    %c0_i32_1 = arith.constant 0 : i32
    return %c0_i32, %c0_i32_0 : i32, i32
  }
  func.func @transform_5(%arg0: i32, %arg1: i32) -> (i32, i32, i32) {
    %c0_i32 = arith.constant 0 : i32
    %c0_i32_0 = arith.constant 0 : i32
    %c0_i32_1 = arith.constant 0 : i32
    %c0_i32_2 = arith.constant 0 : i32
    return %c0_i32, %c0_i32_0, %c0_i32_1 : i32, i32, i32
  }
  func.func @transform_6(%arg0: i32, %arg1: i32) -> (i32, i32) {
    %c0_i32 = arith.constant 0 : i32
    %c0_i32_0 = arith.constant 0 : i32
    %c0_i32_1 = arith.constant 0 : i32
    return %c0_i32, %c0_i32_0 : i32, i32
  }
  func.func @transform_7(%arg0: i32, %arg1: i32) -> (i32, i32, i32) {
    %c0_i32 = arith.constant 0 : i32
    %c0_i32_0 = arith.constant 0 : i32
    %c0_i32_1 = arith.constant 0 : i32
    %c0_i32_2 = arith.constant 0 : i32
    return %c0_i32, %c0_i32_0, %c0_i32_1 : i32, i32, i32
  }
  func.func @transform_8(%arg0: i32, %arg1: i32) -> (i32, i32) {
    %c0_i32 = arith.constant 0 : i32
    %c0_i32_0 = arith.constant 0 : i32
    %c0_i32_1 = arith.constant 0 : i32
    return %c0_i32, %c0_i32_0 : i32, i32
  }
  func.func @transform_9(%arg0: i32, %arg1: i32) -> (i32, i32, i32) {
    %c0_i32 = arith.constant 0 : i32
    %c0_i32_0 = arith.constant 0 : i32
    return %arg0, %arg1, %c0_i32 : i32, i32, i32
  }
}

</mosaic_0001>

<bundles_post_ra>
// kernel: tpu_custom_call.1
= control target key start
LH: loop header
LB: loop body
LE: loop exit
PB: predicated region body
PF: predicated region fallthrough
CT: control target
= control target key end

     0   :  { %14 = vsyncpa [#allocation7], 0  ;;  %s17652_s0 = inlined_call_operand.hbm [shape: bf16[2,352,128], index: 0, kind: input, shape index: {}]   ;;  %s17653_s1 = inlined_call_operand.vmem [shape: f32[320,1], index: 1, kind: input, shape index: {}]   ;;  %s17654_s2 = inlined_call_operand.vmem [shape: f32[320,1], index: 2, kind: input, shape index: {}]   ;;  %s17655_s3 = inlined_call_operand.vmem [shape: bf16[3,128,384], index: 3, kind: input, shape index: {}]   ;;  %s17656_s4 = inlined_call_operand.vmem [shape: f32[1,128], index: 4, kind: input, shape index: {}]   ;;  %s17657_s5 = inlined_call_operand.hbm [shape: bf16[3,128,384], index: 5, kind: input, shape index: {}]   ;;  %s17658_s6 = inlined_call_operand.vmem [shape: f32[1,128], index: 6, kind: input, shape index: {}]   ;;  %s17659_s7 = inlined_call_operand.hbm [shape: bf16[3,128,384], index: 7, kind: input, shape index: {}]   ;;  %s17660_s8 = inlined_call_operand.vmem [shape: f32[1,128], index: 8, kind: input, shape index: {}]   ;;  %s17661_s9 = inlined_call_operand.vmem [shape: f32[2,256,12], index: 9, kind: output, shape index: {}]  }
   0x1   :  { %15 = vsyncpa [#allocation9], 0  ;;  %s12144_s30 = smov 0   ;;  %s12146_s10 = smov 0  }
   0x2   :  { %s12148_s11 = smov 0  }
   0x3 LB: > { %s9985_s12 = sadd.s32 4294967295, %s12085_s11   ;;  %s33_s13 = sadd.s32 1, %s12081_s10  ;;  %s12085_s11 = sphi %s12148_s11, %s21_s11   ;;  %s12081_s10 = sphi %s12146_s10, %s18938_s10   ;;  %s12077_s30 = sphi %s12144_s30, %s18937_s30  }
   0x4   : > { %p35_p0 = scmp.ge.s32.totalorder %s33_s13, 2  ;;  %p9987_p1 = scmp.ge.s32.totalorder %s12085_s11, 1 }
   0x5   : > { %p234_p2 = scmp.lt.s32.totalorder %s12085_s11, 3  ;;  %p12169_p4 = scmp.eq.s32.totalorder %s9985_s12, 0 }
   0x6   : > { %s18940_s13 = smov (%p35_p0, %s33_s13), 0  ;;  %s12087_s16 = smov [#allocation6]  }
   0x7   : > { %p12165_p3 = pnand %p9987_p1, %p234_p2  ;;  %s258_s17 = sshll.u32 %s12087_s16, 4  ;;  %s259_s17 = int_to_ptr.vmem [resolvable:$true] %s258_s17 }
   0x8   : > { %s12088_s19 = smov [#allocation8]   ;;  %s11990_s21 = scalar_lea.vmem %s259_s17, 9216 }
   0x9   : > { %p11457_p5 = pneg %p12165_p3  ;;  %s274_s20 = sshll.u32 %s12088_s19, 4  ;;  %s275_s20 = int_to_ptr.vmem [resolvable:$true] %s274_s20 }
   0xa   : > { %p11991_p8 = scmp.ne.s32.totalorder %s259_s17, %s11990_s21  ;;  %p11998_p11 = scmp.lt.s32.totalorder %s259_s17, %s259_s17 }
   0xb   : > { %p12177_p6 = pnand %p12169_p4, %p11457_p5  ;;  %p11999_p12 = scmp.lt.s32.totalorder %s11990_s21, %s11990_s21 }
   0xd   : > { %p11981_p7 = pneg %p12177_p6  ;;  %p12000_p13 = por %p11999_p12, %p11998_p11 }
   0xf   : > { %p11993_p9 = pnand %p11991_p8, %p11981_p7 }
  0x11   : > { %p11994_p10 = pneg %p11993_p9 }
  0x13   : > { %p12001_p0 = pnand %p12000_p13, %p11994_p10 }
  0x15   : > { %12004 = shalt.err (!%p12001_p0)
}
  0x16   : > { %s12089_s22 = smov 192   ;;  %s12090_s23 = smov 12  }
  0x17   : > { %11460 = dma.hbm_to_vmem [thread:$0]  (!%p12177_p6), %s17657_s5, 9216, %s259_s17, [#allocation7], %s12089_s22, %s12089_s22, %s12090_s23  }
  0x18   : > { %s12016_s26 = scalar_lea.vmem %s275_s20, 9216  ;;  %p12024_p8 = scmp.lt.s32.totalorder %s275_s20, %s275_s20 }
  0x19   : > { %p12017_p1 = scmp.ne.s32.totalorder %s275_s20, %s12016_s26  ;;  %p12025_p9 = scmp.lt.s32.totalorder %s12016_s26, %s12016_s26 }
  0x1b   : > { %p12019_p2 = pnand %p12017_p1, %p11981_p7  ;;  %p12026_p11 = por %p12025_p9, %p12024_p8 }
  0x1d   : > { %p12020_p5 = pneg %p12019_p2 }
  0x1f   : > { %p12027_p10 = pnand %p12026_p11, %p12020_p5 }
  0x21   : > { %12030 = shalt.err (!%p12027_p10)
}
  0x22   : > { %11463 = dma.hbm_to_vmem [thread:$0]  (!%p12177_p6), %s17659_s7, 9216, %s275_s20, [#allocation9], %s12089_s22, %s12089_s22, %s12090_s23  }
  0x23   : > { %293 = sbr.rel (%p12165_p3) target bundleno = 1612 (0x64c), region = 52 }
  0x28   : > { %12066 = dma.done.wait (%p12169_p4), [#allocation7], 9216  }
  0x29   : > { %12068 = vsyncadd (%p12169_p4), [#allocation7], 4294958080 }
  0x2a   : > { %12070 = dma.done.wait (%p12169_p4), [#allocation9], 9216  }
  0x2b   : > { %12072 = vsyncadd (%p12169_p4), [#allocation9], 4294958080  ;;  %p331_p7 = scmp.lt.s32.totalorder %s12077_s30, 1  ;;  %s10472_s29 = smul.u32 2816, %s12077_s30 }
  0x2c   : > { %s12091_s17 = smov [#allocation2]   ;;  %s12033_s25 = scalar_lea.hbm %s17652_s0, 5632 }
  0x2d   : > { %s18942_s30 = smov (!%p331_p7, %s12077_s30), 1  ;;  %s347_s16 = scalar_lea.hbm %s17652_s0, %s10472_s29 }
  0x2e   : > { %s355_s18 = sshll.u32 %s12091_s17, 4  ;;  %s10471_s19 = sshll.u32 %s18942_s30, 8  ;;  %s356_s18 = int_to_ptr.vmem [resolvable:$true] %s355_s18 }
  0x2f   : > { %s12218_s22 = scalar_lea.vmem %s17661_s9, %s10471_s19  ;;  %s12031_s15 = scalar_lea.hbm %s347_s16, 2816 }
  0x30   : > { %p12032_p3 = scmp.ne.s32.totalorder %s347_s16, %s12031_s15  ;;  %p12034_p4 = scmp.lt.s32.totalorder %s347_s16, %s17652_s0 }
  0x31   : > { %p12035_p6 = scmp.lt.s32.totalorder %s12033_s25, %s12031_s15 }
  0x33   : > { %p12036_p12 = por %p12035_p6, %p12034_p4 }
  0x35   : > { %p12037_p13 = pnand %p12036_p12, %p12032_p3 }
  0x37   : > { %12040 = shalt.err (!%p12037_p13)  }
  0x38   : > { %s12041_s30 = scalar_lea.vmem %s356_s18, 2816  ;;  %s12045_s28 = scalar_lea.vmem %s356_s18, 5632 }
  0x39   : > { %p12042_p0 = scmp.ne.s32.totalorder %s356_s18, %s12041_s30  ;;  %p12046_p1 = scmp.lt.s32.totalorder %s356_s18, %s356_s18 }
  0x3a   : > { %p12047_p2 = scmp.lt.s32.totalorder %s12045_s28, %s12041_s30 }
  0x3c   : > { %p12048_p5 = por %p12047_p2, %p12046_p1 }
  0x3e   : > { %p12049_p8 = pnand %p12048_p5, %p12042_p0 }
  0x40   : > { %12052 = shalt.err (!%p12049_p8)  }
  0x41   : > { %358 = dma.hbm_to_vmem [thread:$0]  %s347_s16, 2816, %s356_s18, [#allocation5] }
  0x42   : > { %12073 = dma.done.wait [#allocation5], 2816 }
  0x43   : > { %12074 = vsyncadd [#allocation5], 4294964480  ;;  %v17662_v0 = vmov 0   ;;  %v2653_v1 = vld [vmem:[%s17654_s2 + $0x20] sm:$0xff]  ;;  %v11501_v3 = vld [vmem:[%s17655_s3 + $0x16c] ss:$12 sps:$4 sm:$0xff]  }
  0x44   : > { %11500 = vset.pattern.permute.xlu1 %v17662_v0  ;;  %11499 = vset.pattern.permute.xlu0 %v17662_v0  ;;  %v2613_v2 = vld [vmem:[%s17653_s1 + $0x20] sm:$0xff]  ;;  %v11503_v4 = vld [vmem:[%s17655_s3 + $0x170] ss:$12 sps:$4 sm:$0xff]   ;;  %v11504_v5 = vld [vmem:[%s17655_s3 + $0x168] ss:$12 sps:$4 sm:$0xff]   ;;  %vm9836_vm2 = vcmask 97280  }
  0x45   : > { %788 = vmatprep.mubr.bf16.mxu0 %v17662_v0  ;;  %3202 = vperm.xlu1 %11500, %v2653_v1   ;;  %v2654_v6 = vld [vmem:[%s17654_s2 + $0x28] sm:$0xff]  ;;  %v11505_v8 = vld [vmem:[%s17655_s3 + $0x154] ss:$12 sps:$4 sm:$0xff]   ;;  %v11507_v9 = vld [vmem:[%s17655_s3 + $0x158] ss:$12 sps:$4 sm:$0xff]  }
  0x46   : > { %2841 = vperm.xlu0 %11499, %v2613_v2   ;;  %756 = vmatprep.subr.bf16.mxu0 %v11501_v3  ;;  %v2614_v7 = vld [vmem:[%s17653_s1 + $0x28] sm:$0xff]  ;;  %v11508_v10 = vld [vmem:[%s17655_s3 + $0x150] ss:$12 sps:$4 sm:$0xff]   ;;  %v11512_v15 = vld [vmem:[%s17655_s3 + $0x138] ss:$12 sps:$4 sm:$0xff]  }
  0x47   : > { %10965 = vmatprep.subr.bf16.mxu1 %v11503_v4  ;;  %757 = vmatpush1.bf16.msra.mxu0 %v11504_v5  ;;  %v2616_v11 = vld [vmem:[%s17653_s1 + $0x38] sm:$0xff]  ;;  %v2615_v12 = vld [vmem:[%s17653_s1 + $0x30] sm:$0xff]  ;;  %v11511_v14 = vld [vmem:[%s17655_s3 + $0x140] ss:$12 sps:$4 sm:$0xff]  }
  0x48   : > { %10966 = vmatpush3.bf16.msra.mxu1 %v11503_v4  ;;  %758 = vmatprep.subr.bf16.mxu0 %v11505_v8  ;;  %v11509_v13 = vld [vmem:[%s17655_s3 + $0x13c] ss:$12 sps:$4 sm:$0xff]   ;;  %v11513_v17 = vld [vmem:[%s17655_s3 + $0x124] ss:$12 sps:$4 sm:$0xff]   ;;  %v11516_v20 = vld [vmem:[%s17655_s3 + $0x120] ss:$12 sps:$4 sm:$0xff]  }
  0x49   : > { %3207 = vperm.xlu1 %11500, %v2654_v6   ;;  %10967 = vmatprep.subr.bf16.mxu1 %v11507_v9  ;;  %v2656_v16 = vld [vmem:[%s17654_s2 + $0x38] sm:$0xff]  ;;  %v2655_v18 = vld [vmem:[%s17654_s2 + $0x30] sm:$0xff]  ;;  %v2618_v21 = vld [vmem:[%s17653_s1 + $0x48] sm:$0xff] }
  0x4a   : > { %2846 = vperm.xlu0 %11499, %v2614_v7   ;;  %v11515_v19 = vld [vmem:[%s17655_s3 + $0x128] ss:$12 sps:$4 sm:$0xff]   ;;  %v11517_v22 = vld [vmem:[%s17655_s3 + $0x10c] ss:$12 sps:$4 sm:$0xff]   ;;  %v2617_v23 = vld [vmem:[%s17653_s1 + $0x40] sm:$0xff] }
  0x4b   : > { %759 = vmatpush1.bf16.msra.mxu0 %v11508_v10  ;;  %v11519_v24 = vld [vmem:[%s17655_s3 + $0x110] ss:$12 sps:$4 sm:$0xff]   ;;  %v11520_v25 = vld [vmem:[%s17655_s3 + $0x108] ss:$12 sps:$4 sm:$0xff]   ;;  %v2657_v27 = vld [vmem:[%s17654_s2 + $0x40] sm:$0xff] }
  0x4c   : > { %10968 = vmatpush3.bf16.msra.mxu1 %v11507_v9  ;;  %760 = vmatprep.subr.bf16.mxu0 %v11509_v13  ;;  %v2658_v26 = vld [vmem:[%s17654_s2 + $0x48] sm:$0xff]  ;;  %v11521_v28 = vld [vmem:[%s17655_s3 + $0xf4] ss:$12 sps:$4 sm:$0xff]   ;;  %v11523_v29 = vld [vmem:[%s17655_s3 + $0xf8] ss:$12 sps:$4 sm:$0xff]  }
  0x4d   : > { %2856 = vperm.xlu1 %11500, %v2616_v11   ;;  %10969 = vmatprep.subr.bf16.mxu1 %v11511_v14  ;;  %v11524_v30 = vld [vmem:[%s17655_s3 + $0xf0] ss:$12 sps:$4 sm:$0xff]   ;;  %v11527_v34 = vld [vmem:[%s17655_s3 + $0xe0] ss:$12 sps:$4 sm:$0xff]   ;;  %v11528_v35 = vld [vmem:[%s17655_s3 + $0xd8] ss:$12 sps:$4 sm:$0xff]  }
  0x4e   : > { %2851 = vperm.xlu0 %11499, %v2615_v12   ;;  %v2620_v31 = vld [vmem:[%s17653_s1 + $0x58] sm:$0xff]  ;;  %v2619_v33 = vld [vmem:[%s17653_s1 + $0x50] sm:$0xff]  ;;  %v12337_v37 = vld [vmem:[#allocation2 + $0x8] sm:$0xff]  }
  0x4f   : > { %761 = vmatpush1.bf16.msra.mxu0 %v11512_v15  ;;  %v11525_v32 = vld [vmem:[%s17655_s3 + $0xdc] ss:$12 sps:$4 sm:$0xff]   ;;  %v11529_v38 = vld [vmem:[%s17655_s3 + $0xc4] ss:$12 sps:$4 sm:$0xff]   ;;  %10981 = vmatprep.mubr.bf16.mxu1 %v12337_v37  ;;  %v11532_v41 = vld [vmem:[%s17655_s3 + $0xc0] ss:$12 sps:$4 sm:$0xff]  }
  0x50   : > { %10970 = vmatpush3.bf16.msra.mxu1 %v11511_v14  ;;  %762 = vmatprep.subr.bf16.mxu0 %v11513_v17  ;;  %v2660_v36 = vld [vmem:[%s17654_s2 + $0x58] sm:$0xff]  ;;  %v2659_v39 = vld [vmem:[%s17654_s2 + $0x50] sm:$0xff]  ;;  %v2622_v42 = vld [vmem:[%s17653_s1 + $0x68] sm:$0xff] }
  0x51   : > { %3217 = vperm.xlu1 %11500, %v2656_v16   ;;  %10971 = vmatprep.subr.bf16.mxu1 %v11515_v19  ;;  %v11531_v40 = vld [vmem:[%s17655_s3 + $0xc8] ss:$12 sps:$4 sm:$0xff]   ;;  %v11535_v43 = vld [vmem:[%s17655_s3 + $0xb0] ss:$12 sps:$4 sm:$0xff]   ;;  %v2621_v44 = vld [vmem:[%s17653_s1 + $0x60] sm:$0xff] }
  0x52   : > { %3212 = vperm.xlu0 %11499, %v2655_v18   ;;  %v12361_v45 = vld [vmem:[#allocation2 + $0x10] sm:$0xff]   ;;  %v11540_v46 = vld [vmem:[%s17655_s3 + $0xac] ss:$12 sps:$4 sm:$0xff]   ;;  %v2661_v49 = vld [vmem:[%s17654_s2 + $0x60] sm:$0xff] }
  0x53   : > { %763 = vmatpush1.bf16.msra.mxu0 %v11516_v20  ;;  %v2662_v47 = vld [vmem:[%s17654_s2 + $0x68] sm:$0xff]  ;;  %v12369_v48 = vld [vmem:[#allocation2 + $0x18] sm:$0xff]   ;;  %v11545_v52 = vld [vmem:[%s17655_s3 + $0x94] ss:$12 sps:$4 sm:$0xff]  }
  0x54   : > { %10972 = vmatpush3.bf16.msra.mxu1 %v11515_v19  ;;  %764 = vmatprep.subr.bf16.mxu0 %v11517_v22  ;;  %v11538_v50 = vld [vmem:[%s17655_s3 + $0xa8] ss:$12 sps:$4 sm:$0xff]   ;;  %v2624_v51 = vld [vmem:[%s17653_s1 + $0x78] sm:$0xff]  ;;  %v12396_v56 = vld [vmem:[#allocation2 + $0x20] sm:$0xff]  }
  0x55   : > { %2866 = vperm.xlu1 %11500, %v2618_v21   ;;  %10973 = vmatprep.subr.bf16.mxu1 %v11519_v24  ;;  %v2623_v53 = vld [vmem:[%s17653_s1 + $0x70] sm:$0xff]  ;;  %v11546_v54 = vld [vmem:[%s17655_s3 + $0x98] ss:$12 sps:$4 sm:$0xff]   ;;  %v12398_v57 = vld [vmem:[#allocation2 + $0x28] sm:$0xff]  }
  0x56   : > { %2861 = vperm.xlu0 %11499, %v2617_v23   ;;  %v11543_v55 = vld [vmem:[%s17655_s3 + $0x90] ss:$12 sps:$4 sm:$0xff]   ;;  %v11549_v60 = vld [vmem:[%s17655_s3 + $0x78] ss:$12 sps:$4 sm:$0xff]   ;;  %v2626_v62 = vld [vmem:[%s17653_s1 + $0x88] sm:$0xff] }
  0x57   : > { %765 = vmatpush1.bf16.msra.mxu0 %v11520_v25  ;;  %v2664_v58 = vld [vmem:[%s17654_s2 + $0x78] sm:$0xff]  ;;  %v2663_v59 = vld [vmem:[%s17654_s2 + $0x70] sm:$0xff]  ;;  %v2625_v63 = vld [vmem:[%s17653_s1 + $0x80] sm:$0xff] }
  0x58   : > { %10974 = vmatpush3.bf16.msra.mxu1 %v11519_v24  ;;  %766 = vmatprep.subr.bf16.mxu0 %v11521_v28  ;;  %v11551_v61 = vld [vmem:[%s17655_s3 + $0x7c] ss:$12 sps:$4 sm:$0xff]   ;;  %v12422_v1 = vld [vmem:[#allocation2 + $0x30] sm:$0xff]   ;;  %v11554_v2 = vld [vmem:[%s17655_s3 + $0x60] ss:$12 sps:$4 sm:$0xff]  }
  0x59   : > { %3227 = vperm.xlu1 %11500, %v2658_v26   ;;  %10975 = vmatprep.subr.bf16.mxu1 %v11523_v29  ;;  %v11556_v3 = vld [vmem:[%s17655_s3 + $0x64] ss:$12 sps:$4 sm:$0xff]   ;;  %v12430_v4 = vld [vmem:[#allocation2 + $0x38] sm:$0xff]   ;;  %v2666_v5 = vld [vmem:[%s17654_s2 + $0x88] sm:$0xff] }
  0x5a   : > { %3222 = vperm.xlu0 %11499, %v2657_v27   ;;  %v2665_v6 = vld [vmem:[%s17654_s2 + $0x80] sm:$0xff]  ;;  %v2628_v8 = vld [vmem:[%s17653_s1 + $0x98] sm:$0xff]  ;;  %v2627_v9 = vld [vmem:[%s17653_s1 + $0x90] sm:$0xff] }
  0x5b   : > { %767 = vmatpush1.bf16.msra.mxu0 %v11524_v30  ;;  %v11559_v7 = vld [vmem:[%s17655_s3 + $0x80] ss:$12 sps:$4 sm:$0xff]   ;;  %v11562_v10 = vld [vmem:[%s17655_s3 + $0x48] ss:$12 sps:$4 sm:$0xff]   ;;  %v2668_v14 = vld [vmem:[%s17654_s2 + $0x98] sm:$0xff] }
  0x5c   : > { %10976 = vmatpush3.bf16.msra.mxu1 %v11523_v29  ;;  %768 = vmatprep.subr.bf16.mxu0 %v11525_v32  ;;  %v12454_v11 = vld [vmem:[#allocation2 + $0x40] sm:$0xff]   ;;  %v11564_v12 = vld [vmem:[%s17655_s3 + $0x4c] ss:$12 sps:$4 sm:$0xff]   ;;  %v2667_v15 = vld [vmem:[%s17654_s2 + $0x90] sm:$0xff] }
  0x5d   : > { %2876 = vperm.xlu1 %11500, %v2620_v31   ;;  %10977 = vmatprep.subr.bf16.mxu1 %v11527_v34  ;;  %v12459_v13 = vld [vmem:[#allocation2 + $0x48] sm:$0xff]   ;;  %v11567_v16 = vld [vmem:[%s17655_s3 + $0x30] ss:$12 sps:$4 sm:$0xff]   ;;  %v11569_v17 = vld [vmem:[%s17655_s3 + $0x34] ss:$12 sps:$4 sm:$0xff]  }
  0x5e   : > { %2871 = vperm.xlu0 %11499, %v2619_v33   ;;  %v2630_v18 = vld [vmem:[%s17653_s1 + $0xa8] sm:$0xff]  ;;  %v2629_v20 = vld [vmem:[%s17653_s1 + $0xa0] sm:$0xff]  ;;  %v12486_v21 = vld [vmem:[#allocation2 + $0x50] sm:$0xff]  }
  0x5f   : > { %769 = vmatpush1.bf16.msra.mxu0 %v11528_v35  ;;  %v11570_v19 = vld [vmem:[%s17655_s3 + $0x68] ss:$12 sps:$4 sm:$0xff]   ;;  %v12488_v22 = vld [vmem:[#allocation2 + $0x58] sm:$0xff]   ;;  %v2669_v24 = vld [vmem:[%s17654_s2 + $0xa0] sm:$0xff] }
  0x60   : > { %10978 = vmatpush3.bf16.msra.mxu1 %v11527_v34  ;;  %770 = vmatprep.subr.bf16.mxu0 %v11529_v38  ;;  %v2670_v23 = vld [vmem:[%s17654_s2 + $0xa8] sm:$0xff]  ;;  %v11573_v25 = vld [vmem:[%s17655_s3 + $0x18] ss:$12 sps:$4 sm:$0xff]   ;;  %v2631_v28 = vld [vmem:[%s17653_s1 + $0xb0] sm:$0xff] }
  0x61   : > { %3237 = vperm.xlu1 %11500, %v2660_v36   ;;  %10979 = vmatprep.subr.bf16.mxu1 %v11531_v40  ;;  %v11575_v26 = vld [vmem:[%s17655_s3 + $0x1c] ss:$12 sps:$4 sm:$0xff]   ;;  %v11578_v29 = vld [vmem:[%s17655_s3] ss:$12 sps:$4 sm:$0xff]   ;;  %v11580_v30 = vld [vmem:[%s17655_s3 + $0x4] ss:$12 sps:$4 sm:$0xff]  }
  0x62   : > { %3232 = vperm.xlu0 %11499, %v2659_v39   ;;  %v2632_v27 = vld [vmem:[%s17653_s1 + $0xb8] sm:$0xff]  ;;  %v12518_v31 = vld [vmem:[#allocation2 + $0x60] sm:$0xff]   ;;  %v12520_v32 = vld [vmem:[#allocation2 + $0x68] sm:$0xff]  }
  0x63   : > { %771 = vmatpush1.bf16.msra.mxu0 %v11532_v41  ;;  %v2672_v33 = vld [vmem:[%s17654_s2 + $0xb8] sm:$0xff]  ;;  %v2671_v35 = vld [vmem:[%s17654_s2 + $0xb0] sm:$0xff]  ;;  %v2634_v38 = vld [vmem:[%s17653_s1 + $0xc8] sm:$0xff] }
  0x64   : > { %10980 = vmatpush3.bf16.msra.mxu1 %v11531_v40  ;;  %11021 = vmatprep.subr.bf16.mxu0 %v11535_v43  ;;  %v11582_v34 = vld [vmem:[%s17655_s3 + $0x50] ss:$12 sps:$4 sm:$0xff]   ;;  %v2633_v39 = vld [vmem:[%s17653_s1 + $0xc0] sm:$0xff] }
  0x65   : > { %2886 = vperm.xlu1 %11500, %v2622_v42   ;;  %1316 = vmatprep.subr.bf16.mxu1 %v11540_v46  ;;  %v12537_v36 = vld [vmem:[%s17655_s3 + $0x230] ss:$12 sps:$4 sm:$0xff]   ;;  %v11584_v41 = vld [vmem:[%s17655_s3 + $0x38] ss:$12 sps:$4 sm:$0xff]   ;;  %v2674_v42 = vld [vmem:[%s17654_s2 + $0xc8] sm:$0xff] }
  0x66   : > { %2881 = vperm.xlu0 %11499, %v2621_v44   ;;  %789 = vmatmul.mubr.bf16.vlgmr.msra.gmra.mxu0 %v12337_v37  ;;  %v12546_v40 = vld [vmem:[#allocation2 + $0x70] sm:$0xff]   ;;  %v2673_v44 = vld [vmem:[%s17654_s2 + $0xc0] sm:$0xff] }
  0x67   : > { %10982 = vmatmul.mubr.bf16.vlgmr.msra.gmra.mxu1 %v12361_v45  ;;  %11022 = vmatpush3.bf16.msra.mxu0 %v11535_v43  ;;  %v12555_v43 = vld [vmem:[#allocation2 + $0x78] sm:$0xff]   ;;  %v11586_v46 = vld [vmem:[%s17655_s3 + $0x20] ss:$12 sps:$4 sm:$0xff]  }
  0x68   : > { %798 = vmatprep.mubr.bf16.mxu0 %v17662_v0  ;;  %10985 = vmatprep.mubr.bf16.mxu1 %v12369_v48 }
  0x69   : > { %3247 = vperm.xlu1 %11500, %v2662_v47   ;;  %1317 = vmatpush1.bf16.msra.mxu1 %v11538_v50  ;;  %v2636_v47 = vld [vmem:[%s17653_s1 + $0xd8] sm:$0xff]  ;;  %v11588_v50 = vld [vmem:[%s17655_s3 + $0x8] ss:$12 sps:$4 sm:$0xff]  }
  0x6a   : > { %3242 = vperm.xlu0 %11499, %v2661_v49   ;;  %1318 = vmatprep.subr.bf16.mxu1 %v11545_v52  ;;  %v2635_v49 = vld [vmem:[%s17653_s1 + $0xd0] sm:$0xff]  ;;  %v2676_v52 = vld [vmem:[%s17654_s2 + $0xd8] sm:$0xff] }
  0x6b   : > { %11023 = vmatprep.subr.bf16.mxu0 %v11546_v54 }
  0x6c   : > { %11024 = vmatpush3.bf16.msra.mxu0 %v11546_v54  ;;  %v12584_v54 = vld [vmem:[#allocation2 + $0x88] sm:$0xff]  }
  0x6d   : > { %2896 = vperm.xlu1 %11500, %v2624_v51   ;;  %1319 = vmatpush1.bf16.msra.mxu1 %v11543_v55  ;;  %v12576_v51 = vld [vmem:[#allocation2 + $0x80] sm:$0xff]   ;;  %v11592_v55 = vld [vmem:[%s17655_s3 + $0x22c] ss:$12 sps:$4 sm:$0xff]  }
  0x6e   : > { %2891 = vperm.xlu0 %11499, %v2623_v53   ;;  %799 = vmatmul.mubr.bf16.gmra.mxu0 %v12361_v45  ;;  %v2675_v53 = vld [vmem:[%s17654_s2 + $0xd0] sm:$0xff] }
  0x6f   : > { %10986 = vmatmul.mubr.bf16.gmra.mxu1 %v12396_v56  ;;  %808 = vmatprep.mubr.bf16.mxu0 %v17662_v0 }
  0x70   : > { %10989 = vmatprep.mubr.bf16.mxu1 %v12398_v57  ;;  %1320 = vmatprep.subr.bf16.mxu1 %v11551_v61  ;;  %v12605_v61 = vld [vmem:[#allocation2 + $0x98] sm:$0xff]  }
  0x71   : > { %3257 = vperm.xlu1 %11500, %v2664_v58   ;;  %1321 = vmatpush1.bf16.msra.mxu1 %v11549_v60  ;;  %v12594_v58 = vld [vmem:[%s17653_s1 + $0xe8] sm:$0xff]  ;;  %v12603_v60 = vld [vmem:[#allocation2 + $0x90] sm:$0xff]  }
  0x72   : > { %3252 = vperm.xlu0 %11499, %v2663_v59   ;;  %1322 = vmatprep.subr.bf16.mxu1 %v11556_v3  ;;  %v12600_v59 = vld [vmem:[%s17653_s1 + $0xe0] sm:$0xff]  ;;  %v12631_v3 = vld [vmem:[%s17653_s1 + $0xf0] sm:$0xff] }
  0x73   : > { %11025 = vmatprep.subr.bf16.mxu0 %v11559_v7 }
  0x74   : > { %11026 = vmatpush3.bf16.msra.mxu0 %v11559_v7  ;;  %v12654_v7 = vld [vmem:[%s17653_s1 + $0x108] sm:$0xff] }
  0x75   : > { %2906 = vperm.xlu1 %11500, %v2626_v62   ;;  %1323 = vmatpush1.bf16.msra.mxu1 %v11554_v2  ;;  %v12612_v62 = vld [vmem:[%s17654_s2 + $0xe8] sm:$0xff]  ;;  %v12624_v2 = vld [vmem:[%s17653_s1 + $0xf8] sm:$0xff] }
  0x76   : > { %2901 = vperm.xlu0 %11499, %v2625_v63   ;;  %809 = vmatmul.mubr.bf16.gmra.mxu0 %v12369_v48  ;;  %v12617_v63 = vld [vmem:[%s17654_s2 + $0xe0] sm:$0xff] }
  0x77   : > { %10990 = vmatmul.mubr.bf16.gmra.mxu1 %v12422_v1  ;;  %818 = vmatprep.mubr.bf16.mxu0 %v17662_v0 }
  0x78   : > { %10993 = vmatprep.mubr.bf16.mxu1 %v12430_v4  ;;  %1324 = vmatprep.subr.bf16.mxu1 %v11564_v12  ;;  %v11585_v12 = vld [vmem:[%s17655_s3 + $0x218] ss:$12 sps:$4 sm:$0xff]  }
  0x79   : > { %3267 = vperm.xlu1 %11500, %v2666_v5   ;;  %1325 = vmatpush1.bf16.msra.mxu1 %v11562_v10  ;;  %v12640_v5 = vld [vmem:[%s17654_s2 + $0xf8] sm:$0xff]  ;;  %v12670_v10 = vld [vmem:[%s17654_s2 + $0x108] sm:$0xff] }
  0x7a   : > { %3262 = vperm.xlu0 %11499, %v2665_v6   ;;  %1326 = vmatprep.subr.bf16.mxu1 %v11569_v17  ;;  %v12646_v6 = vld [vmem:[%s17654_s2 + $0xf0] sm:$0xff] }
  0x7b   : > { %11027 = vmatprep.subr.bf16.mxu0 %v11570_v19  ;;  %v2683_v17 = vld [vmem:[%s17654_s2 + $0x110] sm:$0xff] }
  0x7c   : > { %11028 = vmatpush3.bf16.msra.mxu0 %v11570_v19 }
  0x7d   : > { %2916 = vperm.xlu1 %11500, %v2628_v8   ;;  %1327 = vmatpush1.bf16.msra.mxu1 %v11567_v16  ;;  %v12661_v8 = vld [vmem:[%s17653_s1 + $0x100] sm:$0xff]  ;;  %v2684_v16 = vld [vmem:[%s17654_s2 + $0x118] sm:$0xff] }
  0x7e   : > { %2911 = vperm.xlu0 %11499, %v2627_v9   ;;  %819 = vmatmul.mubr.bf16.gmra.mxu0 %v12396_v56  ;;  %v12665_v9 = vld [vmem:[#allocation2] sm:$0xff]  }
  0x7f   : > { %10994 = vmatmul.mubr.bf16.gmra.mxu1 %v12454_v11  ;;  %828 = vmatprep.mubr.bf16.mxu0 %v17662_v0 }
  0x80   : > { %10997 = vmatprep.mubr.bf16.mxu1 %v12459_v13  ;;  %1328 = vmatprep.subr.bf16.mxu1 %v11575_v26 }
  0x81   : > { %3277 = vperm.xlu1 %11500, %v2668_v14   ;;  %1329 = vmatpush1.bf16.msra.mxu1 %v11573_v25  ;;  %v2643_v14 = vld [vmem:[%s17653_s1 + $0x110] sm:$0xff]  ;;  %v11600_v25 = vld [vmem:[%s17655_s3 + $0x1b8] ss:$12 sps:$4 sm:$0xff]  }
  0x82   : > { %3272 = vperm.xlu0 %11499, %v2667_v15   ;;  %1330 = vmatprep.subr.bf16.mxu1 %v11580_v30  ;;  %v11587_v15 = vld [vmem:[%s17655_s3 + $0x200] ss:$12 sps:$4 sm:$0xff]   ;;  %v6085_v30 = vld [vmem:[%s17654_s2 + $0x10] sm:$0xff] }
  0x83   : > { %11029 = vmatprep.subr.bf16.mxu0 %v11582_v34 }
  0x84   : > { %11030 = vmatpush3.bf16.msra.mxu0 %v11582_v34  ;;  %v11614_v34 = vld [vmem:[%s17655_s3 + $0x188] ss:$12 sps:$4 sm:$0xff]  }
  0x85   : > { %2926 = vperm.xlu1 %11500, %v2630_v18   ;;  %1331 = vmatpush1.bf16.msra.mxu1 %v11578_v29  ;;  %v11589_v18 = vld [vmem:[%s17655_s3 + $0x1e8] ss:$12 sps:$4 sm:$0xff]  }
  0x86   : > { %2921 = vperm.xlu0 %11499, %v2629_v20   ;;  %829 = vmatmul.mubr.bf16.gmra.mxu0 %v12398_v57  ;;  %v11900_v29 = vld [vmem:[%s17653_s1 + $0x28] sm:$0xff] }
  0x87   : > { %10998 = vmatmul.mubr.bf16.gmra.mxu1 %v12486_v21  ;;  %838 = vmatprep.mubr.bf16.mxu0 %v17662_v0 }
  0x88   : > { %11001 = vmatprep.mubr.bf16.mxu1 %v12488_v22  ;;  %11077 = vmatprep.subr.bf16.mxu1 %v12537_v36 }
  0x89   : > { %3287 = vperm.xlu1 %11500, %v2670_v23   ;;  %11031 = vmatprep.subr.bf16.mxu0 %v11584_v41 }
  0x8a   : > { %3282 = vperm.xlu0 %11499, %v2669_v24   ;;  %11032 = vmatpush3.bf16.msra.mxu0 %v11584_v41  ;;  %v11904_v41 = vld [vmem:[%s17653_s1 + $0x38] sm:$0xff] }
  0x8b   : > { %11033 = vmatprep.subr.bf16.mxu0 %v11586_v46 }
  0x8d   : > { %2936 = vperm.xlu1 %11500, %v2632_v27   ;;  %v6086_v27 = vld [vmem:[%s17654_s2 + $0x18] sm:$0xff] }
  0x8e   : > { %2931 = vperm.xlu0 %11499, %v2631_v28   ;;  %839 = vmatmul.mubr.bf16.gmra.mxu0 %v12422_v1 }
  0x8f   : > { %11002 = vmatmul.mubr.bf16.gmra.mxu1 %v12518_v31  ;;  %848 = vmatprep.mubr.bf16.mxu0 %v17662_v0 }
  0x90   : > { %11005 = vmatprep.mubr.bf16.mxu1 %v12520_v32  ;;  %11034 = vmatpush3.bf16.msra.mxu0 %v11586_v46 }
  0x91   : > { %3297 = vperm.xlu1 %11500, %v2672_v33   ;;  %11035 = vmatprep.subr.bf16.mxu0 %v11588_v50 }
  0x92   : > { %3292 = vperm.xlu0 %11499, %v2671_v35  }
  0x94   : > { %11036 = vmatpush3.bf16.msra.mxu0 %v11588_v50  ;;  %v11908_v50 = vld [vmem:[%s17654_s2 + $0x38] sm:$0xff] }
  0x95   : > { %2946 = vperm.xlu1 %11500, %v2634_v38   ;;  %2063 = vmatprep.subr.bf16.mxu0 %v11592_v55  ;;  %v11902_v38 = vld [vmem:[%s17654_s2 + $0x28] sm:$0xff] }
  0x96   : > { %2941 = vperm.xlu0 %11499, %v2633_v39   ;;  %849 = vmatmul.mubr.bf16.gmra.mxu0 %v12430_v4  ;;  %v12635_v4 = vld [vmem:[#allocation2 + $0xa0] sm:$0xff]  }
  0x97   : > { %11006 = vmatmul.mubr.bf16.gmra.mxu1 %v12546_v40  ;;  %858 = vmatprep.mubr.bf16.mxu0 %v17662_v0  ;;  %v11903_v39 = vld [vmem:[%s17654_s2 + $0x20] sm:$0xff] }
  0x98   : > { %11009 = vmatprep.mubr.bf16.mxu1 %v12555_v43 }
  0x99   : > { %3307 = vperm.xlu1 %11500, %v2674_v42   ;;  %v11905_v42 = vld [vmem:[%s17653_s1 + $0x30] sm:$0xff] }
  0x9a   : > { %3302 = vperm.xlu0 %11499, %v2673_v44  }
  0x9d   : > { %2956 = vperm.xlu1 %11500, %v2636_v47   ;;  %v11906_v47 = vld [vmem:[%s17653_s1 + $0x48] sm:$0xff] }
  0x9e   : > { %2951 = vperm.xlu0 %11499, %v2635_v49   ;;  %859 = vmatmul.mubr.bf16.gmra.mxu0 %v12454_v11  ;;  %v12676_v11 = vld [vmem:[%s17654_s2 + $0x100] sm:$0xff] }
  0x9f   : > { %11010 = vmatmul.mubr.bf16.gmra.mxu1 %v12576_v51  ;;  %868 = vmatprep.mubr.bf16.mxu0 %v17662_v0  ;;  %v11907_v49 = vld [vmem:[%s17653_s1 + $0x40] sm:$0xff] }
  0xa0   : > { %11013 = vmatprep.mubr.bf16.mxu1 %v12584_v54 }
  0xa1   : > { %3317 = vperm.xlu1 %11500, %v2676_v52   ;;  %v11909_v52 = vld [vmem:[%s17654_s2 + $0x30] sm:$0xff] }
  0xa2   : > { %3312 = vperm.xlu0 %11499, %v2675_v53  }
  0xa5   : > { %2966 = vperm.xlu1 %11500, %v12594_v58  }
  0xa6   : > { %2961 = vperm.xlu0 %11499, %v12600_v59   ;;  %869 = vmatmul.mubr.bf16.gmra.mxu0 %v12459_v13  ;;  %v2644_v13 = vld [vmem:[%s17653_s1 + $0x118] sm:$0xff] }
  0xa7   : > { %11014 = vmatmul.mubr.bf16.gmra.mxu1 %v12603_v60  ;;  %878 = vmatprep.mubr.bf16.mxu0 %v17662_v0 }
  0xa8   : > { %11017 = vmatprep.mubr.bf16.mxu1 %v12605_v61 }
  0xa9   : > { %3327 = vperm.xlu1 %11500, %v12612_v62  }
  0xaa   : > { %3322 = vperm.xlu0 %11499, %v12617_v63  }
  0xad   : > { %2976 = vperm.xlu1 %11500, %v12624_v2  }
  0xae   : > { %2971 = vperm.xlu0 %11499, %v12631_v3   ;;  %879 = vmatmul.mubr.bf16.gmra.mxu0 %v12486_v21  ;;  %v12716_v21 = vld [vmem:[%s17653_s1 + $0x18] sm:$0xff] }
  0xaf   : > { %11018 = vmatmul.mubr.bf16.gmra.mxu1 %v12635_v4  ;;  %888 = vmatprep.mubr.bf16.mxu0 %v17662_v0 }
  0xb0   : > { %1348 = vmatprep.mubr.bf16.mxu1 %v17662_v0 }
  0xb1   : > { %3337 = vperm.xlu1 %11500, %v12640_v5  }
  0xb2   : > { %3332 = vperm.xlu0 %11499, %v12646_v6  }
  0xb5   : > { %2986 = vperm.xlu1 %11500, %v12654_v7  }
  0xb6   : > { %2981 = vperm.xlu0 %11499, %v12661_v8   ;;  %889 = vmatmul.mubr.bf16.gmra.mxu0 %v12488_v22  ;;  %v12722_v22 = vld [vmem:[%s17653_s1 + $0x10] sm:$0xff] }
  0xb7   : > { %1349 = vmatmul.mubr.bf16.vlgmr.msra.gmra.mxu1 %v12665_v9  ;;  %898 = vmatprep.mubr.bf16.mxu0 %v17662_v0 }
  0xb8   : > { %1358 = vmatprep.mubr.bf16.mxu1 %v17662_v0  ;;  %11078 = vmatpush3.bf16.msra.mxu1 %v12537_v36 }
  0xb9   : > { %3347 = vperm.xlu1 %11500, %v12670_v10   ;;  %11079 = vmatprep.subr.bf16.mxu1 %v11585_v12 }
  0xba   : > { %3342 = vperm.xlu0 %11499, %v12676_v11  }
  0xbc   : > { %11080 = vmatpush3.bf16.msra.mxu1 %v11585_v12  ;;  %v11910_v12 = vld [vmem:[%s17654_s2 + $0x48] sm:$0xff] }
  0xbd   : > { %2996 = vperm.xlu1 %11500, %v2644_v13   ;;  %11081 = vmatprep.subr.bf16.mxu1 %v11587_v15  ;;  %v11911_v13 = vld [vmem:[%s17654_s2 + $0x40] sm:$0xff] }
  0xbe   : > { %2991 = vperm.xlu0 %11499, %v2643_v14   ;;  %899 = vmatmul.mubr.bf16.gmra.mxu0 %v12518_v31  ;;  %v11901_v31 = vld [vmem:[%s17653_s1 + $0x20] sm:$0xff]  ;;  %v11912_v14 = vld [vmem:[%s17653_s1 + $0x58] sm:$0xff] }
  0xbf   : > { %1359 = vmatmul.mubr.bf16.gmra.mxu1 %v12337_v37  ;;  %908 = vmatprep.mubr.bf16.mxu0 %v17662_v0  ;;  %v11593_v37 = vld [vmem:[%s17655_s3 + $0x1d0] ss:$12 sps:$4 sm:$0xff]  }
  0xc0   : > { %v12709_v19 = vpop.permute.xlu1 %3202  ;;  %1368 = vmatprep.mubr.bf16.mxu1 %v17662_v0  ;;  %11082 = vmatpush3.bf16.msra.mxu1 %v11587_v15  ;;  %v11913_v15 = vld [vmem:[%s17653_s1 + $0x50] sm:$0xff] }
  0xc1   : > { %17687 = vst [vmem:[#allocation19_spill] sm:$0xff] %v12709_v19  ;;  %v12711_v20 = vpop.permute.xlu0 %2841  ;;  %3357 = vperm.xlu1 %11500, %v2684_v16   ;;  %11083 = vmatprep.subr.bf16.mxu1 %v11589_v18 }
  0xc2   : > { %17688 = vst [vmem:[#allocation20_spill] sm:$0xff] %v12711_v20  ;;  %3352 = vperm.xlu0 %11499, %v2683_v17   ;;  %v11914_v17 = vld [vmem:[%s17653_s1 + $0x68] sm:$0xff]  ;;  %v13430_v20 = vld [vmem:[#allocation2 + $0x78] sm:$0xff]  }
  0xc4   : > { %v12728_v23 = vpop.permute.xlu1 %3207  ;;  %11084 = vmatpush3.bf16.msra.mxu1 %v11589_v18 }
  0xc5   : > { %17689 = vst [vmem:[#allocation21_spill] sm:$0xff] %v12728_v23  ;;  %v12730_v24 = vpop.permute.xlu0 %2846  ;;  %6251 = vperm.xlu1 %11500, %v12716_v21   ;;  %11085 = vmatprep.subr.bf16.mxu1 %v11593_v37  ;;  %v13364_v23 = vld [vmem:[#allocation2 + $0x58] sm:$0xff]  }
  0xc6   : > { %17690 = vst [vmem:[#allocation22_spill] sm:$0xff] %v12730_v24  ;;  %6246 = vperm.xlu0 %11499, %v12722_v22   ;;  %909 = vmatmul.mubr.bf16.gmra.mxu0 %v12520_v32 }
  0xc7   : > { %1369 = vmatmul.mubr.bf16.gmra.mxu1 %v12361_v45  ;;  %918 = vmatprep.mubr.bf16.mxu0 %v17662_v0  ;;  %v11607_v45 = vld [vmem:[%s17655_s3 + $0x1a0] ss:$12 sps:$4 sm:$0xff]  }
  0xc8   : > { %v12739_v26 = vpop.permute.xlu1 %2856  ;;  %1378 = vmatprep.mubr.bf16.mxu1 %v17662_v0  ;;  %11086 = vmatpush3.bf16.msra.mxu1 %v11593_v37  ;;  %v11915_v37 = vld [vmem:[%s17653_s1 + $0x60] sm:$0xff] }
  0xc9   : > { %17691 = vst [vmem:[#allocation23_spill] sm:$0xff] %v12739_v26  ;;  %v12745_v28 = vpop.permute.xlu0 %2851  ;;  %6261 = vperm.xlu1 %11500, %v11900_v29   ;;  %11087 = vmatprep.subr.bf16.mxu1 %v11600_v25  ;;  %v12864_v29 = vld [vmem:[#allocation2 + $0x38] sm:$0xff]  }
  0xca   : > { %17692 = vst [vmem:[#allocation24_spill] sm:$0xff] %v12745_v28  ;;  %6256 = vperm.xlu0 %11499, %v11901_v31   ;;  %v11921_v31 = vld [vmem:[%s17653_s1 + $0x78] sm:$0xff] }
  0xcc   : > { %v12760_v32 = vpop.permute.xlu1 %3217  ;;  %11088 = vmatpush3.bf16.msra.mxu1 %v11600_v25 }
  0xcd   : > { %17693 = vst [vmem:[#allocation25_spill] sm:$0xff] %v12760_v32  ;;  %v12762_v33 = vpop.permute.xlu0 %3212  ;;  %6575 = vperm.xlu1 %11500, %v6086_v27   ;;  %11089 = vmatprep.subr.bf16.mxu1 %v11607_v45 }
  0xce   : > { %17694 = vst [vmem:[#allocation26_spill] sm:$0xff] %v12762_v33  ;;  %6570 = vperm.xlu0 %11499, %v6085_v30   ;;  %919 = vmatmul.mubr.bf16.gmra.mxu0 %v12546_v40  ;;  %v11919_v30 = vld [vmem:[%s17654_s2 + $0x68] sm:$0xff] }
  0xcf   : > { %1379 = vmatmul.mubr.bf16.gmra.mxu1 %v12369_v48  ;;  %928 = vmatprep.mubr.bf16.mxu0 %v17662_v0 }
  0xd0   : > { %v12769_v35 = vpop.permute.xlu1 %2866  ;;  %1388 = vmatprep.mubr.bf16.mxu1 %v17662_v0  ;;  %11090 = vmatpush3.bf16.msra.mxu1 %v11607_v45  ;;  %v11920_v45 = vld [vmem:[%s17654_s2 + $0x60] sm:$0xff] }
  0xd1   : > { %17695 = vst [vmem:[#allocation27_spill] sm:$0xff] %v12769_v35  ;;  %v12772_v36 = vpop.permute.xlu0 %2861  ;;  %6585 = vperm.xlu1 %11500, %v11902_v38   ;;  %11091 = vmatprep.subr.bf16.mxu1 %v11614_v34  ;;  %v11922_v38 = vld [vmem:[%s17653_s1 + $0x70] sm:$0xff] }
  0xd2   : > { %17696 = vst [vmem:[#allocation28_spill] sm:$0xff] %v12772_v36  ;;  %6580 = vperm.xlu0 %11499, %v11903_v39   ;;  %v12886_v39 = vld [vmem:[#allocation2 + $0x40] sm:$0xff]  }
  0xd4   : > { %v12781_v48 = vpop.permute.xlu1 %3227  ;;  %11092 = vmatpush3.bf16.msra.mxu1 %v11614_v34 }
  0xd5   : > { %17697 = vst [vmem:[#allocation29_spill] sm:$0xff] %v12781_v48  ;;  %v12783_v40 = vpop.permute.xlu0 %3222  ;;  %6271 = vperm.xlu1 %11500, %v11904_v41   ;;  %v11924_v41 = vld [vmem:[%s17653_s1 + $0x88] sm:$0xff]  ;;  %v13286_v48 = vld [vmem:[#allocation2 + $0x38] sm:$0xff]  }
  0xd6   : > { %17698 = vst [vmem:[#allocation30_spill] sm:$0xff] %v12783_v40  ;;  %6266 = vperm.xlu0 %11499, %v11905_v42   ;;  %929 = vmatmul.mubr.bf16.gmra.mxu0 %v12555_v43  ;;  %v11925_v42 = vld [vmem:[%s17653_s1 + $0x80] sm:$0xff] }
  0xd7   : > { %1389 = vmatmul.mubr.bf16.gmra.mxu1 %v12396_v56  ;;  %938 = vmatprep.mubr.bf16.mxu0 %v17662_v0 }
  0xd8   : > { %v12793_v44 = vpop.permute.xlu1 %2876  ;;  %1398 = vmatprep.mubr.bf16.mxu1 %v17662_v0 }
  0xd9   : > { %17699 = vst [vmem:[#allocation31_spill] sm:$0xff] %v12793_v44  ;;  %v12796_v46 = vpop.permute.xlu0 %2871  ;;  %6281 = vperm.xlu1 %11500, %v11906_v47   ;;  %v11621_v44 = vld [vmem:[#allocation2 + $0x28] sm:$0xff]  }
  0xda   : > { %17700 = vst [vmem:[#allocation32_spill] sm:$0xff] %v12796_v46  ;;  %6276 = vperm.xlu0 %11499, %v11907_v49   ;;  %v11926_v49 = vld [vmem:[%s17654_s2 + $0x78] sm:$0xff] }
  0xdc   : > { %v12805_v43 = vpop.permute.xlu1 %3237 }
  0xdd   : > { %17701 = vst [vmem:[#allocation33_spill] sm:$0xff] %v12805_v43  ;;  %v12807_v56 = vpop.permute.xlu0 %3232  ;;  %6595 = vperm.xlu1 %11500, %v11908_v50   ;;  %v11927_v50 = vld [vmem:[%s17654_s2 + $0x70] sm:$0xff]  ;;  %v9169_v43 = vld [vmem:[%s17653_s1 + $0x60] sm:$0xff] }
  0xde   : > { %17702 = vst [vmem:[#allocation34_spill] sm:$0xff] %v12807_v56  ;;  %6590 = vperm.xlu0 %11499, %v11909_v52   ;;  %939 = vmatmul.mubr.bf16.gmra.mxu0 %v12576_v51  ;;  %v12908_v52 = vld [vmem:[#allocation2 + $0x48] sm:$0xff]  }
  0xdf   : > { %1399 = vmatmul.mubr.bf16.gmra.mxu1 %v12398_v57  ;;  %948 = vmatprep.mubr.bf16.mxu0 %v17662_v0 }
  0xe0   : > { %v12817_v53 = vpop.permute.xlu1 %2886  ;;  %1408 = vmatprep.mubr.bf16.mxu1 %v17662_v0 }
  0xe1   : > { %17703 = vst [vmem:[#allocation35_spill] sm:$0xff] %v12817_v53  ;;  %v12820_v55 = vpop.permute.xlu0 %2881  ;;  %6605 = vperm.xlu1 %11500, %v11910_v12   ;;  %v9168_v53 = vld [vmem:[%s17653_s1 + $0x58] sm:$0xff] }
  0xe2   : > { %17704 = vst [vmem:[#allocation36_spill] sm:$0xff] %v12820_v55  ;;  %6600 = vperm.xlu0 %11499, %v11911_v13   ;;  %v11929_v13 = vld [vmem:[%s17654_s2 + $0x88] sm:$0xff] }
  0xe4   : > { %v12829_v51 = vpop.permute.xlu1 %3247 }
  0xe5   : > { %17705 = vst [vmem:[#allocation37_spill] sm:$0xff] %v12829_v51  ;;  %v12831_v57 = vpop.permute.xlu0 %3242  ;;  %6291 = vperm.xlu1 %11500, %v11912_v14  }
  0xe6   : > { %17706 = vst [vmem:[#allocation38_spill] sm:$0xff] %v12831_v57  ;;  %6286 = vperm.xlu0 %11499, %v11913_v15   ;;  %949 = vmatmul.mubr.bf16.gmra.mxu0 %v12584_v54  ;;  %v11917_v54 = vld [vmem:[%s17654_s2 + $0x50] sm:$0xff]  ;;  %v11931_v15 = vld [vmem:[%s17653_s1 + $0x98] sm:$0xff] }
  0xe7   : > { %1409 = vmatmul.mubr.bf16.gmra.mxu1 %v12422_v1  ;;  %958 = vmatprep.mubr.bf16.mxu0 %v17662_v0  ;;  %v11916_v1 = vld [vmem:[%s17654_s2 + $0x58] sm:$0xff] }
  0xe8   : > { %v12842_v16 = vpop.permute.xlu1 %2896  ;;  %1418 = vmatprep.mubr.bf16.mxu1 %v17662_v0 }
  0xe9   : > { %17707 = vst [vmem:[#allocation39_spill] sm:$0xff] %v12842_v16  ;;  %6301 = vperm.xlu1 %11500, %v11914_v17   ;;  %v12848_v18 = vpop.permute.xlu0 %2891  ;;  %v11932_v17 = vld [vmem:[%s17653_s1 + $0x90] sm:$0xff]  ;;  %v11619_v16 = vld [vmem:[#allocation2 + $0x18] sm:$0xff]  }
  0xea   : > { %17708 = vst [vmem:[#allocation40_spill] sm:$0xff] %v12848_v18  ;;  %6296 = vperm.xlu0 %11499, %v11915_v37  }
  0xec   : > { %v12859_v25 = vpop.permute.xlu1 %3257 }
  0xed   : > { %6615 = vperm.xlu1 %11500, %v11916_v1   ;;  %17709 = vst [vmem:[#allocation41_spill] sm:$0xff] %v12859_v25  ;;  %v12862_v27 = vpop.permute.xlu0 %3252  ;;  %v11933_v1 = vld [vmem:[#allocation2 + $0x8] sm:$0xff]  }
  0xee   : > { %6610 = vperm.xlu0 %11499, %v11917_v54   ;;  %959 = vmatmul.mubr.bf16.gmra.mxu0 %v12603_v60  ;;  %17710 = vst [vmem:[#allocation42_spill] sm:$0xff] %v12862_v27  ;;  %v11596_v54 = vld [vmem:[%s17655_s3 + $0x214] ss:$12 sps:$4 sm:$0xff]  }
  0xef   : > { %1419 = vmatmul.mubr.bf16.gmra.mxu1 %v12864_v29  ;;  %968 = vmatprep.mubr.bf16.mxu0 %v17662_v0 }
  0xf0   : > { %1428 = vmatprep.mubr.bf16.mxu1 %v17662_v0  ;;  %v12875_v60 = vpop.permute.xlu1 %2906 }
  0xf1   : > { %6625 = vperm.xlu1 %11500, %v11919_v30   ;;  %17711 = vst [vmem:[#allocation43_spill] sm:$0xff] %v12875_v60  ;;  %v12880_v34 = vpop.permute.xlu0 %2901 }
  0xf2   : > { %6620 = vperm.xlu0 %11499, %v11920_v45   ;;  %17712 = vst [vmem:[#allocation44_spill] sm:$0xff] %v12880_v34  ;;  %v12939_v45 = vld [vmem:[#allocation2 + $0x50] sm:$0xff]   ;;  %v9166_v34 = vld [vmem:[%s17653_s1 + $0x48] sm:$0xff] }
  0xf4   : > { %v12897_v47 = vpop.permute.xlu1 %3267 }
  0xf5   : > { %6311 = vperm.xlu1 %11500, %v11921_v31   ;;  %17713 = vst [vmem:[#allocation45_spill] sm:$0xff] %v12897_v47  ;;  %v11594_v31 = vld [vmem:[%s17655_s3 + $0x210] ss:$12 sps:$4 sm:$0xff]  }
  0xf6   : > { %6306 = vperm.xlu0 %11499, %v11922_v38   ;;  %969 = vmatmul.mubr.bf16.gmra.mxu0 %v12605_v61  ;;  %v12899_v61 = vpop.permute.xlu0 %3262  ;;  %v11935_v38 = vld [vmem:[%s17653_s1 + $0xa8] sm:$0xff]  ;;  %v11966_v47 = vld [vmem:[#allocation2 + $0x98] sm:$0xff]  }
  0xf7   : > { %1429 = vmatmul.mubr.bf16.gmra.mxu1 %v12886_v39  ;;  %978 = vmatprep.mubr.bf16.mxu0 %v17662_v0  ;;  %17714 = vst [vmem:[#allocation46_spill] sm:$0xff] %v12899_v61 }
  0xf8   : > { %1438 = vmatprep.mubr.bf16.mxu1 %v17662_v0  ;;  %v12912_v12 = vpop.permute.xlu1 %2916 }
  0xf9   : > { %6321 = vperm.xlu1 %11500, %v11924_v41   ;;  %17715 = vst [vmem:[#allocation47_spill] sm:$0xff] %v12912_v12  ;;  %v11599_v41 = vld [vmem:[%s17655_s3 + $0x1fc] ss:$12 sps:$4 sm:$0xff]  }
  0xfa   : > { %6316 = vperm.xlu0 %11499, %v11925_v42   ;;  %v12918_v14 = vpop.permute.xlu0 %2911  ;;  %v11936_v42 = vld [vmem:[%s17653_s1 + $0xa0] sm:$0xff] }
  0xfb   : > { %17716 = vst [vmem:[#allocation48_spill] sm:$0xff] %v12918_v14  ;;  %v9164_v14 = vld [vmem:[%s17653_s1 + $0x38] sm:$0xff] }
  0xfc   : > { %v12932_v37 = vpop.permute.xlu1 %3277 }
  0xfd   : > { %6635 = vperm.xlu1 %11500, %v11926_v49   ;;  %17717 = vst [vmem:[#allocation49_spill] sm:$0xff] %v12932_v37  ;;  %v11937_v49 = vld [vmem:[#allocation2 + $0x10] sm:$0xff]  }
  0xfe   : > { %6630 = vperm.xlu0 %11499, %v11927_v50   ;;  %979 = vmatmul.mubr.bf16.gmra.mxu0 %v12635_v4  ;;  %v11930_v4 = vld [vmem:[%s17654_s2 + $0x80] sm:$0xff]  ;;  %v12937_v30 = vpop.permute.xlu0 %3272 }
  0xff   : > { %1439 = vmatmul.mubr.bf16.gmra.mxu1 %v12908_v52  ;;  %11037 = vmatprep.mubr.bf16.mxu0 %v12665_v9  ;;  %v11590_v9 = vld [vmem:[%s17655_s3 + $0x228] ss:$12 sps:$4 sm:$0xff]   ;;  %17718 = vst [vmem:[#allocation50_spill] sm:$0xff] %v12937_v30 }
 0x100   : > { %1448 = vmatprep.mubr.bf16.mxu1 %v17662_v0  ;;  %v12955_v50 = vpop.permute.xlu1 %2926 }
 0x101   : > { %6645 = vperm.xlu1 %11500, %v11929_v13   ;;  %17719 = vst [vmem:[#allocation51_spill] sm:$0xff] %v12955_v50  ;;  %v11938_v13 = vld [vmem:[%s17654_s2 + $0x98] sm:$0xff] }
 0x102   : > { %6640 = vperm.xlu0 %11499, %v11930_v4   ;;  %v12960_v4 = vpop.permute.xlu0 %2921 }
 0x103   : > { %17720 = vst [vmem:[#allocation52_spill] sm:$0xff] %v12960_v4 }
 0x105   : > { %6331 = vperm.xlu1 %11500, %v11931_v15   ;;  %v11597_v15 = vld [vmem:[%s17655_s3 + $0x1f8] ss:$12 sps:$4 sm:$0xff]  }
 0x106   : > { %6326 = vperm.xlu0 %11499, %v11932_v17   ;;  %11038 = vmatmul.mubr.bf16.vlgmr.msra.gmra.mxu0 %v11933_v1  ;;  %v11940_v17 = vld [vmem:[#allocation2 + $0x18] sm:$0xff]   ;;  %v11603_v1 = vld [vmem:[%s17655_s3 + $0x1e4] ss:$12 sps:$4 sm:$0xff]  }
 0x107   : > { %1449 = vmatmul.mubr.bf16.gmra.mxu1 %v12939_v45  ;;  %2064 = vmatpush1.bf16.msra.mxu0 %v11590_v9  ;;  %v11939_v9 = vld [vmem:[%s17654_s2 + $0x90] sm:$0xff] }
 0x108   : > { %1458 = vmatprep.mubr.bf16.mxu1 %v17662_v0  ;;  %11041 = vmatprep.mubr.bf16.mxu0 %v11937_v49  ;;  %v12984_v49 = vpop.permute.xlu1 %3287 }
 0x109   : > { %6341 = vperm.xlu1 %11500, %v11935_v38   ;;  %2065 = vmatprep.subr.bf16.mxu0 %v11596_v54  ;;  %v12971_v54 = vld [vmem:[#allocation2 + $0x58] sm:$0xff]   ;;  %v11943_v38 = vld [vmem:[%s17654_s2 + $0xa8] sm:$0xff]  ;;  %17721 = vst [vmem:[#allocation53_spill] sm:$0xff] %v12984_v49 }
 0x10a   : > { %6336 = vperm.xlu0 %11499, %v11936_v42   ;;  %v11601_v42 = vld [vmem:[%s17655_s3 + $0x1e0] ss:$12 sps:$4 sm:$0xff]  }
 0x10b   : > { %2066 = vmatpush1.bf16.msra.mxu0 %v11594_v31  ;;  %v11942_v31 = vld [vmem:[#allocation2 + $0x20] sm:$0xff]   ;;  %v11954_v49 = vld [vmem:[#allocation2 + $0x68] sm:$0xff]  }
 0x10c   : > { %2067 = vmatprep.subr.bf16.mxu0 %v11599_v41  ;;  %v11944_v41 = vld [vmem:[%s17654_s2 + $0xa0] sm:$0xff] }
 0x10d   : > { %6655 = vperm.xlu1 %11500, %v11938_v13   ;;  %v11606_v13 = vld [vmem:[%s17655_s3 + $0x1cc] ss:$12 sps:$4 sm:$0xff]  }
 0x10e   : > { %6650 = vperm.xlu0 %11499, %v11939_v9   ;;  %11042 = vmatmul.mubr.bf16.gmra.mxu0 %v11940_v17  ;;  %v12989_v9 = vpop.permute.xlu0 %3282  ;;  %v11945_v17 = vld [vmem:[%s17653_s1 + $0xb8] sm:$0xff] }
 0x10f   : > { %1459 = vmatmul.mubr.bf16.gmra.mxu1 %v12971_v54  ;;  %11045 = vmatprep.mubr.bf16.mxu0 %v11942_v31  ;;  %17722 = vst [vmem:[#allocation54_spill] sm:$0xff] %v12989_v9  ;;  %v11947_v31 = vld [vmem:[#allocation2 + $0x28] sm:$0xff]   ;;  %v11965_v9 = vld [vmem:[#allocation2 + $0x90] sm:$0xff]  }
 0x110   : > { %1468 = vmatprep.mubr.bf16.mxu1 %v17662_v0  ;;  %2068 = vmatpush1.bf16.msra.mxu0 %v11597_v15  ;;  %v11946_v15 = vld [vmem:[%s17653_s1 + $0xb0] sm:$0xff]  ;;  %v13006_v0 = vpop.permute.xlu1 %2936 }
 0x111   : > { %6665 = vperm.xlu1 %11500, %v11943_v38   ;;  %2069 = vmatprep.subr.bf16.mxu0 %v11603_v1  ;;  %v11604_v1 = vld [vmem:[%s17655_s3 + $0x1c8] ss:$12 sps:$4 sm:$0xff]   ;;  %17723 = vst [vmem:[#allocation55_spill] sm:$0xff] %v13006_v0 }
 0x112   : > { %6660 = vperm.xlu0 %11499, %v11944_v41   ;;  %v11610_v38 = vld [vmem:[%s17655_s3 + $0x1b4] ss:$12 sps:$4 sm:$0xff]   ;;  %v11613_v0 = vld [vmem:[%s17655_s3 + $0x19c] ss:$12 sps:$4 sm:$0xff]  }
 0x113   : > { %v13003_v41 = vld [vmem:[#allocation2 + $0x60] sm:$0xff]  }
 0x114   : > { %2070 = vmatpush1.bf16.msra.mxu0 %v11601_v42  ;;  %v11950_v42 = vld [vmem:[%s17653_s1 + $0xc8] sm:$0xff] }
 0x115   : > { %6351 = vperm.xlu1 %11500, %v11945_v17   ;;  %2071 = vmatprep.subr.bf16.mxu0 %v11606_v13  ;;  %v11949_v17 = vld [vmem:[#allocation2 + $0x30] sm:$0xff]   ;;  %v13012_v13 = vpop.permute.xlu0 %2931 }
 0x116   : > { %6346 = vperm.xlu0 %11499, %v11946_v15   ;;  %11046 = vmatmul.mubr.bf16.gmra.mxu0 %v11947_v31  ;;  %v17724_v15 = vmov 0   ;;  %17725 = vst [vmem:[#allocation56_spill] sm:$0xff] %v13012_v13  ;;  %v11951_v31 = vld [vmem:[%s17653_s1 + $0xc0] sm:$0xff]  ;;  %v11953_v13 = vld [vmem:[%s17654_s2 + $0xb0] sm:$0xff] }
 0x117   : > { %1469 = vmatmul.mubr.bf16.gmra.mxu1 %v13003_v41  ;;  %11049 = vmatprep.mubr.bf16.mxu0 %v11949_v17  ;;  %v11608_v17 = vld [vmem:[%s17655_s3 + $0x1b0] ss:$12 sps:$4 sm:$0xff]  }
 0x118   : > { %1478 = vmatprep.mubr.bf16.mxu1 %v17724_v15  ;;  %2072 = vmatpush1.bf16.msra.mxu0 %v11604_v1  ;;  %v11611_v1 = vld [vmem:[%s17655_s3 + $0x198] ss:$12 sps:$4 sm:$0xff]  }
 0x119   : > { %6361 = vperm.xlu1 %11500, %v11950_v42   ;;  %2073 = vmatprep.subr.bf16.mxu0 %v11610_v38  ;;  %v11952_v42 = vld [vmem:[%s17654_s2 + $0xb8] sm:$0xff]  ;;  %v13032_v38 = vpop.permute.xlu1 %3297 }
 0x11a   : > { %6356 = vperm.xlu0 %11499, %v11951_v31   ;;  %17726 = vst [vmem:[#allocation57_spill] sm:$0xff] %v13032_v38  ;;  %v11617_v31 = vld [vmem:[%s17655_s3 + $0x184] ss:$12 sps:$4 sm:$0xff]  }
 0x11b   : > { %v11958_v38 = vld [vmem:[%s17653_s1 + $0xd0] sm:$0xff] }
 0x11c   : > { %2074 = vmatpush1.bf16.msra.mxu0 %v11608_v17 }
 0x11d   : > { %6675 = vperm.xlu1 %11500, %v11952_v42   ;;  %2075 = vmatprep.subr.bf16.mxu0 %v11613_v0  ;;  %v13038_v42 = vpop.permute.xlu0 %3292  ;;  %v11956_v0 = vld [vmem:[%s17654_s2 + $0xc0] sm:$0xff]  ;;  %v13051_v17 = vpop.permute.xlu1 %2946 }
 0x11e   : > { %6670 = vperm.xlu0 %11499, %v11953_v13   ;;  %11050 = vmatmul.mubr.bf16.gmra.mxu0 %v12864_v29  ;;  %17727 = vst [vmem:[#allocation58_spill] sm:$0xff] %v13038_v42  ;;  %v11955_v13 = vld [vmem:[%s17654_s2 + $0xc8] sm:$0xff]  ;;  %17728 = vst [vmem:[#allocation59_spill] sm:$0xff] %v13051_v17 }
 0x11f   : > { %1479 = vmatmul.mubr.bf16.gmra.mxu1 %v11954_v49  ;;  %11053 = vmatprep.mubr.bf16.mxu0 %v12886_v39  ;;  %v11615_v29 = vld [vmem:[%s17655_s3 + $0x180] ss:$12 sps:$4 sm:$0xff]   ;;  %v11957_v39 = vld [vmem:[%s17653_s1 + $0xd8] sm:$0xff] }
 0x120   : > { %1488 = vmatprep.mubr.bf16.mxu1 %v17724_v15  ;;  %2076 = vmatpush1.bf16.msra.mxu0 %v11611_v1 }
 0x121   : > { %6685 = vperm.xlu1 %11500, %v11955_v13   ;;  %2077 = vmatprep.subr.bf16.mxu0 %v11617_v31  ;;  %v13056_v13 = vpop.permute.xlu0 %2941  ;;  %v11959_v31 = vld [vmem:[#allocation2 + $0x70] sm:$0xff]  }
 0x122   : > { %6680 = vperm.xlu0 %11499, %v11956_v0   ;;  %17729 = vst [vmem:[#allocation60_spill] sm:$0xff] %v13056_v13  ;;  %v13066_v13 = vpop.permute.xlu1 %3307 }
 0x123   : > { %17730 = vst [vmem:[#allocation61_spill] sm:$0xff] %v13066_v13  ;;  %v11964_v13 = vld [vmem:[#allocation2 + $0x88] sm:$0xff]  }
 0x124   : > { %2078 = vmatpush1.bf16.msra.mxu0 %v11615_v29 }
 0x125   : > { %6371 = vperm.xlu1 %11500, %v11957_v39   ;;  %v13068_v29 = vpop.permute.xlu0 %3302 }
 0x126   : > { %6366 = vperm.xlu0 %11499, %v11958_v38   ;;  %v790_v1 = vpop.f32.mrf.mxu0  ;;  %11054 = vmatmul.mubr.bf16.gmra.mxu0 %v12908_v52  ;;  %17731 = vst [vmem:[#allocation62_spill] sm:$0xff] %v13068_v29  ;;  %v11960_v52 = vld [vmem:[%s17654_s2 + $0xd8] sm:$0xff] }
 0x127   : > { %v10983_v0 = vpop.f32.mrf.mxu1  ;;  %1489 = vmatmul.mubr.bf16.gmra.mxu1 %v11959_v31  ;;  %11057 = vmatprep.mubr.bf16.mxu0 %v12939_v45 }
 0x128   : > { %v792_v17 = vpop.f32.mrf.mxu0  ;;  %1498 = vmatprep.mubr.bf16.mxu1 %v17724_v15 }
 0x129   : > { %6381 = vperm.xlu1 %11500, %v12594_v58   ;;  %v1023_v39 = vpop.f32.mrf.mxu1  ;;  %v11961_v58 = vld [vmem:[%s17654_s2 + $0xd0] sm:$0xff] }
 0x12a   : > { %6376 = vperm.xlu0 %11499, %v12600_v59   ;;  %v794_v38 = vpop.f32.mrf.mxu0  ;;  %v11962_v39 = vld [vmem:[#allocation2 + $0x78] sm:$0xff]  }
 0x12b   : > { %v10984_v1 = vpop.f32.mrf.mxu1  ;;  %v13080_v38 = vpop.permute.xlu1 %2956 }
 0x12c   : > { %v796_v45 = vpop.f32.mrf.mxu0  ;;  %17733 = vst [vmem:[#allocation64_spill] sm:$0xff] %v13080_v38  ;;  %v11963_v38 = vld [vmem:[#allocation2 + $0x80] sm:$0xff]  }
 0x12d   : > { %6695 = vperm.xlu1 %11500, %v11960_v52   ;;  %v1026_v17 = vpop.f32.mrf.mxu1  ;;  %v13084_v52 = vpop.permute.xlu0 %2951 }
 0x12e   : > { %6690 = vperm.xlu0 %11499, %v11961_v58   ;;  %v800_v59 = vpop.f32.mrf.mxu0  ;;  %11058 = vmatmul.mubr.bf16.gmra.mxu0 %v12971_v54  ;;  %17734 = vst [vmem:[#allocation65_spill] sm:$0xff] %v13084_v52 }
 0x12f   : > { %v13077_v0 = vpop.f32.mrf.mxu1  ;;  %1499 = vmatmul.mubr.bf16.gmra.mxu1 %v11962_v39  ;;  %11061 = vmatprep.mubr.bf16.mxu0 %v13003_v41 }
 0x130   : > { %17732 = vst [vmem:[#allocation63_spill] sm:$0xff] %v13077_v0  ;;  %v802_v1 = vpop.f32.mrf.mxu0  ;;  %1508 = vmatprep.mubr.bf16.mxu1 %v17724_v15 }
 0x131   : > { %6705 = vperm.xlu1 %11500, %v12612_v62   ;;  %v13087_v45 = vpop.f32.mrf.mxu1  ;;  %v13097_v62 = vpop.permute.xlu1 %3317 }
 0x132   : > { %6700 = vperm.xlu0 %11499, %v12617_v63   ;;  %17735 = vst [vmem:[#allocation66_spill] sm:$0xff] %v13087_v45  ;;  %v13089_v54 = vpop.f32.mrf.mxu0  ;;  %17738 = vst [vmem:[#allocation69_spill] sm:$0xff] %v13097_v62  ;;  %v13101_v1 = vpop.permute.xlu0 %3312  ;;  %v9209_v45 = vld [vmem:[%s17654_s2 + $0xa0] sm:$0xff] }
 0x133   : > { %v13091_v58 = vpop.f32.mrf.mxu1  ;;  %17739 = vst [vmem:[#allocation70_spill] sm:$0xff] %v13101_v1 }
 0x134   : > { %17736 = vst [vmem:[#allocation67_spill] sm:$0xff] %v13091_v58  ;;  %v806_v41 = vpop.f32.mrf.mxu0 }
 0x135   : > { %6391 = vperm.xlu1 %11500, %v12624_v2   ;;  %v13095_v17 = vpop.f32.mrf.mxu1  ;;  %v13116_v62 = vpop.permute.xlu1 %2966 }
 0x136   : > { %6386 = vperm.xlu0 %11499, %v12631_v3   ;;  %17737 = vst [vmem:[#allocation68_spill] sm:$0xff] %v13095_v17  ;;  %v13099_v59 = vpop.f32.mrf.mxu0  ;;  %11062 = vmatmul.mubr.bf16.gmra.mxu0 %v11954_v49  ;;  %17743 = vst [vmem:[#allocation74_spill] sm:$0xff] %v13116_v62 }
 0x137   : > { %v13103_v63 = vpop.f32.mrf.mxu1  ;;  %1509 = vmatmul.mubr.bf16.gmra.mxu1 %v11963_v38  ;;  %11065 = vmatprep.mubr.bf16.mxu0 %v11959_v31  ;;  %v13121_v31 = vpop.permute.xlu0 %2961 }
 0x138   : > { %17740 = vst [vmem:[#allocation71_spill] sm:$0xff] %v13103_v63  ;;  %v13106_v2 = vpop.f32.mrf.mxu0  ;;  %1518 = vmatprep.mubr.bf16.mxu1 %v17724_v15  ;;  %17744 = vst [vmem:[#allocation75_spill] sm:$0xff] %v13121_v31 }
 0x139   : > { %6401 = vperm.xlu1 %11500, %v12654_v7   ;;  %v13110_v3 = vpop.f32.mrf.mxu1 }
 0x13a   : > { %6396 = vperm.xlu0 %11499, %v12661_v8   ;;  %17741 = vst [vmem:[#allocation72_spill] sm:$0xff] %v13110_v3  ;;  %v13112_v41 = vpop.f32.mrf.mxu0 }
 0x13b   : > { %v13114_v49 = vpop.f32.mrf.mxu1 }
 0x13c   : > { %17742 = vst [vmem:[#allocation73_spill] sm:$0xff] %v13114_v49  ;;  %v13119_v1 = vpop.f32.mrf.mxu0 }
 0x13d   : > { %6715 = vperm.xlu1 %11500, %v12640_v5   ;;  %v13124_v7 = vpop.f32.mrf.mxu1 }
 0x13e   : > { %6710 = vperm.xlu0 %11499, %v12646_v6   ;;  %17745 = vst [vmem:[#allocation76_spill] sm:$0xff] %v13124_v7  ;;  %v13126_v52 = vpop.f32.mrf.mxu0  ;;  %11066 = vmatmul.mubr.bf16.gmra.mxu0 %v11962_v39  ;;  %v9158_v6 = vld [vmem:[%s17653_s1 + $0x8] sm:$0xff]  ;;  %v13140_v39 = vpop.permute.xlu1 %3327  ;;  %v11648_v7 = vld [vmem:[#allocation6 + $0x158] ss:$12 sps:$4 sm:$0xff]  }
 0x13f   : > { %v13128_v8 = vpop.f32.mrf.mxu1  ;;  %1519 = vmatmul.mubr.bf16.gmra.mxu1 %v11964_v13  ;;  %11069 = vmatprep.mubr.bf16.mxu0 %v11963_v38  ;;  %17748 = vst [vmem:[#allocation79_spill] sm:$0xff] %v13140_v39  ;;  %v13147_v38 = vpop.permute.xlu0 %3322 }
 0x140   : > { %17746 = vst [vmem:[#allocation77_spill] sm:$0xff] %v13128_v8  ;;  %v13131_v62 = vpop.f32.mrf.mxu0  ;;  %1528 = vmatprep.mubr.bf16.mxu1 %v17724_v15  ;;  %17749 = vst [vmem:[#allocation80_spill] sm:$0xff] %v13147_v38 }
 0x141   : > { %6725 = vperm.xlu1 %11500, %v12670_v10   ;;  %v13135_v5 = vpop.f32.mrf.mxu1  ;;  %v9157_v10 = vld [vmem:[%s17653_s1] sm:$0xff] }
 0x142   : > { %6720 = vperm.xlu0 %11499, %v12676_v11   ;;  %17747 = vst [vmem:[#allocation78_spill] sm:$0xff] %v13135_v5  ;;  %v13142_v31 = vpop.f32.mrf.mxu0  ;;  %v13159_v4 = vpop.permute.xlu1 %2976 }
 0x143   : > { %v13149_v29 = vpop.f32.mrf.mxu1  ;;  %17753 = vst [vmem:[#allocation84_spill] sm:$0xff] %v13159_v4 }
 0x144   : > { %17750 = vst [vmem:[#allocation81_spill] sm:$0xff] %v13149_v29  ;;  %v13151_v11 = vpop.f32.mrf.mxu0  ;;  %v13396_v29 = vld [vmem:[#allocation2 + $0x68] sm:$0xff]  }
 0x145   : > { %9331 = vperm.xlu1 %11500, %v9158_v6   ;;  %v13153_v42 = vpop.f32.mrf.mxu1  ;;  %v13165_v6 = vpop.permute.xlu0 %2971 }
 0x146   : > { %9326 = vperm.xlu0 %11499, %v9157_v10   ;;  %17751 = vst [vmem:[#allocation82_spill] sm:$0xff] %v13153_v42  ;;  %v13155_v50 = vpop.f32.mrf.mxu0  ;;  %11070 = vmatmul.mubr.bf16.gmra.mxu0 %v11964_v13  ;;  %17754 = vst [vmem:[#allocation85_spill] sm:$0xff] %v13165_v6  ;;  %v9162_v13 = vld [vmem:[%s17653_s1 + $0x28] sm:$0xff]  ;;  %v11618_v6 = vld [vmem:[#allocation2 + $0x10] sm:$0xff]   ;;  %v13187_v37 = vpop.permute.xlu1 %3337 }
 0x147   : > { %v13157_v39 = vpop.f32.mrf.mxu1  ;;  %1529 = vmatmul.mubr.bf16.gmra.mxu1 %v11965_v9  ;;  %11073 = vmatprep.mubr.bf16.mxu0 %v11965_v9  ;;  %17758 = vst [vmem:[#allocation89_spill] sm:$0xff] %v13187_v37 }
 0x148   : > { %17752 = vst [vmem:[#allocation83_spill] sm:$0xff] %v13157_v39  ;;  %v13162_v38 = vpop.f32.mrf.mxu0  ;;  %1538 = vmatprep.mubr.bf16.mxu1 %v17724_v15  ;;  %v9184_v39 = vld [vmem:[%s17653_s1 + $0xd8] sm:$0xff] }
 0x149   : > { %9341 = vperm.xlu1 %11500, %v12716_v21   ;;  %v13168_v10 = vpop.f32.mrf.mxu1  ;;  %v9161_v21 = vld [vmem:[%s17653_s1 + $0x20] sm:$0xff]  ;;  %v13194_v60 = vpop.permute.xlu0 %3332 }
 0x14a   : > { %9336 = vperm.xlu0 %11499, %v12722_v22   ;;  %17755 = vst [vmem:[#allocation86_spill] sm:$0xff] %v13168_v10  ;;  %v13173_v12 = vpop.f32.mrf.mxu0  ;;  %17759 = vst [vmem:[#allocation90_spill] sm:$0xff] %v13194_v60  ;;  %v9165_v60 = vld [vmem:[%s17653_s1 + $0x40] sm:$0xff]  ;;  %v11641_v10 = vld [vmem:[#allocation6 + $0x170] ss:$12 sps:$4 sm:$0xff]  }
 0x14b   : > { %v13178_v9 = vpop.f32.mrf.mxu1  ;;  %11133 = vmatprep.subr.bf16.mxu0 %v11641_v10 }
 0x14c   : > { %17756 = vst [vmem:[#allocation87_spill] sm:$0xff] %v13178_v9  ;;  %v13180_v4 = vpop.f32.mrf.mxu0 }
 0x14d   : > { %9351 = vperm.xlu1 %11500, %v9162_v13   ;;  %v13182_v22 = vpop.f32.mrf.mxu1  ;;  %v9163_v13 = vld [vmem:[%s17653_s1 + $0x30] sm:$0xff]  ;;  %v13217_v18 = vpop.permute.xlu0 %2981 }
 0x14e   : > { %9346 = vperm.xlu0 %11499, %v9161_v21   ;;  %17757 = vst [vmem:[#allocation88_spill] sm:$0xff] %v13182_v22  ;;  %v13189_v30 = vpop.f32.mrf.mxu0  ;;  %11074 = vmatmul.mubr.bf16.gmra.mxu0 %v11966_v47  ;;  %17764 = vst [vmem:[#allocation95_spill] sm:$0xff] %v13217_v18  ;;  %v9180_v22 = vld [vmem:[%s17653_s1 + $0xb8] sm:$0xff] }
 0x14f   : > { %v13196_v61 = vpop.f32.mrf.mxu1  ;;  %1539 = vmatmul.mubr.bf16.gmra.mxu1 %v11966_v47  ;;  %2095 = vmatprep.mubr.bf16.mxu0 %v17724_v15 }
 0x150   : > { %17760 = vst [vmem:[#allocation91_spill] sm:$0xff] %v13196_v61  ;;  %v13199_v21 = vpop.f32.mrf.mxu0  ;;  %11093 = vmatprep.mubr.bf16.mxu1 %v11618_v6 }
 0x151   : > { %9361 = vperm.xlu1 %11500, %v9164_v14   ;;  %v13201_v37 = vpop.f32.mrf.mxu1  ;;  %v13213_v14 = vpop.permute.xlu1 %2986 }
 0x152   : > { %9356 = vperm.xlu0 %11499, %v9163_v13   ;;  %17761 = vst [vmem:[#allocation92_spill] sm:$0xff] %v13201_v37  ;;  %v13206_v25 = vpop.f32.mrf.mxu0  ;;  %17763 = vst [vmem:[#allocation94_spill] sm:$0xff] %v13213_v14  ;;  %v11620_v13 = vld [vmem:[#allocation2 + $0x20] sm:$0xff]   ;;  %v9167_v14 = vld [vmem:[%s17653_s1 + $0x50] sm:$0xff] }
 0x153   : > { %v13211_v47 = vpop.f32.mrf.mxu1 }
 0x154   : > { %17762 = vst [vmem:[#allocation93_spill] sm:$0xff] %v13211_v47  ;;  %v13215_v27 = vpop.f32.mrf.mxu0  ;;  %v9174_v47 = vld [vmem:[%s17653_s1 + $0x88] sm:$0xff] }
 0x155   : > { %9371 = vperm.xlu1 %11500, %v9166_v34   ;;  %v13219_v51 = vpop.f32.mrf.mxu1 }
 0x156   : > { %9366 = vperm.xlu0 %11499, %v9165_v60   ;;  %17765 = vst [vmem:[#allocation96_spill] sm:$0xff] %v13219_v51  ;;  %v13224_v55 = vpop.f32.mrf.mxu0  ;;  %2096 = vmatmul.mubr.bf16.vlgmr.msra.gmra.mxu0 %v11618_v6  ;;  %v9170_v6 = vld [vmem:[%s17653_s1 + $0x68] sm:$0xff]  ;;  %v13239_v51 = vpop.permute.xlu1 %3347 }
 0x157   : > { %v13229_v34 = vpop.f32.mrf.mxu1  ;;  %11094 = vmatmul.mubr.bf16.vlgmr.msra.gmra.mxu1 %v11619_v16  ;;  %2105 = vmatprep.mubr.bf16.mxu0 %v17724_v15  ;;  %17768 = vst [vmem:[#allocation99_spill] sm:$0xff] %v13239_v51  ;;  %v9172_v51 = vld [vmem:[%s17653_s1 + $0x78] sm:$0xff] }
 0x158   : > { %17766 = vst [vmem:[#allocation97_spill] sm:$0xff] %v13229_v34  ;;  %v13232_v60 = vpop.f32.mrf.mxu0  ;;  %11097 = vmatprep.mubr.bf16.mxu1 %v11620_v13  ;;  %v13246_v34 = vpop.permute.xlu0 %3342  ;;  %11134 = vmatpush3.bf16.msra.mxu0 %v11641_v10 }
 0x159   : > { %9381 = vperm.xlu1 %11500, %v9168_v53   ;;  %v13234_v18 = vpop.f32.mrf.mxu1  ;;  %17769 = vst [vmem:[#allocation100_spill] sm:$0xff] %v13246_v34  ;;  %v9171_v34 = vld [vmem:[%s17653_s1 + $0x70] sm:$0xff]  ;;  %11135 = vmatprep.subr.bf16.mxu0 %v11648_v7 }
 0x15a   : > { %9376 = vperm.xlu0 %11499, %v9167_v14   ;;  %17767 = vst [vmem:[#allocation98_spill] sm:$0xff] %v13234_v18  ;;  %v13241_v57 = vpop.f32.mrf.mxu0  ;;  %v13252_v18 = vld [vmem:[#allocation2 + $0x30] sm:$0xff]  }
 0x15b   : > { %v13248_v53 = vpop.f32.mrf.mxu1 }
 0x15c   : > { %17770 = vst [vmem:[#allocation101_spill] sm:$0xff] %v13248_v53  ;;  %v13250_v14 = vpop.f32.mrf.mxu0  ;;  %11136 = vmatpush3.bf16.msra.mxu0 %v11648_v7  ;;  %v13476_v7 = vld [vmem:[#allocation2 + $0x90] sm:$0xff]  }
 0x15d   : > { %9391 = vperm.xlu1 %11500, %v9170_v6   ;;  %v13254_v46 = vpop.f32.mrf.mxu1  ;;  %v13267_v6 = vpop.permute.xlu1 %2996 }
 0x15e   : > { %9386 = vperm.xlu0 %11499, %v9169_v43   ;;  %17771 = vst [vmem:[#allocation102_spill] sm:$0xff] %v13254_v46  ;;  %v13259_v56 = vpop.f32.mrf.mxu0  ;;  %2106 = vmatmul.mubr.bf16.gmra.mxu0 %v11619_v16  ;;  %17774 = vst [vmem:[#allocation105_spill] sm:$0xff] %v13267_v6  ;;  %v13272_v46 = vpop.permute.xlu0 %2991  ;;  %v9173_v6 = vld [vmem:[%s17653_s1 + $0x80] sm:$0xff] }
 0x15f   : > { %17772 = vst [vmem:[#allocation103_spill] sm:$0xff] %v13259_v56  ;;  %v13264_v53 = vpop.f32.mrf.mxu1  ;;  %11098 = vmatmul.mubr.bf16.gmra.mxu1 %v11621_v44  ;;  %2115 = vmatprep.mubr.bf16.mxu0 %v17724_v15  ;;  %17776 = vst [vmem:[#allocation107_spill] sm:$0xff] %v13272_v46 }
 0x160   : > { %17773 = vst [vmem:[#allocation104_spill] sm:$0xff] %v13264_v53  ;;  %v13269_v43 = vpop.f32.mrf.mxu0  ;;  %11101 = vmatprep.mubr.bf16.mxu1 %v13252_v18 }
 0x161   : > { %9401 = vperm.xlu1 %11500, %v9172_v51   ;;  %17775 = vst [vmem:[#allocation106_spill] sm:$0xff] %v13269_v43  ;;  %v13274_v16 = vpop.f32.mrf.mxu1  ;;  %v13297_v37 = vpop.permute.xlu1 %3357 }
 0x162   : > { %9396 = vperm.xlu0 %11499, %v9171_v34   ;;  %17777 = vst [vmem:[#allocation108_spill] sm:$0xff] %v13274_v16  ;;  %v13279_v53 = vpop.f32.mrf.mxu0  ;;  %v13290_v34 = vld [vmem:[#allocation2 + $0x40] sm:$0xff]   ;;  %v9176_v16 = vld [vmem:[%s17653_s1 + $0x98] sm:$0xff]  ;;  %17782 = vst [vmem:[#allocation113_spill] sm:$0xff] %v13297_v37 }
 0x163   : > { %17778 = vst [vmem:[#allocation109_spill] sm:$0xff] %v13279_v53  ;;  %v13284_v51 = vpop.f32.mrf.mxu1 }
 0x164   : > { %17779 = vst [vmem:[#allocation110_spill] sm:$0xff] %v13284_v51  ;;  %v13288_v35 = vpop.f32.mrf.mxu0  ;;  %v13304_v51 = vpop.permute.xlu0 %3352 }
 0x165   : > { %9411 = vperm.xlu1 %11500, %v9174_v47   ;;  %17780 = vst [vmem:[#allocation111_spill] sm:$0xff] %v13288_v35  ;;  %v13292_v46 = vpop.f32.mrf.mxu1  ;;  %v9175_v47 = vld [vmem:[%s17653_s1 + $0x90] sm:$0xff]  ;;  %17784 = vst [vmem:[#allocation115_spill] sm:$0xff] %v13304_v51  ;;  %v9177_v51 = vld [vmem:[%s17653_s1 + $0xa0] sm:$0xff]  ;;  %v13327_v32 = vpop.permute.xlu1 %6251 }
 0x166   : > { %9406 = vperm.xlu0 %11499, %v9173_v6   ;;  %17781 = vst [vmem:[#allocation112_spill] sm:$0xff] %v13292_v46  ;;  %v13299_v36 = vpop.f32.mrf.mxu0  ;;  %2116 = vmatmul.mubr.bf16.gmra.mxu0 %v11620_v13  ;;  %v9178_v13 = vld [vmem:[%s17653_s1 + $0xa8] sm:$0xff]  ;;  %17790 = vst [vmem:[#allocation121_spill] sm:$0xff] %v13327_v32 }
 0x167   : > { %17783 = vst [vmem:[#allocation114_spill] sm:$0xff] %v13299_v36  ;;  %v13306_v40 = vpop.f32.mrf.mxu1  ;;  %11102 = vmatmul.mubr.bf16.gmra.mxu1 %v13286_v48  ;;  %2125 = vmatprep.mubr.bf16.mxu0 %v17724_v15  ;;  %v11640_v32 = vld [vmem:[#allocation6 + $0x16c] ss:$12 sps:$4 sm:$0xff]  }
 0x168   : > { %17785 = vst [vmem:[#allocation116_spill] sm:$0xff] %v13306_v40  ;;  %v13310_v6 = vpop.f32.mrf.mxu0  ;;  %11105 = vmatprep.mubr.bf16.mxu1 %v13290_v34  ;;  %v13333_v26 = vpop.permute.xlu0 %6246  ;;  %4330 = vmatprep.subr.bf16.mxu1 %v11640_v32  ;;  %v13368_v32 = vld [vmem:[#allocation2 + $0x60] sm:$0xff]  }
 0x169   : > { %9421 = vperm.xlu1 %11500, %v9176_v16   ;;  %17786 = vst [vmem:[#allocation117_spill] sm:$0xff] %v13310_v6  ;;  %v13313_v37 = vpop.f32.mrf.mxu1  ;;  %v13325_v16 = vld [vmem:[#allocation2 + $0x48] sm:$0xff]   ;;  %17792 = vst [vmem:[#allocation123_spill] sm:$0xff] %v13333_v26 }
 0x16a   : > { %9416 = vperm.xlu0 %11499, %v9175_v47   ;;  %17787 = vst [vmem:[#allocation118_spill] sm:$0xff] %v13313_v37  ;;  %v13318_v46 = vpop.f32.mrf.mxu0  ;;  %v13331_v37 = vld [vmem:[#allocation2 + $0x50] sm:$0xff]  }
 0x16b   : > { %17788 = vst [vmem:[#allocation119_spill] sm:$0xff] %v13318_v46  ;;  %v13323_v40 = vpop.f32.mrf.mxu1  ;;  %v11658_v46 = vld [vmem:[#allocation6 + $0xf4] ss:$12 sps:$4 sm:$0xff]  }
 0x16c   : > { %17789 = vst [vmem:[#allocation120_spill] sm:$0xff] %v13323_v40  ;;  %v13329_v47 = vpop.f32.mrf.mxu0  ;;  %v9179_v40 = vld [vmem:[%s17653_s1 + $0xb0] sm:$0xff]  ;;  %v13362_v33 = vpop.permute.xlu0 %6256 }
 0x16d   : > { %9431 = vperm.xlu1 %11500, %v9178_v13   ;;  %17791 = vst [vmem:[#allocation122_spill] sm:$0xff] %v13329_v47  ;;  %v13335_v61 = vpop.f32.mrf.mxu1  ;;  %v11638_v13 = vld [vmem:[#allocation6 + $0x168] ss:$12 sps:$4 sm:$0xff]   ;;  %17799 = vst [vmem:[#allocation130_spill] sm:$0xff] %v13362_v33 }
 0x16e   : > { %9426 = vperm.xlu0 %11499, %v9177_v51   ;;  %17793 = vst [vmem:[#allocation124_spill] sm:$0xff] %v13335_v61  ;;  %v13343_v9 = vpop.f32.mrf.mxu0  ;;  %2126 = vmatmul.mubr.bf16.gmra.mxu0 %v11621_v44  ;;  %v9182_v44 = vld [vmem:[%s17653_s1 + $0xc8] sm:$0xff]  ;;  %v13355_v61 = vpop.permute.xlu1 %6261 }
 0x16f   : > { %17794 = vst [vmem:[#allocation125_spill] sm:$0xff] %v13343_v9  ;;  %v11019_v28 = vpop.f32.mrf.mxu1  ;;  %11106 = vmatmul.mubr.bf16.gmra.mxu1 %v13325_v16  ;;  %2135 = vmatprep.mubr.bf16.mxu0 %v17724_v15  ;;  %17797 = vst [vmem:[#allocation128_spill] sm:$0xff] %v13355_v61 }
 0x170   : > { %v13347_v51 = vpop.f32.mrf.mxu0  ;;  %11109 = vmatprep.mubr.bf16.mxu1 %v13331_v37  ;;  %4331 = vmatpush1.bf16.msra.mxu1 %v11638_v13  ;;  %v9183_v13 = vld [vmem:[%s17653_s1 + $0xd0] sm:$0xff]  ;;  %v13386_v33 = vpop.permute.xlu0 %6570 }
 0x171   : > { %9441 = vperm.xlu1 %11500, %v9180_v22   ;;  %17795 = vst [vmem:[#allocation126_spill] sm:$0xff] %v13347_v51  ;;  %v13350_v26 = vpop.f32.mrf.mxu1  ;;  %v9181_v22 = vld [vmem:[%s17653_s1 + $0xc0] sm:$0xff]  ;;  %17804 = vst [vmem:[#allocation135_spill] sm:$0xff] %v13386_v33  ;;  %v9188_v33 = vld [vmem:[%s17653_s1 + $0xf8] sm:$0xff] }
 0x172   : > { %9436 = vperm.xlu0 %11499, %v9179_v40   ;;  %17796 = vst [vmem:[#allocation127_spill] sm:$0xff] %v13350_v26  ;;  %v13357_v28 = vpop.f32.mrf.mxu0  ;;  %v9201_v51 = vld [vmem:[%s17654_s2 + $0x60] sm:$0xff] }
 0x173   : > { %17798 = vst [vmem:[#allocation129_spill] sm:$0xff] %v13357_v28  ;;  %v11020_v40 = vpop.f32.mrf.mxu1  ;;  %v11655_v28 = vld [vmem:[#allocation6 + $0x140] ss:$12 sps:$4 sm:$0xff]  }
 0x174   : > { %v13366_v26 = vpop.f32.mrf.mxu0  ;;  %v11644_v40 = vld [vmem:[#allocation6 + $0x154] ss:$12 sps:$4 sm:$0xff]   ;;  %11137 = vmatprep.subr.bf16.mxu0 %v11655_v28 }
 0x175   : > { %9451 = vperm.xlu1 %11500, %v9182_v44   ;;  %17800 = vst [vmem:[#allocation131_spill] sm:$0xff] %v13366_v26  ;;  %v1170_v61 = vpop.f32.mrf.mxu1  ;;  %v13381_v44 = vpop.permute.xlu1 %6575  ;;  %4332 = vmatprep.subr.bf16.mxu1 %v11644_v40 }
 0x176   : > { %9446 = vperm.xlu0 %11499, %v9181_v22   ;;  %v13373_v42 = vpop.f32.mrf.mxu0  ;;  %2136 = vmatmul.mubr.bf16.gmra.mxu0 %v13252_v18  ;;  %17802 = vst [vmem:[#allocation133_spill] sm:$0xff] %v13381_v44  ;;  %v11642_v22 = vld [vmem:[#allocation6 + $0x150] ss:$12 sps:$4 sm:$0xff]  }
 0x177   : > { %17801 = vst [vmem:[#allocation132_spill] sm:$0xff] %v13373_v42  ;;  %v1350_v10 = vpop.f32.mrf.mxu1  ;;  %11110 = vmatmul.mubr.bf16.gmra.mxu1 %v13364_v23  ;;  %2145 = vmatprep.mubr.bf16.mxu0 %v17724_v15 }
 0x178   : > { %v13383_v61 = vpop.f32.mrf.mxu0  ;;  %11113 = vmatprep.mubr.bf16.mxu1 %v13368_v32  ;;  %v9186_v10 = vld [vmem:[%s17653_s1 + $0xe8] sm:$0xff]  ;;  %4333 = vmatpush1.bf16.msra.mxu1 %v11642_v22  ;;  %v13413_v22 = vpop.permute.xlu0 %6580 }
 0x179   : > { %9461 = vperm.xlu1 %11500, %v9184_v39   ;;  %17803 = vst [vmem:[#allocation134_spill] sm:$0xff] %v13383_v61  ;;  %v1352_v18 = vpop.f32.mrf.mxu1  ;;  %v9185_v39 = vld [vmem:[%s17653_s1 + $0xe0] sm:$0xff]  ;;  %v13405_v8 = vpop.permute.xlu1 %6585  ;;  %17809 = vst [vmem:[#allocation140_spill] sm:$0xff] %v13413_v22  ;;  %v11647_v22 = vld [vmem:[#allocation6 + $0x13c] ss:$12 sps:$4 sm:$0xff]   ;;  %11138 = vmatpush3.bf16.msra.mxu0 %v11655_v28 }
 0x17a   : > { %9456 = vperm.xlu0 %11499, %v9183_v13   ;;  %v13391_v24 = vpop.f32.mrf.mxu0  ;;  %v13400_v13 = vld [vmem:[#allocation2 + $0x70] sm:$0xff]   ;;  %17807 = vst [vmem:[#allocation138_spill] sm:$0xff] %v13405_v8  ;;  %v11645_v8 = vld [vmem:[#allocation6 + $0x138] ss:$12 sps:$4 sm:$0xff]   ;;  %4334 = vmatprep.subr.bf16.mxu1 %v11647_v22 }
 0x17b   : > { %17805 = vst [vmem:[#allocation136_spill] sm:$0xff] %v13391_v24  ;;  %v1354_v44 = vpop.f32.mrf.mxu1  ;;  %v11654_v61 = vld [vmem:[#allocation6 + $0x10c] ss:$12 sps:$4 sm:$0xff]   ;;  %v9203_v28 = vld [vmem:[%s17654_s2 + $0x70] sm:$0xff] }
 0x17c   : > { %v13398_v5 = vpop.f32.mrf.mxu0  ;;  %v9187_v44 = vld [vmem:[%s17653_s1 + $0xf0] sm:$0xff]  ;;  %4335 = vmatpush1.bf16.msra.mxu1 %v11645_v8 }
 0x17d   : > { %9471 = vperm.xlu1 %11500, %v9186_v10   ;;  %17806 = vst [vmem:[#allocation137_spill] sm:$0xff] %v13398_v5  ;;  %v1356_v18 = vpop.f32.mrf.mxu1 }
 0x17e   : > { %9466 = vperm.xlu0 %11499, %v9185_v39   ;;  %v13407_v19 = vpop.f32.mrf.mxu0  ;;  %2146 = vmatmul.mubr.bf16.gmra.mxu0 %v13286_v48  ;;  %v9190_v48 = vld [vmem:[%s17654_s2 + $0x8] sm:$0xff]  ;;  %v9189_v18 = vld [vmem:[%s17654_s2] sm:$0xff] }
 0x17f   : > { %17808 = vst [vmem:[#allocation139_spill] sm:$0xff] %v13407_v19  ;;  %v1360_v40 = vpop.f32.mrf.mxu1  ;;  %11114 = vmatmul.mubr.bf16.gmra.mxu1 %v13396_v29  ;;  %2155 = vmatprep.mubr.bf16.mxu0 %v17724_v15  ;;  %v13438_v19 = vpop.permute.xlu0 %6266 }
 0x180   : > { %v13417_v10 = vpop.f32.mrf.mxu0  ;;  %11117 = vmatprep.mubr.bf16.mxu1 %v13400_v13  ;;  %17814 = vst [vmem:[#allocation145_spill] sm:$0xff] %v13438_v19 }
 0x181   : > { %9481 = vperm.xlu1 %11500, %v9188_v33   ;;  %17810 = vst [vmem:[#allocation141_spill] sm:$0xff] %v13417_v10  ;;  %v1362_v39 = vpop.f32.mrf.mxu1  ;;  %v13432_v10 = vpop.permute.xlu1 %6271 }
 0x182   : > { %9476 = vperm.xlu0 %11499, %v9187_v44   ;;  %v13426_v40 = vpop.f32.mrf.mxu0  ;;  %17812 = vst [vmem:[#allocation143_spill] sm:$0xff] %v13432_v10  ;;  %v13436_v39 = vld [vmem:[#allocation2 + $0x80] sm:$0xff]  }
 0x183   : > { %17811 = vst [vmem:[#allocation142_spill] sm:$0xff] %v13426_v40  ;;  %v13428_v33 = vpop.f32.mrf.mxu1  ;;  %v9192_v40 = vld [vmem:[%s17654_s2 + $0x18] sm:$0xff]  ;;  %v13468_v19 = vpop.permute.xlu0 %6276 }
 0x184   : > { %v13434_v44 = vpop.f32.mrf.mxu0  ;;  %17819 = vst [vmem:[#allocation150_spill] sm:$0xff] %v13468_v19 }
 0x185   : > { %9619 = vperm.xlu1 %11500, %v9190_v48   ;;  %17813 = vst [vmem:[#allocation144_spill] sm:$0xff] %v13434_v44  ;;  %v1366_v49 = vpop.f32.mrf.mxu1  ;;  %v9191_v48 = vld [vmem:[%s17654_s2 + $0x10] sm:$0xff]  ;;  %v13461_v8 = vpop.permute.xlu1 %6281 }
 0x186   : > { %9614 = vperm.xlu0 %11499, %v9189_v18   ;;  %v13443_v3 = vpop.f32.mrf.mxu0  ;;  %2156 = vmatmul.mubr.bf16.gmra.mxu0 %v13290_v34  ;;  %v9194_v34 = vld [vmem:[%s17654_s2 + $0x28] sm:$0xff]  ;;  %17817 = vst [vmem:[#allocation148_spill] sm:$0xff] %v13461_v8  ;;  %v11651_v44 = vld [vmem:[#allocation6 + $0x124] ss:$12 sps:$4 sm:$0xff]  }
 0x187   : > { %17815 = vst [vmem:[#allocation146_spill] sm:$0xff] %v13443_v3  ;;  %v13449_v10 = vpop.f32.mrf.mxu1  ;;  %11118 = vmatmul.mubr.bf16.gmra.mxu1 %v13430_v20  ;;  %2165 = vmatprep.mubr.bf16.mxu0 %v17724_v15  ;;  %v11649_v3 = vld [vmem:[#allocation6 + $0x120] ss:$12 sps:$4 sm:$0xff]  }
 0x188   : > { %v13453_v49 = vpop.f32.mrf.mxu0  ;;  %11121 = vmatprep.mubr.bf16.mxu1 %v13436_v39  ;;  %4336 = vmatprep.subr.bf16.mxu1 %v11651_v44  ;;  %v13498_v44 = vpop.permute.xlu0 %6590 }
 0x189   : > { %9629 = vperm.xlu1 %11500, %v9192_v40   ;;  %17816 = vst [vmem:[#allocation147_spill] sm:$0xff] %v13453_v49  ;;  %v13456_v22 = vpop.f32.mrf.mxu1  ;;  %v9193_v40 = vld [vmem:[%s17654_s2 + $0x20] sm:$0xff]  ;;  %4337 = vmatpush1.bf16.msra.mxu1 %v11649_v3  ;;  %17824 = vst [vmem:[#allocation155_spill] sm:$0xff] %v13498_v44  ;;  %v9198_v3 = vld [vmem:[%s17654_s2 + $0x48] sm:$0xff] }
 0x18a   : > { %9624 = vperm.xlu0 %11499, %v9191_v48   ;;  %v13463_v18 = vpop.f32.mrf.mxu0  ;;  %v13472_v48 = vld [vmem:[#allocation2 + $0x88] sm:$0xff]   ;;  %4338 = vmatprep.subr.bf16.mxu1 %v11654_v61 }
 0x18b   : > { %17818 = vst [vmem:[#allocation149_spill] sm:$0xff] %v13463_v18  ;;  %v13470_v49 = vpop.f32.mrf.mxu1  ;;  %v9196_v18 = vld [vmem:[%s17654_s2 + $0x38] sm:$0xff] }
 0x18c   : > { %v13474_v63 = vpop.f32.mrf.mxu0 }
 0x18d   : > { %9639 = vperm.xlu1 %11500, %v9194_v34   ;;  %17820 = vst [vmem:[#allocation151_spill] sm:$0xff] %v13474_v63  ;;  %v13478_v8 = vpop.f32.mrf.mxu1  ;;  %v9195_v34 = vld [vmem:[%s17654_s2 + $0x30] sm:$0xff] }
 0x18e   : > { %9634 = vperm.xlu0 %11499, %v9193_v40   ;;  %v13483_v19 = vpop.f32.mrf.mxu0  ;;  %2166 = vmatmul.mubr.bf16.gmra.mxu0 %v13325_v16  ;;  %v13493_v40 = vpop.permute.xlu1 %6595 }
 0x18f   : > { %17821 = vst [vmem:[#allocation152_spill] sm:$0xff] %v13483_v19  ;;  %v13489_v63 = vpop.f32.mrf.mxu1  ;;  %11122 = vmatmul.mubr.bf16.gmra.mxu1 %v13472_v48  ;;  %2175 = vmatprep.mubr.bf16.mxu0 %v17724_v15  ;;  %17822 = vst [vmem:[#allocation153_spill] sm:$0xff] %v13493_v40  ;;  %v9197_v40 = vld [vmem:[%s17654_s2 + $0x40] sm:$0xff] }
 0x190   : > { %v13495_v5 = vpop.f32.mrf.mxu0  ;;  %11125 = vmatprep.mubr.bf16.mxu1 %v13476_v7 }
 0x191   : > { %9649 = vperm.xlu1 %11500, %v9196_v18   ;;  %17823 = vst [vmem:[#allocation154_spill] sm:$0xff] %v13495_v5  ;;  %v13500_v16 = vpop.f32.mrf.mxu1  ;;  %v13512_v5 = vld [vmem:[#allocation2 + $0x98] sm:$0xff]  }
 0x192   : > { %9644 = vperm.xlu0 %11499, %v9195_v34   ;;  %v13505_v19 = vpop.f32.mrf.mxu0  ;;  %v13516_v34 = vld [vmem:[#allocation2 + $0xa0] sm:$0xff]   ;;  %v13523_v42 = vpop.permute.xlu1 %6605 }
 0x193   : > { %17825 = vst [vmem:[#allocation156_spill] sm:$0xff] %v13505_v19  ;;  %v13510_v18 = vpop.f32.mrf.mxu1  ;;  %v9200_v19 = vld [vmem:[%s17654_s2 + $0x58] sm:$0xff]  ;;  %17827 = vst [vmem:[#allocation158_spill] sm:$0xff] %v13523_v42 }
 0x194   : > { %v13514_v24 = vpop.f32.mrf.mxu0 }
 0x195   : > { %9659 = vperm.xlu1 %11500, %v9198_v3   ;;  %17826 = vst [vmem:[#allocation157_spill] sm:$0xff] %v13514_v24  ;;  %v13518_v44 = vpop.f32.mrf.mxu1  ;;  %v9199_v3 = vld [vmem:[%s17654_s2 + $0x50] sm:$0xff] }
 0x196   : > { %9654 = vperm.xlu0 %11499, %v9197_v40   ;;  %v13525_v26 = vpop.f32.mrf.mxu0  ;;  %2176 = vmatmul.mubr.bf16.gmra.mxu0 %v13331_v37  ;;  %v11652_v24 = vld [vmem:[#allocation6 + $0x108] ss:$12 sps:$4 sm:$0xff]   ;;  %v13531_v40 = vpop.permute.xlu0 %6600 }
 0x197   : > { %17828 = vst [vmem:[#allocation159_spill] sm:$0xff] %v13525_v26  ;;  %17829 = vst [vmem:[#allocation160_spill] sm:$0xff] %v13531_v40  ;;  %v13533_v17 = vpop.f32.mrf.mxu1  ;;  %11126 = vmatmul.mubr.bf16.gmra.mxu1 %v13512_v5  ;;  %2185 = vmatprep.mubr.bf16.mxu0 %v17724_v15  ;;  %v9202_v26 = vld [vmem:[%s17654_s2 + $0x68] sm:$0xff] }
 0x198   : > { %v13537_v42 = vpop.f32.mrf.mxu0  ;;  %11129 = vmatprep.mubr.bf16.mxu1 %v13516_v34  ;;  %4339 = vmatpush1.bf16.msra.mxu1 %v11652_v24 }
 0x199   : > { %9669 = vperm.xlu1 %11500, %v9200_v19   ;;  %17830 = vst [vmem:[#allocation161_spill] sm:$0xff] %v13537_v42  ;;  %v13540_v37 = vpop.f32.mrf.mxu1  ;;  %v13552_v42 = vld [vmem:[#allocation2 + $0xa8] sm:$0xff]   ;;  %4340 = vmatprep.subr.bf16.mxu1 %v11658_v46 }
 0x19a   : > { %9664 = vperm.xlu0 %11499, %v9199_v3   ;;  %v13545_v40 = vpop.f32.mrf.mxu0  ;;  %v13554_v3 = vpop.permute.xlu1 %6291 }
 0x19b   : > { %17831 = vst [vmem:[#allocation162_spill] sm:$0xff] %v13545_v40  ;;  %v13550_v19 = vpop.f32.mrf.mxu1  ;;  %17832 = vst [vmem:[#allocation163_spill] sm:$0xff] %v13554_v3  ;;  %v13558_v47 = vpop.permute.xlu0 %6286  ;;  %v9204_v40 = vld [vmem:[%s17654_s2 + $0x78] sm:$0xff] }
 0x19c   : > { %v13556_v9 = vpop.f32.mrf.mxu0  ;;  %17834 = vst [vmem:[#allocation165_spill] sm:$0xff] %v13558_v47 }
 0x19d   : > { %9679 = vperm.xlu1 %11500, %v9202_v26   ;;  %17833 = vst [vmem:[#allocation164_spill] sm:$0xff] %v13556_v9  ;;  %v13560_v61 = vpop.f32.mrf.mxu1  ;;  %v9205_v9 = vld [vmem:[%s17654_s2 + $0x80] sm:$0xff] }
 0x19e   : > { %9674 = vperm.xlu0 %11499, %v9201_v51   ;;  %v13565_v24 = vpop.f32.mrf.mxu0  ;;  %2186 = vmatmul.mubr.bf16.gmra.mxu0 %v13364_v23  ;;  %v9206_v23 = vld [vmem:[%s17654_s2 + $0x88] sm:$0xff]  ;;  %v13583_v47 = vpop.permute.xlu1 %6301 }
 0x19f   : > { %17835 = vst [vmem:[#allocation166_spill] sm:$0xff] %v13565_v24  ;;  %v13571_v26 = vpop.f32.mrf.mxu1  ;;  %11130 = vmatmul.mubr.bf16.gmra.mxu1 %v13552_v42  ;;  %2195 = vmatprep.mubr.bf16.mxu0 %v17724_v15  ;;  %17837 = vst [vmem:[#allocation168_spill] sm:$0xff] %v13583_v47  ;;  %v9208_v47 = vld [vmem:[%s17654_s2 + $0x98] sm:$0xff] }
 0x1a0   : > { %v13575_v51 = vpop.f32.mrf.mxu0  ;;  %4362 = vmatprep.mubr.bf16.mxu1 %v17724_v15 }
 0x1a1   : > { %9689 = vperm.xlu1 %11500, %v9204_v40   ;;  %17836 = vst [vmem:[#allocation167_spill] sm:$0xff] %v13575_v51  ;;  %v13578_v3 = vpop.f32.mrf.mxu1  ;;  %v11656_v40 = vld [vmem:[#allocation6 + $0xf0] ss:$12 sps:$4 sm:$0xff]   ;;  %v13590_v51 = vpop.permute.xlu0 %6296 }
 0x1a2   : > { %9684 = vperm.xlu0 %11499, %v9203_v28   ;;  %v13585_v24 = vpop.f32.mrf.mxu0  ;;  %17839 = vst [vmem:[#allocation170_spill] sm:$0xff] %v13590_v51  ;;  %4341 = vmatpush1.bf16.msra.mxu1 %v11656_v40  ;;  %v9207_v51 = vld [vmem:[%s17654_s2 + $0x90] sm:$0xff]  ;;  %v13610_v46 = vpop.permute.xlu1 %6615 }
 0x1a3   : > { %17838 = vst [vmem:[#allocation169_spill] sm:$0xff] %v13585_v24  ;;  %v13592_v6 = vpop.f32.mrf.mxu1  ;;  %17842 = vst [vmem:[#allocation173_spill] sm:$0xff] %v13610_v46  ;;  %v11661_v46 = vld [vmem:[#allocation6 + $0xdc] ss:$12 sps:$4 sm:$0xff]  }
 0x1a4   : > { %v13594_v28 = vpop.f32.mrf.mxu0  ;;  %4342 = vmatprep.subr.bf16.mxu1 %v11661_v46  ;;  %v11665_v46 = vld [vmem:[#allocation6 + $0xc4] ss:$12 sps:$4 sm:$0xff]  }
 0x1a5   : > { %9699 = vperm.xlu1 %11500, %v9206_v23   ;;  %17840 = vst [vmem:[#allocation171_spill] sm:$0xff] %v13594_v28  ;;  %v13596_v58 = vpop.f32.mrf.mxu1  ;;  %v13614_v28 = vpop.permute.xlu0 %6610 }
 0x1a6   : > { %9694 = vperm.xlu0 %11499, %v9205_v9   ;;  %v13601_v24 = vpop.f32.mrf.mxu0  ;;  %2196 = vmatmul.mubr.bf16.gmra.mxu0 %v13368_v32  ;;  %17844 = vst [vmem:[#allocation175_spill] sm:$0xff] %v13614_v28  ;;  %v9210_v32 = vld [vmem:[%s17654_s2 + $0xa8] sm:$0xff]  ;;  %v9212_v28 = vld [vmem:[%s17654_s2 + $0xb8] sm:$0xff]  ;;  %v13635_v35 = vpop.permute.xlu1 %6625 }
 0x1a7   : > { %17841 = vst [vmem:[#allocation172_spill] sm:$0xff] %v13601_v24  ;;  %v13607_v23 = vpop.f32.mrf.mxu1  ;;  %2205 = vmatprep.mubr.bf16.mxu0 %v17724_v15  ;;  %17847 = vst [vmem:[#allocation178_spill] sm:$0xff] %v13635_v35 }
 0x1a8   : > { %v13612_v9 = vpop.f32.mrf.mxu0 }
 0x1a9   : > { %9709 = vperm.xlu1 %11500, %v9208_v47   ;;  %17843 = vst [vmem:[#allocation174_spill] sm:$0xff] %v13612_v9  ;;  %v13616_v40 = vpop.f32.mrf.mxu1  ;;  %v11659_v9 = vld [vmem:[#allocation6 + $0xd8] ss:$12 sps:$4 sm:$0xff]   ;;  %v13643_v56 = vpop.permute.xlu0 %6620 }
 0x1aa   : > { %9704 = vperm.xlu0 %11499, %v9207_v51   ;;  %v13621_v24 = vpop.f32.mrf.mxu0  ;;  %17849 = vst [vmem:[#allocation180_spill] sm:$0xff] %v13643_v56  ;;  %4343 = vmatpush1.bf16.msra.mxu1 %v11659_v9  ;;  %v11663_v56 = vld [vmem:[#allocation6 + $0xc0] ss:$12 sps:$4 sm:$0xff]  }
 0x1ab   : > { %17845 = vst [vmem:[#allocation176_spill] sm:$0xff] %v13621_v24  ;;  %v13626_v36 = vpop.f32.mrf.mxu1  ;;  %4344 = vmatprep.subr.bf16.mxu1 %v11665_v46 }
 0x1ac   : > { %v13628_v47 = vpop.f32.mrf.mxu0 }
 0x1ad   : > { %9719 = vperm.xlu1 %11500, %v9210_v32   ;;  %17846 = vst [vmem:[#allocation177_spill] sm:$0xff] %v13628_v47  ;;  %v13630_v51 = vpop.f32.mrf.mxu1  ;;  %v9211_v32 = vld [vmem:[%s17654_s2 + $0xb0] sm:$0xff] }
 0x1ae   : > { %9714 = vperm.xlu0 %11499, %v9209_v45   ;;  %v13637_v24 = vpop.f32.mrf.mxu0  ;;  %2206 = vmatmul.mubr.bf16.gmra.mxu0 %v13396_v29  ;;  %v11662_v47 = vld [vmem:[#allocation6 + $0x128] ss:$12 sps:$4 sm:$0xff]   ;;  %v12093_v45 = vmov 0.0|0.0  }
 0x1af   : > { %17848 = vst [vmem:[#allocation179_spill] sm:$0xff] %v13637_v24  ;;  %v10175_v53 = vcombine.low %v12093_v45, %v12093_v45  ;;  %v10176_v43 = vcombine.high %v12093_v45, %v12093_v45  ;;  %v13645_v0 = vpop.f32.mrf.mxu1  ;;  %2215 = vmatprep.mubr.bf16.mxu0 %v17724_v15  ;;  %11139 = vmatprep.subr.bf16.mxu0 %v11662_v47  ;;  %v9213_v45 = vld [vmem:[%s17654_s2 + $0xc0] sm:$0xff]  ;;  %v13666_v24 = vpop.permute.xlu0 %6306 }
 0x1b0   : > { %v13648_v35 = vpop.f32.mrf.mxu0  ;;  %11140 = vmatpush3.bf16.msra.mxu0 %v11662_v47  ;;  %4345 = vmatpush1.bf16.msra.mxu1 %v11663_v56  ;;  %17856 = vst [vmem:[#allocation187_spill] sm:$0xff] %v13666_v24  ;;  %v9218_v56 = vld [vmem:[%s17654_s2 + $0xe8] sm:$0xff]  ;;  %v11668_v24 = vld [vmem:[#allocation6 + $0xf8] ss:$12 sps:$4 sm:$0xff]  }
 0x1b1   : > { %9729 = vperm.xlu1 %11500, %v9212_v28   ;;  %17850 = vst [vmem:[#allocation181_spill] sm:$0xff] %v13648_v35  ;;  %3953 = vst [vmem:[#allocation3 + $0x8] sm:$0xf] %v10175_v53  ;;  %v13650_v29 = vpop.f32.mrf.mxu1  ;;  %v9214_v28 = vld [vmem:[%s17654_s2 + $0xc8] sm:$0xff] }
 0x1b2   : > { %3954 = vst [vmem:[#allocation3 + $0xc] sm:$0xf] %v10176_v43  ;;  %3951 = vst [vmem:[#allocation3] sm:$0xf] %v10175_v53  ;;  %9724 = vperm.xlu0 %11499, %v9211_v32   ;;  %v13655_v9 = vpop.f32.mrf.mxu0 }
 0x1b3   : > { %3952 = vst [vmem:[#allocation3 + $0x4] sm:$0xf] %v10176_v43  ;;  %3987 = vst [vmem:[#allocation3 + $0x90] sm:$0xf] %v10175_v53  ;;  %v13660_v35 = vpop.f32.mrf.mxu1 }
 0x1b4   : > { %3988 = vst [vmem:[#allocation3 + $0x94] sm:$0xf] %v10176_v43  ;;  %3989 = vst [vmem:[#allocation3 + $0x98] sm:$0xf] %v10175_v53  ;;  %v13664_v32 = vpop.f32.mrf.mxu0 }
 0x1b5   : > { %3990 = vst [vmem:[#allocation3 + $0x9c] sm:$0xf] %v10176_v43  ;;  %7217 = vst [vmem:[#allocation4] sm:$0xf] %v10175_v53  ;;  %9739 = vperm.xlu1 %11500, %v9214_v28   ;;  %v13668_v47 = vpop.f32.mrf.mxu1  ;;  %v9215_v28 = vld [vmem:[%s17654_s2 + $0xd0] sm:$0xff] }
 0x1b6   : > { %7218 = vst [vmem:[#allocation4 + $0x4] sm:$0xf] %v10176_v43  ;;  %7251 = vst [vmem:[#allocation4 + $0x88] sm:$0xf] %v10175_v53  ;;  %v11666_v53 = vld [vmem:[#allocation6 + $0x110] ss:$12 sps:$4 sm:$0xff]   ;;  %9734 = vperm.xlu0 %11499, %v9213_v45   ;;  %2216 = vmatmul.mubr.bf16.gmra.mxu0 %v13400_v13 }
 0x1b7   : > { %7252 = vst [vmem:[#allocation4 + $0x8c] sm:$0xf] %v10176_v43  ;;  %17851 = vst [vmem:[#allocation182_spill] sm:$0xff] %v13650_v29  ;;  %v13662_v43 = vpop.permute.xlu1 %6311  ;;  %11141 = vmatprep.subr.bf16.mxu0 %v11666_v53  ;;  %v970_v29 = vpop.f32.mrf.mxu0  ;;  %2225 = vmatprep.mubr.bf16.mxu0 %v17724_v15  ;;  %v9217_v13 = vld [vmem:[%s17654_s2 + $0xe0] sm:$0xff] }
 0x1b8   : > { %17852 = vst [vmem:[#allocation183_spill] sm:$0xff] %v13655_v9  ;;  %17853 = vst [vmem:[#allocation184_spill] sm:$0xff] %v13660_v35  ;;  %v9216_v9 = vld [vmem:[%s17654_s2 + $0xd8] sm:$0xff]  ;;  %v13677_v46 = vpop.f32.mrf.mxu1  ;;  %11142 = vmatpush3.bf16.msra.mxu0 %v11666_v53  ;;  %v13694_v53 = vpop.permute.xlu0 %6316 }
 0x1b9   : > { %17854 = vst [vmem:[#allocation185_spill] sm:$0xff] %v13662_v43  ;;  %17855 = vst [vmem:[#allocation186_spill] sm:$0xff] %v13664_v32  ;;  %v13683_v45 = vld [vmem:[#allocation3 + $0x8] sm:$0xff]   ;;  %9749 = vperm.xlu1 %11500, %v9216_v9   ;;  %v972_v43 = vpop.f32.mrf.mxu0  ;;  %11143 = vmatprep.subr.bf16.mxu0 %v11668_v24 }
 0x1ba   : > { %17857 = vst [vmem:[#allocation188_spill] sm:$0xff] %v13668_v47  ;;  %17858 = vst [vmem:[#allocation189_spill] sm:$0xff] %v13677_v46  ;;  %9744 = vperm.xlu0 %11499, %v9215_v28   ;;  %v13688_v29 = vpop.f32.mrf.mxu1  ;;  %4363 = vmatmul.mubr.bf16.vlgmr.msra.gmra.mxu1 %v13683_v45  ;;  %v9220_v28 = vld [vmem:[%s17654_s2 + $0xf8] sm:$0xff] }
 0x1bb   : > { %17859 = vst [vmem:[#allocation190_spill] sm:$0xff] %v13688_v29  ;;  %v13691_v32 = vpop.permute.xlu1 %6321  ;;  %v974_v46 = vpop.f32.mrf.mxu0  ;;  %4372 = vmatprep.mubr.bf16.mxu1 %v17724_v15  ;;  %17861 = vst [vmem:[#allocation192_spill] sm:$0xff] %v13694_v53  ;;  %v11669_v29 = vld [vmem:[#allocation6 + $0xe0] ss:$12 sps:$4 sm:$0xff]  }
 0x1bc   : > { %17860 = vst [vmem:[#allocation191_spill] sm:$0xff] %v13691_v32  ;;  %v13696_v47 = vpop.f32.mrf.mxu1  ;;  %11144 = vmatpush3.bf16.msra.mxu0 %v11668_v24  ;;  %v9219_v46 = vld [vmem:[%s17654_s2 + $0xf0] sm:$0xff] }
 0x1bd   : > { %17862 = vst [vmem:[#allocation193_spill] sm:$0xff] %v13696_v47  ;;  %9759 = vperm.xlu1 %11500, %v9218_v56   ;;  %v976_v9 = vpop.f32.mrf.mxu0  ;;  %11145 = vmatprep.subr.bf16.mxu0 %v11669_v29 }
 0x1be   : > { %9754 = vperm.xlu0 %11499, %v9217_v13   ;;  %v13698_v43 = vpop.f32.mrf.mxu1  ;;  %2226 = vmatmul.mubr.bf16.gmra.mxu0 %v13430_v20  ;;  %v13712_v13 = vpop.permute.xlu0 %6630  ;;  %v11673_v20 = vld [vmem:[#allocation6 + $0xc8] ss:$12 sps:$4 sm:$0xff]  }
 0x1bf   : > { %17863 = vst [vmem:[#allocation194_spill] sm:$0xff] %v13698_v43  ;;  %v980_v32 = vpop.f32.mrf.mxu0  ;;  %2235 = vmatprep.mubr.bf16.mxu0 %v17724_v15  ;;  %v13710_v24 = vpop.permute.xlu1 %6635  ;;  %17866 = vst [vmem:[#allocation197_spill] sm:$0xff] %v13712_v13  ;;  %v11670_v13 = vld [vmem:[#allocation6 + $0xa8] ss:$12 sps:$4 sm:$0xff]  }
 0x1c0   : > { %v13707_v53 = vpop.f32.mrf.mxu1  ;;  %17865 = vst [vmem:[#allocation196_spill] sm:$0xff] %v13710_v24  ;;  %11146 = vmatpush3.bf16.msra.mxu0 %v11669_v29 }
 0x1c1   : > { %17864 = vst [vmem:[#allocation195_spill] sm:$0xff] %v13707_v53  ;;  %9769 = vperm.xlu1 %11500, %v9220_v28   ;;  %v982_v56 = vpop.f32.mrf.mxu0  ;;  %11147 = vmatprep.subr.bf16.mxu0 %v11673_v20 }
 0x1c2   : > { %9764 = vperm.xlu0 %11499, %v9219_v46   ;;  %v13714_v32 = vpop.f32.mrf.mxu1 }
 0x1c3   : > { %v984_v9 = vpop.f32.mrf.mxu0 }
 0x1c4   : > { %v13716_v43 = vpop.f32.mrf.mxu1  ;;  %11148 = vmatpush3.bf16.msra.mxu0 %v11673_v20 }
 0x1c5   : > { %17867 = vst [vmem:[#allocation198_spill] sm:$0xff] %v13716_v43  ;;  %v986_v47 = vpop.f32.mrf.mxu0  ;;  %v11672_v43 = vld [vmem:[#allocation6 + $0xac] ss:$12 sps:$4 sm:$0xff]  }
 0x1c6   : > { %v13718_v53 = vpop.f32.mrf.mxu1  ;;  %2236 = vmatmul.mubr.bf16.gmra.mxu0 %v13436_v39  ;;  %4854 = vmatprep.subr.bf16.mxu1 %v11672_v43 }
 0x1c7   : > { %17868 = vst [vmem:[#allocation199_spill] sm:$0xff] %v13718_v53  ;;  %v11039_v35 = vpop.f32.mrf.mxu0  ;;  %2245 = vmatprep.mubr.bf16.mxu0 %v17724_v15  ;;  %4855 = vmatpush1.bf16.msra.mxu1 %v11670_v13 }
 0x1c8   : > { %v13721_v28 = vpop.f32.mrf.mxu1 }
 0x1c9   : > { %17869 = vst [vmem:[#allocation200_spill] sm:$0xff] %v13721_v28  ;;  %v1583_v29 = vpop.f32.mrf.mxu0 }
 0x1ca   : > { %v13724_v46 = vpop.f32.mrf.mxu1 }
 0x1cb   : > { %17870 = vst [vmem:[#allocation201_spill] sm:$0xff] %v13724_v46  ;;  %v11040_v56 = vpop.f32.mrf.mxu0 }
 0x1cc   : > { %v13726_v24 = vpop.f32.mrf.mxu1 }
 0x1cd   : > { %17871 = vst [vmem:[#allocation202_spill] sm:$0xff] %v13726_v24  ;;  %v1586_v9 = vpop.f32.mrf.mxu0 }
 0x1ce   : > { %v13728_v47 = vpop.f32.mrf.mxu1  ;;  %2246 = vmatmul.mubr.bf16.gmra.mxu0 %v13472_v48 }
 0x1cf   : > { %17872 = vst [vmem:[#allocation203_spill] sm:$0xff] %v13728_v47  ;;  %v13730_v20 = vpop.f32.mrf.mxu0  ;;  %2255 = vmatprep.mubr.bf16.mxu0 %v17724_v15 }
 0x1d0   : > { %v13733_v35 = vpop.f32.mrf.mxu1 }
 0x1d1   : > { %17873 = vst [vmem:[#allocation204_spill] sm:$0xff] %v13733_v35  ;;  %v13736_v39 = vpop.f32.mrf.mxu0 }
 0x1d2   : > { %v13738_v29 = vpop.f32.mrf.mxu1 }
 0x1d3   : > { %17874 = vst [vmem:[#allocation205_spill] sm:$0xff] %v13738_v29  ;;  %v13740_v56 = vpop.f32.mrf.mxu0 }
 0x1d4   : > { %v13742_v9 = vpop.f32.mrf.mxu1 }
 0x1d5   : > { %17875 = vst [vmem:[#allocation206_spill] sm:$0xff] %v13742_v9  ;;  %v13744_v24 = vpop.f32.mrf.mxu0 }
 0x1d6   : > { %17876 = vst [vmem:[#allocation207_spill] sm:$0xff] %v13744_v24  ;;  %v13746_v47 = vpop.f32.mrf.mxu1  ;;  %2256 = vmatmul.mubr.bf16.gmra.mxu0 %v13476_v7  ;;  %v11676_v7 = vld [vmem:[#allocation6 + $0x90] ss:$12 sps:$4 sm:$0xff]  }
 0x1d7   : > { %17877 = vst [vmem:[#allocation208_spill] sm:$0xff] %v13746_v47  ;;  %v13748_v46 = vpop.f32.mrf.mxu0  ;;  %2265 = vmatprep.mubr.bf16.mxu0 %v17724_v15 }
 0x1d8   : > { %17878 = vst [vmem:[#allocation209_spill] sm:$0xff] %v13748_v46  ;;  %v13751_v48 = vpop.f32.mrf.mxu1 }
 0x1d9   : > { %17879 = vst [vmem:[#allocation210_spill] sm:$0xff] %v13751_v48  ;;  %v13754_v43 = vpop.f32.mrf.mxu0  ;;  %v11678_v48 = vld [vmem:[#allocation6 + $0x94] ss:$12 sps:$4 sm:$0xff]  }
 0x1da   : > { %17880 = vst [vmem:[#allocation211_spill] sm:$0xff] %v13754_v43  ;;  %v13756_v13 = vpop.f32.mrf.mxu1  ;;  %4856 = vmatprep.subr.bf16.mxu1 %v11678_v48 }
 0x1db   : > { %17881 = vst [vmem:[#allocation212_spill] sm:$0xff] %v13756_v13  ;;  %v13758_v29 = vpop.f32.mrf.mxu0  ;;  %4857 = vmatpush1.bf16.msra.mxu1 %v11676_v7 }
 0x1dc   : > { %17882 = vst [vmem:[#allocation213_spill] sm:$0xff] %v13758_v29  ;;  %v13760_v35 = vpop.f32.mrf.mxu1  ;;  %v11692_v29 = vld [vmem:[#allocation6 + $0x48] ss:$12 sps:$4 sm:$0xff]  }
 0x1dd   : > { %17883 = vst [vmem:[#allocation214_spill] sm:$0xff] %v13760_v35  ;;  %v13762_v9 = vpop.f32.mrf.mxu0 }
 0x1de   : > { %17884 = vst [vmem:[#allocation215_spill] sm:$0xff] %v13762_v9  ;;  %v13764_v28 = vpop.f32.mrf.mxu1  ;;  %2266 = vmatmul.mubr.bf16.gmra.mxu0 %v13512_v5 }
 0x1df   : > { %17885 = vst [vmem:[#allocation216_spill] sm:$0xff] %v13764_v28  ;;  %v13766_v47 = vpop.f32.mrf.mxu0  ;;  %2275 = vmatprep.mubr.bf16.mxu0 %v17724_v15 }
 0x1e0   : > { %17886 = vst [vmem:[#allocation217_spill] sm:$0xff] %v13766_v47  ;;  %v13769_v46 = vpop.f32.mrf.mxu1 }
 0x1e1   : > { %17887 = vst [vmem:[#allocation218_spill] sm:$0xff] %v13769_v46  ;;  %v13772_v43 = vpop.f32.mrf.mxu0 }
 0x1e2   : > { %17888 = vst [vmem:[#allocation219_spill] sm:$0xff] %v13772_v43  ;;  %v13774_v13 = vpop.f32.mrf.mxu1 }
 0x1e3   : > { %17889 = vst [vmem:[#allocation220_spill] sm:$0xff] %v13774_v13  ;;  %v13776_v35 = vpop.f32.mrf.mxu0 }
 0x1e4   : > { %17890 = vst [vmem:[#allocation221_spill] sm:$0xff] %v13776_v35  ;;  %v13778_v9 = vpop.f32.mrf.mxu1 }
 0x1e5   : > { %17891 = vst [vmem:[#allocation222_spill] sm:$0xff] %v13778_v9  ;;  %v13780_v28 = vpop.f32.mrf.mxu0 }
 0x1e6   : > { %17892 = vst [vmem:[#allocation223_spill] sm:$0xff] %v13780_v28  ;;  %v13782_v47 = vpop.f32.mrf.mxu1  ;;  %2276 = vmatmul.mubr.bf16.gmra.mxu0 %v13516_v34 }
 0x1e7   : > { %17893 = vst [vmem:[#allocation224_spill] sm:$0xff] %v13782_v47  ;;  %v13784_v5 = vpop.f32.mrf.mxu0  ;;  %2285 = vmatprep.mubr.bf16.mxu0 %v17724_v15  ;;  %v11683_v15 = vld [vmem:[#allocation6 + $0x7c] ss:$12 sps:$4 sm:$0xff]  }
 0x1e8   : > { %17894 = vst [vmem:[#allocation225_spill] sm:$0xff] %v13784_v5  ;;  %v13787_v46 = vpop.f32.mrf.mxu1  ;;  %4858 = vmatprep.subr.bf16.mxu1 %v11683_v15 }
 0x1e9   : > { %17895 = vst [vmem:[#allocation226_spill] sm:$0xff] %v13787_v46  ;;  %v13790_v48 = vpop.f32.mrf.mxu0  ;;  %v11681_v46 = vld [vmem:[#allocation6 + $0x78] ss:$12 sps:$4 sm:$0xff]  }
 0x1ea   : > { %17896 = vst [vmem:[#allocation227_spill] sm:$0xff] %v13790_v48  ;;  %v13792_v13 = vpop.f32.mrf.mxu1  ;;  %4859 = vmatpush1.bf16.msra.mxu1 %v11681_v46  ;;  %v11688_v46 = vld [vmem:[#allocation6 + $0x64] ss:$12 sps:$4 sm:$0xff]  }
 0x1eb   : > { %17897 = vst [vmem:[#allocation228_spill] sm:$0xff] %v13792_v13  ;;  %v13794_v7 = vpop.f32.mrf.mxu0  ;;  %4860 = vmatprep.subr.bf16.mxu1 %v11688_v46 }
 0x1ec   : > { %17898 = vst [vmem:[#allocation229_spill] sm:$0xff] %v13794_v7  ;;  %v13796_v35 = vpop.f32.mrf.mxu1 }
 0x1ed   : > { %17899 = vst [vmem:[#allocation230_spill] sm:$0xff] %v13796_v35  ;;  %v13798_v9 = vpop.f32.mrf.mxu0 }
 0x1ee   : > { %17900 = vst [vmem:[#allocation231_spill] sm:$0xff] %v13798_v9  ;;  %v13800_v28 = vpop.f32.mrf.mxu1  ;;  %2286 = vmatmul.mubr.bf16.gmra.mxu0 %v13552_v42 }
 0x1ef   : > { %17901 = vst [vmem:[#allocation232_spill] sm:$0xff] %v13800_v28  ;;  %v13802_v47 = vpop.f32.mrf.mxu0  ;;  %11149 = vmatprep.mubr.bf16.mxu0 %v13683_v45 }
 0x1f0   : > { %17902 = vst [vmem:[#allocation233_spill] sm:$0xff] %v13802_v47  ;;  %v13805_v34 = vpop.f32.mrf.mxu1 }
 0x1f1   : > { %17903 = vst [vmem:[#allocation234_spill] sm:$0xff] %v13805_v34  ;;  %v13808_v48 = vpop.f32.mrf.mxu0 }
 0x1f2   : > { %17904 = vst [vmem:[#allocation235_spill] sm:$0xff] %v13808_v48  ;;  %v13810_v13 = vpop.f32.mrf.mxu1 }
 0x1f3   : > { %17905 = vst [vmem:[#allocation236_spill] sm:$0xff] %v13810_v13  ;;  %v13812_v35 = vpop.f32.mrf.mxu0  ;;  %v11686_v13 = vld [vmem:[#allocation6 + $0x60] ss:$12 sps:$4 sm:$0xff]  }
 0x1f4   : > { %17906 = vst [vmem:[#allocation237_spill] sm:$0xff] %v13812_v35  ;;  %v13814_v9 = vpop.f32.mrf.mxu1  ;;  %4861 = vmatpush1.bf16.msra.mxu1 %v11686_v13 }
 0x1f5   : > { %17907 = vst [vmem:[#allocation238_spill] sm:$0xff] %v13814_v9  ;;  %v13816_v28 = vpop.f32.mrf.mxu0 }
 0x1f6   : > { %17908 = vst [vmem:[#allocation239_spill] sm:$0xff] %v13816_v28  ;;  %v13818_v47 = vpop.f32.mrf.mxu1 }
 0x1f7   : > { %17909 = vst [vmem:[#allocation240_spill] sm:$0xff] %v13818_v47  ;;  %v13820_v42 = vpop.f32.mrf.mxu0 }
 0x1f8   : > { %17910 = vst [vmem:[#allocation241_spill] sm:$0xff] %v13820_v42  ;;  %v13822_v34 = vpop.f32.mrf.mxu1 }
 0x1f9   : > { %17911 = vst [vmem:[#allocation242_spill] sm:$0xff] %v13822_v34  ;;  %v13824_v45 = vpop.f32.mrf.mxu0 }
 0x1fa   : > { %17912 = vst [vmem:[#allocation243_spill] sm:$0xff] %v13824_v45  ;;  %v13826_v7 = vpop.f32.mrf.mxu1 }
 0x1fb   : > { %17913 = vst [vmem:[#allocation244_spill] sm:$0xff] %v13826_v7  ;;  %v13828_v48 = vpop.f32.mrf.mxu0 }
 0x1fc   : > { %17914 = vst [vmem:[#allocation245_spill] sm:$0xff] %v13828_v48  ;;  %v13830_v15 = vpop.f32.mrf.mxu1 }
 0x1fd   : > { %17915 = vst [vmem:[#allocation246_spill] sm:$0xff] %v13830_v15  ;;  %v13832_v35 = vpop.f32.mrf.mxu0 }
 0x1fe   : > { %17916 = vst [vmem:[#allocation247_spill] sm:$0xff] %v13832_v35  ;;  %v13834_v9 = vpop.f32.mrf.mxu1 }
 0x1ff   : > { %17917 = vst [vmem:[#allocation248_spill] sm:$0xff] %v13834_v9  ;;  %v13836_v47 = vpop.f32.mrf.mxu0 }
 0x200   : > { %17918 = vst [vmem:[#allocation249_spill] sm:$0xff] %v13836_v47  ;;  %v13838_v28 = vpop.f32.mrf.mxu1 }
 0x201   : > { %17919 = vst [vmem:[#allocation250_spill] sm:$0xff] %v13838_v28  ;;  %v13840_v34 = vpop.f32.mrf.mxu0 }
 0x202   : > { %17920 = vst [vmem:[#allocation251_spill] sm:$0xff] %v13840_v34  ;;  %v13842_v45 = vpop.f32.mrf.mxu1 }
 0x203   : > { %17921 = vst [vmem:[#allocation252_spill] sm:$0xff] %v13842_v45  ;;  %v13844_v7 = vpop.f32.mrf.mxu0 }
 0x204   : > { %17922 = vst [vmem:[#allocation253_spill] sm:$0xff] %v13844_v7  ;;  %v13846_v48 = vpop.f32.mrf.mxu1 }
 0x205   : > { %17923 = vst [vmem:[#allocation254_spill] sm:$0xff] %v13846_v48  ;;  %v13848_v15 = vpop.f32.mrf.mxu0 }
 0x206   : > { %17924 = vst [vmem:[#allocation255_spill] sm:$0xff] %v13848_v15  ;;  %v13850_v42 = vpop.f32.mrf.mxu1 }
 0x207   : > { %17925 = vst [vmem:[#allocation256_spill] sm:$0xff] %v13850_v42  ;;  %v13852_v35 = vpop.f32.mrf.mxu0  ;;  %v11694_v42 = vld [vmem:[#allocation6 + $0x4c] ss:$12 sps:$4 sm:$0xff]  }
 0x208   : > { %17926 = vst [vmem:[#allocation257_spill] sm:$0xff] %v13852_v35  ;;  %v1530_v46 = vpop.f32.mrf.mxu1  ;;  %4862 = vmatprep.subr.bf16.mxu1 %v11694_v42  ;;  %v17942_v42 = vld [vmem:[#allocation117_spill] sm:$0xff] }
 0x209   : > { %v13854_v9 = vpop.f32.mrf.mxu0  ;;  %4863 = vmatpush1.bf16.msra.mxu1 %v11692_v29 }
 0x20a   : > { %17927 = vst [vmem:[#allocation258_spill] sm:$0xff] %v13854_v9  ;;  %v1532_v13 = vpop.f32.mrf.mxu1 }
 0x20b   : > { %v13856_v47 = vpop.f32.mrf.mxu0 }
 0x20c   : > { %17928 = vst [vmem:[#allocation259_spill] sm:$0xff] %v13856_v47  ;;  %v1534_v28 = vpop.f32.mrf.mxu1  ;;  %v2776_v47 = vlaneseq }
 0x20d   : > { %v13858_v34 = vpop.f32.mrf.mxu0 }
 0x20e   : > { %17929 = vst [vmem:[#allocation260_spill] sm:$0xff] %v13858_v34  ;;  %v1536_v45 = vpop.f32.mrf.mxu1 }
 0x20f   : > { %v11075_v5 = vpop.f32.mrf.mxu0  ;;  %v13864_v45 = vld [vmem:[#allocation6 + $0xb0] ss:$12 sps:$4 sm:$0xff]  }
 0x210   : > { %v1540_v7 = vpop.f32.mrf.mxu1  ;;  %v1365_v5 = vadd.f32 %v13428_v33, %v13089_v54  ;;  %v13882_v54 = vadd.f32 %v13478_v8, %v13119_v1  ;;  %v13886_v33 = vadd.f32 %v13489_v63, %v13126_v52  ;;  %11185 = vmatprep.subr.bf16.mxu0 %v13864_v45  ;;  %v13903_v1 = vadd.f32 %v13533_v17, %v13155_v50  ;;  %v17933_v8 = vld [vmem:[#allocation182_spill] sm:$0xff] }
 0x211   : > { %v13860_v43 = vpop.f32.mrf.mxu0  ;;  %v13907_v52 = vadd.f32 %v13540_v37, %v13162_v38  ;;  %v13923_v50 = vadd.f32 %v13578_v3, %v13199_v21  ;;  %v13927_v17 = vadd.f32 %v13592_v6, %v13206_v25  ;;  %v13944_v25 = vadd.f32 %v13626_v36, %v13241_v57  ;;  %v17931_v6 = vld [vmem:[#allocation103_spill] sm:$0xff]  ;;  %v17934_v36 = vld [vmem:[#allocation109_spill] sm:$0xff]  ;;  %v17935_v57 = vld [vmem:[#allocation184_spill] sm:$0xff] }
 0x212   : > { %v1542_v48 = vpop.f32.mrf.mxu1  ;;  %v13948_v21 = vadd.f32 %v13630_v51, %v13250_v14  ;;  %v17936_v14 = vld [vmem:[#allocation111_spill] sm:$0xff]  ;;  %v17938_v3 = vld [vmem:[#allocation114_spill] sm:$0xff] }
 0x213   : > { %v11076_v15 = vpop.f32.mrf.mxu0  ;;  %v13868_v48 = vadd.f32 %v13449_v10, %v13099_v59  ;;  %v13890_v59 = vadd.f32 %v13500_v16, %v13131_v62  ;;  %v13899_v10 = vadd.f32 %v13518_v44, %v13151_v11  ;;  %v13911_v62 = vadd.f32 %v13550_v19, %v13173_v12 }
 0x214   : > { %v1544_v53 = vpop.f32.mrf.mxu1  ;;  %v13919_v11 = vadd.f32 %v13571_v26, %v13189_v30  ;;  %v13931_v12 = vadd.f32 %v13596_v58, %v13215_v27  ;;  %v13939_v30 = vadd.f32 %v13616_v40, %v13232_v60  ;;  %v17930_v27 = vld [vmem:[#allocation63_spill] sm:$0xff]  ;;  %v13955_v60 = vadd.f32 %v13645_v0, %v17931_v6  ;;  %v17943_v15 = vld [vmem:[#allocation190_spill] sm:$0xff]  ;;  %v17954_v6 = vld [vmem:[#allocation68_spill] sm:$0xff] }
 0x215   : > { %v1730_v35 = vpop.f32.mrf.mxu0  ;;  %v13872_v53 = vadd.f32 %v13456_v22, %v13106_v2  ;;  %v13894_v2 = vadd.f32 %v13510_v18, %v13142_v31  ;;  %v13915_v31 = vadd.f32 %v13560_v61, %v13180_v4  ;;  %v13935_v4 = vadd.f32 %v13607_v23, %v13224_v55  ;;  %v17932_v22 = vld [vmem:[#allocation106_spill] sm:$0xff]  ;;  %v17937_v18 = vld [vmem:[#allocation188_spill] sm:$0xff]  ;;  %v17939_v61 = vld [vmem:[#allocation189_spill] sm:$0xff] }
 0x216   : > { %v1546_v46 = vpop.f32.mrf.mxu1  ;;  %v13876_v35 = vadd.f32 %v13470_v49, %v13112_v41  ;;  %v1608_v58 = vadd.f32 %v13730_v20, %v17930_v27  ;;  %v13959_v44 = vadd.f32 %v17933_v8, %v17932_v22  ;;  %v13963_v16 = vadd.f32 %v17935_v57, %v17934_v36  ;;  %v17940_v23 = vld [vmem:[#allocation66_spill] sm:$0xff]  ;;  %v17941_v40 = vld [vmem:[#allocation67_spill] sm:$0xff] }
 0x217   : > { %v2097_v13 = vpop.f32.mrf.mxu0  ;;  %v13967_v37 = vadd.f32 %v17937_v18, %v17936_v14  ;;  %v13971_v26 = vadd.f32 %v17939_v61, %v17938_v3  ;;  %v1600_v0 = vadd.f32 %v13736_v39, %v17940_v23  ;;  %v1611_v51 = vadd.f32 %v13740_v56, %v17941_v40  ;;  %v17950_v39 = vld [vmem:[#allocation195_spill] sm:$0xff]  ;;  %v17956_v18 = vld [vmem:[#allocation129_spill] sm:$0xff]  ;;  %v17957_v3 = vld [vmem:[#allocation198_spill] sm:$0xff] }
 0x218   : > { %v11095_v9 = vpop.f32.mrf.mxu1  ;;  %v13979_v46 = vadd.f32 %v17943_v15, %v17942_v42  ;;  %v17944_v13 = vld [vmem:[#allocation119_spill] sm:$0xff]  ;;  %v14001_v61 = vadd.f32 %v17957_v3, %v17956_v18  ;;  %v17962_v15 = vld [vmem:[#allocation132_spill] sm:$0xff] }
 0x219   : > { %v2099_v28 = vpop.f32.mrf.mxu0  ;;  %v11699_v9 = vld [vmem:[#allocation6 + $0x30] ss:$12 sps:$4 sm:$0xff]   ;;  %v17955_v22 = vld [vmem:[#allocation207_spill] sm:$0xff] }
 0x21a   : > { %v2330_v24 = vpop.f32.mrf.mxu1  ;;  %v17945_v28 = vld [vmem:[#allocation193_spill] sm:$0xff]  ;;  %v1603_v8 = vadd.f32 %v17955_v22, %v17954_v6  ;;  %17958 = vst [vmem:[#allocation182_spill] sm:$0xff] %v14001_v61  ;;  %v17959_v23 = vld [vmem:[#allocation131_spill] sm:$0xff]  ;;  %v17969_v6 = vld [vmem:[#allocation202_spill] sm:$0xff] }
 0x21b   : > { %v2101_v7 = vpop.f32.mrf.mxu0  ;;  %v13878_v24 = vshrl.u32 %v2776_v47, 7  ;;  %v17960_v40 = vld [vmem:[#allocation199_spill] sm:$0xff] }
 0x21c   : > { %v11096_v29 = vpop.f32.mrf.mxu1  ;;  %v13983_v7 = vadd.f32 %v17945_v28, %v17944_v13  ;;  %v14005_v42 = vadd.f32 %v17960_v40, %v17959_v23  ;;  %v17963_v13 = vld [vmem:[#allocation200_spill] sm:$0xff]  ;;  %v17972_v18 = vld [vmem:[#allocation203_spill] sm:$0xff] }
 0x21d   : > { %v2103_v41 = vpop.f32.mrf.mxu0  ;;  %vm3139_vm0 = vcmp.lt.s32.totalorder %v13878_v24, 7  ;;  %vm2778_vm1 = vcmp.lt.s32.totalorder %v13878_v24, 1  ;;  %v17946_v29 = vld [vmem:[#allocation122_spill] sm:$0xff]  ;;  %v14009_v28 = vadd.f32 %v17963_v13, %v17962_v15  ;;  %v17976_v15 = vld [vmem:[#allocation72_spill] sm:$0xff] }
 0x21e   : > { %v2333_v63 = vpop.f32.mrf.mxu1  ;;  %v17947_v41 = vld [vmem:[#allocation194_spill] sm:$0xff]  ;;  %17961 = vst [vmem:[#allocation109_spill] sm:$0xff] %v14005_v42 }
 0x21f   : > { %v2107_v38 = vpop.f32.mrf.mxu0  ;;  %v13987_v63 = vadd.f32 %v17947_v41, %v17946_v29  ;;  %17964 = vst [vmem:[#allocation184_spill] sm:$0xff] %v14009_v28  ;;  %v17965_v41 = vld [vmem:[#allocation134_spill] sm:$0xff] }
 0x220   : > { %v11099_v49 = vpop.f32.mrf.mxu1  ;;  %v17949_v38 = vld [vmem:[#allocation125_spill] sm:$0xff] }
 0x221   : > { %v2109_v55 = vpop.f32.mrf.mxu0  ;;  %v2509_v47 = vadd.f32 %v11099_v49, %v1608_v58  ;;  %17948 = vst [vmem:[#allocation63_spill] sm:$0xff] %v13987_v63  ;;  %v13991_v27 = vadd.f32 %v17950_v39, %v17949_v38  ;;  %v11701_v49 = vld [vmem:[#allocation6 + $0x34] ss:$12 sps:$4 sm:$0xff]   ;;  %v17952_v58 = vld [vmem:[#allocation126_spill] sm:$0xff] }
 0x222   : > { %v2346_v19 = vpop.f32.mrf.mxu1  ;;  %v13995_v55 = vadd.f32 %v13714_v32, %v17952_v58  ;;  %4864 = vmatprep.subr.bf16.mxu1 %v11701_v49  ;;  %v17966_v38 = vld [vmem:[#allocation201_spill] sm:$0xff]  ;;  %v17968_v58 = vld [vmem:[#allocation136_spill] sm:$0xff] }
 0x223   : > { %v2111_v20 = vpop.f32.mrf.mxu0  ;;  %17951 = vst [vmem:[#allocation103_spill] sm:$0xff] %v13991_v27  ;;  %v2503_v36 = vadd.f32 %v2346_v19, %v1600_v0  ;;  %v14013_v19 = vadd.f32 %v17966_v38, %v17965_v41  ;;  %v3105_v0 = vrot.slane %v2509_v47, 1  ;;  %4865 = vmatpush1.bf16.msra.mxu1 %v11699_v9  ;;  %v14017_v22 = vadd.f32 %v17969_v6, %v17968_v58  ;;  %v17977_v47 = vld [vmem:[#allocation211_spill] sm:$0xff] }
 0x224   : > { %v11100_v56 = vpop.f32.mrf.mxu1  ;;  %17953 = vst [vmem:[#allocation106_spill] sm:$0xff] %v13995_v55  ;;  %v2498_v32 = vadd.f32 %v2111_v20, %v1365_v5  ;;  %v17974_v5 = vld [vmem:[#allocation71_spill] sm:$0xff]  ;;  %v17975_v20 = vld [vmem:[#allocation209_spill] sm:$0xff] }
 0x225   : > { %v2512_v57 = vadd.f32 %v11100_v56, %v1611_v51  ;;  %v2113_v14 = vpop.f32.mrf.mxu0  ;;  %17967 = vst [vmem:[#allocation111_spill] sm:$0xff] %v14013_v19  ;;  %17970 = vst [vmem:[#allocation188_spill] sm:$0xff] %v14017_v22  ;;  %v1624_v49 = vadd.f32 %v17975_v20, %v17974_v5  ;;  %v14033_v41 = vld [vmem:[%s17656_s4] ss:$0 sm:$0xff] }
 0x226   : > { %v2349_v29 = vpop.f32.mrf.mxu1  ;;  %v17971_v14 = vld [vmem:[#allocation137_spill] sm:$0xff]  ;;  %v2739_v38 = vrot.slane %v2498_v32, 7  ;;  %v17981_v32 = vld [vmem:[#allocation204_spill] sm:$0xff]  ;;  %v18002_v19 = vld [vmem:[#allocation223_spill] sm:$0xff] }
 0x227   : > { %v3106_v51 = vrot.slane %v2512_v57, 1  ;;  %v2506_v39 = vadd.f32 %v2349_v29, %v1603_v8  ;;  %v2117_v56 = vpop.f32.mrf.mxu0  ;;  %v14021_v3 = vadd.f32 %v17972_v18, %v17971_v14  ;;  %v1616_v57 = vadd.f32 %v17977_v47, %v17976_v15  ;;  %v17978_v14 = vld [vmem:[#allocation73_spill] sm:$0xff]  ;;  %v17980_v47 = vld [vmem:[#allocation139_spill] sm:$0xff] }
 0x228   : > { %v2501_v23 = vadd.f32 %v2117_v56, %v13868_v48  ;;  %v11103_v40 = vpop.f32.mrf.mxu1  ;;  %v3103_v8 = vrot.slane %v2503_v36, 1  ;;  %v17979_v18 = vld [vmem:[#allocation213_spill] sm:$0xff] }
 0x229   : > { %17973 = vst [vmem:[#allocation114_spill] sm:$0xff] %v14021_v3  ;;  %v3172_v9 = vsel %vm3139_vm0, %v3105_v0, %v3106_v51  ;;  %v3104_v13 = vrot.slane %v2506_v39, 1  ;;  %v2119_v29 = vpop.f32.mrf.mxu0  ;;  %v14035_v6 = vadd.f32 %v11103_v40, %v1624_v49  ;;  %v1627_v36 = vadd.f32 %v17979_v18, %v17978_v14  ;;  %v17983_v49 = vld [vmem:[#allocation141_spill] sm:$0xff]  ;;  %v17986_v18 = vld [vmem:[#allocation20_spill] sm:$0xff]  ;;  %v17989_v3 = vld [vmem:[#allocation19_spill] sm:$0xff] }
 0x22a   : > { %v2740_v58 = vrot.slane %v2501_v23, 7  ;;  %v2502_v48 = vadd.f32 %v2119_v29, %v13872_v53  ;;  %v2362_v56 = vpop.f32.mrf.mxu1  ;;  %v14048_v23 = vadd.f32 %v17981_v32, %v17980_v47  ;;  %v17984_v40 = vld [vmem:[#allocation205_spill] sm:$0xff]  ;;  %v17987_v47 = vld [vmem:[#allocation76_spill] sm:$0xff]  ;;  %v17988_v32 = vld [vmem:[#allocation215_spill] sm:$0xff] }
 0x22b   : > { %v3173_v5 = vsel %vm3139_vm0, %v3104_v13, %v3105_v0  ;;  %v3174_v39 = vsel %vm3139_vm0, %v3103_v8, %v3104_v13  ;;  %v14044_v20 = vadd.f32 %v2362_v56, %v1616_v57  ;;  %v2121_v15 = vpop.f32.mrf.mxu0  ;;  %v14052_v53 = vadd.f32 %v17984_v40, %v17983_v49 }
 0x22c   : > { %17982 = vst [vmem:[#allocation189_spill] sm:$0xff] %v14048_v23  ;;  %v2814_v29 = vsel %vm2778_vm1, %v2739_v38, %v2740_v58  ;;  %v2700_v14 = vadd.f32 %v14033_v41, %v2502_v48  ;;  %v11104_v0 = vpop.f32.mrf.mxu1  ;;  %v2504_v8 = vadd.f32 %v2121_v15, %v13876_v35  ;;  %v1619_v23 = vadd.f32 %v17988_v32, %v17987_v47  ;;  %v17992_v32 = vld [vmem:[#allocation78_spill] sm:$0xff] }
 0x22d   : > { %17985 = vst [vmem:[#allocation66_spill] sm:$0xff] %v14052_v53  ;;  %v3023_v34 = vmul.f32 %v17986_v18, %v2814_v29  ;;  %v17665_v57 = vrot.slane %v14044_v20, 1  ;;  %v2524_v13 = vadd.f32 %v11104_v0, %v1627_v36  ;;  %v2123_v56 = vpop.f32.mrf.mxu0  ;;  %v3384_v49 = vmul.f32 %v17989_v3, %v3174_v39  ;;  %v17990_v0 = vld [vmem:[#allocation77_spill] sm:$0xff]  ;;  %v17993_v3 = vld [vmem:[#allocation219_spill] sm:$0xff] }
 0x22e   : > { %v2505_v38 = vadd.f32 %v2123_v56, %v13882_v54  ;;  %v2365_v53 = vpop.f32.mrf.mxu1  ;;  %v2741_v35 = vrot.slane %v2504_v8, 7  ;;  %v17991_v18 = vld [vmem:[#allocation217_spill] sm:$0xff]  ;;  %v1632_v39 = vadd.f32 %v17993_v3, %v17992_v32 }
 0x22f   : > { %v3063_v48 = vadd.f32 %v3023_v34, %v2700_v14  ;;  %v14069_v29 = vsel %vm3139_vm0, %v3106_v51, %v17665_v57  ;;  %v3110_v36 = vrot.slane %v2524_v13, 1  ;;  %v2127_v15 = vpop.f32.mrf.mxu0  ;;  %v1640_v47 = vadd.f32 %v17991_v18, %v17990_v0  ;;  %v17995_v18 = vld [vmem:[#allocation142_spill] sm:$0xff]  ;;  %v17999_v3 = vld [vmem:[#allocation221_spill] sm:$0xff] }
 0x230   : > { %v2701_v40 = vadd.f32 %v14033_v41, %v2505_v38  ;;  %v2507_v54 = vadd.f32 %v2127_v15, %v13886_v33  ;;  %v11107_v34 = vpop.f32.mrf.mxu1  ;;  %v2813_v56 = vsel %vm2778_vm1, %v2740_v58, %v2741_v35  ;;  %v17994_v51 = vrot.slane %v14035_v6, 1  ;;  %v17996_v57 = vld [vmem:[#allocation206_spill] sm:$0xff]  ;;  %v17998_v38 = vld [vmem:[#allocation81_spill] sm:$0xff] }
 0x231   : > { %v3424_v14 = vadd.f32 %v3384_v49, %v3063_v48  ;;  %v2518_v13 = vadd.f32 %v2365_v53, %v1619_v23  ;;  %v2129_v0 = vpop.f32.mrf.mxu0  ;;  %v14087_v32 = vadd.f32 %v17996_v57, %v17995_v18  ;;  %v1643_v33 = vadd.f32 %v17999_v3, %v17998_v38  ;;  %v18000_v15 = vld [vmem:[#allocation22_spill] sm:$0xff]  ;;  %v18003_v18 = vld [vmem:[#allocation83_spill] sm:$0xff]  ;;  %v18005_v38 = vld [vmem:[#allocation21_spill] sm:$0xff] }
 0x232   : > { %v14083_v8 = vsel %vm3139_vm0, %v17994_v51, %v3110_v36  ;;  %v3024_v49 = vmul.f32 %v18000_v15, %v2813_v56  ;;  %v2742_v48 = vrot.slane %v2507_v54, 7  ;;  %v2378_v22 = vpop.f32.mrf.mxu1  ;;  %v18001_v58 = vld [vmem:[#allocation82_spill] sm:$0xff]  ;;  %v14096_v42 = vadd.f32 %v11107_v34, %v1640_v47 }
 0x233   : > { %17997 = vst [vmem:[#allocation67_spill] sm:$0xff] %v14087_v32  ;;  %v14094_v28 = vadd.f32 %v18002_v19, %v18001_v58  ;;  %v2508_v23 = vadd.f32 %v2129_v0, %v13890_v59  ;;  %v14099_v53 = vadd.f32 %v2378_v22, %v1632_v39  ;;  %v2131_v51 = vpop.f32.mrf.mxu0  ;;  %v11706_v57 = vld [vmem:[#allocation6 + $0x18] ss:$12 sps:$4 sm:$0xff]   ;;  %v18004_v32 = vld [vmem:[#allocation225_spill] sm:$0xff]  ;;  %v3385_v3 = vmul.f32 %v18005_v38, %v3173_v5  ;;  %v11708_v19 = vld [vmem:[#allocation6 + $0x1c] ss:$12 sps:$4 sm:$0xff]  }
 0x234   : > { %v1656_v61 = vadd.f32 %v18004_v32, %v18003_v18  ;;  %v3064_v56 = vadd.f32 %v3024_v49, %v2701_v40  ;;  %v2812_v54 = vsel %vm2778_vm1, %v2741_v35, %v2742_v48  ;;  %v11108_v15 = vpop.f32.mrf.mxu1  ;;  %v18006_v58 = vld [vmem:[#allocation26_spill] sm:$0xff]  ;;  %v3108_v34 = vrot.slane %v2518_v13, 1  ;;  %v18007_v22 = vld [vmem:[#allocation24_spill] sm:$0xff]  ;;  %4866 = vmatprep.subr.bf16.mxu1 %v11708_v19 }
 0x235   : > { %v3386_v47 = vmul.f32 %v18006_v58, %v3172_v9  ;;  %v2702_v59 = vadd.f32 %v14033_v41, %v2508_v23  ;;  %v3025_v39 = vmul.f32 %v18007_v22, %v2812_v54  ;;  %v2133_v0 = vpop.f32.mrf.mxu0  ;;  %v17667_v27 = vrot.slane %v14099_v53, 1  ;;  %4867 = vmatpush1.bf16.msra.mxu1 %v11706_v57  ;;  %v11713_v19 = vld [vmem:[#allocation6] ss:$12 sps:$4 sm:$0xff]  }
 0x236   : > { %v3425_v55 = vadd.f32 %v3385_v3, %v3064_v56  ;;  %v2510_v32 = vadd.f32 %v2131_v51, %v13894_v2  ;;  %v14111_v5 = vadd.f32 %v11108_v15, %v1643_v33  ;;  %v14113_v40 = vpop.f32.mrf.mxu1  ;;  %v3464_v35 = vmax.f32 %v3424_v14, 0.0  ;;  %v18008_v3 = vld [vmem:[#allocation86_spill] sm:$0xff]  ;;  %v18009_v14 = vld [vmem:[#allocation227_spill] sm:$0xff] }
 0x237   : > { %v17666_v49 = vrot.slane %v14096_v42, 1  ;;  %v3065_v9 = vadd.f32 %v3025_v39, %v2702_v59  ;;  %v2511_v13 = vadd.f32 %v2133_v0, %v13899_v10  ;;  %v2137_v23 = vpop.f32.mrf.mxu0  ;;  %v14121_v38 = vsel %vm3139_vm0, %v3110_v36, %v17667_v27  ;;  %v11715_v39 = vld [vmem:[#allocation6 + $0x4] ss:$12 sps:$4 sm:$0xff]  }
 0x238   : > { %v3465_v18 = vmax.f32 %v3425_v55, 0.0  ;;  %v2743_v2 = vrot.slane %v2510_v32, 7  ;;  %v3114_v33 = vrot.slane %v14111_v5, 1  ;;  %v11111_v51 = vpop.f32.mrf.mxu1  ;;  %v1648_v56 = vadd.f32 %v18009_v14, %v18008_v3  ;;  %v18011_v0 = vld [vmem:[#allocation87_spill] sm:$0xff]  ;;  %v18013_v5 = vld [vmem:[#allocation88_spill] sm:$0xff]  ;;  %4868 = vmatprep.subr.bf16.mxu1 %v11715_v39 }
 0x239   : > { %v18010_v54 = vrot.slane %v14044_v20, 1  ;;  %v3426_v57 = vadd.f32 %v3386_v47, %v3065_v9  ;;  %v2703_v55 = vadd.f32 %v14033_v41, %v2511_v13  ;;  %v2139_v15 = vpop.f32.mrf.mxu0  ;;  %v2513_v20 = vadd.f32 %v2137_v23, %v13903_v1  ;;  %v18012_v47 = vld [vmem:[#allocation229_spill] sm:$0xff]  ;;  %v18014_v9 = vld [vmem:[#allocation231_spill] sm:$0xff]  ;;  %4869 = vmatpush1.bf16.msra.mxu1 %v11713_v19 }
 0x23a   : > { %v10542_v58 = vpack.c.bf16 %v3465_v18, %v3464_v35  ;;  %v2811_v36 = vsel %vm2778_vm1, %v2742_v48, %v2743_v2  ;;  %v14137_v59 = vsel %vm3139_vm0, %v17666_v49, %v3114_v33  ;;  %v2394_v22 = vpop.f32.mrf.mxu1  ;;  %v1659_v32 = vadd.f32 %v18012_v47, %v18011_v0  ;;  %v18015_v35 = vld [vmem:[#allocation91_spill] sm:$0xff]  ;;  %v18016_v18 = vld [vmem:[#allocation233_spill] sm:$0xff] }
 0x23b   : > { %v3170_v10 = vsel %vm3139_vm0, %v18010_v54, %v3108_v34  ;;  %v14144_v13 = vadd.f32 %v18014_v9, %v18013_v5  ;;  %v1672_v48 = vadd.f32 %v18016_v18, %v18015_v35  ;;  %v18017_v3 = vld [vmem:[#allocation23_spill] sm:$0xff]  ;;  %v2141_v54 = vpop.f32.mrf.mxu0  ;;  %v18018_v49 = vld [vmem:[#allocation25_spill] sm:$0xff]  ;;  %v18019_v1 = vrot.slane %v14035_v6, 1  ;;  %v18020_v9 = vld [vmem:[#allocation30_spill] sm:$0xff] }
 0x23c   : > { %v3026_v14 = vmul.f32 %v18017_v3, %v2811_v36  ;;  %v3387_v27 = vmul.f32 %v18018_v49, %v14069_v29  ;;  %10699 = vst [vmem:[#allocation3 + $0x10] sm:$0xff] %v10542_v58   ;;  %v2744_v0 = vrot.slane %v2513_v20, 7  ;;  %v14155_v47 = vadd.f32 %v11111_v51, %v1656_v61  ;;  %v11112_v5 = vpop.f32.mrf.mxu1 }
 0x23d   : > { %v3169_v23 = vsel %vm3139_vm0, %v3108_v34, %v18019_v1  ;;  %v3388_v63 = vmul.f32 %v18020_v9, %v3170_v10  ;;  %v2514_v36 = vadd.f32 %v2139_v15, %v13907_v52  ;;  %v14159_v18 = vadd.f32 %v2394_v22, %v1648_v56  ;;  %v2143_v3 = vpop.f32.mrf.mxu0 }
 0x23e   : > { %v3066_v35 = vadd.f32 %v3026_v14, %v2703_v55  ;;  %v3466_v29 = vmax.f32 %v3426_v57, 0.0  ;;  %v2810_v6 = vsel %vm2778_vm1, %v2743_v2, %v2744_v0  ;;  %v2516_v34 = vadd.f32 %v2141_v54, %v13911_v62  ;;  %v14166_v61 = vpop.f32.mrf.mxu1  ;;  %v18021_v55 = vld [vmem:[#allocation28_spill] sm:$0xff]  ;;  %v18023_v54 = vld [vmem:[#allocation235_spill] sm:$0xff] }
 0x23f   : > { %v14164_v49 = vadd.f32 %v11112_v5, %v1659_v32  ;;  %v2704_v10 = vadd.f32 %v14033_v41, %v2514_v36  ;;  %v3027_v58 = vmul.f32 %v18021_v55, %v2810_v6  ;;  %v3115_v52 = vrot.slane %v14159_v18, 1  ;;  %v2147_v56 = vpop.f32.mrf.mxu0  ;;  %v18022_v14 = vld [vmem:[#allocation92_spill] sm:$0xff]  ;;  %v18024_v6 = vld [vmem:[#allocation27_spill] sm:$0xff] }
 0x240   : > { %v3427_v51 = vadd.f32 %v3387_v27, %v3066_v35  ;;  %v3117_v15 = vrot.slane %v14155_v47, 1  ;;  %v2745_v57 = vrot.slane %v2516_v34, 7  ;;  %v2517_v2 = vadd.f32 %v2143_v3, %v13915_v31  ;;  %v11115_v62 = vpop.f32.mrf.mxu1 }
 0x241   : > { %v3118_v19 = vrot.slane %v14164_v49, 1  ;;  %v3067_v22 = vadd.f32 %v3027_v58, %v2704_v10  ;;  %v14178_v27 = vsel %vm3139_vm0, %v3114_v33, %v3115_v52  ;;  %v2519_v39 = vadd.f32 %v2147_v56, %v13919_v11  ;;  %v2149_v32 = vpop.f32.mrf.mxu0  ;;  %v11698_v33 = vld [vmem:[#allocation6 + $0x98] ss:$12 sps:$4 sm:$0xff]  }
 0x242   : > { %v3467_v20 = vmax.f32 %v3427_v51, 0.0  ;;  %v1664_v1 = vadd.f32 %v18023_v54, %v18022_v14  ;;  %v2809_v5 = vsel %vm2778_vm1, %v2744_v0, %v2745_v57  ;;  %v2705_v9 = vadd.f32 %v14033_v41, %v2517_v2  ;;  %v2410_v35 = vpop.f32.mrf.mxu1  ;;  %v18025_v51 = vld [vmem:[#allocation29_spill] sm:$0xff] }
 0x243   : > { %v14189_v31 = vsel %vm3139_vm0, %v3117_v15, %v3118_v19  ;;  %v14194_v11 = vadd.f32 %v14113_v40, %v14094_v28  ;;  %v3428_v3 = vadd.f32 %v3388_v63, %v3067_v22  ;;  %v3028_v34 = vmul.f32 %v18024_v6, %v2809_v5  ;;  %v2151_v49 = vpop.f32.mrf.mxu0  ;;  %v11674_v0 = vld [vmem:[#allocation3 + $0x10] sm:$0xff]  }
 0x244   : > { %v10547_v36 = vpack.c.bf16 %v3467_v20, %v3466_v29  ;;  %v3389_v10 = vmul.f32 %v18025_v51, %v3169_v23  ;;  %v2746_v55 = vrot.slane %v2519_v39, 7  ;;  %v14198_v58 = vadd.f32 %v11115_v62, %v1672_v48  ;;  %v11116_v2 = vpop.f32.mrf.mxu1  ;;  %4373 = vmatmul.mubr.bf16.gmra.mxu1 %v11674_v0  ;;  %11150 = vmatmul.mubr.bf16.vlgmr.msra.gmra.mxu0 %v11674_v0  ;;  %v18026_v63 = vld [vmem:[#allocation93_spill] sm:$0xff]  ;;  %v18028_v23 = vld [vmem:[#allocation34_spill] sm:$0xff] }
 0x245   : > { %v2520_v56 = vadd.f32 %v2149_v32, %v13923_v50  ;;  %v3068_v14 = vadd.f32 %v3028_v34, %v2705_v9  ;;  %v14201_v29 = vadd.f32 %v2410_v35, %v1664_v1  ;;  %v2522_v28 = vadd.f32 %v2151_v49, %v13927_v17  ;;  %v2153_v40 = vpop.f32.mrf.mxu0  ;;  %v18027_v20 = vld [vmem:[#allocation237_spill] sm:$0xff]  ;;  %11186 = vmatpush3.bf16.msra.mxu0 %v13864_v45  ;;  %v11703_v9 = vld [vmem:[#allocation6 + $0x80] ss:$12 sps:$4 sm:$0xff]  }
 0x246   : > { %10700 = vst [vmem:[#allocation3 + $0x18] sm:$0xff] %v10547_v36   ;;  %v1675_v22 = vadd.f32 %v18027_v20, %v18026_v63  ;;  %v3390_v39 = vmul.f32 %v18028_v23, %v14083_v8  ;;  %v2808_v48 = vsel %vm2778_vm1, %v2745_v57, %v2746_v55  ;;  %v14210_v50 = vpop.f32.mrf.mxu1  ;;  %v18029_v62 = vmov 0   ;;  %11187 = vmatprep.subr.bf16.mxu0 %v11698_v33  ;;  %v18030_v35 = vld [vmem:[#allocation32_spill] sm:$0xff]  ;;  %v18033_v23 = vld [vmem:[#allocation97_spill] sm:$0xff] }
 0x247   : > { %4382 = vmatprep.mubr.bf16.mxu1 %v18029_v62  ;;  %v3112_v17 = vrot.slane %v14194_v11, 1  ;;  %v3468_v32 = vmax.f32 %v3428_v3, 0.0  ;;  %v3429_v54 = vadd.f32 %v3389_v10, %v3068_v14  ;;  %v2706_v1 = vadd.f32 %v14033_v41, %v2520_v56  ;;  %v2157_v5 = vpop.f32.mrf.mxu0 }
 0x248   : > { %v3029_v8 = vmul.f32 %v18030_v35, %v2808_v48  ;;  %v17668_v36 = vrot.slane %v14201_v29, 1  ;;  %v2747_v57 = vrot.slane %v2522_v28, 7  ;;  %v14218_v6 = vadd.f32 %v11116_v2, %v1675_v22  ;;  %v11119_v34 = vpop.f32.mrf.mxu1  ;;  %v18034_v48 = vld [vmem:[#allocation241_spill] sm:$0xff] }
 0x249   : > { %v3469_v49 = vmax.f32 %v3429_v54, 0.0  ;;  %v17669_v45 = vrot.slane %v14198_v58, 1  ;;  %v2523_v11 = vadd.f32 %v2153_v40, %v13931_v12  ;;  %v14223_v3 = vadd.f32 %v2157_v5, %v13935_v4  ;;  %v2159_v0 = vpop.f32.mrf.mxu0  ;;  %11188 = vmatpush3.bf16.msra.mxu0 %v11698_v33  ;;  %v18032_v40 = vld [vmem:[#allocation31_spill] sm:$0xff] }
 0x24a   : > { %v3069_v51 = vadd.f32 %v3029_v8, %v2706_v1  ;;  %v14229_v10 = vsel %vm3139_vm0, %v3118_v19, %v17668_v36  ;;  %v2807_v56 = vsel %vm2778_vm1, %v2746_v55, %v2747_v57  ;;  %v3122_v2 = vrot.slane %v14218_v6, 1  ;;  %v2426_v14 = vpop.f32.mrf.mxu1  ;;  %11189 = vmatprep.subr.bf16.mxu0 %v11703_v9  ;;  %v11705_v19 = vld [vmem:[#allocation6 + $0x68] ss:$12 sps:$4 sm:$0xff]   ;;  %v18035_v1 = vld [vmem:[#allocation98_spill] sm:$0xff]  ;;  %v18036_v5 = vld [vmem:[#allocation243_spill] sm:$0xff] }
 0x24b   : > { %v18031_v12 = vrot.slane %v14099_v53, 1  ;;  %v10552_v28 = vpack.c.bf16 %v3469_v49, %v3468_v32  ;;  %v3030_v63 = vmul.f32 %v18032_v40, %v2807_v56  ;;  %v2707_v20 = vadd.f32 %v14033_v41, %v2523_v11  ;;  %v2161_v22 = vpop.f32.mrf.mxu0  ;;  %v18037_v8 = vld [vmem:[#allocation33_spill] sm:$0xff]  ;;  %v18041_v36 = vld [vmem:[#allocation38_spill] sm:$0xff]  ;;  %v18047_v6 = vld [vmem:[#allocation35_spill] sm:$0xff] }
 0x24c   : > { %v1688_v55 = vadd.f32 %v18034_v48, %v18033_v23  ;;  %v3430_v54 = vadd.f32 %v3390_v39, %v3069_v51  ;;  %v14248_v53 = vsel %vm3139_vm0, %v17669_v45, %v3122_v2  ;;  %v2748_v33 = vrot.slane %v14223_v3, 7  ;;  %v11120_v32 = vpop.f32.mrf.mxu1  ;;  %v18039_v40 = vld [vmem:[#allocation245_spill] sm:$0xff] }
 0x24d   : > { %v3166_v4 = vsel %vm3139_vm0, %v18031_v12, %v3112_v17  ;;  %v1680_v35 = vadd.f32 %v18036_v5, %v18035_v1  ;;  %v3391_v49 = vmul.f32 %v18037_v8, %v14121_v38  ;;  %10701 = vst [vmem:[#allocation3 + $0x20] sm:$0xff] %v10552_v28   ;;  %v3070_v11 = vadd.f32 %v3030_v63, %v2707_v20  ;;  %v2163_v51 = vpop.f32.mrf.mxu0  ;;  %v11675_v56 = vld [vmem:[#allocation3 + $0x18] sm:$0xff]   ;;  %v18038_v12 = vld [vmem:[#allocation101_spill] sm:$0xff] }
 0x24e   : > { %v2526_v39 = vadd.f32 %v2159_v0, %v13939_v30  ;;  %v1691_v23 = vadd.f32 %v18039_v40, %v18038_v12  ;;  %v18040_v48 = vrot.slane %v14096_v42, 1  ;;  %v3392_v45 = vmul.f32 %v18041_v36, %v3166_v4  ;;  %v14265_v38 = vpop.f32.mrf.mxu1  ;;  %11190 = vmatpush3.bf16.msra.mxu0 %v11703_v9  ;;  %4383 = vmatmul.mubr.bf16.gmra.mxu1 %v11675_v56  ;;  %v11710_v63 = vld [vmem:[#allocation6 + $0x50] ss:$12 sps:$4 sm:$0xff]   ;;  %v18042_v36 = vld [vmem:[#allocation36_spill] sm:$0xff] }
 0x24f   : > { %v2806_v1 = vsel %vm2778_vm1, %v2747_v57, %v2748_v33  ;;  %v14269_v30 = vadd.f32 %v14166_v61, %v14144_v13  ;;  %v3431_v0 = vadd.f32 %v3391_v49, %v3070_v11  ;;  %v14271_v28 = vadd.f32 %v11119_v34, %v1688_v55  ;;  %11153 = vmatprep.mubr.bf16.mxu0 %v11675_v56  ;;  %v2167_v42 = vpop.f32.mrf.mxu0  ;;  %v11721_v8 = vld [vmem:[#allocation6 + $0x230] ss:$12 sps:$4 sm:$0xff]  }
 0x250   : > { %v3165_v3 = vsel %vm3139_vm0, %v3112_v17, %v18040_v48  ;;  %v2708_v17 = vadd.f32 %v14033_v41, %v2526_v39  ;;  %v3031_v4 = vmul.f32 %v18042_v36, %v2806_v1  ;;  %v14275_v20 = vadd.f32 %v2426_v14, %v1680_v35  ;;  %v11123_v9 = vpop.f32.mrf.mxu1  ;;  %4392 = vmatprep.mubr.bf16.mxu1 %v18029_v62  ;;  %v18044_v48 = vld [vmem:[#allocation239_spill] sm:$0xff]  ;;  %v18048_v36 = vld [vmem:[#allocation108_spill] sm:$0xff] }
 0x251   : > { %v2528_v57 = vadd.f32 %v2161_v22, %v13944_v25  ;;  %v3470_v13 = vmax.f32 %v3430_v54, 0.0  ;;  %v3471_v61 = vmax.f32 %v3431_v0, 0.0  ;;  %v14279_v5 = vadd.f32 %v11120_v32, %v1691_v23  ;;  %v2169_v55 = vpop.f32.mrf.mxu0  ;;  %11191 = vmatprep.subr.bf16.mxu0 %v11705_v19  ;;  %11237 = vmatprep.subr.bf16.mxu1 %v11721_v8  ;;  %v18043_v23 = vld [vmem:[#allocation96_spill] sm:$0xff]  ;;  %v18046_v0 = vld [vmem:[#allocation249_spill] sm:$0xff] }
 0x252   : > { %v2529_v34 = vadd.f32 %v2163_v51, %v13948_v21  ;;  %v3071_v49 = vadd.f32 %v3031_v4, %v2708_v17  ;;  %v3123_v11 = vrot.slane %v14275_v20, 1  ;;  %v14284_v14 = vadd.f32 %v2167_v42, %v13955_v60  ;;  %v2442_v25 = vpop.f32.mrf.mxu1  ;;  %11192 = vmatpush3.bf16.msra.mxu0 %v11705_v19  ;;  %v18049_v4 = vld [vmem:[#allocation251_spill] sm:$0xff]  ;;  %v18053_v8 = vld [vmem:[#allocation257_spill] sm:$0xff]  ;;  %v18109_v20 = vld [vmem:[#allocation154_spill] sm:$0xff] }
 0x253   : > { %v2749_v39 = vrot.slane %v2528_v57, 7  ;;  %v10557_v22 = vpack.c.bf16 %v3471_v61, %v3470_v13  ;;  %v3125_v54 = vrot.slane %v14271_v28, 1  ;;  %v3126_v32 = vrot.slane %v14279_v5, 1  ;;  %v2171_v21 = vpop.f32.mrf.mxu0  ;;  %11193 = vmatprep.subr.bf16.mxu0 %v11710_v63  ;;  %v18050_v13 = vld [vmem:[#allocation110_spill] sm:$0xff]  ;;  %v18051_v61 = vld [vmem:[#allocation253_spill] sm:$0xff] }
 0x254   : > { %v2709_v35 = vadd.f32 %v14033_v41, %v2529_v34  ;;  %v3432_v51 = vadd.f32 %v3392_v45, %v3071_v49  ;;  %v14295_v60 = vsel %vm3139_vm0, %v3122_v2, %v3123_v11  ;;  %v2750_v56 = vrot.slane %v14284_v14, 7  ;;  %v11124_v12 = vpop.f32.mrf.mxu1  ;;  %v11679_v40 = vld [vmem:[#allocation3 + $0x20] sm:$0xff]   ;;  %v18045_v45 = vld [vmem:[#allocation104_spill] sm:$0xff]  ;;  %v18054_v14 = vld [vmem:[#allocation37_spill] sm:$0xff] }
 0x255   : > { %v2805_v19 = vsel %vm2778_vm1, %v2748_v33, %v2749_v39  ;;  %v14302_v1 = vadd.f32 %v18044_v48, %v18043_v23  ;;  %v1704_v42 = vadd.f32 %v18046_v0, %v18045_v45  ;;  %10702 = vst [vmem:[#allocation3 + $0x28] sm:$0xff] %v10557_v22   ;;  %v14311_v2 = vsel %vm3139_vm0, %v3125_v54, %v3126_v32  ;;  %v2173_v33 = vpop.f32.mrf.mxu0  ;;  %v18052_v34 = vld [vmem:[#allocation116_spill] sm:$0xff]  ;;  %v11712_v23 = vld [vmem:[#allocation6 + $0x38] ss:$12 sps:$4 sm:$0xff]  }
 0x256   : > { %v3032_v17 = vmul.f32 %v18047_v6, %v2805_v19  ;;  %v1696_v57 = vadd.f32 %v18049_v4, %v18048_v36  ;;  %v1707_v5 = vadd.f32 %v18051_v61, %v18050_v13  ;;  %v14319_v49 = vadd.f32 %v18053_v8, %v18052_v34  ;;  %v14322_v19 = vpop.f32.mrf.mxu1  ;;  %11154 = vmatmul.mubr.bf16.gmra.mxu0 %v11679_v40  ;;  %v18055_v13 = vld [vmem:[#allocation40_spill] sm:$0xff] }
 0x257   : > { %v3393_v22 = vmul.f32 %v18054_v14, %v3165_v3  ;;  %v3116_v48 = vrot.slane %v14269_v30, 1  ;;  %v2804_v0 = vsel %vm2778_vm1, %v2749_v39, %v2750_v56  ;;  %v14327_v6 = vadd.f32 %v11123_v9, %v1704_v42  ;;  %4393 = vmatmul.mubr.bf16.gmra.mxu1 %v11679_v40  ;;  %v2177_v36 = vpop.f32.mrf.mxu0  ;;  %11194 = vmatpush3.bf16.msra.mxu0 %v11710_v63  ;;  %v18056_v63 = vld [vmem:[#allocation42_spill] sm:$0xff] }
 0x258   : > { %v3072_v45 = vadd.f32 %v3032_v17, %v2709_v35  ;;  %v2532_v4 = vadd.f32 %v2169_v55, %v13959_v44  ;;  %v3033_v61 = vmul.f32 %v18055_v13, %v2804_v0  ;;  %v14331_v34 = vadd.f32 %v2442_v25, %v1696_v57  ;;  %v11127_v8 = vpop.f32.mrf.mxu1  ;;  %4402 = vmatprep.mubr.bf16.mxu1 %v18029_v62 }
 0x259   : > { %v2534_v3 = vadd.f32 %v2171_v21, %v13963_v16  ;;  %v3472_v30 = vmax.f32 %v3432_v51, 0.0  ;;  %v14335_v17 = vadd.f32 %v11124_v12, %v1707_v5  ;;  %v2535_v9 = vadd.f32 %v2173_v33, %v13967_v37  ;;  %v2179_v39 = vpop.f32.mrf.mxu0  ;;  %11195 = vmatprep.subr.bf16.mxu0 %v11712_v23  ;;  %v11718_v33 = vld [vmem:[#allocation6 + $0x20] ss:$12 sps:$4 sm:$0xff]  }
 0x25a   : > { %v3433_v35 = vadd.f32 %v3393_v22, %v3072_v45  ;;  %v3129_v40 = vrot.slane %v14327_v6, 1  ;;  %v2710_v44 = vadd.f32 %v14033_v41, %v2532_v4  ;;  %v3127_v55 = vrot.slane %v14331_v34, 1  ;;  %v2458_v42 = vpop.f32.mrf.mxu1  ;;  %v18136_v34 = vld [vmem:[#allocation236_spill] sm:$0xff] }
 0x25b   : > { %v2751_v25 = vrot.slane %v2534_v3, 7  ;;  %v3130_v21 = vrot.slane %v14335_v17, 1  ;;  %v2711_v51 = vadd.f32 %v14033_v41, %v2535_v9  ;;  %v14344_v12 = vadd.f32 %v2177_v36, %v13971_v26  ;;  %v2181_v37 = vpop.f32.mrf.mxu0  ;;  %v18057_v26 = vld [vmem:[#allocation118_spill] sm:$0xff]  ;;  %v18059_v3 = vld [vmem:[#allocation39_spill] sm:$0xff]  ;;  %11196 = vmatpush3.bf16.msra.mxu0 %v11712_v23  ;;  %v18141_v6 = vld [vmem:[#allocation124_spill] sm:$0xff] }
 0x25c   : > { %v3473_v16 = vmax.f32 %v3433_v35, 0.0  ;;  %v3394_v57 = vmul.f32 %v18056_v63, %v14137_v59  ;;  %v3073_v5 = vadd.f32 %v3033_v61, %v2710_v44  ;;  %v14352_v14 = vsel %vm3139_vm0, %v3126_v32, %v3127_v55  ;;  %v11128_v45 = vpop.f32.mrf.mxu1  ;;  %v14356_v0 = vld [vmem:[#allocation3 + $0x28] sm:$0xff]   ;;  %v18058_v36 = vld [vmem:[#allocation258_spill] sm:$0xff]  ;;  %v18061_v17 = vld [vmem:[#allocation259_spill] sm:$0xff]  ;;  %11197 = vmatprep.subr.bf16.mxu0 %v11718_v33 }
 0x25d   : > { %v2803_v22 = vsel %vm2778_vm1, %v2750_v56, %v2751_v25  ;;  %v1712_v4 = vadd.f32 %v18058_v36, %v18057_v26  ;;  %v14365_v59 = vsel %vm3139_vm0, %v3129_v40, %v3130_v21  ;;  %v2183_v32 = vpop.f32.mrf.mxu0  ;;  %v18060_v61 = vld [vmem:[#allocation120_spill] sm:$0xff]  ;;  %v18062_v9 = vld [vmem:[#allocation127_spill] sm:$0xff]  ;;  %v18063_v63 = vld [vmem:[#allocation41_spill] sm:$0xff]  ;;  %11157 = vmatprep.mubr.bf16.mxu0 %v14356_v0  ;;  %v3161_v23 = vsel %vm3139_vm0, %v3116_v48, %v3117_v15 }
 0x25e   : > { %v10562_v13 = vpack.c.bf16 %v3473_v16, %v3472_v30  ;;  %v3034_v35 = vmul.f32 %v18059_v3, %v2803_v22  ;;  %v1723_v56 = vadd.f32 %v18061_v17, %v18060_v61  ;;  %v1728_v44 = vadd.f32 %v13860_v43, %v18062_v9  ;;  %v14373_v16 = vpop.f32.mrf.mxu1  ;;  %v11719_v22 = vld [vmem:[#allocation6 + $0x8] ss:$12 sps:$4 sm:$0xff]  }
 0x25f   : > { %v3395_v26 = vmul.f32 %v18063_v63, %v14178_v27  ;;  %v3434_v30 = vadd.f32 %v3394_v57, %v3073_v5  ;;  %v3162_v36 = vsel %vm3139_vm0, %v3115_v52, %v3116_v48  ;;  %v2752_v27 = vrot.slane %v14344_v12, 7  ;;  %4403 = vmatmul.mubr.bf16.gmra.mxu1 %v14356_v0  ;;  %v2187_v57 = vpop.f32.mrf.mxu0  ;;  %11198 = vmatpush3.bf16.msra.mxu0 %v11718_v33 }
 0x260   : > { %10703 = vst [vmem:[#allocation3 + $0x30] sm:$0xff] %v10562_v13   ;;  %v3074_v43 = vadd.f32 %v3034_v35, %v2711_v51  ;;  %v14387_v3 = vadd.f32 %v11127_v8, %v14319_v49  ;;  %v2538_v47 = vadd.f32 %v2179_v39, %v13979_v46  ;;  %v14390_v15 = vadd.f32 %v2458_v42, %v1712_v4  ;;  %v11131_v18 = vpop.f32.mrf.mxu1  ;;  %v18064_v46 = vld [vmem:[#allocation44_spill] sm:$0xff] }
 0x261   : > { %v3474_v5 = vmax.f32 %v3434_v30, 0.0  ;;  %4412 = vmatprep.mubr.bf16.mxu1 %v18029_v62  ;;  %v2802_v48 = vsel %vm2778_vm1, %v2751_v25, %v2752_v27  ;;  %v2540_v51 = vadd.f32 %v2181_v37, %v13983_v7  ;;  %v14396_v12 = vadd.f32 %v11128_v45, %v1723_v56  ;;  %v2189_v13 = vpop.f32.mrf.mxu0  ;;  %11199 = vmatprep.subr.bf16.mxu0 %v11719_v22  ;;  %v11724_v35 = vld [vmem:[#allocation6 + $0x22c] ss:$12 sps:$4 sm:$0xff]   ;;  %v18065_v7 = vld [vmem:[#allocation63_spill] sm:$0xff] }
 0x262   : > { %v3435_v52 = vadd.f32 %v3395_v26, %v3074_v43  ;;  %v3133_v49 = vrot.slane %v14387_v3, 1  ;;  %v2712_v8 = vadd.f32 %v14033_v41, %v2538_v47  ;;  %v3035_v39 = vmul.f32 %v18064_v46, %v2802_v48  ;;  %v2474_v4 = vpop.f32.mrf.mxu1  ;;  %v18066_v56 = vld [vmem:[#allocation46_spill] sm:$0xff]  ;;  %v18067_v26 = vld [vmem:[#allocation103_spill] sm:$0xff] }
 0x263   : > { %v3131_v42 = vrot.slane %v14390_v15, 1  ;;  %v2753_v17 = vrot.slane %v2540_v51, 7  ;;  %v3134_v25 = vrot.slane %v14396_v12, 1  ;;  %v2541_v37 = vadd.f32 %v2183_v32, %v18065_v7  ;;  %v2191_v45 = vpop.f32.mrf.mxu0  ;;  %11200 = vmatpush3.bf16.msra.mxu0 %v11719_v22  ;;  %v18069_v48 = vld [vmem:[#allocation247_spill] sm:$0xff]  ;;  %v18162_v15 = vld [vmem:[#allocation252_spill] sm:$0xff] }
 0x264   : > { %v3475_v61 = vmax.f32 %v3435_v52, 0.0  ;;  %v3396_v33 = vmul.f32 %v18066_v56, %v3162_v36  ;;  %v3075_v9 = vadd.f32 %v3035_v39, %v2712_v8  ;;  %v2543_v30 = vadd.f32 %v2187_v57, %v18067_v26  ;;  %v11132_v43 = vpop.f32.mrf.mxu1  ;;  %v18070_v12 = vld [vmem:[#allocation43_spill] sm:$0xff]  ;;  %5549 = vmatprep.subr.bf16.mxu0 %v11724_v35 }
 0x265   : > { %v14409_v63 = vsel %vm3139_vm0, %v3130_v21, %v3131_v42  ;;  %v2554_v47 = vadd.f32 %v14210_v50, %v14302_v1  ;;  %v2801_v32 = vsel %vm2778_vm1, %v2752_v27, %v2753_v17  ;;  %v14420_v36 = vsel %vm3139_vm0, %v3133_v49, %v3134_v25  ;;  %v2193_v52 = vpop.f32.mrf.mxu0  ;;  %v18068_v21 = vld [vmem:[#allocation102_spill] sm:$0xff]  ;;  %v18071_v27 = vld [vmem:[#allocation45_spill] sm:$0xff] }
 0x266   : > { %v10567_v18 = vpack.c.bf16 %v3475_v61, %v3474_v5  ;;  %v1683_v51 = vadd.f32 %v18069_v48, %v18068_v21  ;;  %v3436_v57 = vadd.f32 %v3396_v33, %v3075_v9  ;;  %v3036_v8 = vmul.f32 %v18070_v12, %v2801_v32  ;;  %v2477_v5 = vpop.f32.mrf.mxu1  ;;  %v18072_v61 = vld [vmem:[#allocation106_spill] sm:$0xff]  ;;  %v18074_v33 = vld [vmem:[#allocation109_spill] sm:$0xff] }
 0x267   : > { %v2713_v50 = vadd.f32 %v14033_v41, %v2541_v37  ;;  %v14426_v1 = vld [vmem:[#allocation3 + $0x30] sm:$0xff]   ;;  %v3397_v46 = vmul.f32 %v18071_v27, %v3161_v23  ;;  %v2754_v39 = vrot.slane %v2543_v30, 7  ;;  %v2544_v7 = vadd.f32 %v2189_v13, %v18072_v61  ;;  %v2197_v22 = vpop.f32.mrf.mxu0  ;;  %v18073_v43 = vld [vmem:[#allocation182_spill] sm:$0xff]  ;;  %v18079_v61 = vld [vmem:[#allocation111_spill] sm:$0xff] }
 0x268   : > { %10704 = vst [vmem:[#allocation3 + $0x38] sm:$0xff] %v10567_v18   ;;  %v2599_v56 = vadd.f32 %v2474_v4, %v1728_v44  ;;  %v2546_v21 = vadd.f32 %v2191_v45, %v18073_v43  ;;  %v2547_v9 = vadd.f32 %v2193_v52, %v18074_v33  ;;  %4413 = vmatmul.mubr.bf16.gmra.mxu1 %v14426_v1  ;;  %v18075_v37 = vld [vmem:[#allocation50_spill] sm:$0xff]  ;;  %v3120_v32 = vrot.slane %v2554_v47, 1  ;;  %v18076_v4 = vld [vmem:[#allocation49_spill] sm:$0xff]  ;;  %v18077_v52 = vld [vmem:[#allocation48_spill] sm:$0xff] }
 0x269   : > { %v3076_v26 = vadd.f32 %v3036_v8, %v2713_v50  ;;  %11158 = vmatmul.mubr.bf16.gmra.mxu0 %v14426_v1  ;;  %v3398_v35 = vmul.f32 %v18075_v37, %v14189_v31  ;;  %v2800_v23 = vsel %vm2778_vm1, %v2753_v17, %v2754_v39  ;;  %v2714_v13 = vadd.f32 %v14033_v41, %v2544_v7  ;;  %v2199_v44 = vpop.f32.mrf.mxu0  ;;  %v18078_v47 = vld [vmem:[#allocation184_spill] sm:$0xff] }
 0x26a   : > { %4422 = vmatprep.mubr.bf16.mxu1 %v18029_v62  ;;  %v3399_v45 = vmul.f32 %v18076_v4, %v14229_v10  ;;  %v3476_v30 = vmax.f32 %v3436_v57, 0.0  ;;  %v3037_v48 = vmul.f32 %v18077_v52, %v2800_v23  ;;  %v3135_v12 = vrot.slane %v2599_v56, 1  ;;  %v18080_v43 = vld [vmem:[#allocation188_spill] sm:$0xff] }
 0x26b   : > { %v3437_v18 = vadd.f32 %v3397_v46, %v3076_v26  ;;  %v2755_v8 = vrot.slane %v2546_v21, 7  ;;  %v2715_v31 = vadd.f32 %v14033_v41, %v2547_v9  ;;  %v2549_v50 = vadd.f32 %v2197_v22, %v18078_v47  ;;  %v2201_v5 = vpop.f32.mrf.mxu0 }
 0x26c   : > { %v3077_v27 = vadd.f32 %v3037_v48, %v2714_v13  ;;  %v2550_v7 = vadd.f32 %v2199_v44, %v18079_v61  ;;  %v2552_v33 = vadd.f32 %v2201_v5, %v18080_v43  ;;  %v18081_v37 = vrot.slane %v14198_v58, 1  ;;  %v18083_v58 = vld [vmem:[#allocation47_spill] sm:$0xff] }
 0x26d   : > { %v3477_v17 = vmax.f32 %v3437_v18, 0.0  ;;  %v14453_v57 = vsel %vm3139_vm0, %v3134_v25, %v3135_v12  ;;  %v2799_v46 = vsel %vm2778_vm1, %v2754_v39, %v2755_v8  ;;  %v2756_v56 = vrot.slane %v2549_v50, 7  ;;  %v2203_v22 = vpop.f32.mrf.mxu0  ;;  %v18084_v39 = vld [vmem:[#allocation114_spill] sm:$0xff]  ;;  %v18085_v12 = vld [vmem:[#allocation52_spill] sm:$0xff] }
 0x26e   : > { %v3157_v10 = vsel %vm3139_vm0, %v3120_v32, %v18081_v37  ;;  %v18082_v26 = vrot.slane %v14201_v29, 1  ;;  %v3438_v23 = vadd.f32 %v3398_v35, %v3077_v27  ;;  %v3038_v13 = vmul.f32 %v18083_v58, %v2799_v46  ;;  %v18086_v35 = vld [vmem:[#allocation189_spill] sm:$0xff]  ;;  %v18089_v37 = vld [vmem:[#allocation144_spill] sm:$0xff] }
 0x26f   : > { %v10572_v9 = vpack.c.bf16 %v3477_v17, %v3476_v30  ;;  %v14462_v44 = vld [vmem:[#allocation3 + $0x38] sm:$0xff]   ;;  %v2798_v25 = vsel %vm2778_vm1, %v2755_v8, %v2756_v56  ;;  %v2716_v4 = vadd.f32 %v14033_v41, %v2550_v7  ;;  %v2757_v18 = vrot.slane %v2552_v33, 7  ;;  %v2207_v48 = vpop.f32.mrf.mxu0  ;;  %v18088_v7 = vld [vmem:[#allocation51_spill] sm:$0xff]  ;;  %v18090_v46 = vld [vmem:[#allocation208_spill] sm:$0xff] }
 0x270   : > { %v3158_v21 = vsel %vm3139_vm0, %v18082_v26, %v3120_v32  ;;  %v2553_v52 = vadd.f32 %v2203_v22, %v18084_v39  ;;  %v3078_v29 = vadd.f32 %v3038_v13, %v2715_v31  ;;  %v3039_v47 = vmul.f32 %v18085_v12, %v2798_v25  ;;  %4423 = vmatmul.mubr.bf16.gmra.mxu1 %v14462_v44  ;;  %v18087_v30 = vld [vmem:[#allocation54_spill] sm:$0xff]  ;;  %v18091_v26 = vld [vmem:[#allocation53_spill] sm:$0xff] }
 0x271   : > { %10705 = vst [vmem:[#allocation3 + $0x40] sm:$0xff] %v10572_v9   ;;  %11161 = vmatprep.mubr.bf16.mxu0 %v14462_v44  ;;  %v2555_v32 = vadd.f32 %v2207_v48, %v18086_v35  ;;  %v3400_v50 = vmul.f32 %v18087_v30, %v3158_v21  ;;  %v14474_v8 = vadd.f32 %v14265_v38, %v1683_v51  ;;  %v2209_v27 = vpop.f32.mrf.mxu0  ;;  %v3478_v38 = vmax.f32 %v3438_v23, 0.0  ;;  %v18092_v51 = vld [vmem:[#allocation66_spill] sm:$0xff] }
 0x272   : > { %v2797_v5 = vsel %vm2778_vm1, %v2756_v56, %v2757_v18  ;;  %v2717_v17 = vadd.f32 %v14033_v41, %v2553_v52  ;;  %4432 = vmatprep.mubr.bf16.mxu1 %v18029_v62  ;;  %v3439_v31 = vadd.f32 %v3399_v45, %v3078_v29  ;;  %v3079_v61 = vadd.f32 %v3039_v47, %v2716_v4  ;;  %v18093_v45 = vld [vmem:[#allocation146_spill] sm:$0xff]  ;;  %v18095_v29 = vld [vmem:[#allocation56_spill] sm:$0xff]  ;;  %v18096_v47 = vld [vmem:[#allocation67_spill] sm:$0xff] }
 0x273   : > { %v3040_v43 = vmul.f32 %v18088_v7, %v2797_v5  ;;  %v2758_v33 = vrot.slane %v2555_v32, 7  ;;  %v1467_v22 = vadd.f32 %v18090_v46, %v18089_v37  ;;  %v3401_v21 = vmul.f32 %v18091_v26, %v3157_v10  ;;  %v2211_v58 = vpop.f32.mrf.mxu0  ;;  %v18094_v4 = vld [vmem:[#allocation210_spill] sm:$0xff] }
 0x274   : > { %v2556_v9 = vadd.f32 %v2209_v27, %v18092_v51  ;;  %v3479_v56 = vmax.f32 %v3439_v31, 0.0  ;;  %v3440_v13 = vadd.f32 %v3400_v50, %v3079_v61  ;;  %v1471_v52 = vadd.f32 %v18094_v4, %v18093_v45  ;;  %v18097_v50 = vld [vmem:[#allocation147_spill] sm:$0xff] }
 0x275   : > { %v3080_v25 = vadd.f32 %v3040_v43, %v2717_v17  ;;  %v2796_v39 = vsel %vm2778_vm1, %v2757_v18, %v2758_v33  ;;  %v2558_v35 = vadd.f32 %v2211_v58, %v18096_v47  ;;  %v2213_v10 = vpop.f32.mrf.mxu0  ;;  %v3124_v23 = vrot.slane %v14474_v8, 1  ;;  %v18098_v17 = vld [vmem:[#allocation212_spill] sm:$0xff]  ;;  %v18099_v18 = vld [vmem:[#allocation58_spill] sm:$0xff] }
 0x276   : > { %v2718_v48 = vadd.f32 %v14033_v41, %v2556_v9  ;;  %v3041_v12 = vmul.f32 %v18095_v29, %v2796_v39  ;;  %v10577_v32 = vpack.c.bf16 %v3479_v56, %v3478_v38  ;;  %v2559_v5 = vadd.f32 %v2213_v10, %v1467_v22  ;;  %v18100_v38 = vld [vmem:[#allocation149_spill] sm:$0xff] }
 0x277   : > { %v3441_v30 = vadd.f32 %v3401_v21, %v3080_v25  ;;  %v1473_v27 = vadd.f32 %v18098_v17, %v18097_v50  ;;  %v3402_v31 = vmul.f32 %v18099_v18, %v14248_v53  ;;  %v2759_v7 = vrot.slane %v2558_v35, 7  ;;  %v2217_v37 = vpop.f32.mrf.mxu0  ;;  %v18101_v21 = vld [vmem:[#allocation214_spill] sm:$0xff]  ;;  %v18102_v25 = vld [vmem:[#allocation55_spill] sm:$0xff]  ;;  %v18106_v17 = vld [vmem:[#allocation152_spill] sm:$0xff] }
 0x278   : > { %v3081_v61 = vadd.f32 %v3041_v12, %v2718_v48  ;;  %v14497_v43 = vld [vmem:[#allocation3 + $0x40] sm:$0xff]   ;;  %10706 = vst [vmem:[#allocation3 + $0x48] sm:$0xff] %v10577_v32   ;;  %v3480_v46 = vmax.f32 %v3440_v13, 0.0  ;;  %v2719_v51 = vadd.f32 %v14033_v41, %v2559_v5  ;;  %v2561_v8 = vadd.f32 %v2217_v37, %v1471_v52  ;;  %v18104_v48 = vld [vmem:[#allocation216_spill] sm:$0xff]  ;;  %v18105_v12 = vld [vmem:[#allocation57_spill] sm:$0xff] }
 0x279   : > { %v3481_v26 = vmax.f32 %v3441_v30, 0.0  ;;  %v1475_v22 = vadd.f32 %v18101_v21, %v18100_v38  ;;  %v2795_v58 = vsel %vm2778_vm1, %v2758_v33, %v2759_v7  ;;  %4433 = vmatmul.mubr.bf16.gmra.mxu1 %v14497_v43  ;;  %11162 = vmatmul.mubr.bf16.gmra.mxu0 %v14497_v43  ;;  %v2219_v53 = vpop.f32.mrf.mxu0  ;;  %v18103_v52 = vld [vmem:[#allocation151_spill] sm:$0xff]  ;;  %v3403_v47 = vmul.f32 %v18105_v12, %v14295_v60  ;;  %v18110_v37 = vld [vmem:[#allocation220_spill] sm:$0xff] }
 0x27a   : > { %v3442_v9 = vadd.f32 %v3402_v31, %v3081_v61  ;;  %v3042_v39 = vmul.f32 %v18102_v25, %v2795_v58  ;;  %v2760_v13 = vrot.slane %v2561_v8, 7  ;;  %v2562_v45 = vadd.f32 %v2219_v53, %v1473_v27  ;;  %4442 = vmatprep.mubr.bf16.mxu1 %v18029_v62  ;;  %v4364_v4 = vpop.f32.mrf.mxu1  ;;  %v18107_v27 = vld [vmem:[#allocation218_spill] sm:$0xff]  ;;  %v18108_v31 = vld [vmem:[#allocation60_spill] sm:$0xff] }
 0x27b   : > { %v10582_v56 = vpack.c.bf16 %v3481_v26, %v3480_v46  ;;  %v1477_v29 = vadd.f32 %v18104_v48, %v18103_v52  ;;  %v3154_v33 = vsel %vm3139_vm0, %v3123_v11, %v3124_v23  ;;  %v2221_v35 = vpop.f32.mrf.mxu0  ;;  %v1481_v18 = vadd.f32 %v18107_v27, %v18106_v17  ;;  %v18113_v4 = vld [vmem:[#allocation222_spill] sm:$0xff]  ;;  %v18114_v48 = vld [vmem:[#allocation59_spill] sm:$0xff]  ;;  %v18115_v12 = vld [vmem:[#allocation112_spill] sm:$0xff] }
 0x27c   : > { %v3082_v10 = vadd.f32 %v3042_v39, %v2719_v51  ;;  %v2794_v32 = vsel %vm2778_vm1, %v2759_v7, %v2760_v13  ;;  %v2720_v30 = vadd.f32 %v14033_v41, %v2562_v45  ;;  %v2564_v5 = vadd.f32 %v2221_v35, %v1475_v22  ;;  %v4366_v50 = vpop.f32.mrf.mxu1  ;;  %v18111_v7 = vld [vmem:[#allocation62_spill] sm:$0xff]  ;;  %v14538_v39 = vld [vmem:[%s17656_s4] ss:$0 sm:$0xff]  ;;  %v18119_v17 = vld [vmem:[#allocation61_spill] sm:$0xff] }
 0x27d   : > { %10707 = vst [vmem:[#allocation3 + $0x50] sm:$0xff] %v10582_v56   ;;  %v3043_v60 = vmul.f32 %v18108_v31, %v2794_v32  ;;  %v2223_v61 = vpop.f32.mrf.mxu0  ;;  %v1483_v46 = vadd.f32 %v18110_v37, %v18109_v20  ;;  %v3153_v41 = vsel %vm3139_vm0, %v3124_v23, %v3125_v54  ;;  %v3404_v38 = vmul.f32 %v18111_v7, %v3154_v33  ;;  %v18112_v23 = vld [vmem:[#allocation156_spill] sm:$0xff] }
 0x27e   : > { %v3443_v11 = vadd.f32 %v3403_v47, %v3082_v10  ;;  %v2761_v26 = vrot.slane %v2564_v5, 7  ;;  %v2565_v8 = vadd.f32 %v2223_v61, %v1477_v29  ;;  %v14524_v51 = vpop.f32.mrf.mxu1  ;;  %v3482_v21 = vmax.f32 %v3442_v9, 0.0  ;;  %v18116_v47 = vld [vmem:[#allocation255_spill] sm:$0xff]  ;;  %v18118_v5 = vld [vmem:[#allocation224_spill] sm:$0xff] }
 0x27f   : > { %v3083_v22 = vadd.f32 %v3043_v60, %v2720_v30  ;;  %v14531_v58 = vld [vmem:[#allocation3 + $0x48] sm:$0xff]   ;;  %v2227_v53 = vpop.f32.mrf.mxu0  ;;  %v1485_v9 = vadd.f32 %v18113_v4, %v18112_v23  ;;  %v1699_v33 = vadd.f32 %v18116_v47, %v18115_v12  ;;  %v18117_v30 = vld [vmem:[#allocation157_spill] sm:$0xff]  ;;  %v3405_v27 = vmul.f32 %v18119_v17, %v3153_v41  ;;  %v18121_v41 = vld [vmem:[#allocation159_spill] sm:$0xff] }
 0x280   : > { %v3483_v56 = vmax.f32 %v3443_v11, 0.0  ;;  %v2793_v25 = vsel %vm2778_vm1, %v2760_v13, %v2761_v26  ;;  %v2721_v28 = vadd.f32 %v14538_v39, %v2565_v8  ;;  %v2567_v45 = vadd.f32 %v2227_v53, %v1481_v18  ;;  %v4370_v54 = vpop.f32.mrf.mxu1  ;;  %11165 = vmatprep.mubr.bf16.mxu0 %v14531_v58  ;;  %v18120_v8 = vld [vmem:[#allocation65_spill] sm:$0xff] }
 0x281   : > { %v3444_v52 = vadd.f32 %v3404_v38, %v3083_v22  ;;  %v3044_v29 = vmul.f32 %v18114_v48, %v2793_v25  ;;  %4443 = vmatmul.mubr.bf16.gmra.mxu1 %v14531_v58  ;;  %v2229_v13 = vpop.f32.mrf.mxu0  ;;  %v1487_v50 = vadd.f32 %v18118_v5, %v18117_v30  ;;  %v2578_v61 = vadd.f32 %v14322_v19, %v1699_v33  ;;  %v18123_v53 = vld [vmem:[#allocation161_spill] sm:$0xff]  ;;  %v18127_v5 = vld [vmem:[#allocation162_spill] sm:$0xff] }
 0x282   : > { %v10587_v35 = vpack.c.bf16 %v3483_v56, %v3482_v21  ;;  %v2762_v10 = vrot.slane %v2567_v45, 7  ;;  %v2568_v32 = vadd.f32 %v2229_v13, %v1483_v46  ;;  %4452 = vmatprep.mubr.bf16.mxu1 %v18029_v62  ;;  %v18122_v21 = vld [vmem:[#allocation226_spill] sm:$0xff]  ;;  %v18124_v56 = vld [vmem:[#allocation228_spill] sm:$0xff] }
 0x283   : > { %v3084_v18 = vadd.f32 %v3044_v29, %v2721_v28  ;;  %v2231_v31 = vpop.f32.mrf.mxu0  ;;  %v1491_v22 = vadd.f32 %v18122_v21, %v18121_v41  ;;  %v1493_v25 = vadd.f32 %v18124_v56, %v18123_v53  ;;  %v18125_v45 = vld [vmem:[#allocation70_spill] sm:$0xff]  ;;  %v3484_v54 = vmax.f32 %v3444_v52, 0.0  ;;  %v18132_v21 = vld [vmem:[#allocation75_spill] sm:$0xff] }
 0x284   : > { %v14552_v60 = vld [vmem:[#allocation3 + $0x50] sm:$0xff]   ;;  %10708 = vst [vmem:[#allocation3 + $0x58] sm:$0xff] %v10587_v35   ;;  %v2792_v20 = vsel %vm2778_vm1, %v2761_v26, %v2762_v10  ;;  %v2722_v37 = vadd.f32 %v14538_v39, %v2568_v32  ;;  %v2570_v46 = vadd.f32 %v2231_v31, %v1485_v9  ;;  %v3406_v26 = vmul.f32 %v18125_v45, %v14311_v2  ;;  %v18126_v35 = vld [vmem:[#allocation64_spill] sm:$0xff]  ;;  %v18128_v2 = vld [vmem:[#allocation230_spill] sm:$0xff] }
 0x285   : > { %v3445_v11 = vadd.f32 %v3405_v27, %v3084_v18  ;;  %v3045_v7 = vmul.f32 %v18120_v8, %v2792_v20  ;;  %v2233_v38 = vpop.f32.mrf.mxu0  ;;  %11166 = vmatmul.mubr.bf16.gmra.mxu0 %v14552_v60  ;;  %v3128_v48 = vrot.slane %v2578_v61, 1  ;;  %v1495_v52 = vadd.f32 %v18128_v2, %v18127_v5  ;;  %v18129_v27 = vld [vmem:[#allocation164_spill] sm:$0xff]  ;;  %v18131_v31 = vld [vmem:[#allocation69_spill] sm:$0xff]  ;;  %v18133_v53 = vld [vmem:[#allocation166_spill] sm:$0xff] }
 0x286   : > { %v2763_v19 = vrot.slane %v2570_v46, 7  ;;  %v2571_v28 = vadd.f32 %v2233_v38, %v1487_v50  ;;  %v18130_v18 = vld [vmem:[#allocation232_spill] sm:$0xff]  ;;  %v3407_v61 = vmul.f32 %v18131_v31, %v14352_v14  ;;  %v18134_v56 = vld [vmem:[#allocation234_spill] sm:$0xff]  ;;  %v18143_v31 = vld [vmem:[#allocation171_spill] sm:$0xff] }
 0x287   : > { %v3485_v23 = vmax.f32 %v3445_v11, 0.0  ;;  %v3085_v4 = vadd.f32 %v3045_v7, %v2722_v37  ;;  %v2237_v9 = vpop.f32.mrf.mxu0  ;;  %v3150_v11 = vsel %vm3139_vm0, %v3127_v55, %v3128_v48  ;;  %v18138_v5 = vld [vmem:[#allocation74_spill] sm:$0xff] }
 0x288   : > { %v2791_v29 = vsel %vm2778_vm1, %v2762_v10, %v2763_v19  ;;  %v2723_v13 = vadd.f32 %v14538_v39, %v2571_v28  ;;  %v2573_v12 = vadd.f32 %v2237_v9, %v1491_v22  ;;  %v1497_v10 = vadd.f32 %v18130_v18, %v18129_v27  ;;  %v18135_v28 = vld [vmem:[#allocation167_spill] sm:$0xff]  ;;  %v18142_v18 = vld [vmem:[#allocation260_spill] sm:$0xff] }
 0x289   : > { %v10592_v47 = vpack.c.bf16 %v3485_v23, %v3484_v54  ;;  %v3446_v33 = vadd.f32 %v3406_v26, %v3085_v4  ;;  %v3046_v32 = vmul.f32 %v18126_v35, %v2791_v29  ;;  %4453 = vmatmul.mubr.bf16.gmra.mxu1 %v14552_v60  ;;  %v2239_v30 = vpop.f32.mrf.mxu0  ;;  %v1503_v45 = vadd.f32 %v18136_v34, %v18135_v28  ;;  %v18137_v54 = vld [vmem:[#allocation80_spill] sm:$0xff]  ;;  %v18148_v34 = vld [vmem:[#allocation242_spill] sm:$0xff] }
 0x28a   : > { %v2764_v50 = vrot.slane %v2573_v12, 7  ;;  %v2574_v17 = vadd.f32 %v2239_v30, %v1493_v25  ;;  %4462 = vmatprep.mubr.bf16.mxu1 %v18029_v62  ;;  %v1501_v25 = vadd.f32 %v18134_v56, %v18133_v53  ;;  %v3408_v23 = vmul.f32 %v18137_v54, %v3150_v11  ;;  %v18146_v53 = vld [vmem:[#allocation85_spill] sm:$0xff]  ;;  %v18147_v28 = vld [vmem:[#allocation172_spill] sm:$0xff] }
 0x28b   : > { %10709 = vst [vmem:[#allocation3 + $0x60] sm:$0xff] %v10592_v47   ;;  %v3086_v20 = vadd.f32 %v3046_v32, %v2723_v13  ;;  %v2241_v37 = vpop.f32.mrf.mxu0  ;;  %v14578_v46 = vld [vmem:[#allocation3 + $0x58] sm:$0xff]   ;;  %v3149_v13 = vsel %vm3139_vm0, %v3128_v48, %v3129_v40  ;;  %v18150_v54 = vld [vmem:[#allocation244_spill] sm:$0xff] }
 0x28c   : > { %v2790_v8 = vsel %vm2778_vm1, %v2763_v19, %v2764_v50  ;;  %v2724_v7 = vadd.f32 %v14538_v39, %v2574_v17  ;;  %v2576_v38 = vadd.f32 %v2241_v37, %v1495_v52  ;;  %11169 = vmatprep.mubr.bf16.mxu0 %v14578_v46  ;;  %v3486_v19 = vmax.f32 %v3446_v33, 0.0  ;;  %v18139_v52 = vld [vmem:[#allocation169_spill] sm:$0xff]  ;;  %v18140_v17 = vld [vmem:[#allocation238_spill] sm:$0xff]  ;;  %v18145_v37 = vld [vmem:[#allocation79_spill] sm:$0xff] }
 0x28d   : > { %v3447_v41 = vadd.f32 %v3407_v61, %v3086_v20  ;;  %v3047_v22 = vmul.f32 %v18132_v21, %v2790_v8  ;;  %v2243_v14 = vpop.f32.mrf.mxu0  ;;  %v1505_v27 = vadd.f32 %v18140_v17, %v18139_v52  ;;  %v18144_v61 = vld [vmem:[#allocation240_spill] sm:$0xff]  ;;  %v3409_v11 = vmul.f32 %v18145_v37, %v3149_v13 }
 0x28e   : > { %v2765_v26 = vrot.slane %v2576_v38, 7  ;;  %v2577_v55 = vadd.f32 %v2243_v14, %v1497_v10  ;;  %v1715_v10 = vadd.f32 %v18142_v18, %v18141_v6  ;;  %v1507_v20 = vadd.f32 %v18144_v61, %v18143_v31  ;;  %v18152_v52 = vld [vmem:[#allocation84_spill] sm:$0xff] }
 0x28f   : > { %v3487_v4 = vmax.f32 %v3447_v41, 0.0  ;;  %v3087_v9 = vadd.f32 %v3047_v22, %v2724_v7  ;;  %v2247_v29 = vpop.f32.mrf.mxu0  ;;  %v18153_v6 = vld [vmem:[#allocation176_spill] sm:$0xff] }
 0x290   : > { %v2789_v12 = vsel %vm2778_vm1, %v2764_v50, %v2765_v26  ;;  %v2725_v47 = vadd.f32 %v14538_v39, %v2577_v55  ;;  %v2579_v35 = vadd.f32 %v2247_v29, %v1501_v25  ;;  %v2590_v38 = vadd.f32 %v14373_v16, %v1715_v10  ;;  %v18149_v55 = vld [vmem:[#allocation174_spill] sm:$0xff]  ;;  %v18156_v31 = vld [vmem:[#allocation248_spill] sm:$0xff] }
 0x291   : > { %v10597_v32 = vpack.c.bf16 %v3487_v4, %v3486_v19  ;;  %v3448_v30 = vadd.f32 %v3408_v23, %v3087_v9  ;;  %v3048_v2 = vmul.f32 %v18138_v5, %v2789_v12  ;;  %4463 = vmatmul.mubr.bf16.gmra.mxu1 %v14578_v46  ;;  %v2249_v33 = vpop.f32.mrf.mxu0  ;;  %v1513_v23 = vadd.f32 %v18150_v54, %v18149_v55  ;;  %v18151_v4 = vld [vmem:[#allocation90_spill] sm:$0xff]  ;;  %v18163_v54 = vld [vmem:[#allocation100_spill] sm:$0xff] }
 0x292   : > { %v2766_v40 = vrot.slane %v2579_v35, 7  ;;  %v2580_v48 = vadd.f32 %v2249_v33, %v1503_v45  ;;  %4472 = vmatprep.mubr.bf16.mxu1 %v18029_v62  ;;  %v14608_v50 = vld [vmem:[#allocation3 + $0x60] sm:$0xff]   ;;  %v1511_v45 = vadd.f32 %v18148_v34, %v18147_v28  ;;  %v18161_v34 = vld [vmem:[#allocation181_spill] sm:$0xff] }
 0x293   : > { %10710 = vst [vmem:[#allocation3 + $0x68] sm:$0xff] %v10597_v32   ;;  %v3088_v8 = vadd.f32 %v3048_v2, %v2725_v47  ;;  %v2251_v7 = vpop.f32.mrf.mxu0  ;;  %11170 = vmatmul.mubr.bf16.gmra.mxu0 %v14608_v50  ;;  %v3488_v9 = vmax.f32 %v3448_v30, 0.0  ;;  %v3132_v47 = vrot.slane %v2590_v38, 1 }
 0x294   : > { %v2788_v41 = vsel %vm2778_vm1, %v2765_v26, %v2766_v40  ;;  %v2726_v21 = vadd.f32 %v14538_v39, %v2580_v48  ;;  %v2582_v22 = vadd.f32 %v2251_v7, %v1505_v27  ;;  %v3410_v26 = vmul.f32 %v18151_v4, %v14365_v59  ;;  %v18154_v59 = vld [vmem:[#allocation246_spill] sm:$0xff] }
 0x295   : > { %v3449_v14 = vadd.f32 %v3409_v11, %v3088_v8  ;;  %v3049_v56 = vmul.f32 %v18146_v53, %v2788_v41  ;;  %v2253_v25 = vpop.f32.mrf.mxu0  ;;  %v1515_v30 = vadd.f32 %v18154_v59, %v18153_v6  ;;  %v3146_v7 = vsel %vm3139_vm0, %v3131_v42, %v3132_v47 }
 0x296   : > { %v2767_v19 = vrot.slane %v2582_v22, 7  ;;  %v2583_v16 = vadd.f32 %v2253_v25, %v1507_v20  ;;  %v18157_v20 = vld [vmem:[#allocation89_spill] sm:$0xff]  ;;  %v18160_v25 = vld [vmem:[#allocation250_spill] sm:$0xff] }
 0x297   : > { %v3489_v29 = vmax.f32 %v3449_v14, 0.0  ;;  %v3089_v13 = vadd.f32 %v3049_v56, %v2726_v21  ;;  %v2257_v12 = vpop.f32.mrf.mxu0  ;;  %v3411_v37 = vmul.f32 %v18157_v20, %v14409_v63  ;;  %v18158_v14 = vld [vmem:[#allocation95_spill] sm:$0xff] }
 0x298   : > { %v2787_v35 = vsel %vm2778_vm1, %v2766_v40, %v2767_v19  ;;  %v2727_v32 = vadd.f32 %v14538_v39, %v2583_v16  ;;  %v2585_v5 = vadd.f32 %v2257_v12, %v1511_v45  ;;  %v18155_v40 = vld [vmem:[#allocation177_spill] sm:$0xff]  ;;  %v18159_v56 = vld [vmem:[#allocation179_spill] sm:$0xff]  ;;  %v1523_v45 = vadd.f32 %v18162_v15, %v18161_v34 }
 0x299   : > { %v10602_v2 = vpack.c.bf16 %v3489_v29, %v3488_v9  ;;  %v3450_v33 = vadd.f32 %v3410_v26, %v3089_v13  ;;  %v3050_v17 = vmul.f32 %v18152_v52, %v2787_v35  ;;  %4473 = vmatmul.mubr.bf16.gmra.mxu1 %v14608_v50  ;;  %v2259_v27 = vpop.f32.mrf.mxu0  ;;  %v1517_v61 = vadd.f32 %v18156_v31, %v18155_v40  ;;  %v18165_v52 = vld [vmem:[#allocation183_spill] sm:$0xff]  ;;  %v18169_v40 = vld [vmem:[#allocation256_spill] sm:$0xff] }
 0x29a   : > { %v2768_v18 = vrot.slane %v2585_v5, 7  ;;  %v2586_v10 = vadd.f32 %v2259_v27, %v1513_v23  ;;  %4482 = vmatprep.mubr.bf16.mxu1 %v18029_v62  ;;  %v14633_v48 = vld [vmem:[#allocation3 + $0x68] sm:$0xff]   ;;  %v1521_v28 = vadd.f32 %v18160_v25, %v18159_v56  ;;  %v3412_v23 = vmul.f32 %v18163_v54, %v3146_v7  ;;  %v18164_v5 = vld [vmem:[#allocation94_spill] sm:$0xff] }
 0x29b   : > { %10711 = vst [vmem:[#allocation3 + $0x70] sm:$0xff] %v10602_v2   ;;  %v3090_v11 = vadd.f32 %v3050_v17, %v2727_v32  ;;  %v2261_v8 = vpop.f32.mrf.mxu0  ;;  %11173 = vmatprep.mubr.bf16.mxu0 %v14633_v48  ;;  %v3145_v9 = vsel %vm3139_vm0, %v3132_v47, %v3133_v49  ;;  %v18166_v17 = vld [vmem:[#allocation254_spill] sm:$0xff]  ;;  %v18167_v47 = vld [vmem:[#allocation99_spill] sm:$0xff] }
 0x29c   : > { %v2786_v38 = vsel %vm2778_vm1, %v2767_v19, %v2768_v18  ;;  %v2728_v41 = vadd.f32 %v14538_v39, %v2586_v10  ;;  %v2588_v21 = vadd.f32 %v2261_v8, %v1515_v30  ;;  %v3490_v19 = vmax.f32 %v3450_v33, 0.0  ;;  %v18168_v10 = vld [vmem:[#allocation186_spill] sm:$0xff]  ;;  %v18170_v8 = vld [vmem:[#allocation107_spill] sm:$0xff] }
 0x29d   : > { %v3451_v22 = vadd.f32 %v3411_v37, %v3090_v11  ;;  %v3051_v53 = vmul.f32 %v18158_v14, %v2786_v38  ;;  %v2263_v63 = vpop.f32.mrf.mxu0  ;;  %v1525_v27 = vadd.f32 %v18166_v17, %v18165_v52  ;;  %v3413_v59 = vmul.f32 %v18167_v47, %v3145_v9  ;;  %v11722_v17 = vld [vmem:[#allocation6 + $0x228] ss:$12 sps:$4 sm:$0xff]   ;;  %v11725_v47 = vld [vmem:[#allocation6 + $0x210] ss:$12 sps:$4 sm:$0xff]  }
 0x29e   : > { %v2769_v55 = vrot.slane %v2588_v21, 7  ;;  %v2589_v42 = vadd.f32 %v2263_v63, %v1517_v61  ;;  %v1527_v31 = vadd.f32 %v18169_v40, %v18168_v10  ;;  %v11970_v10 = vld [vmem:[#allocation3 + $0x18] sm:$0xff]   ;;  %v11971_v40 = vld [vmem:[#allocation3 + $0x20] sm:$0xff]  }
 0x29f   : > { %v3491_v16 = vmax.f32 %v3451_v22, 0.0  ;;  %v3091_v4 = vadd.f32 %v3051_v53, %v2728_v41  ;;  %v2267_v26 = vpop.f32.mrf.mxu0  ;;  %v18171_v22 = vld [vmem:[#allocation115_spill] sm:$0xff] }
 0x2a0   : > { %v2785_v29 = vsel %vm2778_vm1, %v2768_v18, %v2769_v55  ;;  %v2729_v13 = vadd.f32 %v14538_v39, %v2589_v42  ;;  %v2591_v12 = vadd.f32 %v2267_v26, %v1521_v28  ;;  %v3414_v14 = vmul.f32 %v18171_v22, %v14420_v36  ;;  %v18173_v36 = vld [vmem:[#allocation113_spill] sm:$0xff]  ;;  %v11743_v22 = vld [vmem:[#allocation6 + $0x198] ss:$12 sps:$4 sm:$0xff]  }
 0x2a1   : > { %v10607_v35 = vpack.c.bf16 %v3491_v16, %v3490_v19  ;;  %v3452_v32 = vadd.f32 %v3412_v23, %v3091_v4  ;;  %v3052_v2 = vmul.f32 %v18164_v5, %v2785_v29  ;;  %4483 = vmatmul.mubr.bf16.gmra.mxu1 %v14633_v48  ;;  %v2269_v33 = vpop.f32.mrf.mxu0  ;;  %v3415_v19 = vmul.f32 %v18173_v36, %v14453_v57 }
 0x2a2   : > { %v2770_v3 = vrot.slane %v2591_v12, 7  ;;  %v2592_v6 = vadd.f32 %v2269_v33, %v1523_v45  ;;  %4492 = vmatprep.mubr.bf16.mxu1 %v18029_v62  ;;  %v14665_v49 = vld [vmem:[#allocation3 + $0x70] sm:$0xff]   ;;  %v11720_v33 = vld [vmem:[#allocation3] sm:$0xff]  }
 0x2a3   : > { %10712 = vst [vmem:[#allocation3 + $0x78] sm:$0xff] %v10607_v35   ;;  %v3092_v30 = vadd.f32 %v3052_v2, %v2729_v13  ;;  %v2271_v18 = vpop.f32.mrf.mxu0  ;;  %11174 = vmatmul.mubr.bf16.gmra.mxu0 %v14665_v49  ;;  %v3492_v53 = vmax.f32 %v3452_v32, 0.0  ;;  %v11717_v2 = vld [vmem:[#allocation3 + $0x90] sm:$0xff]  }
 0x2a4   : > { %v2784_v61 = vsel %vm2778_vm1, %v2769_v55, %v2770_v3  ;;  %v2730_v20 = vadd.f32 %v14538_v39, %v2592_v6  ;;  %v2594_v37 = vadd.f32 %v2271_v18, %v1525_v27  ;;  %v18172_v55 = vld [vmem:[#allocation105_spill] sm:$0xff] }
 0x2a5   : > { %v3453_v11 = vadd.f32 %v3413_v59, %v3092_v30  ;;  %v3053_v7 = vmul.f32 %v18170_v8, %v2784_v61  ;;  %v2273_v38 = vpop.f32.mrf.mxu0  ;;  %v11727_v27 = vld [vmem:[#allocation6 + $0x214] ss:$12 sps:$4 sm:$0xff]   ;;  %v11731_v59 = vld [vmem:[#allocation6 + $0x1fc] ss:$12 sps:$4 sm:$0xff]   ;;  %v11729_v30 = vld [vmem:[#allocation6 + $0x1f8] ss:$12 sps:$4 sm:$0xff]  }
 0x2a6   : > { %v2771_v41 = vrot.slane %v2594_v37, 7  ;;  %v2595_v21 = vadd.f32 %v2273_v38, %v1527_v31  ;;  %v11969_v6 = vld [vmem:[#allocation3 + $0x10] sm:$0xff]   ;;  %v11728_v31 = vld [vmem:[#allocation6 + $0x218] ss:$12 sps:$4 sm:$0xff]   ;;  %v11732_v61 = vld [vmem:[#allocation6 + $0x1e0] ss:$12 sps:$4 sm:$0xff]  }
 0x2a7   : > { %v3493_v63 = vmax.f32 %v3453_v11, 0.0  ;;  %v3093_v56 = vadd.f32 %v3053_v7, %v2730_v20  ;;  %v2277_v25 = vpop.f32.mrf.mxu0  ;;  %v11734_v18 = vld [vmem:[#allocation6 + $0x1e4] ss:$12 sps:$4 sm:$0xff]   ;;  %v11738_v20 = vld [vmem:[#allocation6 + $0x1cc] ss:$12 sps:$4 sm:$0xff]  }
 0x2a8   : > { %v2783_v28 = vsel %vm2778_vm1, %v2770_v3, %v2771_v41  ;;  %v2731_v34 = vadd.f32 %v14538_v39, %v2595_v21  ;;  %v11968_v3 = vld [vmem:[#allocation3 + $0x8] sm:$0xff]   ;;  %v11972_v37 = vld [vmem:[#allocation6 + $0x230] ss:$12 sps:$4 sm:$0xff]   ;;  %v11741_v7 = vld [vmem:[#allocation6 + $0x1b4] ss:$12 sps:$4 sm:$0xff]  }
 0x2a9   : > { %v10612_v15 = vpack.c.bf16 %v3493_v63, %v3492_v53  ;;  %v3454_v45 = vadd.f32 %v3414_v14, %v3093_v56  ;;  %v3054_v42 = vmul.f32 %v18172_v55, %v2783_v28  ;;  %4493 = vmatmul.mubr.bf16.gmra.mxu1 %v14665_v49  ;;  %v2279_v54 = vpop.f32.mrf.mxu0  ;;  %v11735_v11 = vld [vmem:[#allocation6 + $0x200] ss:$12 sps:$4 sm:$0xff]   ;;  %v11736_v8 = vld [vmem:[#allocation6 + $0x1c8] ss:$12 sps:$4 sm:$0xff]   ;;  %v11739_v38 = vld [vmem:[#allocation6 + $0x1b0] ss:$12 sps:$4 sm:$0xff]  }
 0x2aa   : > { %4502 = vmatprep.mubr.bf16.mxu1 %v18029_v62  ;;  %v14683_v23 = vld [vmem:[#allocation3 + $0x78] sm:$0xff]   ;;  %v11742_v41 = vld [vmem:[#allocation6 + $0x1e8] ss:$12 sps:$4 sm:$0xff]   ;;  %v11748_v53 = vld [vmem:[#allocation6 + $0x184] ss:$12 sps:$4 sm:$0xff]  }
 0x2ab   : > { %10713 = vst [vmem:[#allocation3 + $0x80] sm:$0xff] %v10612_v15   ;;  %v3094_v16 = vadd.f32 %v3054_v42, %v2731_v34  ;;  %v2281_v4 = vpop.f32.mrf.mxu0  ;;  %11177 = vmatprep.mubr.bf16.mxu0 %v14683_v23  ;;  %v3494_v9 = vmax.f32 %v3454_v45, 0.0  ;;  %v11745_v21 = vld [vmem:[#allocation6 + $0x19c] ss:$12 sps:$4 sm:$0xff]   ;;  %v11754_v63 = vld [vmem:[#allocation6 + $0x1b8] ss:$12 sps:$4 sm:$0xff]  }
 0x2ac   : > { %v11750_v14 = vld [vmem:[#allocation6 + $0x1d0] ss:$12 sps:$4 sm:$0xff]   ;;  %v11757_v56 = vld [vmem:[#allocation6 + $0x1a0] ss:$12 sps:$4 sm:$0xff]   ;;  %v11760_v25 = vld [vmem:[#allocation6 + $0x188] ss:$12 sps:$4 sm:$0xff]  }
 0x2ad   : > { %v3455_v39 = vadd.f32 %v3415_v19, %v3094_v16  ;;  %v2283_v26 = vpop.f32.mrf.mxu0  ;;  %v11973_v28 = vld [vmem:[#allocation3 + $0x28] sm:$0xff]   ;;  %v14737_v19 = vld [vmem:[#allocation3 + $0x10] sm:$0xff]  }
 0x2af   : > { %v3495_v29 = vmax.f32 %v3455_v39, 0.0  ;;  %v2287_v13 = vpop.f32.mrf.mxu0  ;;  %v14749_v39 = vld [vmem:[#allocation3 + $0x18] sm:$0xff]  }
 0x2b0   : > { %v14763_v13 = vld [vmem:[#allocation3 + $0x20] sm:$0xff]  }
 0x2b1   : > { %v10617_v12 = vpack.c.bf16 %v3495_v29, %v3494_v9  ;;  %4503 = vmatmul.mubr.bf16.gmra.mxu1 %v14683_v23  ;;  %v2289_v35 = vpop.f32.mrf.mxu0 }
 0x2b2   : > { %4512 = vmatprep.mubr.bf16.mxu1 %v18029_v62  ;;  %v14690_v32 = vld [vmem:[#allocation3 + $0x80] sm:$0xff]  }
 0x2b3   : > { %10714 = vst [vmem:[#allocation3 + $0x88] sm:$0xff] %v10617_v12   ;;  %v2291_v57 = vpop.f32.mrf.mxu0  ;;  %11178 = vmatmul.mubr.bf16.gmra.mxu0 %v14690_v32 }
 0x2b5   : > { %v2293_v5 = vpop.f32.mrf.mxu0 }
 0x2b9   : > { %4513 = vmatmul.mubr.bf16.gmra.mxu1 %v14690_v32 }
 0x2ba   : > { %4522 = vmatprep.mubr.bf16.mxu1 %v18029_v62  ;;  %v14695_v52 = vld [vmem:[#allocation3 + $0x88] sm:$0xff]  }
 0x2bb   : > { %11181 = vmatprep.mubr.bf16.mxu0 %v14695_v52 }
 0x2bc   : > { %11182 = vmatmul.mubr.bf16.gmra.mxu0 %v11717_v2 }
 0x2bd   : > { %11201 = vmatprep.mubr.bf16.mxu0 %v11720_v33 }
 0x2c1   : > { %4523 = vmatmul.mubr.bf16.gmra.mxu1 %v14695_v52 }
 0x2c2   : > { %4532 = vmatprep.mubr.bf16.mxu1 %v18029_v62 }
 0x2c4   : > { %11202 = vmatmul.mubr.bf16.vlgmr.msra.gmra.mxu0 %v11968_v3 }
 0x2c5   : > { %11205 = vmatprep.mubr.bf16.mxu0 %v11969_v6  ;;  %5550 = vmatpush1.bf16.msra.mxu0 %v11722_v17 }
 0x2c6   : > { %5551 = vmatprep.subr.bf16.mxu0 %v11727_v27 }
 0x2c9   : > { %4533 = vmatmul.mubr.bf16.gmra.mxu1 %v11717_v2  ;;  %5552 = vmatpush1.bf16.msra.mxu0 %v11725_v47  ;;  %v14779_v2 = vld [vmem:[#allocation3 + $0x28] sm:$0xff]  }
 0x2ca   : > { %4886 = vmatprep.mubr.bf16.mxu1 %v18029_v62  ;;  %5553 = vmatprep.subr.bf16.mxu0 %v11731_v59 }
 0x2cc   : > { %11206 = vmatmul.mubr.bf16.gmra.mxu0 %v11970_v10 }
 0x2cd   : > { %11209 = vmatprep.mubr.bf16.mxu0 %v11971_v40  ;;  %5554 = vmatpush1.bf16.msra.mxu0 %v11729_v30 }
 0x2ce   : > { %5555 = vmatprep.subr.bf16.mxu0 %v11734_v18 }
 0x2d1   : > { %4887 = vmatmul.mubr.bf16.vlgmr.msra.gmra.mxu1 %v11720_v33  ;;  %5556 = vmatpush1.bf16.msra.mxu0 %v11732_v61 }
 0x2d2   : > { %11238 = vmatpush3.bf16.msra.mxu1 %v11972_v37  ;;  %4896 = vmatprep.mubr.bf16.mxu1 %v18029_v62 }
 0x2d3   : > { %11239 = vmatprep.subr.bf16.mxu1 %v11728_v31  ;;  %5557 = vmatprep.subr.bf16.mxu0 %v11738_v20 }
 0x2d4   : > { %11210 = vmatmul.mubr.bf16.gmra.mxu0 %v14356_v0  ;;  %v11746_v0 = vld [vmem:[#allocation6 + $0x180] ss:$12 sps:$4 sm:$0xff]  }
 0x2d5   : > { %11213 = vmatprep.mubr.bf16.mxu0 %v14426_v1  ;;  %5558 = vmatpush1.bf16.msra.mxu0 %v11736_v8 }
 0x2d6   : > { %11240 = vmatpush3.bf16.msra.mxu1 %v11728_v31  ;;  %5559 = vmatprep.subr.bf16.mxu0 %v11741_v7  ;;  %v14815_v31 = vld [vmem:[#allocation3 + $0x38] sm:$0xff]  }
 0x2d7   : > { %11241 = vmatprep.subr.bf16.mxu1 %v11735_v11 }
 0x2d9   : > { %4897 = vmatmul.mubr.bf16.gmra.mxu1 %v11968_v3  ;;  %5560 = vmatpush1.bf16.msra.mxu0 %v11739_v38  ;;  %v14833_v38 = vld [vmem:[#allocation3 + $0x40] sm:$0xff]  }
 0x2da   : > { %4906 = vmatprep.mubr.bf16.mxu1 %v18029_v62  ;;  %11242 = vmatpush3.bf16.msra.mxu1 %v11735_v11  ;;  %v11771_v11 = vld [vmem:[#allocation8 + $0x170] ss:$12 sps:$4 sm:$0xff]  }
 0x2db   : > { %11243 = vmatprep.subr.bf16.mxu1 %v11742_v41  ;;  %5561 = vmatprep.subr.bf16.mxu0 %v11745_v21 }
 0x2dc   : > { %11214 = vmatmul.mubr.bf16.gmra.mxu0 %v14462_v44 }
 0x2dd   : > { %11217 = vmatprep.mubr.bf16.mxu0 %v14497_v43  ;;  %5562 = vmatpush1.bf16.msra.mxu0 %v11743_v22 }
 0x2de   : > { %11244 = vmatpush3.bf16.msra.mxu1 %v11742_v41  ;;  %5563 = vmatprep.subr.bf16.mxu0 %v11748_v53 }
 0x2df   : > { %11245 = vmatprep.subr.bf16.mxu1 %v11750_v14 }
 0x2e1   : > { %4907 = vmatmul.mubr.bf16.gmra.mxu1 %v11969_v6  ;;  %5564 = vmatpush1.bf16.msra.mxu0 %v11746_v0  ;;  %v14795_v6 = vld [vmem:[#allocation3 + $0x30] sm:$0xff]   ;;  %v14851_v0 = vld [vmem:[#allocation3 + $0x48] sm:$0xff]  }
 0x2e2   : > { %4916 = vmatprep.mubr.bf16.mxu1 %v18029_v62  ;;  %11246 = vmatpush3.bf16.msra.mxu1 %v11750_v14 }
 0x2e3   : > { %11247 = vmatprep.subr.bf16.mxu1 %v11754_v63  ;;  %11289 = vmatprep.subr.bf16.mxu0 %v11771_v11 }
 0x2e4   : > { %11218 = vmatmul.mubr.bf16.gmra.mxu0 %v14531_v58 }
 0x2e5   : > { %11221 = vmatprep.mubr.bf16.mxu0 %v14552_v60 }
 0x2e6   : > { %11248 = vmatpush3.bf16.msra.mxu1 %v11754_v63 }
 0x2e7   : > { %11249 = vmatprep.subr.bf16.mxu1 %v11757_v56 }
 0x2e9   : > { %4917 = vmatmul.mubr.bf16.gmra.mxu1 %v11970_v10 }
 0x2ea   : > { %4926 = vmatprep.mubr.bf16.mxu1 %v18029_v62  ;;  %11250 = vmatpush3.bf16.msra.mxu1 %v11757_v56 }
 0x2eb   : > { %11251 = vmatprep.subr.bf16.mxu1 %v11760_v25 }
 0x2ec   : > { %11222 = vmatmul.mubr.bf16.gmra.mxu0 %v14578_v46 }
 0x2ed   : > { %11225 = vmatprep.mubr.bf16.mxu0 %v14608_v50 }
 0x2ee   : > { %11252 = vmatpush3.bf16.msra.mxu1 %v11760_v25 }
 0x2f1   : > { %4927 = vmatmul.mubr.bf16.gmra.mxu1 %v11971_v40 }
 0x2f2   : > { %4936 = vmatprep.mubr.bf16.mxu1 %v18029_v62 }
 0x2f4   : > { %11226 = vmatmul.mubr.bf16.gmra.mxu0 %v14633_v48 }
 0x2f5   : > { %11229 = vmatprep.mubr.bf16.mxu0 %v14665_v49 }
 0x2f9   : > { %4937 = vmatmul.mubr.bf16.gmra.mxu1 %v11973_v28 }
 0x2fa   : > { %4946 = vmatprep.mubr.bf16.mxu1 %v18029_v62 }
 0x2fc   : > { %11230 = vmatmul.mubr.bf16.gmra.mxu0 %v14683_v23 }
 0x2fd   : > { %11233 = vmatprep.mubr.bf16.mxu0 %v14690_v32 }
 0x301   : > { %4947 = vmatmul.mubr.bf16.gmra.mxu1 %v14426_v1 }
 0x302   : > { %4956 = vmatprep.mubr.bf16.mxu1 %v18029_v62 }
 0x304   : > { %v14721_v34 = vpop.f32.mrf.mxu1  ;;  %v14723_v15 = vpop.f32.mrf.mxu0  ;;  %11234 = vmatmul.mubr.bf16.gmra.mxu0 %v14695_v52 }
 0x305   : > { %5581 = vmatprep.mubr.bf16.mxu0 %v18029_v62 }
 0x306   : > { %v14727_v45 = vpop.f32.mrf.mxu1  ;;  %v4577_v55 = vpop.f32.mrf.mxu0 }
 0x308   : > { %v14730_v42 = vpop.f32.mrf.mxu1  ;;  %v14732_v54 = vpop.f32.mrf.mxu0 }
 0x309   : > { %4957 = vmatmul.mubr.bf16.gmra.mxu1 %v14462_v44 }
 0x30a   : > { %4966 = vmatprep.mubr.bf16.mxu1 %v18029_v62  ;;  %v14735_v1 = vpop.f32.mrf.mxu1  ;;  %v4580_v36 = vpop.f32.mrf.mxu0 }
 0x30b   : > { %18174 = vst [vmem:[#allocation117_spill] sm:$0xff] %v14735_v1  ;;  %v11772_v36 = vld [vmem:[#allocation8 + $0x158] ss:$12 sps:$4 sm:$0xff]  }
 0x30c   : > { %5582 = vmatmul.mubr.bf16.vlgmr.msra.gmra.mxu0 %v14737_v19 }
 0x30d   : > { %5591 = vmatprep.mubr.bf16.mxu0 %v18029_v62  ;;  %11290 = vmatpush3.bf16.msra.mxu0 %v11771_v11 }
 0x30e   : > { %v14741_v16 = vpop.f32.mrf.mxu1  ;;  %11291 = vmatprep.subr.bf16.mxu0 %v11772_v36 }
 0x310   : > { %v14744_v44 = vpop.f32.mrf.mxu1 }
 0x311   : > { %4967 = vmatmul.mubr.bf16.gmra.mxu1 %v14497_v43  ;;  %11292 = vmatpush3.bf16.msra.mxu0 %v11772_v36 }
 0x312   : > { %4976 = vmatprep.mubr.bf16.mxu1 %v18029_v62  ;;  %v14747_v4 = vpop.f32.mrf.mxu1 }
 0x314   : > { %v14751_v26 = vpop.f32.mrf.mxu1  ;;  %5592 = vmatmul.mubr.bf16.gmra.mxu0 %v14749_v39 }
 0x315   : > { %18175 = vst [vmem:[#allocation190_spill] sm:$0xff] %v14751_v26  ;;  %5601 = vmatprep.mubr.bf16.mxu0 %v18029_v62 }
 0x316   : > { %v14771_v57 = vpop.f32.mrf.mxu0 }
 0x317   : > { %v14755_v9 = vpop.f32.mrf.mxu1 }
 0x318   : > { %v14781_v33 = vpop.f32.mrf.mxu0 }
 0x319   : > { %4977 = vmatmul.mubr.bf16.gmra.mxu1 %v14531_v58  ;;  %v14758_v29 = vpop.f32.mrf.mxu1 }
 0x31a   : > { %4986 = vmatprep.mubr.bf16.mxu1 %v18029_v62  ;;  %v14787_v27 = vpop.f32.mrf.mxu0 }
 0x31b   : > { %v14761_v43 = vpop.f32.mrf.mxu1 }
 0x31c   : > { %5602 = vmatmul.mubr.bf16.gmra.mxu0 %v14763_v13  ;;  %v14797_v47 = vpop.f32.mrf.mxu0 }
 0x31d   : > { %v14765_v12 = vpop.f32.mrf.mxu1  ;;  %5611 = vmatprep.mubr.bf16.mxu0 %v18029_v62 }
 0x31e   : > { %18176 = vst [vmem:[#allocation119_spill] sm:$0xff] %v14765_v12 }
 0x31f   : > { %v14769_v35 = vpop.f32.mrf.mxu1 }
 0x321   : > { %4987 = vmatmul.mubr.bf16.gmra.mxu1 %v14552_v60  ;;  %v14774_v58 = vpop.f32.mrf.mxu1 }
 0x322   : > { %4996 = vmatprep.mubr.bf16.mxu1 %v18029_v62 }
 0x323   : > { %v14777_v5 = vpop.f32.mrf.mxu1 }
 0x324   : > { %5612 = vmatmul.mubr.bf16.gmra.mxu0 %v14779_v2 }
 0x325   : > { %v14783_v17 = vpop.f32.mrf.mxu1  ;;  %5621 = vmatprep.mubr.bf16.mxu0 %v18029_v62 }
 0x326   : > { %18177 = vst [vmem:[#allocation193_spill] sm:$0xff] %v14783_v17 }
 0x328   : > { %v14789_v3 = vpop.f32.mrf.mxu1 }
 0x329   : > { %4997 = vmatmul.mubr.bf16.gmra.mxu1 %v14578_v46  ;;  %v14802_v30 = vpop.f32.mrf.mxu0 }
 0x32a   : > { %v14792_v60 = vpop.f32.mrf.mxu1  ;;  %5006 = vmatprep.mubr.bf16.mxu1 %v18029_v62  ;;  %18178 = vst [vmem:[#allocation122_spill] sm:$0xff] %v14802_v30 }
 0x32b   : > { %v14810_v46 = vpop.f32.mrf.mxu0 }
 0x32c   : > { %v14799_v59 = vpop.f32.mrf.mxu1  ;;  %5622 = vmatmul.mubr.bf16.gmra.mxu0 %v14795_v6  ;;  %18180 = vst [vmem:[#allocation125_spill] sm:$0xff] %v14810_v46 }
 0x32d   : > { %5631 = vmatprep.mubr.bf16.mxu0 %v18029_v62  ;;  %v14820_v20 = vpop.f32.mrf.mxu0 }
 0x32e   : > { %v14804_v18 = vpop.f32.mrf.mxu1  ;;  %18181 = vst [vmem:[#allocation195_spill] sm:$0xff] %v14820_v20 }
 0x32f   : > { %18179 = vst [vmem:[#allocation194_spill] sm:$0xff] %v14804_v18  ;;  %v14828_v8 = vpop.f32.mrf.mxu0 }
 0x330   : > { %v14807_v10 = vpop.f32.mrf.mxu1  ;;  %18184 = vst [vmem:[#allocation207_spill] sm:$0xff] %v14828_v8  ;;  %v11802_v8 = vld [vmem:[#allocation8 + $0xc4] ss:$12 sps:$4 sm:$0xff]  }
 0x331   : > { %5007 = vmatmul.mubr.bf16.gmra.mxu1 %v14608_v50 }
 0x332   : > { %v14812_v40 = vpop.f32.mrf.mxu1  ;;  %5016 = vmatprep.mubr.bf16.mxu1 %v18029_v62 }
 0x334   : > { %v14817_v61 = vpop.f32.mrf.mxu1  ;;  %5632 = vmatmul.mubr.bf16.gmra.mxu0 %v14815_v31 }
 0x335   : > { %5641 = vmatprep.mubr.bf16.mxu0 %v18029_v62 }
 0x336   : > { %v14822_v37 = vpop.f32.mrf.mxu1 }
 0x337   : > { %18182 = vst [vmem:[#allocation126_spill] sm:$0xff] %v14822_v37 }
 0x339   : > { %v14825_v50 = vpop.f32.mrf.mxu1  ;;  %5017 = vmatmul.mubr.bf16.gmra.mxu1 %v14633_v48  ;;  %v14835_v41 = vpop.f32.mrf.mxu0 }
 0x33a   : > { %18183 = vst [vmem:[#allocation68_spill] sm:$0xff] %v14825_v50  ;;  %5026 = vmatprep.mubr.bf16.mxu1 %v18029_v62  ;;  %18186 = vst [vmem:[#allocation198_spill] sm:$0xff] %v14835_v41  ;;  %v11796_v50 = vld [vmem:[#allocation8 + $0xd8] ss:$12 sps:$4 sm:$0xff]  }
 0x33b   : > { %v14831_v7 = vpop.f32.mrf.mxu1  ;;  %v14843_v48 = vpop.f32.mrf.mxu0 }
 0x33c   : > { %18185 = vst [vmem:[#allocation129_spill] sm:$0xff] %v14831_v7  ;;  %5642 = vmatmul.mubr.bf16.gmra.mxu0 %v14833_v38  ;;  %18189 = vst [vmem:[#allocation132_spill] sm:$0xff] %v14843_v48 }
 0x33d   : > { %v14837_v21 = vpop.f32.mrf.mxu1  ;;  %5651 = vmatprep.mubr.bf16.mxu0 %v18029_v62  ;;  %v14853_v63 = vpop.f32.mrf.mxu0 }
 0x33e   : > { %18187 = vst [vmem:[#allocation131_spill] sm:$0xff] %v14837_v21  ;;  %18192 = vst [vmem:[#allocation201_spill] sm:$0xff] %v14853_v63 }
 0x33f   : > { %v14841_v22 = vpop.f32.mrf.mxu1  ;;  %v14861_v28 = vpop.f32.mrf.mxu0 }
 0x340   : > { %18188 = vst [vmem:[#allocation199_spill] sm:$0xff] %v14841_v22  ;;  %18195 = vst [vmem:[#allocation137_spill] sm:$0xff] %v14861_v28  ;;  %v14871_v22 = vld [vmem:[#allocation3 + $0x50] sm:$0xff]   ;;  %v11792_v28 = vld [vmem:[#allocation8 + $0xe0] ss:$12 sps:$4 sm:$0xff]  }
 0x341   : > { %v14845_v14 = vpop.f32.mrf.mxu1  ;;  %5027 = vmatmul.mubr.bf16.gmra.mxu1 %v14665_v49 }
 0x342   : > { %18190 = vst [vmem:[#allocation200_spill] sm:$0xff] %v14845_v14  ;;  %5036 = vmatprep.mubr.bf16.mxu1 %v18029_v62  ;;  %v11773_v14 = vld [vmem:[#allocation8 + $0x140] ss:$12 sps:$4 sm:$0xff]  }
 0x343   : > { %v14849_v53 = vpop.f32.mrf.mxu1  ;;  %11293 = vmatprep.subr.bf16.mxu0 %v11773_v14 }
 0x344   : > { %18191 = vst [vmem:[#allocation134_spill] sm:$0xff] %v14849_v53  ;;  %5652 = vmatmul.mubr.bf16.gmra.mxu0 %v14851_v0 }
 0x345   : > { %v14855_v56 = vpop.f32.mrf.mxu1  ;;  %5661 = vmatprep.mubr.bf16.mxu0 %v18029_v62  ;;  %v14866_v49 = vpop.f32.mrf.mxu0  ;;  %11294 = vmatpush3.bf16.msra.mxu0 %v11773_v14 }
 0x346   : > { %18193 = vst [vmem:[#allocation136_spill] sm:$0xff] %v14855_v56  ;;  %18197 = vst [vmem:[#allocation71_spill] sm:$0xff] %v14866_v49  ;;  %v11791_v49 = vld [vmem:[#allocation8 + $0x10c] ss:$12 sps:$4 sm:$0xff]  }
 0x347   : > { %v14859_v25 = vpop.f32.mrf.mxu1 }
 0x348   : > { %18194 = vst [vmem:[#allocation202_spill] sm:$0xff] %v14859_v25  ;;  %v14876_v25 = vpop.f32.mrf.mxu0 }
 0x349   : > { %v14863_v55 = vpop.f32.mrf.mxu1  ;;  %5037 = vmatmul.mubr.bf16.gmra.mxu1 %v14683_v23  ;;  %18200 = vst [vmem:[#allocation211_spill] sm:$0xff] %v14876_v25 }
 0x34a   : > { %18196 = vst [vmem:[#allocation203_spill] sm:$0xff] %v14863_v55  ;;  %5046 = vmatprep.mubr.bf16.mxu1 %v18029_v62  ;;  %v14884_v37 = vpop.f32.mrf.mxu0 }
 0x34b   : > { %v14869_v11 = vpop.f32.mrf.mxu1  ;;  %18203 = vst [vmem:[#allocation139_spill] sm:$0xff] %v14884_v37 }
 0x34c   : > { %18198 = vst [vmem:[#allocation209_spill] sm:$0xff] %v14869_v11  ;;  %5662 = vmatmul.mubr.bf16.gmra.mxu0 %v14871_v22  ;;  %v14894_v18 = vpop.f32.mrf.mxu0 }
 0x34d   : > { %v14873_v56 = vpop.f32.mrf.mxu1  ;;  %5671 = vmatprep.mubr.bf16.mxu0 %v18029_v62  ;;  %18206 = vst [vmem:[#allocation205_spill] sm:$0xff] %v14894_v18  ;;  %v11788_v18 = vld [vmem:[#allocation8 + $0x124] ss:$12 sps:$4 sm:$0xff]  }
 0x34e   : > { %18199 = vst [vmem:[#allocation72_spill] sm:$0xff] %v14873_v56  ;;  %v14889_v56 = vld [vmem:[#allocation3 + $0x58] sm:$0xff]  }
 0x34f   : > { %v14879_v23 = vpop.f32.mrf.mxu1 }
 0x350   : > { %18201 = vst [vmem:[#allocation73_spill] sm:$0xff] %v14879_v23  ;;  %v14907_v23 = vld [vmem:[#allocation3 + $0x60] sm:$0xff]  }
 0x351   : > { %v14881_v55 = vpop.f32.mrf.mxu1  ;;  %5047 = vmatmul.mubr.bf16.gmra.mxu1 %v14690_v32 }
 0x352   : > { %18202 = vst [vmem:[#allocation213_spill] sm:$0xff] %v14881_v55  ;;  %5056 = vmatprep.mubr.bf16.mxu1 %v18029_v62 }
 0x353   : > { %v14887_v11 = vpop.f32.mrf.mxu1  ;;  %v14899_v55 = vpop.f32.mrf.mxu0 }
 0x354   : > { %18204 = vst [vmem:[#allocation204_spill] sm:$0xff] %v14887_v11  ;;  %5672 = vmatmul.mubr.bf16.gmra.mxu0 %v14889_v56  ;;  %18208 = vst [vmem:[#allocation76_spill] sm:$0xff] %v14899_v55 }
 0x355   : > { %v14891_v53 = vpop.f32.mrf.mxu1  ;;  %5681 = vmatprep.mubr.bf16.mxu0 %v18029_v62 }
 0x356   : > { %18205 = vst [vmem:[#allocation141_spill] sm:$0xff] %v14891_v53  ;;  %v14909_v53 = vpop.f32.mrf.mxu0 }
 0x357   : > { %v14897_v36 = vpop.f32.mrf.mxu1  ;;  %18211 = vst [vmem:[#allocation77_spill] sm:$0xff] %v14909_v53 }
 0x358   : > { %18207 = vst [vmem:[#allocation20_spill] sm:$0xff] %v14897_v36 }
 0x359   : > { %v14901_v32 = vpop.f32.mrf.mxu1  ;;  %5057 = vmatmul.mubr.bf16.gmra.mxu1 %v14695_v52  ;;  %v14917_v52 = vpop.f32.mrf.mxu0 }
 0x35a   : > { %18209 = vst [vmem:[#allocation215_spill] sm:$0xff] %v14901_v32  ;;  %11253 = vmatprep.mubr.bf16.mxu1 %v14737_v19  ;;  %18214 = vst [vmem:[#allocation219_spill] sm:$0xff] %v14917_v52  ;;  %v14925_v32 = vld [vmem:[#allocation3 + $0x68] sm:$0xff]   ;;  %v11782_v52 = vld [vmem:[#allocation8 + $0x138] ss:$12 sps:$4 sm:$0xff]  }
 0x35b   : > { %v14905_v11 = vpop.f32.mrf.mxu1 }
 0x35c   : > { %18210 = vst [vmem:[#allocation19_spill] sm:$0xff] %v14905_v11  ;;  %5682 = vmatmul.mubr.bf16.gmra.mxu0 %v14907_v23 }
 0x35d   : > { %v14911_v17 = vpop.f32.mrf.mxu1  ;;  %5691 = vmatprep.mubr.bf16.mxu0 %v18029_v62 }
 0x35e   : > { %18212 = vst [vmem:[#allocation217_spill] sm:$0xff] %v14911_v17  ;;  %v14927_v17 = vpop.f32.mrf.mxu0 }
 0x35f   : > { %v14915_v36 = vpop.f32.mrf.mxu1  ;;  %18217 = vst [vmem:[#allocation81_spill] sm:$0xff] %v14927_v17 }
 0x360   : > { %18213 = vst [vmem:[#allocation78_spill] sm:$0xff] %v14915_v36 }
 0x361   : > { %v14919_v19 = vpop.f32.mrf.mxu1  ;;  %11254 = vmatmul.mubr.bf16.vlgmr.msra.gmra.mxu1 %v14749_v39 }
 0x362   : > { %18215 = vst [vmem:[#allocation142_spill] sm:$0xff] %v14919_v19  ;;  %11257 = vmatprep.mubr.bf16.mxu1 %v14763_v13 }
 0x363   : > { %v14923_v11 = vpop.f32.mrf.mxu1  ;;  %v14932_v36 = vpop.f32.mrf.mxu0 }
 0x364   : > { %18216 = vst [vmem:[#allocation206_spill] sm:$0xff] %v14923_v11  ;;  %5692 = vmatmul.mubr.bf16.gmra.mxu0 %v14925_v32  ;;  %18219 = vst [vmem:[#allocation22_spill] sm:$0xff] %v14932_v36  ;;  %v11765_v11 = vld [vmem:[#allocation3 + $0x70] sm:$0xff]  }
 0x365   : > { %v14929_v53 = vpop.f32.mrf.mxu1  ;;  %5701 = vmatprep.mubr.bf16.mxu0 %v18029_v62  ;;  %v14941_v39 = vpop.f32.mrf.mxu0  ;;  %v11774_v36 = vld [vmem:[#allocation8 + $0x128] ss:$12 sps:$4 sm:$0xff]  }
 0x366   : > { %18218 = vst [vmem:[#allocation221_spill] sm:$0xff] %v14929_v53  ;;  %18222 = vst [vmem:[#allocation83_spill] sm:$0xff] %v14941_v39  ;;  %11295 = vmatprep.subr.bf16.mxu0 %v11774_v36 }
 0x367   : > { %v14935_v14 = vpop.f32.mrf.mxu1  ;;  %v14947_v17 = vpop.f32.mrf.mxu0  ;;  %11296 = vmatpush3.bf16.msra.mxu0 %v11774_v36 }
 0x368   : > { %18220 = vst [vmem:[#allocation82_spill] sm:$0xff] %v14935_v14  ;;  %18225 = vst [vmem:[#allocation26_spill] sm:$0xff] %v14947_v17 }
 0x369   : > { %v14937_v19 = vpop.f32.mrf.mxu1  ;;  %11258 = vmatmul.mubr.bf16.gmra.mxu1 %v14779_v2  ;;  %v14955_v2 = vpop.f32.mrf.mxu0 }
 0x36a   : > { %18221 = vst [vmem:[#allocation223_spill] sm:$0xff] %v14937_v19  ;;  %11261 = vmatprep.mubr.bf16.mxu1 %v14795_v6  ;;  %18228 = vst [vmem:[#allocation227_spill] sm:$0xff] %v14955_v2 }
 0x36b   : > { %v14943_v13 = vpop.f32.mrf.mxu1 }
 0x36c   : > { %18223 = vst [vmem:[#allocation225_spill] sm:$0xff] %v14943_v13  ;;  %5702 = vmatmul.mubr.bf16.gmra.mxu0 %v11765_v11 }
 0x36d   : > { %v14945_v53 = vpop.f32.mrf.mxu1  ;;  %5711 = vmatprep.mubr.bf16.mxu0 %v18029_v62 }
 0x36e   : > { %18224 = vst [vmem:[#allocation21_spill] sm:$0xff] %v14945_v53  ;;  %v11766_v53 = vld [vmem:[#allocation3 + $0x78] sm:$0xff]  }
 0x36f   : > { %v14950_v14 = vpop.f32.mrf.mxu1 }
 0x370   : > { %18226 = vst [vmem:[#allocation24_spill] sm:$0xff] %v14950_v14 }
 0x371   : > { %v14952_v19 = vpop.f32.mrf.mxu1  ;;  %11262 = vmatmul.mubr.bf16.gmra.mxu1 %v14815_v31 }
 0x372   : > { %18227 = vst [vmem:[#allocation86_spill] sm:$0xff] %v14952_v19  ;;  %11265 = vmatprep.mubr.bf16.mxu1 %v14833_v38 }
 0x373   : > { %v14958_v6 = vpop.f32.mrf.mxu1  ;;  %v14960_v13 = vpop.f32.mrf.mxu0 }
 0x374   : > { %18229 = vst [vmem:[#allocation87_spill] sm:$0xff] %v14958_v6  ;;  %18230 = vst [vmem:[#allocation229_spill] sm:$0xff] %v14960_v13  ;;  %5712 = vmatmul.mubr.bf16.gmra.mxu0 %v11766_v53  ;;  %v11778_v13 = vld [vmem:[#allocation8 + $0x110] ss:$12 sps:$4 sm:$0xff]  }
 0x375   : > { %v14962_v17 = vpop.f32.mrf.mxu1  ;;  %v14964_v39 = vpop.f32.mrf.mxu0  ;;  %5721 = vmatprep.mubr.bf16.mxu0 %v18029_v62  ;;  %11297 = vmatprep.subr.bf16.mxu0 %v11778_v13 }
 0x376   : > { %18231 = vst [vmem:[#allocation88_spill] sm:$0xff] %v14962_v17  ;;  %18232 = vst [vmem:[#allocation231_spill] sm:$0xff] %v14964_v39  ;;  %v11767_v17 = vld [vmem:[#allocation3 + $0x80] sm:$0xff]   ;;  %11298 = vmatpush3.bf16.msra.mxu0 %v11778_v13 }
 0x377   : > { %v14967_v19 = vpop.f32.mrf.mxu1  ;;  %v14969_v31 = vpop.f32.mrf.mxu0 }
 0x378   : > { %18233 = vst [vmem:[#allocation91_spill] sm:$0xff] %v14967_v19  ;;  %18234 = vst [vmem:[#allocation233_spill] sm:$0xff] %v14969_v31 }
 0x379   : > { %v14971_v36 = vpop.f32.mrf.mxu1  ;;  %11266 = vmatmul.mubr.bf16.gmra.mxu1 %v14851_v0  ;;  %v14975_v38 = vpop.f32.mrf.mxu0  ;;  %v11777_v0 = vld [vmem:[#allocation8 + $0x16c] ss:$12 sps:$4 sm:$0xff]  }
 0x37a   : > { %18235 = vst [vmem:[#allocation23_spill] sm:$0xff] %v14971_v36  ;;  %11269 = vmatprep.mubr.bf16.mxu1 %v14871_v22  ;;  %18236 = vst [vmem:[#allocation25_spill] sm:$0xff] %v14975_v38  ;;  %v11775_v36 = vld [vmem:[#allocation8 + $0x168] ss:$12 sps:$4 sm:$0xff]   ;;  %7576 = vmatprep.subr.bf16.mxu1 %v11777_v0 }
 0x37b   : > { %v14977_v6 = vpop.f32.mrf.mxu1  ;;  %v11768_v38 = vld [vmem:[#allocation3 + $0x88] sm:$0xff]   ;;  %7577 = vmatpush1.bf16.msra.mxu1 %v11775_v36 }
 0x37c   : > { %18237 = vst [vmem:[#allocation30_spill] sm:$0xff] %v14977_v6  ;;  %v14981_v39 = vpop.f32.mrf.mxu0  ;;  %5722 = vmatmul.mubr.bf16.gmra.mxu0 %v11767_v17 }
 0x37d   : > { %v14979_v14 = vpop.f32.mrf.mxu1  ;;  %18239 = vst [vmem:[#allocation92_spill] sm:$0xff] %v14981_v39  ;;  %5731 = vmatprep.mubr.bf16.mxu0 %v18029_v62 }
 0x37e   : > { %18238 = vst [vmem:[#allocation28_spill] sm:$0xff] %v14979_v14  ;;  %v14986_v31 = vpop.f32.mrf.mxu0 }
 0x37f   : > { %v14984_v19 = vpop.f32.mrf.mxu1  ;;  %18241 = vst [vmem:[#allocation27_spill] sm:$0xff] %v14986_v31 }
 0x380   : > { %18240 = vst [vmem:[#allocation235_spill] sm:$0xff] %v14984_v19  ;;  %v11184_v6 = vpop.f32.mrf.mxu0 }
 0x381   : > { %v14988_v22 = vpop.f32.mrf.mxu1  ;;  %11270 = vmatmul.mubr.bf16.gmra.mxu1 %v14889_v56 }
 0x382   : > { %18242 = vst [vmem:[#allocation29_spill] sm:$0xff] %v14988_v22  ;;  %11273 = vmatprep.mubr.bf16.mxu1 %v14907_v23  ;;  %v14994_v39 = vpop.f32.mrf.mxu0  ;;  %v11779_v22 = vld [vmem:[#allocation8 + $0x150] ss:$12 sps:$4 sm:$0xff]  }
 0x383   : > { %v14992_v14 = vpop.f32.mrf.mxu1  ;;  %18244 = vst [vmem:[#allocation237_spill] sm:$0xff] %v14994_v39  ;;  %v11781_v39 = vld [vmem:[#allocation8 + $0x154] ss:$12 sps:$4 sm:$0xff]  }
 0x384   : > { %18243 = vst [vmem:[#allocation93_spill] sm:$0xff] %v14992_v14  ;;  %v14998_v31 = vpop.f32.mrf.mxu0  ;;  %5732 = vmatmul.mubr.bf16.gmra.mxu0 %v11768_v38  ;;  %v11769_v14 = vld [vmem:[#allocation3 + $0x90] sm:$0xff]   ;;  %7578 = vmatprep.subr.bf16.mxu1 %v11781_v39 }
 0x385   : > { %v14996_v19 = vpop.f32.mrf.mxu1  ;;  %5741 = vmatprep.mubr.bf16.mxu0 %v18029_v62  ;;  %7579 = vmatpush1.bf16.msra.mxu1 %v11779_v22 }
 0x386   : > { %18245 = vst [vmem:[#allocation34_spill] sm:$0xff] %v14996_v19  ;;  %v5101_v6 = vpop.f32.mrf.mxu0 }
 0x387   : > { %v15001_v56 = vpop.f32.mrf.mxu1 }
 0x388   : > { %18246 = vst [vmem:[#allocation32_spill] sm:$0xff] %v15001_v56  ;;  %v15004_v0 = vpop.f32.mrf.mxu0 }
 0x389   : > { %v4534_v23 = vpop.f32.mrf.mxu1  ;;  %11274 = vmatmul.mubr.bf16.gmra.mxu1 %v14925_v32 }
 0x38a   : > { %11277 = vmatprep.mubr.bf16.mxu1 %v11765_v11  ;;  %v5104_v36 = vpop.f32.mrf.mxu0  ;;  %v11784_v11 = vld [vmem:[#allocation8 + $0x13c] ss:$12 sps:$4 sm:$0xff]  }
 0x38b   : > { %v4536_v13 = vpop.f32.mrf.mxu1  ;;  %7580 = vmatprep.subr.bf16.mxu1 %v11784_v11 }
 0x38c   : > { %v15006_v2 = vpop.f32.mrf.mxu0  ;;  %5742 = vmatmul.mubr.bf16.gmra.mxu0 %v11769_v14  ;;  %v11785_v13 = vld [vmem:[#allocation8 + $0xf8] ss:$12 sps:$4 sm:$0xff]   ;;  %7581 = vmatpush1.bf16.msra.mxu1 %v11782_v52 }
 0x38d   : > { %v4538_v19 = vpop.f32.mrf.mxu1  ;;  %5751 = vmatprep.mubr.bf16.mxu0 %v18029_v62  ;;  %11299 = vmatprep.subr.bf16.mxu0 %v11785_v13 }
 0x38e   : > { %v15009_v23 = vpop.f32.mrf.mxu0  ;;  %v11770_v19 = vld [vmem:[#allocation3 + $0x98] sm:$0xff]   ;;  %11300 = vmatpush3.bf16.msra.mxu0 %v11785_v13  ;;  %7582 = vmatprep.subr.bf16.mxu1 %v11788_v18  ;;  %v11789_v18 = vld [vmem:[#allocation8 + $0x108] ss:$12 sps:$4 sm:$0xff]  }
 0x38f   : > { %v4540_v6 = vpop.f32.mrf.mxu1  ;;  %11301 = vmatprep.subr.bf16.mxu0 %v11792_v28 }
 0x390   : > { %v15011_v56 = vpop.f32.mrf.mxu0 }
 0x391   : > { %v4888_v32 = vpop.f32.mrf.mxu1  ;;  %11278 = vmatmul.mubr.bf16.gmra.mxu1 %v11766_v53 }
 0x392   : > { %11281 = vmatprep.mubr.bf16.mxu1 %v11767_v17  ;;  %v15013_v39 = vpop.f32.mrf.mxu0  ;;  %11302 = vmatpush3.bf16.msra.mxu0 %v11792_v28 }
 0x393   : > { %v4890_v36 = vpop.f32.mrf.mxu1 }
 0x394   : > { %v15017_v55 = vpop.f32.mrf.mxu0  ;;  %5752 = vmatmul.mubr.bf16.gmra.mxu0 %v11770_v19  ;;  %v11786_v36 = vld [vmem:[#allocation8 + $0x120] ss:$12 sps:$4 sm:$0xff]  }
 0x395   : > { %v15015_v22 = vpop.f32.mrf.mxu1  ;;  %18247 = vst [vmem:[#allocation31_spill] sm:$0xff] %v15017_v55  ;;  %7583 = vmatpush1.bf16.msra.mxu1 %v11786_v36 }
 0x396   : > { %v15019_v6 = vpop.f32.mrf.mxu0  ;;  %7584 = vmatprep.subr.bf16.mxu1 %v11791_v49 }
 0x397   : > { %v4894_v53 = vpop.f32.mrf.mxu1  ;;  %18248 = vst [vmem:[#allocation97_spill] sm:$0xff] %v15019_v6 }
 0x398   : > { %v15023_v32 = vpop.f32.mrf.mxu0 }
 0x399   : > { %v15021_v17 = vpop.f32.mrf.mxu1  ;;  %11282 = vmatmul.mubr.bf16.gmra.mxu1 %v11768_v38  ;;  %18249 = vst [vmem:[#allocation241_spill] sm:$0xff] %v15023_v32  ;;  %v11799_v32 = vld [vmem:[#allocation8 + $0xc8] ss:$12 sps:$4 sm:$0xff]  }
 0x39a   : > { %11285 = vmatprep.mubr.bf16.mxu1 %v11769_v14  ;;  %v15027_v12 = vpop.f32.mrf.mxu0  ;;  %7585 = vmatpush1.bf16.msra.mxu1 %v11789_v18 }
 0x39b   : > { %v15025_v11 = vpop.f32.mrf.mxu1  ;;  %18250 = vst [vmem:[#allocation98_spill] sm:$0xff] %v15027_v12  ;;  %11303 = vmatprep.subr.bf16.mxu0 %v11799_v32 }
 0x39c   : > { %v15031_v52 = vpop.f32.mrf.mxu0  ;;  %11304 = vmatpush3.bf16.msra.mxu0 %v11799_v32 }
 0x39d   : > { %v15029_v21 = vpop.f32.mrf.mxu1  ;;  %18251 = vst [vmem:[#allocation243_spill] sm:$0xff] %v15031_v52 }
 0x39e   : > { %v15035_v53 = vpop.f32.mrf.mxu0 }
 0x39f   : > { %v15033_v13 = vpop.f32.mrf.mxu1  ;;  %18253 = vst [vmem:[#allocation101_spill] sm:$0xff] %v15035_v53 }
 0x3a0   : > { %18252 = vst [vmem:[#allocation33_spill] sm:$0xff] %v15033_v13  ;;  %v15039_v14 = vpop.f32.mrf.mxu0 }
 0x3a1   : > { %v15037_v38 = vpop.f32.mrf.mxu1  ;;  %11286 = vmatmul.mubr.bf16.gmra.mxu1 %v11770_v19  ;;  %18254 = vst [vmem:[#allocation245_spill] sm:$0xff] %v15039_v14 }
 0x3a2   : > { %7608 = vmatprep.mubr.bf16.mxu1 %v18029_v62  ;;  %v15044_v25 = vpop.f32.mrf.mxu0 }
 0x3a3   : > { %v15042_v37 = vpop.f32.mrf.mxu1  ;;  %18255 = vst [vmem:[#allocation38_spill] sm:$0xff] %v15044_v25 }
 0x3a4   : > { %v15048_v36 = vpop.f32.mrf.mxu0 }
 0x3a5   : > { %v15046_v26 = vpop.f32.mrf.mxu1  ;;  %18256 = vst [vmem:[#allocation36_spill] sm:$0xff] %v15048_v36 }
 0x3a6   : > { %v15052_v19 = vpop.f32.mrf.mxu0 }
 0x3a7   : > { %v15050_v7 = vpop.f32.mrf.mxu1  ;;  %18258 = vst [vmem:[#allocation239_spill] sm:$0xff] %v15052_v19 }
 0x3a8   : > { %18257 = vst [vmem:[#allocation96_spill] sm:$0xff] %v15050_v7  ;;  %v15056_v14 = vpop.f32.mrf.mxu0 }
 0x3a9   : > { %v15054_v62 = vpop.f32.mrf.mxu1  ;;  %18259 = vst [vmem:[#allocation104_spill] sm:$0xff] %v15056_v14 }
 0x3aa   : > { %v15060_v63 = vpop.f32.mrf.mxu0 }
 0x3ab   : > { %v15058_v25 = vpop.f32.mrf.mxu1  ;;  %18260 = vst [vmem:[#allocation249_spill] sm:$0xff] %v15060_v63 }
 0x3ac   : > { %v15064_v48 = vpop.f32.mrf.mxu0 }
 0x3ad   : > { %v15062_v53 = vpop.f32.mrf.mxu1  ;;  %18261 = vst [vmem:[#allocation35_spill] sm:$0xff] %v15064_v48  ;;  %v11795_v48 = vld [vmem:[#allocation8 + $0xf4] ss:$12 sps:$4 sm:$0xff]  }
 0x3ae   : > { %v15068_v36 = vpop.f32.mrf.mxu0  ;;  %7586 = vmatprep.subr.bf16.mxu1 %v11795_v48 }
 0x3af   : > { %v15066_v49 = vpop.f32.mrf.mxu1  ;;  %18263 = vst [vmem:[#allocation251_spill] sm:$0xff] %v15068_v36 }
 0x3b0   : > { %18262 = vst [vmem:[#allocation108_spill] sm:$0xff] %v15066_v49  ;;  %v15072_v18 = vpop.f32.mrf.mxu0  ;;  %v11793_v49 = vld [vmem:[#allocation8 + $0xf0] ss:$12 sps:$4 sm:$0xff]  }
 0x3b1   : > { %v15070_v7 = vpop.f32.mrf.mxu1  ;;  %18264 = vst [vmem:[#allocation110_spill] sm:$0xff] %v15072_v18  ;;  %7587 = vmatpush1.bf16.msra.mxu1 %v11793_v49 }
 0x3b2   : > { %v15076_v19 = vpop.f32.mrf.mxu0 }
 0x3b3   : > { %v15074_v28 = vpop.f32.mrf.mxu1  ;;  %18265 = vst [vmem:[#allocation253_spill] sm:$0xff] %v15076_v19  ;;  %v11798_v19 = vld [vmem:[#allocation8 + $0xdc] ss:$12 sps:$4 sm:$0xff]  }
 0x3b4   : > { %v15080_v52 = vpop.f32.mrf.mxu0  ;;  %7588 = vmatprep.subr.bf16.mxu1 %v11798_v19 }
 0x3b5   : > { %v15078_v14 = vpop.f32.mrf.mxu1  ;;  %18266 = vst [vmem:[#allocation116_spill] sm:$0xff] %v15080_v52  ;;  %7589 = vmatpush1.bf16.msra.mxu1 %v11796_v50 }
 0x3b6   : > { %v15084_v41 = vpop.f32.mrf.mxu0  ;;  %7590 = vmatprep.subr.bf16.mxu1 %v11802_v8 }
 0x3b7   : > { %v15082_v63 = vpop.f32.mrf.mxu1  ;;  %18268 = vst [vmem:[#allocation37_spill] sm:$0xff] %v15084_v41 }
 0x3b8   : > { %18267 = vst [vmem:[#allocation257_spill] sm:$0xff] %v15082_v63  ;;  %v15088_v36 = vpop.f32.mrf.mxu0 }
 0x3b9   : > { %v15086_v13 = vpop.f32.mrf.mxu1  ;;  %18269 = vst [vmem:[#allocation40_spill] sm:$0xff] %v15088_v36  ;;  %v11800_v36 = vld [vmem:[#allocation8 + $0xc0] ss:$12 sps:$4 sm:$0xff]  }
 0x3ba   : > { %v15092_v1 = vpop.f32.mrf.mxu0  ;;  %7591 = vmatpush1.bf16.msra.mxu1 %v11800_v36 }
 0x3bb   : > { %v15090_v18 = vpop.f32.mrf.mxu1  ;;  %18270 = vst [vmem:[#allocation42_spill] sm:$0xff] %v15092_v1 }
 0x3bc   : > { %v15096_v52 = vpop.f32.mrf.mxu0 }
 0x3bd   : > { %v15094_v12 = vpop.f32.mrf.mxu1  ;;  %18271 = vst [vmem:[#allocation118_spill] sm:$0xff] %v15096_v52 }
 0x3be   : > { %v15100_v63 = vpop.f32.mrf.mxu0 }
 0x3bf   : > { %v15098_v41 = vpop.f32.mrf.mxu1  ;;  %18273 = vst [vmem:[#allocation39_spill] sm:$0xff] %v15100_v63 }
 0x3c0   : > { %18272 = vst [vmem:[#allocation258_spill] sm:$0xff] %v15098_v41  ;;  %v15104_v49 = vpop.f32.mrf.mxu0 }
 0x3c1   : > { %v15102_v48 = vpop.f32.mrf.mxu1  ;;  %18274 = vst [vmem:[#allocation120_spill] sm:$0xff] %v15104_v49 }
 0x3c2   : > { %v15108_v20 = vpop.f32.mrf.mxu0 }
 0x3c3   : > { %v15106_v1 = vpop.f32.mrf.mxu1  ;;  %18275 = vst [vmem:[#allocation259_spill] sm:$0xff] %v15108_v20 }
 0x3c4   : > { %v15112_v19 = vpop.f32.mrf.mxu0 }
 0x3c5   : > { %v15110_v50 = vpop.f32.mrf.mxu1  ;;  %18276 = vst [vmem:[#allocation127_spill] sm:$0xff] %v15112_v19  ;;  %v4893_v19 = vadd.f32 %v15015_v22, %v14524_v51  ;;  %v4903_v22 = vadd.f32 %v15029_v21, %v14730_v42 }
 0x3c6   : > { %v15116_v41 = vpop.f32.mrf.mxu0 }
 0x3c7   : > { %v15114_v63 = vpop.f32.mrf.mxu1  ;;  %18278 = vst [vmem:[#allocation44_spill] sm:$0xff] %v15116_v41 }
 0x3c8   : > { %18277 = vst [vmem:[#allocation41_spill] sm:$0xff] %v15114_v63  ;;  %v11236_v49 = vpop.f32.mrf.mxu0 }
 0x3c9   : > { %v15118_v52 = vpop.f32.mrf.mxu1 }
 0x3ca   : > { %18279 = vst [vmem:[#allocation63_spill] sm:$0xff] %v15118_v52  ;;  %v15122_v8 = vpop.f32.mrf.mxu0 }
 0x3cb   : > { %v15120_v6 = vpop.f32.mrf.mxu1  ;;  %18281 = vst [vmem:[#allocation103_spill] sm:$0xff] %v15122_v8 }
 0x3cc   : > { %18280 = vst [vmem:[#allocation46_spill] sm:$0xff] %v15120_v6  ;;  %v5583_v20 = vpop.f32.mrf.mxu0  ;;  %v4899_v6 = vadd.f32 %v15021_v17, %v14721_v34 }
 0x3cd   : > { %v15124_v36 = vpop.f32.mrf.mxu1  ;;  %v4901_v20 = vadd.f32 %v15025_v11, %v14727_v45  ;;  %v15151_v45 = vld [vmem:[#allocation8 + $0xb0] ss:$12 sps:$4 sm:$0xff]  }
 0x3ce   : > { %18282 = vst [vmem:[#allocation102_spill] sm:$0xff] %v15124_v36  ;;  %v5585_v32 = vpop.f32.mrf.mxu0  ;;  %18288 = vst [vmem:[#allocation109_spill] sm:$0xff] %v15151_v45  ;;  %11433 = vmatprep.subr.bf16.mxu1 %v15151_v45 }
 0x3cf   : > { %v15126_v46 = vpop.f32.mrf.mxu1 }
 0x3d0   : > { %18283 = vst [vmem:[#allocation247_spill] sm:$0xff] %v15126_v46  ;;  %v5587_v63 = vpop.f32.mrf.mxu0 }
 0x3d1   : > { %v15130_v55 = vpop.f32.mrf.mxu1  ;;  %v5942_v41 = vadd.f32 %v5587_v63, %v4893_v19  ;;  %v15145_v63 = vld [vmem:[%s17658_s6] ss:$0 sm:$0xff] }
 0x3d2   : > { %18284 = vst [vmem:[#allocation43_spill] sm:$0xff] %v15130_v55  ;;  %v5589_v49 = vpop.f32.mrf.mxu0  ;;  %v18289_v55 = vld [vmem:[#allocation123_spill] sm:$0xff] }
 0x3d3   : > { %v15132_v30 = vpop.f32.mrf.mxu1  ;;  %v6163_v19 = vrot.slane %v5942_v41, 7  ;;  %v4909_v41 = vadd.f32 %v15037_v38, %v14741_v16  ;;  %v4913_v16 = vadd.f32 %v15046_v26, %v14747_v4  ;;  %v4919_v4 = vadd.f32 %v15054_v62, %v14755_v9 }
 0x3d4   : > { %18285 = vst [vmem:[#allocation45_spill] sm:$0xff] %v15132_v30  ;;  %v5593_v36 = vpop.f32.mrf.mxu0  ;;  %v11807_v30 = vld [vmem:[#allocation8 + $0xac] ss:$12 sps:$4 sm:$0xff]   ;;  %v4923_v62 = vadd.f32 %v15062_v53, %v14761_v43  ;;  %v4929_v43 = vadd.f32 %v15070_v7, %v14769_v35  ;;  %v4933_v35 = vadd.f32 %v15078_v14, %v14777_v5  ;;  %v4939_v5 = vadd.f32 %v15086_v13, %v14789_v3 }
 0x3d5   : > { %v15136_v8 = vpop.f32.mrf.mxu1  ;;  %v5945_v32 = vadd.f32 %v5593_v36, %v4899_v6  ;;  %8064 = vmatprep.subr.bf16.mxu0 %v11807_v30  ;;  %v4943_v3 = vadd.f32 %v15094_v12, %v14799_v59  ;;  %v4949_v12 = vadd.f32 %v15102_v48, %v14807_v10  ;;  %v4953_v10 = vadd.f32 %v15110_v50, %v14817_v61 }
 0x3d6   : > { %18286 = vst [vmem:[#allocation106_spill] sm:$0xff] %v15136_v8  ;;  %v5595_v51 = vpop.f32.mrf.mxu0  ;;  %v15302_v50 = vadd.f32 %v15011_v56, %v14787_v27  ;;  %v18311_v56 = vld [vmem:[#allocation170_spill] sm:$0xff] }
 0x3d7   : > { %v15140_v46 = vpop.f32.mrf.mxu1  ;;  %v6164_v34 = vrot.slane %v5945_v32, 7  ;;  %v5946_v17 = vadd.f32 %v5595_v51, %v4901_v20 }
 0x3d8   : > { %18287 = vst [vmem:[#allocation182_spill] sm:$0xff] %v15140_v46  ;;  %v5597_v8 = vpop.f32.mrf.mxu0  ;;  %18303 = vst [vmem:[#allocation189_spill] sm:$0xff] %v15302_v50 }
 0x3d9   : > { %v15149_v49 = vpop.f32.mrf.mxu1  ;;  %v6231_v6 = vsel %vm2778_vm1, %v6163_v19, %v6164_v34  ;;  %v6128_v11 = vadd.f32 %v15145_v63, %v5946_v17  ;;  %v5948_v36 = vadd.f32 %v5597_v8, %v4903_v22  ;;  %v4911_v8 = vadd.f32 %v15042_v37, %v14744_v44 }
 0x3da   : > { %v6416_v52 = vmul.f32 %v18289_v55, %v6231_v6  ;;  %v15159_v42 = vpop.f32.mrf.mxu0 }
 0x3db   : > { %v15156_v46 = vpop.f32.mrf.mxu1  ;;  %v6165_v21 = vrot.slane %v5948_v36, 7  ;;  %v18291_v36 = vld [vmem:[#allocation130_spill] sm:$0xff] }
 0x3dc   : > { %v15164_v20 = vadd.f32 %v6416_v52, %v6128_v11  ;;  %v5603_v51 = vpop.f32.mrf.mxu0 }
 0x3dd   : > { %v15166_v32 = vpop.f32.mrf.mxu1  ;;  %v15172_v55 = vsel %vm2778_vm1, %v6164_v34, %v6165_v21  ;;  %v5951_v22 = vadd.f32 %v5603_v51, %v4909_v41 }
 0x3de   : > { %18290 = vst [vmem:[#allocation50_spill] sm:$0xff] %v15164_v20  ;;  %v5605_v19 = vpop.f32.mrf.mxu0  ;;  %v18354_v20 = vld [vmem:[#allocation205_spill] sm:$0xff] }
 0x3df   : > { %v15174_v30 = vpop.f32.mrf.mxu1  ;;  %v6166_v38 = vrot.slane %v5951_v22, 7  ;;  %v5952_v52 = vadd.f32 %v5605_v19, %v4911_v8 }
 0x3e0   : > { %v5607_v6 = vpop.f32.mrf.mxu0 }
 0x3e1   : > { %v15178_v17 = vpop.f32.mrf.mxu1  ;;  %v6229_v11 = vsel %vm2778_vm1, %v6165_v21, %v6166_v38  ;;  %v6130_v44 = vadd.f32 %v15145_v63, %v5952_v52  ;;  %v5954_v37 = vadd.f32 %v5607_v6, %v4913_v16  ;;  %v4921_v21 = vadd.f32 %v15058_v25, %v14758_v29 }
 0x3e2   : > { %v6418_v41 = vmul.f32 %v18291_v36, %v6229_v11  ;;  %v15186_v51 = vpop.f32.mrf.mxu0 }
 0x3e3   : > { %v15183_v34 = vpop.f32.mrf.mxu1  ;;  %v6167_v26 = vrot.slane %v5954_v37, 7 }
 0x3e4   : > { %v15190_v8 = vadd.f32 %v6418_v41, %v6130_v44  ;;  %v5613_v19 = vpop.f32.mrf.mxu0 }
 0x3e5   : > { %v15192_v22 = vpop.f32.mrf.mxu1  ;;  %v15198_v16 = vsel %vm2778_vm1, %v6166_v38, %v6167_v26  ;;  %v5957_v52 = vadd.f32 %v5613_v19, %v4919_v4  ;;  %v18293_v4 = vld [vmem:[#allocation145_spill] sm:$0xff] }
 0x3e6   : > { %18292 = vst [vmem:[#allocation49_spill] sm:$0xff] %v15190_v8  ;;  %v5615_v11 = vpop.f32.mrf.mxu0 }
 0x3e7   : > { %v15200_v6 = vpop.f32.mrf.mxu1  ;;  %v6168_v9 = vrot.slane %v5957_v52, 7  ;;  %v5958_v44 = vadd.f32 %v5615_v11, %v4921_v21 }
 0x3e8   : > { %v5617_v36 = vpop.f32.mrf.mxu0 }
 0x3e9   : > { %v15204_v37 = vpop.f32.mrf.mxu1  ;;  %v6227_v41 = vsel %vm2778_vm1, %v6167_v26, %v6168_v9  ;;  %v6132_v29 = vadd.f32 %v15145_v63, %v5958_v44  ;;  %v5960_v25 = vadd.f32 %v5617_v36, %v4923_v62  ;;  %v4931_v26 = vadd.f32 %v15074_v28, %v14774_v58 }
 0x3ea   : > { %v6420_v19 = vmul.f32 %v18293_v4, %v6227_v41  ;;  %v15212_v45 = vpop.f32.mrf.mxu0 }
 0x3eb   : > { %v15209_v38 = vpop.f32.mrf.mxu1  ;;  %v6169_v53 = vrot.slane %v5960_v25, 7 }
 0x3ec   : > { %v15216_v21 = vadd.f32 %v6420_v19, %v6132_v29  ;;  %v5623_v11 = vpop.f32.mrf.mxu0 }
 0x3ed   : > { %v15218_v52 = vpop.f32.mrf.mxu1  ;;  %v15224_v62 = vsel %vm2778_vm1, %v6168_v9, %v6169_v53  ;;  %v5963_v44 = vadd.f32 %v5623_v11, %v4929_v43  ;;  %v18295_v43 = vld [vmem:[#allocation150_spill] sm:$0xff] }
 0x3ee   : > { %18294 = vst [vmem:[#allocation48_spill] sm:$0xff] %v15216_v21  ;;  %v5625_v41 = vpop.f32.mrf.mxu0  ;;  %v18322_v21 = vld [vmem:[#allocation198_spill] sm:$0xff] }
 0x3ef   : > { %v15226_v36 = vpop.f32.mrf.mxu1  ;;  %v6170_v7 = vrot.slane %v5963_v44, 7  ;;  %v5964_v29 = vadd.f32 %v5625_v41, %v4931_v26 }
 0x3f0   : > { %v5627_v4 = vpop.f32.mrf.mxu0 }
 0x3f1   : > { %v15230_v25 = vpop.f32.mrf.mxu1  ;;  %v6225_v19 = vsel %vm2778_vm1, %v6169_v53, %v6170_v7  ;;  %v6134_v58 = vadd.f32 %v15145_v63, %v5964_v29  ;;  %v5966_v28 = vadd.f32 %v5627_v4, %v4933_v35  ;;  %v4941_v53 = vadd.f32 %v15090_v18, %v14792_v60 }
 0x3f2   : > { %v6422_v11 = vmul.f32 %v18295_v43, %v6225_v19  ;;  %v15238_v8 = vpop.f32.mrf.mxu0 }
 0x3f3   : > { %v15235_v9 = vpop.f32.mrf.mxu1  ;;  %v6171_v14 = vrot.slane %v5966_v28, 7 }
 0x3f4   : > { %v15242_v26 = vadd.f32 %v6422_v11, %v6134_v58  ;;  %v5633_v41 = vpop.f32.mrf.mxu0 }
 0x3f5   : > { %v15244_v44 = vpop.f32.mrf.mxu1  ;;  %v15250_v35 = vsel %vm2778_vm1, %v6170_v7, %v6171_v14  ;;  %v5969_v29 = vadd.f32 %v5633_v41, %v4939_v5  ;;  %v18297_v5 = vld [vmem:[#allocation165_spill] sm:$0xff] }
 0x3f6   : > { %18296 = vst [vmem:[#allocation184_spill] sm:$0xff] %v15242_v26  ;;  %v5635_v19 = vpop.f32.mrf.mxu0 }
 0x3f7   : > { %v15252_v4 = vpop.f32.mrf.mxu1  ;;  %v6172_v13 = vrot.slane %v5969_v29, 7  ;;  %v5970_v58 = vadd.f32 %v5635_v19, %v4941_v53 }
 0x3f8   : > { %v5637_v43 = vpop.f32.mrf.mxu0 }
 0x3f9   : > { %v15256_v28 = vpop.f32.mrf.mxu1  ;;  %v6223_v11 = vsel %vm2778_vm1, %v6171_v14, %v6172_v13  ;;  %v6136_v60 = vadd.f32 %v15145_v63, %v5970_v58  ;;  %v5972_v18 = vadd.f32 %v5637_v43, %v4943_v3  ;;  %v4951_v14 = vadd.f32 %v15106_v1, %v14812_v40 }
 0x3fa   : > { %v6424_v41 = vmul.f32 %v18297_v5, %v6223_v11  ;;  %v15264_v26 = vpop.f32.mrf.mxu0  ;;  %v15288_v1 = vadd.f32 %v15004_v0, %v14732_v54  ;;  %v15292_v40 = vadd.f32 %v15006_v2, %v14771_v57  ;;  %v15309_v57 = vadd.f32 %v15013_v39, %v14797_v47  ;;  %v18305_v2 = vld [vmem:[#allocation122_spill] sm:$0xff]  ;;  %v18315_v47 = vld [vmem:[#allocation207_spill] sm:$0xff] }
 0x3fb   : > { %v15261_v7 = vpop.f32.mrf.mxu1  ;;  %v6173_v59 = vrot.slane %v5972_v18, 7  ;;  %v15284_v18 = vadd.f32 %v14998_v31, %v14723_v15  ;;  %v18316_v39 = vld [vmem:[#allocation98_spill] sm:$0xff] }
 0x3fc   : > { %v15268_v53 = vadd.f32 %v6424_v41, %v6136_v60  ;;  %v5643_v19 = vpop.f32.mrf.mxu0  ;;  %18300 = vst [vmem:[#allocation47_spill] sm:$0xff] %v15288_v1  ;;  %18301 = vst [vmem:[#allocation114_spill] sm:$0xff] %v15292_v40  ;;  %v18309_v41 = vld [vmem:[#allocation97_spill] sm:$0xff]  ;;  %v18361_v1 = vld [vmem:[#allocation251_spill] sm:$0xff] }
 0x3fd   : > { %v15270_v29 = vpop.f32.mrf.mxu1  ;;  %v15276_v3 = vsel %vm2778_vm1, %v6172_v13, %v6173_v59  ;;  %v5975_v58 = vadd.f32 %v5643_v19, %v4949_v12  ;;  %18299 = vst [vmem:[#allocation188_spill] sm:$0xff] %v15284_v18  ;;  %v15296_v13 = vadd.f32 %v15009_v23, %v14781_v33  ;;  %18304 = vst [vmem:[#allocation54_spill] sm:$0xff] %v15309_v57  ;;  %v18306_v33 = vld [vmem:[#allocation31_spill] sm:$0xff]  ;;  %v18308_v23 = vld [vmem:[#allocation125_spill] sm:$0xff] }
 0x3fe   : > { %18298 = vst [vmem:[#allocation111_spill] sm:$0xff] %v15268_v53  ;;  %v5645_v11 = vpop.f32.mrf.mxu0  ;;  %v15313_v0 = vadd.f32 %v18306_v33, %v18305_v2  ;;  %v15317_v12 = vadd.f32 %v18309_v41, %v18308_v23  ;;  %v18320_v23 = vld [vmem:[#allocation117_spill] sm:$0xff] }
 0x3ff   : > { %v15278_v43 = vpop.f32.mrf.mxu1  ;;  %v6174_v48 = vrot.slane %v5975_v58, 7  ;;  %v5976_v60 = vadd.f32 %v5645_v11, %v4951_v14  ;;  %18302 = vst [vmem:[#allocation52_spill] sm:$0xff] %v15296_v13  ;;  %v18312_v14 = vld [vmem:[#allocation195_spill] sm:$0xff]  ;;  %v18313_v58 = vld [vmem:[#allocation241_spill] sm:$0xff] }
 0x400   : > { %v5647_v61 = vpop.f32.mrf.mxu0  ;;  %18307 = vst [vmem:[#allocation51_spill] sm:$0xff] %v15313_v0  ;;  %18310 = vst [vmem:[#allocation144_spill] sm:$0xff] %v15317_v12  ;;  %v15326_v11 = vadd.f32 %v18313_v58, %v18312_v14  ;;  %v18321_v41 = vld [vmem:[#allocation33_spill] sm:$0xff]  ;;  %v18323_v12 = vld [vmem:[#allocation243_spill] sm:$0xff] }
 0x401   : > { %v15298_v5 = vpop.f32.mrf.mxu1  ;;  %v6221_v15 = vsel %vm2778_vm1, %v6173_v59, %v6174_v48  ;;  %v6138_v54 = vadd.f32 %v15145_v63, %v5976_v60  ;;  %v5978_v31 = vadd.f32 %v5647_v61, %v4953_v10  ;;  %v15330_v10 = vadd.f32 %v18316_v39, %v18315_v47  ;;  %v18318_v60 = vld [vmem:[#allocation68_spill] sm:$0xff]  ;;  %v18319_v61 = vld [vmem:[#allocation63_spill] sm:$0xff]  ;;  %v18326_v0 = vld [vmem:[#allocation101_spill] sm:$0xff] }
 0x402   : > { %v6426_v19 = vmul.f32 %v18311_v56, %v6221_v15  ;;  %v15322_v59 = vpop.f32.mrf.mxu0  ;;  %18314 = vst [vmem:[#allocation208_spill] sm:$0xff] %v15326_v11  ;;  %v4959_v2 = vadd.f32 %v18319_v61, %v18318_v60  ;;  %v4905_v53 = vadd.f32 %v18321_v41, %v18320_v23  ;;  %v15338_v15 = vadd.f32 %v18323_v12, %v18322_v21  ;;  %v18325_v56 = vld [vmem:[#allocation132_spill] sm:$0xff]  ;;  %v18329_v39 = vld [vmem:[#allocation201_spill] sm:$0xff]  ;;  %v18333_v61 = vld [vmem:[#allocation46_spill] sm:$0xff] }
 0x403   : > { %v15319_v27 = vpop.f32.mrf.mxu1  ;;  %18317 = vst [vmem:[#allocation53_spill] sm:$0xff] %v15330_v10  ;;  %v6175_v33 = vrot.slane %v5978_v31, 7  ;;  %v15342_v57 = vadd.f32 %v18326_v0, %v18325_v56  ;;  %v18330_v10 = vld [vmem:[#allocation245_spill] sm:$0xff]  ;;  %v18334_v41 = vld [vmem:[#allocation190_spill] sm:$0xff]  ;;  %v18335_v0 = vld [vmem:[#allocation96_spill] sm:$0xff] }
 0x404   : > { %18324 = vst [vmem:[#allocation66_spill] sm:$0xff] %v15338_v15  ;;  %v15344_v14 = vadd.f32 %v6426_v19, %v6138_v54  ;;  %v5653_v47 = vpop.f32.mrf.mxu0  ;;  %v15350_v60 = vadd.f32 %v18330_v10, %v18329_v39  ;;  %v18332_v31 = vld [vmem:[#allocation129_spill] sm:$0xff]  ;;  %v4915_v56 = vadd.f32 %v18335_v0, %v18334_v41  ;;  %v18337_v19 = vld [vmem:[#allocation38_spill] sm:$0xff]  ;;  %v18340_v15 = vld [vmem:[#allocation36_spill] sm:$0xff]  ;;  %v5949_v18 = vadd.f32 %v15159_v42, %v4905_v53 }
 0x405   : > { %18327 = vst [vmem:[#allocation146_spill] sm:$0xff] %v15342_v57  ;;  %v15346_v58 = vpop.f32.mrf.mxu1  ;;  %v4961_v23 = vadd.f32 %v18333_v61, %v18332_v31  ;;  %v15356_v21 = vsel %vm2778_vm1, %v6174_v48, %v6175_v33  ;;  %v5981_v12 = vadd.f32 %v5653_v47, %v4959_v2  ;;  %v18336_v54 = vld [vmem:[#allocation137_spill] sm:$0xff]  ;;  %v18339_v57 = vld [vmem:[#allocation71_spill] sm:$0xff]  ;;  %v15374_v61 = vpop.permute.xlu0 %6640  ;;  %v18348_v47 = vld [vmem:[#allocation104_spill] sm:$0xff] }
 0x406   : > { %18328 = vst [vmem:[#allocation210_spill] sm:$0xff] %v15344_v14  ;;  %18331 = vst [vmem:[#allocation56_spill] sm:$0xff] %v15350_v60  ;;  %v15362_v14 = vadd.f32 %v18337_v19, %v18336_v54  ;;  %v15366_v11 = vadd.f32 %v18340_v15, %v18339_v57  ;;  %v18342_v10 = vld [vmem:[#allocation211_spill] sm:$0xff]  ;;  %v5655_v48 = vpop.f32.mrf.mxu0  ;;  %v18351_v54 = vld [vmem:[#allocation102_spill] sm:$0xff] }
 0x407   : > { %v18343_v39 = vld [vmem:[#allocation239_spill] sm:$0xff]  ;;  %v15372_v31 = vpop.f32.mrf.mxu1  ;;  %18346 = vst [vmem:[#allocation149_spill] sm:$0xff] %v15374_v61  ;;  %v5982_v50 = vadd.f32 %v5655_v48, %v4961_v23  ;;  %v18353_v15 = vld [vmem:[#allocation108_spill] sm:$0xff]  ;;  %v18360_v61 = vld [vmem:[#allocation77_spill] sm:$0xff] }
 0x408   : > { %18338 = vst [vmem:[#allocation67_spill] sm:$0xff] %v15362_v14  ;;  %18341 = vst [vmem:[#allocation147_spill] sm:$0xff] %v15366_v11  ;;  %v15370_v60 = vadd.f32 %v18343_v39, %v18342_v10  ;;  %v18347_v2 = vld [vmem:[#allocation139_spill] sm:$0xff]  ;;  %v6176_v14 = vrot.slane %v5981_v12, 7  ;;  %v18355_v10 = vld [vmem:[#allocation249_spill] sm:$0xff] }
 0x409   : > { %18345 = vst [vmem:[#allocation58_spill] sm:$0xff] %v15372_v31  ;;  %v15378_v41 = vadd.f32 %v18348_v47, %v18347_v2  ;;  %v18350_v0 = vld [vmem:[#allocation131_spill] sm:$0xff]  ;;  %v15386_v39 = vadd.f32 %v18355_v10, %v18354_v20  ;;  %v15394_v2 = vadd.f32 %v18361_v1, %v18360_v61  ;;  %v15396_v47 = vpop.f32.mrf.mxu1  ;;  %v18365_v23 = vld [vmem:[#allocation110_spill] sm:$0xff]  ;;  %v6140_v20 = vadd.f32 %v15145_v63, %v5982_v50  ;;  %v18369_v10 = vld [vmem:[#allocation81_spill] sm:$0xff] }
 0x40a   : > { %18344 = vst [vmem:[#allocation212_spill] sm:$0xff] %v15370_v60  ;;  %v4963_v19 = vadd.f32 %v18351_v54, %v18350_v0  ;;  %v18352_v57 = vld [vmem:[#allocation119_spill] sm:$0xff]  ;;  %v18357_v60 = vld [vmem:[#allocation76_spill] sm:$0xff]  ;;  %18363 = vst [vmem:[#allocation57_spill] sm:$0xff] %v15396_v47  ;;  %v5657_v0 = vpop.f32.mrf.mxu0  ;;  %v6219_v54 = vsel %vm2778_vm1, %v6175_v33, %v6176_v14 }
 0x40b   : > { %18349 = vst [vmem:[#allocation214_spill] sm:$0xff] %v15378_v41  ;;  %v4925_v11 = vadd.f32 %v18353_v15, %v18352_v57  ;;  %18356 = vst [vmem:[#allocation55_spill] sm:$0xff] %v15386_v39  ;;  %v18358_v13 = vld [vmem:[#allocation35_spill] sm:$0xff]  ;;  %v18367_v15 = vld [vmem:[#allocation193_spill] sm:$0xff] }
 0x40c   : > { %v15390_v40 = vadd.f32 %v18358_v13, %v18357_v60  ;;  %18362 = vst [vmem:[#allocation216_spill] sm:$0xff] %v15394_v2  ;;  %v18364_v12 = vld [vmem:[#allocation219_spill] sm:$0xff]  ;;  %v5984_v57 = vadd.f32 %v5657_v0, %v4963_v19  ;;  %v18368_v13 = vld [vmem:[#allocation257_spill] sm:$0xff]  ;;  %v18372_v2 = vld [vmem:[#allocation22_spill] sm:$0xff]  ;;  %v15420_v33 = vpop.f32.mrf.mxu0 }
 0x40d   : > { %v15400_v48 = vadd.f32 %v18365_v23, %v18364_v12  ;;  %v15407_v60 = vadd.f32 %v18368_v13, %v18367_v15  ;;  %v18370_v1 = vld [vmem:[#allocation253_spill] sm:$0xff]  ;;  %v15417_v12 = vpop.f32.mrf.mxu1  ;;  %v18376_v23 = vld [vmem:[#allocation187_spill] sm:$0xff]  ;;  %v18380_v15 = vld [vmem:[#allocation26_spill] sm:$0xff] }
 0x40e   : > { %18359 = vst [vmem:[#allocation151_spill] sm:$0xff] %v15390_v40  ;;  %v15411_v61 = vadd.f32 %v18370_v1, %v18369_v10  ;;  %v18373_v40 = vld [vmem:[#allocation116_spill] sm:$0xff]  ;;  %18375 = vst [vmem:[#allocation154_spill] sm:$0xff] %v15417_v12  ;;  %v18377_v50 = vld [vmem:[#allocation83_spill] sm:$0xff]  ;;  %v6177_v47 = vrot.slane %v5984_v57, 7 }
 0x40f   : > { %18366 = vst [vmem:[#allocation152_spill] sm:$0xff] %v15400_v48  ;;  %v15415_v39 = vadd.f32 %v18373_v40, %v18372_v2  ;;  %v6428_v48 = vmul.f32 %v18376_v23, %v6219_v54  ;;  %v18378_v19 = vld [vmem:[#allocation37_spill] sm:$0xff]  ;;  %v18381_v13 = vld [vmem:[#allocation40_spill] sm:$0xff]  ;;  %v18384_v1 = vld [vmem:[#allocation43_spill] sm:$0xff] }
 0x410   : > { %18371 = vst [vmem:[#allocation218_spill] sm:$0xff] %v15411_v61  ;;  %v15424_v0 = vadd.f32 %v18378_v19, %v18377_v50  ;;  %v15428_v41 = vadd.f32 %v18381_v13, %v18380_v15  ;;  %v18383_v10 = vld [vmem:[#allocation200_spill] sm:$0xff]  ;;  %v18385_v40 = vld [vmem:[#allocation227_spill] sm:$0xff]  ;;  %v18386_v2 = vld [vmem:[#allocation42_spill] sm:$0xff]  ;;  %v15443_v19 = vpop.f32.mrf.mxu1  ;;  %v5663_v15 = vpop.f32.mrf.mxu0 }
 0x411   : > { %18374 = vst [vmem:[#allocation60_spill] sm:$0xff] %v15415_v39  ;;  %v4969_v61 = vadd.f32 %v18384_v1, %v18383_v10  ;;  %v15434_v39 = vadd.f32 %v18386_v2, %v18385_v40  ;;  %v18388_v12 = vld [vmem:[#allocation229_spill] sm:$0xff]  ;;  %v18389_v54 = vld [vmem:[#allocation118_spill] sm:$0xff]  ;;  %v15441_v50 = vadd.f32 %v6428_v48, %v6140_v20  ;;  %18392 = vst [vmem:[#allocation112_spill] sm:$0xff] %v15443_v19  ;;  %v15445_v13 = vpop.permute.xlu1 %6645 }
 0x412   : > { %18379 = vst [vmem:[#allocation220_spill] sm:$0xff] %v15424_v0  ;;  %18382 = vst [vmem:[#allocation62_spill] sm:$0xff] %v15428_v41  ;;  %v15438_v23 = vadd.f32 %v18389_v54, %v18388_v12  ;;  %v15447_v41 = vpop.permute.xlu0 %6326  ;;  %v18394_v57 = vld [vmem:[#allocation194_spill] sm:$0xff]  ;;  %v18397_v2 = vld [vmem:[#allocation45_spill] sm:$0xff]  ;;  %v15455_v12 = vsel %vm2778_vm1, %v6176_v14, %v6177_v47  ;;  %v5665_v14 = vpop.f32.mrf.mxu0 }
 0x413   : > { %18387 = vst [vmem:[#allocation156_spill] sm:$0xff] %v15434_v39  ;;  %18391 = vst [vmem:[#allocation59_spill] sm:$0xff] %v15441_v50  ;;  %v18395_v10 = vld [vmem:[#allocation258_spill] sm:$0xff]  ;;  %v5987_v42 = vadd.f32 %v5663_v15, %v4969_v61  ;;  %v18399_v53 = vld [vmem:[#allocation231_spill] sm:$0xff] }
 0x414   : > { %18390 = vst [vmem:[#allocation222_spill] sm:$0xff] %v15438_v23  ;;  %18393 = vst [vmem:[#allocation255_spill] sm:$0xff] %v15445_v13  ;;  %v4945_v1 = vadd.f32 %v18395_v10, %v18394_v57  ;;  %v18396_v40 = vld [vmem:[#allocation134_spill] sm:$0xff]  ;;  %v18400_v48 = vld [vmem:[#allocation39_spill] sm:$0xff] }
 0x415   : > { %v4971_v39 = vadd.f32 %v18397_v2, %v18396_v40  ;;  %18398 = vst [vmem:[#allocation157_spill] sm:$0xff] %v15455_v12  ;;  %v15459_v20 = vadd.f32 %v18400_v48, %v18399_v53  ;;  %v18402_v54 = vld [vmem:[#allocation233_spill] sm:$0xff]  ;;  %v18403_v23 = vld [vmem:[#allocation120_spill] sm:$0xff]  ;;  %v18406_v50 = vld [vmem:[#allocation259_spill] sm:$0xff]  ;;  %v15473_v2 = vpop.f32.mrf.mxu1 }
 0x416   : > { %v15463_v0 = vadd.f32 %v18403_v23, %v18402_v54  ;;  %v18405_v13 = vld [vmem:[#allocation25_spill] sm:$0xff]  ;;  %v18408_v57 = vld [vmem:[#allocation92_spill] sm:$0xff]  ;;  %v18409_v10 = vld [vmem:[#allocation127_spill] sm:$0xff]  ;;  %18411 = vst [vmem:[#allocation226_spill] sm:$0xff] %v15473_v2  ;;  %v6178_v23 = vrot.slane %v5987_v42, 7 }
 0x417   : > { %18401 = vst [vmem:[#allocation224_spill] sm:$0xff] %v15459_v20  ;;  %v15467_v19 = vadd.f32 %v18406_v50, %v18405_v13  ;;  %v15471_v40 = vadd.f32 %v18409_v10, %v18408_v57  ;;  %v18412_v61 = vld [vmem:[#allocation126_spill] sm:$0xff]  ;;  %v18413_v15 = vld [vmem:[#allocation41_spill] sm:$0xff]  ;;  %v18414_v53 = vld [vmem:[#allocation136_spill] sm:$0xff]  ;;  %v5988_v54 = vadd.f32 %v5665_v14, %v4971_v39  ;;  %v6129_v10 = vadd.f32 %v15145_v63, %v5949_v18  ;;  %v15491_v2 = vpop.f32.mrf.mxu1 }
 0x418   : > { %18404 = vst [vmem:[#allocation61_spill] sm:$0xff] %v15463_v0  ;;  %v15477_v31 = vadd.f32 %v18413_v15, %v18412_v61  ;;  %v18415_v48 = vld [vmem:[#allocation106_spill] sm:$0xff]  ;;  %v18416_v0 = vld [vmem:[#allocation27_spill] sm:$0xff]  ;;  %v18417_v12 = vld [vmem:[#allocation44_spill] sm:$0xff]  ;;  %v5667_v61 = vpop.f32.mrf.mxu0  ;;  %v6217_v39 = vsel %vm2778_vm1, %v6177_v47, %v6178_v23  ;;  %v15513_v47 = vpop.permute.xlu1 %6331 }
 0x419   : > { %18407 = vst [vmem:[#allocation65_spill] sm:$0xff] %v15467_v19  ;;  %18410 = vst [vmem:[#allocation159_spill] sm:$0xff] %v15471_v40  ;;  %v4973_v20 = vadd.f32 %v18415_v48, %v18414_v53  ;;  %v15483_v50 = vadd.f32 %v18417_v12, %v18416_v0  ;;  %v18419_v13 = vld [vmem:[#allocation237_spill] sm:$0xff]  ;;  %v18420_v19 = vld [vmem:[#allocation103_spill] sm:$0xff]  ;;  %v5955_v40 = vadd.f32 %v15186_v51, %v4915_v56 }
 0x41a   : > { %v15487_v57 = vadd.f32 %v18420_v19, %v18419_v13  ;;  %18422 = vst [vmem:[#allocation70_spill] sm:$0xff] %v15491_v2  ;;  %v18423_v15 = vld [vmem:[#allocation121_spill] sm:$0xff]  ;;  %v6142_v0 = vadd.f32 %v15145_v63, %v5988_v54  ;;  %v18424_v42 = vld [vmem:[#allocation199_spill] sm:$0xff]  ;;  %v18426_v48 = vld [vmem:[#allocation202_spill] sm:$0xff] }
 0x41b   : > { %18418 = vst [vmem:[#allocation161_spill] sm:$0xff] %v15483_v50  ;;  %v6417_v53 = vmul.f32 %v18423_v15, %v15172_v55  ;;  %v5990_v12 = vadd.f32 %v5667_v61, %v4973_v20  ;;  %v18425_v14 = vld [vmem:[#allocation247_spill] sm:$0xff]  ;;  %v18427_v18 = vld [vmem:[#allocation182_spill] sm:$0xff]  ;;  %v18430_v55 = vld [vmem:[#allocation192_spill] sm:$0xff]  ;;  %v15511_v50 = vpop.f32.mrf.mxu0  ;;  %v15515_v20 = vpop.permute.xlu0 %6336 }
 0x41c   : > { %18421 = vst [vmem:[#allocation228_spill] sm:$0xff] %v15487_v57  ;;  %v15500_v19 = vadd.f32 %v18425_v14, %v18424_v42  ;;  %v15504_v13 = vadd.f32 %v18427_v18, %v18426_v48  ;;  %v18428_v51 = vld [vmem:[#allocation203_spill] sm:$0xff]  ;;  %v15508_v57 = vpop.f32.mrf.mxu1  ;;  %v6430_v15 = vmul.f32 %v18430_v55, %v6217_v39  ;;  %18431 = vst [vmem:[#allocation162_spill] sm:$0xff] %v15513_v47  ;;  %v18432_v54 = vld [vmem:[#allocation209_spill] sm:$0xff] }
 0x41d   : > { %v4979_v56 = vadd.f32 %v15149_v49, %v18428_v51  ;;  %18429 = vst [vmem:[#allocation64_spill] sm:$0xff] %v15508_v57  ;;  %v4981_v61 = vadd.f32 %v15156_v46, %v18432_v54  ;;  %v18433_v42 = vld [vmem:[#allocation72_spill] sm:$0xff]  ;;  %v5961_v48 = vadd.f32 %v15212_v45, %v4925_v11  ;;  %v6179_v18 = vrot.slane %v5990_v12, 7  ;;  %v18434_v49 = vld [vmem:[#allocation73_spill] sm:$0xff]  ;;  %v5673_v46 = vpop.f32.mrf.mxu0 }
 0x41e   : > { %v4983_v14 = vadd.f32 %v15166_v32, %v18433_v42  ;;  %v15524_v51 = vadd.f32 %v15174_v30, %v18434_v49  ;;  %v18435_v39 = vld [vmem:[#allocation128_spill] sm:$0xff]  ;;  %v6131_v47 = vadd.f32 %v15145_v63, %v5955_v40  ;;  %v15529_v57 = vadd.f32 %v6430_v15, %v6142_v0  ;;  %v15531_v2 = vpop.f32.mrf.mxu1  ;;  %v18436_v32 = vld [vmem:[#allocation213_spill] sm:$0xff] }
 0x41f   : > { %v6419_v55 = vmul.f32 %v18435_v39, %v15198_v16  ;;  %v15533_v54 = vadd.f32 %v6417_v53, %v6129_v10  ;;  %v4989_v45 = vadd.f32 %v15178_v17, %v18436_v32  ;;  %v15539_v11 = vsel %vm2778_vm1, %v6178_v23, %v6179_v18  ;;  %v18437_v12 = vld [vmem:[#allocation204_spill] sm:$0xff]  ;;  %v18438_v42 = vld [vmem:[#allocation141_spill] sm:$0xff]  ;;  %v5675_v17 = vpop.f32.mrf.mxu0  ;;  %v18440_v23 = vld [vmem:[#allocation143_spill] sm:$0xff] }
 0x420   : > { %v5993_v30 = vadd.f32 %v5673_v46, %v4979_v56  ;;  %v4991_v16 = vadd.f32 %v15183_v34, %v18437_v12  ;;  %v4993_v40 = vadd.f32 %v15192_v22, %v18438_v42  ;;  %v18439_v0 = vld [vmem:[#allocation20_spill] sm:$0xff]  ;;  %v5967_v10 = vadd.f32 %v15238_v8, %v15407_v60  ;;  %v15551_v53 = vpop.f32.mrf.mxu1  ;;  %v18441_v22 = vld [vmem:[#allocation215_spill] sm:$0xff] }
 0x421   : > { %v15547_v15 = vadd.f32 %v15200_v6, %v18439_v0  ;;  %v6421_v49 = vmul.f32 %v18440_v23, %v15224_v62  ;;  %v6133_v56 = vadd.f32 %v15145_v63, %v5961_v48  ;;  %v5994_v34 = vadd.f32 %v5675_v17, %v4981_v61  ;;  %v18442_v6 = vld [vmem:[#allocation19_spill] sm:$0xff]  ;;  %v5677_v42 = vpop.f32.mrf.mxu0  ;;  %v15567_v0 = vpop.permute.xlu1 %6341  ;;  %v18443_v48 = vld [vmem:[#allocation217_spill] sm:$0xff] }
 0x422   : > { %v6180_v39 = vrot.slane %v5993_v30, 7  ;;  %v15556_v46 = vadd.f32 %v6419_v55, %v6131_v47  ;;  %v15560_v32 = vadd.f32 %v15204_v37, %v18441_v22  ;;  %v15564_v12 = vadd.f32 %v15209_v38, %v18442_v6  ;;  %v5058_v60 = vpop.f32.mrf.mxu1  ;;  %v15569_v62 = vpop.permute.xlu0 %6650  ;;  %v18444_v38 = vld [vmem:[#allocation78_spill] sm:$0xff] }
 0x423   : > { %v5973_v8 = vadd.f32 %v15264_v26, %v4945_v1  ;;  %v15573_v47 = vadd.f32 %v15218_v52, %v18443_v48  ;;  %v6144_v61 = vadd.f32 %v15145_v63, %v5994_v34  ;;  %v5996_v55 = vadd.f32 %v5677_v42, %v4983_v14  ;;  %v18445_v26 = vld [vmem:[#allocation148_spill] sm:$0xff]  ;;  %v5679_v52 = vpop.f32.mrf.mxu0  ;;  %v18446_v60 = vld [vmem:[#allocation142_spill] sm:$0xff] }
 0x424   : > { %v6215_v37 = vsel %vm2778_vm1, %v6179_v18, %v6180_v39  ;;  %v15580_v30 = vadd.f32 %v15226_v36, %v18444_v38  ;;  %v6423_v1 = vmul.f32 %v18445_v26, %v15250_v35  ;;  %v6135_v17 = vadd.f32 %v15145_v63, %v5967_v10  ;;  %v5060_v23 = vpop.f32.mrf.mxu1  ;;  %v18447_v34 = vld [vmem:[#allocation206_spill] sm:$0xff]  ;;  %v18448_v35 = vld [vmem:[#allocation163_spill] sm:$0xff] }
 0x425   : > { %v6432_v22 = vmul.f32 %v15447_v41, %v6215_v37  ;;  %v15586_v6 = vadd.f32 %v6421_v49, %v6133_v56  ;;  %v15590_v18 = vadd.f32 %v15230_v25, %v18446_v60  ;;  %v5979_v14 = vadd.f32 %v15322_v59, %v15477_v31  ;;  %v5683_v56 = vpop.f32.mrf.mxu0  ;;  %v18449_v37 = vld [vmem:[#allocation221_spill] sm:$0xff]  ;;  %v18450_v38 = vld [vmem:[#allocation82_spill] sm:$0xff] }
 0x426   : > { %v6181_v36 = vrot.slane %v5996_v55, 7  ;;  %v15596_v42 = vadd.f32 %v15235_v9, %v18447_v34  ;;  %v6425_v10 = vmul.f32 %v18448_v35, %v15276_v3  ;;  %v6137_v41 = vadd.f32 %v15145_v63, %v5973_v8  ;;  %v5062_v49 = vpop.f32.mrf.mxu1  ;;  %v18451_v3 = vld [vmem:[#allocation223_spill] sm:$0xff]  ;;  %v15627_v60 = vpop.permute.xlu0 %6660  ;;  %v18456_v34 = vld [vmem:[#allocation21_spill] sm:$0xff]  ;;  %v18457_v35 = vld [vmem:[#allocation24_spill] sm:$0xff] }
 0x427   : > { %v15601_v48 = vadd.f32 %v6432_v22, %v6144_v61  ;;  %v15605_v25 = vadd.f32 %v15244_v44, %v18449_v37  ;;  %v15609_v59 = vadd.f32 %v15252_v4, %v18450_v38  ;;  %v5999_v31 = vadd.f32 %v5683_v56, %v4989_v45  ;;  %v18452_v61 = vld [vmem:[#allocation225_spill] sm:$0xff]  ;;  %v5685_v4 = vpop.f32.mrf.mxu0  ;;  %v15625_v22 = vpop.permute.xlu1 %6655  ;;  %18454 = vst [vmem:[#allocation164_spill] sm:$0xff] %v15627_v60  ;;  %v18455_v45 = vld [vmem:[#allocation168_spill] sm:$0xff]  ;;  %v18458_v49 = vld [vmem:[#allocation86_spill] sm:$0xff] }
 0x428   : > { %v6214_v9 = vsel %vm2778_vm1, %v6180_v39, %v6181_v36  ;;  %v15613_v55 = vadd.f32 %v6423_v1, %v6135_v17  ;;  %v15617_v8 = vadd.f32 %v15256_v28, %v18451_v3  ;;  %v15621_v26 = vadd.f32 %v15261_v7, %v18452_v61  ;;  %v5064_v23 = vpop.f32.mrf.mxu1  ;;  %18453 = vst [vmem:[#allocation230_spill] sm:$0xff] %v15625_v22  ;;  %v18459_v38 = vld [vmem:[#allocation87_spill] sm:$0xff]  ;;  %v18462_v3 = vld [vmem:[#allocation185_spill] sm:$0xff] }
 0x429   : > { %v5985_v44 = vadd.f32 %v15420_v33, %v15500_v19  ;;  %v6427_v39 = vmul.f32 %v18455_v45, %v15356_v21  ;;  %v6139_v1 = vadd.f32 %v15145_v63, %v5979_v14  ;;  %v6182_v28 = vrot.slane %v5999_v31, 7  ;;  %v5687_v21 = vpop.f32.mrf.mxu0  ;;  %v18463_v45 = vld [vmem:[#allocation91_spill] sm:$0xff] }
 0x42a   : > { %v6000_v17 = vadd.f32 %v5685_v4, %v4991_v16  ;;  %v15634_v7 = vadd.f32 %v15270_v29, %v18456_v34  ;;  %v15638_v33 = vadd.f32 %v15278_v43, %v18457_v35  ;;  %v15640_v19 = vadd.f32 %v6425_v10, %v6137_v41  ;;  %v11255_v37 = vpop.f32.mrf.mxu1  ;;  %v18460_v43 = vld [vmem:[#allocation88_spill] sm:$0xff]  ;;  %v18461_v41 = vld [vmem:[#allocation157_spill] sm:$0xff]  ;;  %v18464_v34 = vld [vmem:[#allocation58_spill] sm:$0xff] }
 0x42b   : > { %v15644_v56 = vadd.f32 %v15298_v5, %v18458_v49  ;;  %v15648_v14 = vadd.f32 %v15319_v27, %v18459_v38  ;;  %v6213_v29 = vsel %vm2778_vm1, %v6181_v36, %v6182_v28  ;;  %v6002_v31 = vadd.f32 %v5687_v21, %v4993_v40  ;;  %v5689_v27 = vpop.f32.mrf.mxu0  ;;  %v18465_v40 = vld [vmem:[#allocation188_spill] sm:$0xff]  ;;  %v18467_v21 = vld [vmem:[#allocation57_spill] sm:$0xff] }
 0x42c   : > { %v6146_v16 = vadd.f32 %v15145_v63, %v6000_v17  ;;  %v15655_v10 = vadd.f32 %v15346_v58, %v18460_v43  ;;  %v6429_v5 = vmul.f32 %v18462_v3, %v18461_v41  ;;  %v6141_v61 = vadd.f32 %v15145_v63, %v5985_v44  ;;  %v5796_v23 = vpop.f32.mrf.mxu1  ;;  %v18466_v58 = vld [vmem:[#allocation23_spill] sm:$0xff]  ;;  %v15677_v3 = vpop.permute.xlu1 %6665 }
 0x42d   : > { %v6434_v4 = vmul.f32 %v15515_v20, %v6213_v29  ;;  %v15663_v35 = vadd.f32 %v18464_v34, %v18463_v45  ;;  %v15665_v36 = vadd.f32 %v6427_v39, %v6139_v1  ;;  %v5947_v17 = vadd.f32 %v11255_v37, %v18465_v40  ;;  %v5693_v41 = vpop.f32.mrf.mxu0  ;;  %18469 = vst [vmem:[#allocation69_spill] sm:$0xff] %v15677_v3  ;;  %v6347_v39 = vpop.permute.xlu0 %6346  ;;  %v18470_v1 = vld [vmem:[#allocation30_spill] sm:$0xff] }
 0x42e   : > { %v6183_v49 = vrot.slane %v6002_v31, 7  ;;  %v15670_v38 = vadd.f32 %v18467_v21, %v18466_v58  ;;  %v5991_v44 = vadd.f32 %v15511_v50, %v15504_v13  ;;  %v5997_v43 = vadd.f32 %v5679_v52, %v15524_v51  ;;  %v11256_v29 = vpop.f32.mrf.mxu1  ;;  %v18471_v23 = vld [vmem:[#allocation154_spill] sm:$0xff]  ;;  %v18472_v31 = vld [vmem:[#allocation47_spill] sm:$0xff]  ;;  %v18473_v13 = vld [vmem:[#allocation28_spill] sm:$0xff] }
 0x42f   : > { %v15675_v20 = vadd.f32 %v6434_v4, %v6146_v16  ;;  %v15681_v37 = vadd.f32 %v18471_v23, %v18470_v1  ;;  %v5950_v45 = vadd.f32 %v11256_v29, %v18472_v31  ;;  %v6005_v50 = vadd.f32 %v5693_v41, %v15560_v32  ;;  %v18474_v51 = vld [vmem:[#allocation112_spill] sm:$0xff]  ;;  %v18475_v16 = vld [vmem:[#allocation235_spill] sm:$0xff]  ;;  %v18476_v4 = vld [vmem:[#allocation226_spill] sm:$0xff]  ;;  %v5695_v31 = vpop.f32.mrf.mxu0 }
 0x430   : > { %v6212_v34 = vsel %vm2778_vm1, %v6182_v28, %v6183_v49  ;;  %v15689_v52 = vadd.f32 %v18474_v51, %v18473_v13  ;;  %v15693_v40 = vadd.f32 %v18476_v4, %v18475_v16  ;;  %v15695_v58 = vadd.f32 %v6429_v5, %v6141_v61  ;;  %v18478_v21 = vld [vmem:[#allocation29_spill] sm:$0xff]  ;;  %v18479_v1 = vld [vmem:[#allocation70_spill] sm:$0xff]  ;;  %v5799_v29 = vpop.f32.mrf.mxu1  ;;  %v18482_v13 = vld [vmem:[#allocation64_spill] sm:$0xff] }
 0x431   : > { %18468 = vst [vmem:[#allocation232_spill] sm:$0xff] %v15675_v20  ;;  %v15699_v23 = vadd.f32 %v18479_v1, %v18478_v21  ;;  %v6488_v20 = vrot.slane %v5947_v17, 1  ;;  %v6489_v28 = vrot.slane %v5950_v45, 1  ;;  %v6184_v3 = vrot.slane %v6005_v50, 7  ;;  %v18481_v41 = vld [vmem:[#allocation93_spill] sm:$0xff]  ;;  %v18484_v16 = vld [vmem:[#allocation191_spill] sm:$0xff]  ;;  %v5697_v1 = vpop.f32.mrf.mxu0 }
 0x432   : > { %18477 = vst [vmem:[#allocation75_spill] sm:$0xff] %v15693_v40  ;;  %v6006_v32 = vadd.f32 %v5695_v31, %v15564_v12  ;;  %v15704_v51 = vadd.f32 %v18482_v13, %v18481_v41  ;;  %v6431_v4 = vmul.f32 %v18484_v16, %v15539_v11  ;;  %v6143_v5 = vadd.f32 %v15145_v63, %v5991_v44  ;;  %v11259_v21 = vpop.f32.mrf.mxu1  ;;  %v18485_v29 = vld [vmem:[#allocation162_spill] sm:$0xff]  ;;  %v18486_v50 = vld [vmem:[#allocation135_spill] sm:$0xff]  ;;  %v6352_v16 = vpop.permute.xlu1 %6351 }
 0x433   : > { %18480 = vst [vmem:[#allocation166_spill] sm:$0xff] %v15699_v23  ;;  %v6145_v61 = vadd.f32 %v15145_v63, %v5997_v43  ;;  %v6433_v23 = vmul.f32 %v18485_v29, %v6214_v9  ;;  %v6554_v17 = vsel %vm3139_vm0, %v6488_v20, %v6489_v28  ;;  %v6211_v12 = vsel %vm2778_vm1, %v6183_v49, %v6184_v3  ;;  %v5699_v13 = vpop.f32.mrf.mxu0  ;;  %v18487_v9 = vld [vmem:[#allocation34_spill] sm:$0xff]  ;;  %v18489_v20 = vld [vmem:[#allocation32_spill] sm:$0xff] }
 0x434   : > { %18483 = vst [vmem:[#allocation234_spill] sm:$0xff] %v15704_v51  ;;  %v6148_v45 = vadd.f32 %v15145_v63, %v6006_v32  ;;  %v6740_v31 = vmul.f32 %v18486_v50, %v6554_v17  ;;  %v6003_v11 = vadd.f32 %v5689_v27, %v15547_v15  ;;  %v5812_v41 = vpop.f32.mrf.mxu1  ;;  %v6436_v44 = vmul.f32 %v6347_v39, %v6211_v12  ;;  %v6357_v51 = vpop.permute.xlu0 %6356  ;;  %v18491_v32 = vld [vmem:[#allocation114_spill] sm:$0xff]  ;;  %v18492_v17 = vld [vmem:[#allocation52_spill] sm:$0xff] }
 0x435   : > { %v6008_v43 = vadd.f32 %v5697_v1, %v15573_v47  ;;  %v15721_v29 = vadd.f32 %v15531_v2, %v18487_v9  ;;  %v15725_v49 = vadd.f32 %v15551_v53, %v18489_v20  ;;  %v5959_v40 = vadd.f32 %v11259_v21, %v18491_v32  ;;  %v18493_v15 = vld [vmem:[#allocation50_spill] sm:$0xff]  ;;  %v5703_v60 = vpop.f32.mrf.mxu0  ;;  %v18495_v9 = vld [vmem:[#allocation189_spill] sm:$0xff] }
 0x436   : > { %v5953_v50 = vadd.f32 %v5812_v41, %v18492_v17  ;;  %v6776_v27 = vadd.f32 %v6740_v31, %v18493_v15  ;;  %v15730_v39 = vadd.f32 %v6436_v44, %v6148_v45  ;;  %v11260_v47 = vpop.f32.mrf.mxu1  ;;  %v6009_v12 = vadd.f32 %v5699_v13, %v15580_v30  ;;  %v18496_v13 = vld [vmem:[#allocation54_spill] sm:$0xff]  ;;  %v18498_v15 = vld [vmem:[#allocation155_spill] sm:$0xff] }
 0x437   : > { %18488 = vst [vmem:[#allocation167_spill] sm:$0xff] %v15721_v29  ;;  %18490 = vst [vmem:[#allocation236_spill] sm:$0xff] %v15725_v49  ;;  %v6185_v1 = vrot.slane %v6008_v43, 7  ;;  %v15733_v22 = vadd.f32 %v6431_v4, %v6143_v5  ;;  %v5962_v29 = vadd.f32 %v11260_v47, %v18495_v9  ;;  %v15737_v53 = vadd.f32 %v5703_v60, %v15590_v18  ;;  %v5705_v30 = vpop.f32.mrf.mxu0  ;;  %v18497_v18 = vld [vmem:[#allocation133_spill] sm:$0xff] }
 0x438   : > { %18494 = vst [vmem:[#allocation80_spill] sm:$0xff] %v15730_v39  ;;  %v6490_v2 = vrot.slane %v5953_v50, 1  ;;  %v15739_v21 = vadd.f32 %v6433_v23, %v6145_v61  ;;  %v6435_v41 = vmul.f32 %v15567_v0, %v6212_v34  ;;  %v6147_v45 = vadd.f32 %v15145_v63, %v6003_v11  ;;  %v5815_v44 = vpop.f32.mrf.mxu1  ;;  %v15754_v32 = vpop.permute.xlu0 %6670  ;;  %v18504_v39 = vld [vmem:[#allocation208_spill] sm:$0xff] }
 0x439   : > { %v6210_v31 = vsel %vm2778_vm1, %v6184_v3, %v6185_v1  ;;  %v6492_v43 = vrot.slane %v5959_v40, 1  ;;  %v6493_v5 = vrot.slane %v5962_v29, 1  ;;  %v5956_v20 = vadd.f32 %v5815_v44, %v18496_v13  ;;  %v5707_v11 = vpop.f32.mrf.mxu0  ;;  %v15752_v3 = vpop.permute.xlu1 %6361  ;;  %v18501_v13 = vld [vmem:[#allocation48_spill] sm:$0xff] }
 0x43a   : > { %v6553_v4 = vsel %vm3139_vm0, %v6489_v28, %v6490_v2  ;;  %v6149_v23 = vadd.f32 %v15145_v63, %v6009_v12  ;;  %v11263_v61 = vpop.f32.mrf.mxu1  ;;  %v6186_v0 = vrot.slane %v15737_v53, 7  ;;  %v6012_v34 = vadd.f32 %v5705_v30, %v15596_v42  ;;  %v18499_v12 = vld [vmem:[#allocation51_spill] sm:$0xff] }
 0x43b   : > { %v6741_v60 = vmul.f32 %v18497_v18, %v6553_v4  ;;  %v6812_v40 = vmax.f32 %v6776_v27, 0.0  ;;  %v6550_v28 = vsel %vm3139_vm0, %v6492_v43, %v6493_v5  ;;  %v6437_v29 = vmul.f32 %v6352_v16, %v6210_v31  ;;  %v5709_v44 = vpop.f32.mrf.mxu0  ;;  %v18500_v16 = vld [vmem:[#allocation144_spill] sm:$0xff] }
 0x43c   : > { %v6491_v17 = vrot.slane %v5956_v20, 1  ;;  %v6744_v47 = vmul.f32 %v18498_v15, %v6550_v28  ;;  %v15761_v9 = vadd.f32 %v11263_v61, %v18499_v12  ;;  %v6209_v42 = vsel %vm2778_vm1, %v6185_v1, %v6186_v0  ;;  %v5828_v53 = vpop.f32.mrf.mxu1  ;;  %v18502_v18 = vld [vmem:[#allocation140_spill] sm:$0xff]  ;;  %v18503_v61 = vld [vmem:[#allocation138_spill] sm:$0xff] }
 0x43d   : > { %v6777_v50 = vadd.f32 %v6741_v60, %v15533_v54  ;;  %v5965_v31 = vadd.f32 %v5828_v53, %v18500_v16  ;;  %v6150_v54 = vadd.f32 %v15145_v63, %v6012_v34  ;;  %v5713_v15 = vpop.f32.mrf.mxu0  ;;  %v6438_v49 = vmul.f32 %v6357_v51, %v6209_v42  ;;  %v18505_v53 = vld [vmem:[#allocation49_spill] sm:$0xff] }
 0x43e   : > { %v6551_v27 = vsel %vm3139_vm0, %v6491_v17, %v6492_v43  ;;  %v6552_v30 = vsel %vm3139_vm0, %v6490_v2, %v6491_v17  ;;  %v6780_v20 = vadd.f32 %v6744_v47, %v18501_v13  ;;  %v11264_v1 = vpop.f32.mrf.mxu1  ;;  %v6014_v2 = vadd.f32 %v5707_v11, %v15605_v25  ;;  %v15781_v13 = vpop.permute.xlu1 %6675 }
 0x43f   : > { %v6813_v4 = vmax.f32 %v6777_v50, 0.0  ;;  %v6742_v60 = vmul.f32 %v18502_v18, %v6552_v30  ;;  %v6743_v28 = vmul.f32 %v18503_v61, %v6551_v27  ;;  %v6494_v12 = vrot.slane %v5965_v31, 1  ;;  %v5715_v30 = vpop.f32.mrf.mxu0  ;;  %v15783_v27 = vpop.permute.xlu0 %6680 }
 0x440   : > { %v15775_v43 = vadd.f32 %v11264_v1, %v18504_v39  ;;  %v6496_v50 = vrot.slane %v15761_v9, 1  ;;  %v5831_v47 = vpop.f32.mrf.mxu1  ;;  %v15787_v39 = vadd.f32 %v6438_v49, %v6150_v54  ;;  %v6187_v11 = vrot.slane %v6014_v2, 7  ;;  %v18508_v9 = vld [vmem:[#allocation53_spill] sm:$0xff] }
 0x441   : > { %v10622_v17 = vpack.c.bf16 %v6813_v4, %v6812_v40  ;;  %v6778_v16 = vadd.f32 %v6742_v60, %v18505_v53  ;;  %v6779_v34 = vadd.f32 %v6743_v28, %v15556_v46  ;;  %v6549_v51 = vsel %vm3139_vm0, %v6493_v5, %v6494_v12  ;;  %v18507_v46 = vld [vmem:[#allocation153_spill] sm:$0xff]  ;;  %v5717_v60 = vpop.f32.mrf.mxu0 }
 0x442   : > { %18506 = vst [vmem:[#allocation74_spill] sm:$0xff] %v15787_v39  ;;  %v6497_v25 = vrot.slane %v15775_v43, 1  ;;  %v6745_v31 = vmul.f32 %v18507_v46, %v6549_v51  ;;  %v5968_v4 = vadd.f32 %v5831_v47, %v18508_v9  ;;  %v11267_v18 = vpop.f32.mrf.mxu1  ;;  %v15792_v61 = vadd.f32 %v6435_v41, %v6147_v45  ;;  %v18509_v43 = vld [vmem:[#allocation175_spill] sm:$0xff]  ;;  %v18510_v45 = vld [vmem:[#allocation66_spill] sm:$0xff] }
 0x443   : > { %10715 = vst [vmem:[#allocation4 + $0x8] sm:$0xff] %v10622_v17   ;;  %v6814_v40 = vmax.f32 %v6778_v16, 0.0  ;;  %v6815_v42 = vmax.f32 %v6779_v34, 0.0  ;;  %v15794_v28 = vadd.f32 %v6437_v29, %v6149_v23  ;;  %v6208_v5 = vsel %vm2778_vm1, %v6186_v0, %v6187_v11  ;;  %v5719_v16 = vpop.f32.mrf.mxu0  ;;  %v18511_v0 = vld [vmem:[#allocation111_spill] sm:$0xff]  ;;  %v6367_v46 = vpop.permute.xlu0 %6366 }
 0x444   : > { %v6546_v49 = vsel %vm3139_vm0, %v6496_v50, %v6497_v25  ;;  %v6781_v1 = vadd.f32 %v6745_v31, %v15586_v6  ;;  %v6015_v17 = vadd.f32 %v5709_v44, %v15609_v59  ;;  %v5844_v53 = vpop.f32.mrf.mxu1  ;;  %v6816_v34 = vmax.f32 %v6780_v20, 0.0  ;;  %v18512_v6 = vld [vmem:[#allocation146_spill] sm:$0xff]  ;;  %v15816_v20 = vpop.permute.xlu1 %6685 }
 0x445   : > { %v10627_v54 = vpack.c.bf16 %v6815_v42, %v6814_v40  ;;  %v6748_v2 = vmul.f32 %v18509_v43, %v6546_v49  ;;  %v6495_v41 = vrot.slane %v5968_v4, 1  ;;  %v15804_v23 = vadd.f32 %v11267_v18, %v18510_v45  ;;  %v5723_v42 = vpop.f32.mrf.mxu0  ;;  %v18513_v18 = vld [vmem:[#allocation160_spill] sm:$0xff] }
 0x446   : > { %v15807_v29 = vadd.f32 %v5713_v15, %v15617_v8  ;;  %v6817_v47 = vmax.f32 %v6781_v1, 0.0  ;;  %v15813_v40 = vadd.f32 %v5844_v53, %v18512_v6  ;;  %v6018_v59 = vadd.f32 %v5715_v30, %v15621_v26  ;;  %v11268_v44 = vpop.f32.mrf.mxu1  ;;  %v18514_v26 = vld [vmem:[#allocation158_spill] sm:$0xff] }
 0x447   : > { %10716 = vst [vmem:[#allocation4 + $0x10] sm:$0xff] %v10627_v54   ;;  %v15810_v51 = vadd.f32 %v6748_v2, %v18511_v0  ;;  %v15819_v31 = vmul.f32 %v15752_v3, %v6208_v5  ;;  %v6547_v8 = vsel %vm3139_vm0, %v6495_v41, %v6496_v50  ;;  %v6548_v15 = vsel %vm3139_vm0, %v6494_v12, %v6495_v41  ;;  %v15831_v43 = vpop.f32.mrf.mxu0  ;;  %v15833_v3 = vld [vmem:[#allocation8 + $0x98] ss:$12 sps:$4 sm:$0xff]   ;;  %v18515_v2 = vld [vmem:[#allocation56_spill] sm:$0xff] }
 0x448   : > { %v6188_v9 = vrot.slane %v15807_v29, 7  ;;  %v10632_v4 = vpack.c.bf16 %v6817_v47, %v6816_v34  ;;  %v6746_v49 = vmul.f32 %v18513_v18, %v6548_v15  ;;  %v6747_v30 = vmul.f32 %v18514_v26, %v6547_v8  ;;  %v5847_v1 = vpop.f32.mrf.mxu1  ;;  %v18520_v18 = vld [vmem:[#allocation109_spill] sm:$0xff]  ;;  %v15865_v26 = vld [vmem:[#allocation8 + $0x80] ss:$12 sps:$4 sm:$0xff]  }
 0x449   : > { %v15829_v54 = vadd.f32 %v15145_v63, %v6015_v17  ;;  %v6498_v12 = vrot.slane %v15813_v40, 1  ;;  %v6152_v5 = vadd.f32 %v15145_v63, %v6018_v59  ;;  %v15840_v53 = vadd.f32 %v11268_v44, %v18515_v2  ;;  %v18517_v17 = vld [vmem:[#allocation184_spill] sm:$0xff]  ;;  %v18518_v59 = vld [vmem:[#allocation67_spill] sm:$0xff]  ;;  %18522 = vst [vmem:[#allocation238_spill] sm:$0xff] %v15865_v26 }
 0x44a   : > { %v6207_v50 = vsel %vm2778_vm1, %v6187_v11, %v6188_v9  ;;  %v15842_v34 = vld [vmem:[#allocation4 + $0x8] sm:$0xff]   ;;  %10717 = vst [vmem:[#allocation4 + $0x18] sm:$0xff] %v10632_v4   ;;  %v6782_v41 = vadd.f32 %v6746_v49, %v18517_v17  ;;  %v6783_v45 = vadd.f32 %v6747_v30, %v15613_v55  ;;  %v15847_v47 = vadd.f32 %v5717_v60, %v15634_v7  ;;  %v11271_v0 = vpop.f32.mrf.mxu1  ;;  %v15849_v11 = vpop.f32.mrf.mxu0  ;;  %v18519_v60 = vld [vmem:[#allocation173_spill] sm:$0xff] }
 0x44b   : > { %18516 = vst [vmem:[#allocation169_spill] sm:$0xff] %v15842_v34  ;;  %v6440_v29 = vmul.f32 %v6367_v46, %v6207_v50  ;;  %v6500_v6 = vrot.slane %v15804_v23, 1  ;;  %v6545_v63 = vsel %vm3139_vm0, %v6497_v25, %v6498_v12  ;;  %v17673_v40 = vrot.slane %v15840_v53, 1  ;;  %7609 = vmatmul.mubr.bf16.vlgmr.msra.gmra.mxu1 %v15842_v34  ;;  %11305 = vmatprep.mubr.bf16.mxu0 %v15842_v34  ;;  %v11805_v55 = vld [vmem:[#allocation8 + $0xa8] ss:$12 sps:$4 sm:$0xff]   ;;  %v15867_v30 = vpop.permute.xlu1 %6371 }
 0x44c   : > { %v5980_v44 = vadd.f32 %v5847_v1, %v18518_v59  ;;  %v6818_v46 = vmax.f32 %v6782_v41, 0.0  ;;  %v6819_v7 = vmax.f32 %v6783_v45, 0.0  ;;  %v6749_v8 = vmul.f32 %v18519_v60, %v6545_v63  ;;  %v5860_v4 = vpop.f32.mrf.mxu1  ;;  %v15861_v23 = vpop.f32.mrf.mxu0  ;;  %11441 = vmatpush3.bf16.msra.mxu1 %v18520_v18  ;;  %v11813_v49 = vld [vmem:[#allocation8 + $0x94] ss:$12 sps:$4 sm:$0xff]  }
 0x44d   : > { %v15859_v15 = vadd.f32 %v6440_v29, %v6152_v5  ;;  %v18521_v25 = vmov 0   ;;  %v6377_v1 = vpop.permute.xlu0 %6376  ;;  %v6542_v50 = vsel %vm3139_vm0, %v6500_v6, %v17673_v40  ;;  %v6189_v5 = vrot.slane %v15847_v47, 7  ;;  %11434 = vmatprep.subr.bf16.mxu1 %v15833_v3  ;;  %v18523_v29 = vld [vmem:[#allocation197_spill] sm:$0xff]  ;;  %v18524_v59 = vld [vmem:[#allocation147_spill] sm:$0xff] }
 0x44e   : > { %7618 = vmatprep.mubr.bf16.mxu1 %v18521_v25  ;;  %v6499_v2 = vrot.slane %v5980_v44, 1  ;;  %v6021_v17 = vadd.f32 %v5719_v16, %v15638_v33  ;;  %v10637_v41 = vpack.c.bf16 %v6819_v7, %v6818_v46  ;;  %v6785_v45 = vadd.f32 %v6749_v8, %v15640_v19  ;;  %v11272_v18 = vpop.f32.mrf.mxu1  ;;  %v15881_v34 = vld [vmem:[#allocation4 + $0x10] sm:$0xff]   ;;  %v15883_v39 = vpop.f32.mrf.mxu0  ;;  %v18526_v7 = vld [vmem:[#allocation59_spill] sm:$0xff] }
 0x44f   : > { %v6752_v63 = vmul.f32 %v18523_v29, %v6542_v50  ;;  %v15879_v60 = vadd.f32 %v11271_v0, %v18524_v59  ;;  %18525 = vst [vmem:[#allocation124_spill] sm:$0xff] %v15881_v34  ;;  %v6206_v47 = vsel %vm2778_vm1, %v6188_v9, %v6189_v5  ;;  %v15892_v19 = vadd.f32 %v5723_v42, %v15644_v56  ;;  %v11811_v44 = vld [vmem:[#allocation8 + $0x90] ss:$12 sps:$4 sm:$0xff]   ;;  %v18527_v50 = vld [vmem:[#allocation180_spill] sm:$0xff] }
 0x450   : > { %v6543_v33 = vsel %vm3139_vm0, %v6499_v2, %v6500_v6  ;;  %v6544_v16 = vsel %vm3139_vm0, %v6498_v12, %v6499_v2  ;;  %v6820_v0 = vmax.f32 %v15810_v51, 0.0  ;;  %10718 = vst [vmem:[#allocation4 + $0x20] sm:$0xff] %v10637_v41   ;;  %v6821_v46 = vmax.f32 %v6785_v45, 0.0  ;;  %v5863_v9 = vpop.f32.mrf.mxu1  ;;  %11306 = vmatmul.mubr.bf16.vlgmr.msra.gmra.mxu0 %v15881_v34  ;;  %v15900_v6 = vpop.f32.mrf.mxu0  ;;  %v11818_v59 = vld [vmem:[#allocation8 + $0x7c] ss:$12 sps:$4 sm:$0xff]   ;;  %11442 = vmatpush3.bf16.msra.mxu1 %v15833_v3 }
 0x451   : > { %v15896_v8 = vadd.f32 %v6752_v63, %v18526_v7  ;;  %v6750_v29 = vmul.f32 %v18527_v50, %v6544_v16  ;;  %v15903_v56 = vld [vmem:[#allocation8 + $0x68] ss:$12 sps:$4 sm:$0xff]   ;;  %v15907_v51 = vadd.f32 %v15819_v31, %v15829_v54  ;;  %v18528_v42 = vld [vmem:[#allocation178_spill] sm:$0xff]  ;;  %v6190_v2 = vrot.slane %v15892_v19, 7  ;;  %8065 = vmatpush1.bf16.msra.mxu0 %v11805_v55  ;;  %11435 = vmatprep.subr.bf16.mxu1 %v15865_v26  ;;  %v15917_v50 = vld [vmem:[%s17658_s6] ss:$0 sm:$0xff]  ;;  %v15927_v55 = vpop.permute.xlu1 %6381 }
 0x452   : > { %v6751_v12 = vmul.f32 %v18528_v42, %v6543_v33  ;;  %v18529_v41 = vld [vmem:[#allocation212_spill] sm:$0xff]  ;;  %v10642_v63 = vpack.c.bf16 %v6821_v46, %v6820_v0  ;;  %v18530_v16 = vld [vmem:[#allocation210_spill] sm:$0xff]  ;;  %v15920_v31 = vadd.f32 %v15917_v50, %v6021_v17  ;;  %v6504_v54 = vrot.slane %v15879_v60, 1  ;;  %v11275_v33 = vpop.f32.mrf.mxu1  ;;  %8066 = vmatprep.subr.bf16.mxu0 %v11813_v49  ;;  %v15929_v0 = vpop.permute.xlu0 %6690 }
 0x453   : > { %v5989_v45 = vadd.f32 %v5860_v4, %v18529_v41  ;;  %v6786_v7 = vadd.f32 %v6750_v29, %v18530_v16  ;;  %v15923_v19 = vld [vmem:[#allocation4 + $0x18] sm:$0xff]   ;;  %v15925_v4 = vpop.f32.mrf.mxu0  ;;  %v6205_v29 = vsel %vm2778_vm1, %v6189_v5, %v6190_v2  ;;  %v6024_v17 = vadd.f32 %v15831_v43, %v15648_v14  ;;  %7619 = vmatmul.mubr.bf16.gmra.mxu1 %v15881_v34  ;;  %v18537_v34 = vld [vmem:[#allocation255_spill] sm:$0xff] }
 0x454   : > { %v6787_v46 = vadd.f32 %v6751_v12, %v15665_v36  ;;  %10719 = vst [vmem:[#allocation4 + $0x28] sm:$0xff] %v10642_v63   ;;  %v6442_v41 = vmul.f32 %v6377_v1, %v6205_v29  ;;  %v18531_v16 = vld [vmem:[#allocation214_spill] sm:$0xff]  ;;  %v15942_v40 = vadd.f32 %v15849_v11, %v15655_v10  ;;  %v5876_v36 = vpop.f32.mrf.mxu1  ;;  %11309 = vmatprep.mubr.bf16.mxu0 %v15923_v19  ;;  %v18532_v43 = vrot.slane %v15840_v53, 1  ;;  %v18533_v12 = vld [vmem:[#allocation55_spill] sm:$0xff]  ;;  %v18534_v10 = vld [vmem:[#allocation196_spill] sm:$0xff] }
 0x455   : > { %v6502_v42 = vrot.slane %v5989_v45, 1  ;;  %v6822_v60 = vmax.f32 %v6786_v7, 0.0  ;;  %v15938_v49 = vadd.f32 %v11272_v18, %v18531_v16  ;;  %v15945_v5 = vpop.f32.mrf.mxu0  ;;  %7628 = vmatprep.mubr.bf16.mxu1 %v18521_v25  ;;  %v6154_v18 = vadd.f32 %v15917_v50, %v6024_v17  ;;  %8067 = vmatpush1.bf16.msra.mxu0 %v11811_v44  ;;  %v11816_v16 = vld [vmem:[#allocation8 + $0x78] ss:$12 sps:$4 sm:$0xff]  }
 0x456   : > { %v6823_v14 = vmax.f32 %v6787_v46, 0.0  ;;  %v5992_v45 = vadd.f32 %v5863_v9, %v18533_v12  ;;  %11443 = vmatpush3.bf16.msra.mxu1 %v15865_v26  ;;  %v17675_v7 = vrot.slane %v15942_v40, 7  ;;  %v6027_v46 = vadd.f32 %v15861_v23, %v15663_v35  ;;  %v11276_v53 = vpop.f32.mrf.mxu1  ;;  %8068 = vmatprep.subr.bf16.mxu0 %v11818_v59 }
 0x457   : > { %v6541_v1 = vsel %vm3139_vm0, %v18532_v43, %v6502_v42  ;;  %v17674_v63 = vrot.slane %v15938_v49, 1  ;;  %v15960_v29 = vpop.f32.mrf.mxu0  ;;  %11436 = vmatprep.subr.bf16.mxu1 %v15903_v56  ;;  %v15964_v44 = vmul.f32 %v15867_v30, %v6206_v47  ;;  %v15966_v17 = vadd.f32 %v6442_v41, %v6154_v18  ;;  %v15982_v41 = vpop.permute.xlu1 %6695 }
 0x458   : > { %v6753_v11 = vmul.f32 %v18534_v10, %v6541_v1  ;;  %v10647_v9 = vpack.c.bf16 %v6823_v14, %v6822_v60  ;;  %v6503_v43 = vrot.slane %v5992_v45, 1  ;;  %v15968_v1 = vld [vmem:[#allocation4 + $0x20] sm:$0xff]   ;;  %v6824_v12 = vmax.f32 %v15896_v8, 0.0  ;;  %v5879_v47 = vpop.f32.mrf.mxu1  ;;  %v15984_v14 = vpop.permute.xlu0 %6700 }
 0x459   : > { %v6538_v23 = vsel %vm3139_vm0, %v6504_v54, %v17674_v63  ;;  %v6204_v30 = vsel %vm2778_vm1, %v6190_v2, %v17675_v7  ;;  %v15980_v59 = vpop.f32.mrf.mxu0  ;;  %v11822_v60 = vld [vmem:[#allocation8 + $0x60] ss:$12 sps:$4 sm:$0xff]   ;;  %11310 = vmatmul.mubr.bf16.gmra.mxu0 %v15968_v1  ;;  %v11824_v2 = vld [vmem:[#allocation8 + $0x64] ss:$12 sps:$4 sm:$0xff]  }
 0x45a   : > { %v6789_v35 = vadd.f32 %v6753_v11, %v15695_v58  ;;  %10720 = vst [vmem:[#allocation4 + $0x30] sm:$0xff] %v10647_v9   ;;  %v6756_v58 = vmul.f32 %v15569_v62, %v6538_v23  ;;  %v6539_v8 = vsel %vm3139_vm0, %v6503_v43, %v6504_v54  ;;  %v6540_v18 = vsel %vm3139_vm0, %v6502_v42, %v6503_v43  ;;  %v18535_v45 = vld [vmem:[#allocation151_spill] sm:$0xff]  ;;  %v18536_v63 = vld [vmem:[#allocation149_spill] sm:$0xff]  ;;  %v11279_v62 = vpop.f32.mrf.mxu1  ;;  %v11829_v54 = vld [vmem:[#allocation8 + $0x4c] ss:$12 sps:$4 sm:$0xff]  }
 0x45b   : > { %v15992_v10 = vadd.f32 %v11275_v33, %v18535_v45  ;;  %v6754_v7 = vmul.f32 %v18536_v63, %v6540_v18  ;;  %v6755_v26 = vmul.f32 %v18537_v34, %v6539_v8  ;;  %v15998_v9 = vadd.f32 %v15917_v50, %v6027_v46  ;;  %v16000_v23 = vpop.f32.mrf.mxu0  ;;  %8069 = vmatpush1.bf16.msra.mxu0 %v11816_v16  ;;  %v16003_v33 = vld [vmem:[#allocation8 + $0x50] ss:$12 sps:$4 sm:$0xff]   ;;  %v18538_v63 = vld [vmem:[#allocation216_spill] sm:$0xff] }
 0x45c   : > { %v6825_v11 = vmax.f32 %v6789_v35, 0.0  ;;  %11444 = vmatpush3.bf16.msra.mxu1 %v15903_v56  ;;  %v16006_v42 = vadd.f32 %v6756_v58, %v15601_v48  ;;  %v6443_v43 = vmul.f32 %v15927_v55, %v6204_v30  ;;  %v6029_v34 = vadd.f32 %v15883_v39, %v15670_v38  ;;  %v16013_v35 = vld [vmem:[#allocation4 + $0x28] sm:$0xff]   ;;  %v16019_v58 = vpop.f32.mrf.mxu1  ;;  %v16022_v55 = vld [vmem:[#allocation8 + $0x38] ss:$12 sps:$4 sm:$0xff]   ;;  %8070 = vmatprep.subr.bf16.mxu0 %v11824_v2 }
 0x45d   : > { %v6001_v46 = vadd.f32 %v5876_v36, %v18538_v63  ;;  %7629 = vmatmul.mubr.bf16.gmra.mxu1 %v15923_v19  ;;  %v6790_v8 = vadd.f32 %v6754_v7, %v15529_v57  ;;  %v6791_v18 = vadd.f32 %v6755_v26, %v15733_v22  ;;  %v6030_v48 = vadd.f32 %v15900_v6, %v15681_v37  ;;  %v18539_v30 = vld [vmem:[#allocation152_spill] sm:$0xff]  ;;  %v16029_v57 = vpop.f32.mrf.mxu0 }
 0x45e   : > { %v10652_v16 = vpack.c.bf16 %v6825_v11, %v6824_v12  ;;  %7638 = vmatprep.mubr.bf16.mxu1 %v18521_v25  ;;  %v6508_v38 = vrot.slane %v15992_v10, 1  ;;  %v6192_v39 = vrot.slane %v6029_v34, 7  ;;  %v16026_v45 = vadd.f32 %v11276_v53, %v18539_v30  ;;  %11313 = vmatprep.mubr.bf16.mxu0 %v16013_v35  ;;  %v16036_v7 = vpop.f32.mrf.mxu1  ;;  %v6387_v53 = vpop.permute.xlu0 %6386  ;;  %v11827_v63 = vld [vmem:[#allocation8 + $0x48] ss:$12 sps:$4 sm:$0xff]  }
 0x45f   : > { %v6506_v36 = vrot.slane %v6001_v46, 1  ;;  %v6826_v22 = vmax.f32 %v6790_v8, 0.0  ;;  %v6827_v37 = vmax.f32 %v6791_v18, 0.0  ;;  %v6156_v26 = vadd.f32 %v15917_v50, %v6030_v48  ;;  %8071 = vmatpush1.bf16.msra.mxu0 %v11822_v60  ;;  %11437 = vmatprep.subr.bf16.mxu1 %v16003_v33  ;;  %v5753_v60 = vpop.f32.mrf.mxu0  ;;  %v16050_v46 = vpop.permute.xlu1 %6705 }
 0x460   : > { %10721 = vst [vmem:[#allocation4 + $0x38] sm:$0xff] %v10652_v16   ;;  %v16034_v6 = vadd.f32 %v15925_v4, %v15689_v52  ;;  %v18540_v12 = vrot.slane %v15942_v40, 7  ;;  %v18541_v2 = vrot.slane %v15938_v49, 1  ;;  %v17679_v34 = vrot.slane %v16026_v45, 1  ;;  %v18542_v52 = vld [vmem:[#allocation218_spill] sm:$0xff]  ;;  %8072 = vmatprep.subr.bf16.mxu0 %v11829_v54  ;;  %11445 = vmatpush3.bf16.msra.mxu1 %v16003_v33  ;;  %v5895_v48 = vpop.f32.mrf.mxu1 }
 0x461   : > { %v6004_v4 = vadd.f32 %v5879_v47, %v18542_v52  ;;  %v10657_v40 = vpack.c.bf16 %v6827_v37, %v6826_v22  ;;  %v18543_v16 = vld [vmem:[#allocation230_spill] sm:$0xff]  ;;  %v16054_v30 = vld [vmem:[#allocation4 + $0x30] sm:$0xff]   ;;  %11438 = vmatprep.subr.bf16.mxu1 %v16022_v55  ;;  %v16059_v47 = vadd.f32 %v15964_v44, %v15920_v31  ;;  %v18544_v37 = vld [vmem:[#allocation60_spill] sm:$0xff]  ;;  %v16083_v60 = vadd.f32 %v6443_v43, %v15998_v9 }
 0x462   : > { %v6203_v10 = vsel %vm2778_vm1, %v18540_v12, %v6192_v39  ;;  %v6537_v11 = vsel %vm3139_vm0, %v18541_v2, %v6506_v36  ;;  %v17680_v49 = vrot.slane %v16034_v6, 7  ;;  %v6534_v54 = vsel %vm3139_vm0, %v6508_v38, %v17679_v34  ;;  %11314 = vmatmul.mubr.bf16.gmra.mxu0 %v16054_v30  ;;  %v16077_v44 = vpop.f32.mrf.mxu1  ;;  %v11840_v43 = vld [vmem:[#allocation8 + $0x1c] ss:$12 sps:$4 sm:$0xff]  }
 0x463   : > { %v6757_v8 = vmul.f32 %v18543_v16, %v6537_v11  ;;  %v6444_v18 = vmul.f32 %v6387_v53, %v6203_v10  ;;  %v6507_v22 = vrot.slane %v6004_v4, 1  ;;  %v16066_v12 = vadd.f32 %v11279_v62, %v18544_v37  ;;  %v11835_v53 = vld [vmem:[#allocation8 + $0x34] ss:$12 sps:$4 sm:$0xff]   ;;  %v5755_v10 = vpop.f32.mrf.mxu0  ;;  %10722 = vst [vmem:[#allocation4 + $0x40] sm:$0xff] %v10657_v40   ;;  %v18545_v16 = vld [vmem:[#allocation80_spill] sm:$0xff]  ;;  %8073 = vmatpush1.bf16.msra.mxu0 %v11827_v63 }
 0x464   : > { %v6760_v52 = vmul.f32 %v15754_v32, %v6534_v54  ;;  %v6202_v31 = vsel %vm2778_vm1, %v6192_v39, %v17680_v49  ;;  %v16079_v62 = vld [vmem:[#allocation8 + $0x20] ss:$12 sps:$4 sm:$0xff]   ;;  %v6828_v4 = vmax.f32 %v16006_v42, 0.0  ;;  %v11833_v39 = vld [vmem:[#allocation8 + $0x30] ss:$12 sps:$4 sm:$0xff]   ;;  %v16095_v9 = vpop.f32.mrf.mxu1  ;;  %8074 = vmatprep.subr.bf16.mxu0 %v11835_v53  ;;  %11446 = vmatpush3.bf16.msra.mxu1 %v16022_v55 }
 0x465   : > { %v6793_v2 = vadd.f32 %v6757_v8, %v15739_v21  ;;  %v16069_v11 = vadd.f32 %v6444_v18, %v6156_v26  ;;  %v6535_v21 = vsel %vm3139_vm0, %v6507_v22, %v6508_v38  ;;  %v6536_v32 = vsel %vm3139_vm0, %v6506_v36, %v6507_v22  ;;  %7639 = vmatmul.mubr.bf16.gmra.mxu1 %v15968_v1  ;;  %v5757_v26 = vpop.f32.mrf.mxu0  ;;  %v18546_v18 = vld [vmem:[#allocation164_spill] sm:$0xff]  ;;  %v18547_v42 = vld [vmem:[#allocation69_spill] sm:$0xff]  ;;  %v18548_v36 = vld [vmem:[#allocation75_spill] sm:$0xff] }
 0x466   : > { %v16091_v8 = vadd.f32 %v6760_v52, %v18545_v16  ;;  %v6758_v54 = vmul.f32 %v18546_v18, %v6536_v32  ;;  %v6759_v37 = vmul.f32 %v18547_v42, %v6535_v21  ;;  %7648 = vmatprep.mubr.bf16.mxu1 %v18521_v25  ;;  %v16098_v38 = vld [vmem:[#allocation8 + $0x8] ss:$12 sps:$4 sm:$0xff]   ;;  %v6033_v22 = vadd.f32 %v15945_v5, %v18548_v36  ;;  %v18549_v10 = vld [vmem:[#allocation166_spill] sm:$0xff]  ;;  %v6392_v16 = vpop.permute.xlu1 %6391  ;;  %v11284_v36 = vpop.f32.mrf.mxu1 }
 0x467   : > { %v6829_v40 = vmax.f32 %v6793_v2, 0.0  ;;  %v6035_v2 = vadd.f32 %v15960_v29, %v18549_v10  ;;  %v18550_v52 = vld [vmem:[#allocation220_spill] sm:$0xff]  ;;  %v16106_v32 = vld [vmem:[#allocation4 + $0x38] sm:$0xff]   ;;  %v5759_v21 = vpop.f32.mrf.mxu0  ;;  %v6512_v5 = vrot.slane %v16066_v12, 1  ;;  %11439 = vmatprep.subr.bf16.mxu1 %v16079_v62  ;;  %8075 = vmatpush1.bf16.msra.mxu0 %v11833_v39 }
 0x468   : > { %v6013_v26 = vadd.f32 %v16019_v58, %v18550_v52  ;;  %v18551_v18 = vld [vmem:[#allocation232_spill] sm:$0xff]  ;;  %v6795_v34 = vadd.f32 %v6759_v37, %v15792_v61  ;;  %v18552_v58 = vld [vmem:[#allocation234_spill] sm:$0xff]  ;;  %11317 = vmatprep.mubr.bf16.mxu0 %v16106_v32  ;;  %v18554_v61 = vld [vmem:[#allocation167_spill] sm:$0xff]  ;;  %v5911_v21 = vpop.f32.mrf.mxu1  ;;  %8076 = vmatprep.subr.bf16.mxu0 %v11840_v43 }
 0x469   : > { %v10662_v63 = vpack.c.bf16 %v6829_v40, %v6828_v4  ;;  %v6794_v42 = vadd.f32 %v6758_v54, %v18551_v18  ;;  %v6194_v29 = vrot.slane %v6035_v2, 7  ;;  %v6036_v52 = vadd.f32 %v15980_v59, %v18552_v58  ;;  %v18553_v53 = vld [vmem:[#allocation62_spill] sm:$0xff]  ;;  %v18555_v54 = vld [vmem:[#allocation156_spill] sm:$0xff]  ;;  %v6397_v18 = vpop.permute.xlu0 %6396  ;;  %11447 = vmatpush3.bf16.msra.mxu1 %v16079_v62 }
 0x46a   : > { %v6510_v10 = vrot.slane %v6013_v26, 1  ;;  %v16117_v49 = vadd.f32 %v16036_v7, %v18553_v53  ;;  %v6831_v40 = vmax.f32 %v6795_v34, 0.0  ;;  %v6038_v12 = vadd.f32 %v16000_v23, %v18554_v61  ;;  %v11838_v2 = vld [vmem:[#allocation8 + $0x18] ss:$12 sps:$4 sm:$0xff]   ;;  %v11287_v61 = vpop.f32.mrf.mxu1  ;;  %11440 = vmatprep.subr.bf16.mxu1 %v16098_v38 }
 0x46b   : > { %10723 = vst [vmem:[#allocation4 + $0x48] sm:$0xff] %v10662_v63   ;;  %v6830_v4 = vmax.f32 %v6794_v42, 0.0  ;;  %v6016_v37 = vadd.f32 %v5895_v48, %v18555_v54  ;;  %v11846_v26 = vld [vmem:[#allocation8 + $0x4] ss:$12 sps:$4 sm:$0xff]   ;;  %v18556_v59 = vrot.slane %v16034_v6, 7  ;;  %v18557_v58 = vrot.slane %v16026_v45, 1  ;;  %8077 = vmatpush1.bf16.msra.mxu0 %v11838_v2 }
 0x46c   : > { %v6158_v63 = vadd.f32 %v15917_v50, %v6036_v52  ;;  %v6513_v23 = vrot.slane %v16117_v49, 1  ;;  %v16133_v48 = vld [vmem:[#allocation4 + $0x40] sm:$0xff]   ;;  %v6195_v53 = vrot.slane %v6038_v12, 7  ;;  %v16138_v45 = vmul.f32 %v6392_v16, %v6202_v31  ;;  %8078 = vmatprep.subr.bf16.mxu0 %v11846_v26  ;;  %v18561_v2 = vld [vmem:[#allocation61_spill] sm:$0xff] }
 0x46d   : > { %v6201_v7 = vsel %vm2778_vm1, %v18556_v59, %v6194_v29  ;;  %v6533_v34 = vsel %vm3139_vm0, %v18557_v58, %v6510_v10  ;;  %v10667_v39 = vpack.c.bf16 %v6831_v40, %v6830_v4  ;;  %v6511_v54 = vrot.slane %v6016_v37, 1  ;;  %v18558_v59 = vld [vmem:[#allocation222_spill] sm:$0xff]  ;;  %11318 = vmatmul.mubr.bf16.gmra.mxu0 %v16133_v48  ;;  %7649 = vmatmul.mubr.bf16.gmra.mxu1 %v16013_v35  ;;  %v6402_v4 = vpop.permute.xlu1 %6401  ;;  %v5924_v37 = vpop.f32.mrf.mxu1  ;;  %v11844_v58 = vld [vmem:[#allocation8] ss:$12 sps:$4 sm:$0xff]  }
 0x46e   : > { %v6761_v6 = vmul.f32 %v15781_v13, %v6533_v34  ;;  %v6446_v42 = vmul.f32 %v6397_v18, %v6201_v7  ;;  %v6530_v52 = vsel %vm3139_vm0, %v6512_v5, %v6513_v23  ;;  %v16146_v43 = vadd.f32 %v16077_v44, %v18558_v59  ;;  %v11854_v13 = vld [vmem:[#allocation8 + $0x22c] ss:$12 sps:$4 sm:$0xff]   ;;  %7658 = vmatprep.mubr.bf16.mxu1 %v18521_v25 }
 0x46f   : > { %10724 = vst [vmem:[#allocation4 + $0x50] sm:$0xff] %v10667_v39   ;;  %v6764_v40 = vmul.f32 %v15929_v0, %v6530_v52  ;;  %v6200_v12 = vsel %vm2778_vm1, %v6194_v29, %v6195_v53  ;;  %v6832_v44 = vmax.f32 %v16091_v8, 0.0  ;;  %v6157_v18 = vadd.f32 %v15917_v50, %v6033_v22  ;;  %v11288_v39 = vpop.f32.mrf.mxu1  ;;  %11448 = vmatpush3.bf16.msra.mxu1 %v16098_v38  ;;  %v18559_v22 = vld [vmem:[#allocation236_spill] sm:$0xff] }
 0x470   : > { %v6797_v31 = vadd.f32 %v6761_v6, %v15794_v28  ;;  %v16151_v16 = vadd.f32 %v6446_v42, %v6158_v63  ;;  %v6531_v7 = vsel %vm3139_vm0, %v6511_v54, %v6512_v5  ;;  %v6532_v28 = vsel %vm3139_vm0, %v6510_v10, %v6511_v54  ;;  %v18560_v6 = vld [vmem:[#allocation224_spill] sm:$0xff]  ;;  %8707 = vmatprep.subr.bf16.mxu1 %v11854_v13 }
 0x471   : > { %v16164_v0 = vadd.f32 %v6764_v40, %v15859_v15  ;;  %v6762_v29 = vmul.f32 %v15783_v27, %v6532_v28  ;;  %v6763_v63 = vmul.f32 %v15816_v20, %v6531_v7  ;;  %v6447_v8 = vmul.f32 %v6402_v4, %v6200_v12  ;;  %v18562_v27 = vld [vmem:[#allocation74_spill] sm:$0xff]  ;;  %v5927_v54 = vpop.f32.mrf.mxu1  ;;  %v18564_v40 = vld [vmem:[#allocation159_spill] sm:$0xff]  ;;  %8079 = vmatpush1.bf16.msra.mxu0 %v11844_v58  ;;  %v18565_v7 = vld [vmem:[#allocation161_spill] sm:$0xff] }
 0x472   : > { %v6833_v34 = vmax.f32 %v6797_v31, 0.0  ;;  %v6039_v5 = vadd.f32 %v16029_v57, %v18559_v22  ;;  %v6025_v10 = vadd.f32 %v16095_v9, %v18560_v6  ;;  %v6034_v42 = vadd.f32 %v11284_v36, %v18561_v2  ;;  %v16174_v53 = vld [vmem:[#allocation4 + $0x48] sm:$0xff]   ;;  %v18563_v31 = vld [vmem:[#allocation65_spill] sm:$0xff]  ;;  %v6716_v9 = vpop.permute.xlu1 %6715  ;;  %v6711_v36 = vpop.permute.xlu0 %6710 }
 0x473   : > { %v6798_v52 = vadd.f32 %v6762_v29, %v18562_v27  ;;  %v6799_v20 = vadd.f32 %v6763_v63, %v15907_v51  ;;  %v6516_v26 = vrot.slane %v16146_v43, 1  ;;  %v6028_v57 = vadd.f32 %v5911_v21, %v18563_v31  ;;  %11321 = vmatprep.mubr.bf16.mxu0 %v16174_v53  ;;  %v18566_v51 = vld [vmem:[#allocation228_spill] sm:$0xff]  ;;  %v16184_v43 = vld [vmem:[#allocation8 + $0xb0] ss:$12 sps:$4 sm:$0xff]  }
 0x474   : > { %v10672_v15 = vpack.c.bf16 %v6833_v34, %v6832_v44  ;;  %v6514_v59 = vrot.slane %v6025_v10, 1  ;;  %v6517_v4 = vrot.slane %v6034_v42, 1  ;;  %v6043_v12 = vadd.f32 %v11287_v61, %v18564_v40  ;;  %11337 = vmatprep.subr.bf16.mxu0 %v16184_v43 }
 0x475   : > { %v6834_v13 = vmax.f32 %v6798_v52, 0.0  ;;  %v6835_v44 = vmax.f32 %v6799_v20, 0.0  ;;  %v6037_v28 = vadd.f32 %v5924_v37, %v18565_v7  ;;  %v6040_v34 = vadd.f32 %v5927_v54, %v18566_v51  ;;  %7659 = vmatmul.mubr.bf16.gmra.mxu1 %v16054_v30 }
 0x476   : > { %10725 = vst [vmem:[#allocation4 + $0x58] sm:$0xff] %v10672_v15   ;;  %v6159_v21 = vadd.f32 %v15917_v50, %v6039_v5  ;;  %v6529_v61 = vsel %vm3139_vm0, %v6513_v23, %v6514_v59  ;;  %v6526_v58 = vsel %vm3139_vm0, %v6516_v26, %v6517_v4  ;;  %v6515_v29 = vrot.slane %v6028_v57, 1  ;;  %v16196_v6 = vld [vmem:[#allocation4 + $0x50] sm:$0xff]   ;;  %7668 = vmatprep.mubr.bf16.mxu1 %v18521_v25 }
 0x477   : > { %v10677_v37 = vpack.c.bf16 %v6835_v44, %v6834_v13  ;;  %v6765_v63 = vmul.f32 %v15982_v41, %v6529_v61  ;;  %v6768_v39 = vmul.f32 %v6711_v36, %v6526_v58  ;;  %v6518_v22 = vrot.slane %v6037_v28, 1  ;;  %11322 = vmatmul.mubr.bf16.gmra.mxu0 %v16196_v6  ;;  %v16241_v58 = vld [vmem:[#allocation4] sm:$0xff]  }
 0x478   : > { %v6527_v50 = vsel %vm3139_vm0, %v6515_v29, %v6516_v26  ;;  %v6528_v49 = vsel %vm3139_vm0, %v6514_v59, %v6515_v29  ;;  %v6520_v23 = vrot.slane %v6043_v12, 1  ;;  %v6519_v5 = vrot.slane %v6040_v34, 1  ;;  %v6721_v26 = vpop.permute.xlu0 %6720  ;;  %v18567_v29 = vld [vmem:[#allocation238_spill] sm:$0xff] }
 0x479   : > { %10726 = vst [vmem:[#allocation4 + $0x60] sm:$0xff] %v10677_v37   ;;  %v6801_v10 = vadd.f32 %v6765_v63, %v16059_v47  ;;  %v6804_v2 = vadd.f32 %v6768_v39, %v16069_v11  ;;  %v6766_v41 = vmul.f32 %v15984_v14, %v6528_v49  ;;  %v6767_v42 = vmul.f32 %v16050_v46, %v6527_v50  ;;  %v6726_v47 = vpop.permute.xlu1 %6725  ;;  %v18568_v37 = vld [vmem:[#allocation169_spill] sm:$0xff]  ;;  %v11861_v39 = vld [vmem:[#allocation8 + $0x1e0] ss:$12 sps:$4 sm:$0xff]  }
 0x47a   : > { %v6481_v15 = vadd.f32 %v16138_v45, %v6157_v18  ;;  %v6525_v27 = vsel %vm3139_vm0, %v6517_v4, %v6518_v22  ;;  %v6523_v52 = vsel %vm3139_vm0, %v6519_v5, %v6520_v23  ;;  %v6524_v20 = vsel %vm3139_vm0, %v6518_v22, %v6519_v5  ;;  %v11863_v63 = vld [vmem:[#allocation8 + $0x1e4] ss:$12 sps:$4 sm:$0xff]   ;;  %v11866_v22 = vld [vmem:[#allocation8 + $0x1cc] ss:$12 sps:$4 sm:$0xff]   ;;  %v11864_v50 = vld [vmem:[#allocation8 + $0x1c8] ss:$12 sps:$4 sm:$0xff]  }
 0x47b   : > { %v6836_v11 = vmax.f32 %v16164_v0, 0.0  ;;  %v6837_v14 = vmax.f32 %v6801_v10, 0.0  ;;  %v6802_v46 = vadd.f32 %v6766_v41, %v15966_v17  ;;  %v6803_v54 = vadd.f32 %v6767_v42, %v16083_v60  ;;  %v11869_v49 = vld [vmem:[#allocation8 + $0x1b4] ss:$12 sps:$4 sm:$0xff]   ;;  %v11867_v23 = vld [vmem:[#allocation8 + $0x1b0] ss:$12 sps:$4 sm:$0xff]  }
 0x47c   : > { %v6483_v59 = vadd.f32 %v6447_v8, %v6159_v21  ;;  %v6769_v45 = vmul.f32 %v6716_v9, %v6525_v27  ;;  %v6770_v18 = vmul.f32 %v6721_v26, %v6524_v20  ;;  %v6771_v31 = vmul.f32 %v6726_v47, %v6523_v52  ;;  %v11872_v5 = vld [vmem:[#allocation8 + $0x19c] ss:$12 sps:$4 sm:$0xff]   ;;  %v11875_v10 = vld [vmem:[#allocation8 + $0x184] ss:$12 sps:$4 sm:$0xff]  }
 0x47d   : > { %v16218_v4 = vld [vmem:[#allocation4 + $0x58] sm:$0xff]   ;;  %v10682_v57 = vpack.c.bf16 %v6837_v14, %v6836_v11  ;;  %v6838_v40 = vmax.f32 %v6802_v46, 0.0  ;;  %v6839_v12 = vmax.f32 %v6803_v54, 0.0  ;;  %7669 = vmatmul.mubr.bf16.gmra.mxu1 %v16106_v32  ;;  %v6840_v17 = vmax.f32 %v6804_v2, 0.0  ;;  %v11873_v2 = vld [vmem:[#allocation8 + $0x180] ss:$12 sps:$4 sm:$0xff]  }
 0x47e   : > { %v6805_v36 = vadd.f32 %v6769_v45, %v6481_v15  ;;  %v6806_v13 = vadd.f32 %v6770_v18, %v16151_v16  ;;  %v6807_v44 = vadd.f32 %v6771_v31, %v6483_v59  ;;  %11325 = vmatprep.mubr.bf16.mxu0 %v16218_v4  ;;  %7678 = vmatprep.mubr.bf16.mxu1 %v18521_v25  ;;  %v16304_v41 = vld [vmem:[#allocation4 + $0x10] sm:$0xff]   ;;  %v16322_v42 = vld [vmem:[#allocation4 + $0x28] sm:$0xff]   ;;  %v16344_v11 = vld [vmem:[#allocation4 + $0x38] sm:$0xff]  }
 0x47f   : > { %10727 = vst [vmem:[#allocation4 + $0x68] sm:$0xff] %v10682_v57   ;;  %v10687_v60 = vpack.c.bf16 %v6839_v12, %v6838_v40  ;;  %v16328_v15 = vld [vmem:[#allocation4 + $0x30] sm:$0xff]   ;;  %v11883_v59 = vld [vmem:[#allocation8 + $0x218] ss:$12 sps:$4 sm:$0xff]   ;;  %v11976_v31 = vld [vmem:[#allocation4 + $0x8] sm:$0xff]  }
 0x480   : > { %v6841_v0 = vmax.f32 %v6805_v36, 0.0  ;;  %v6842_v8 = vmax.f32 %v6806_v13, 0.0  ;;  %v6843_v9 = vmax.f32 %v6807_v44, 0.0  ;;  %v16224_v7 = vld [vmem:[#allocation4 + $0x60] sm:$0xff]   ;;  %v11977_v57 = vld [vmem:[#allocation4 + $0x10] sm:$0xff]  }
 0x481   : > { %10728 = vst [vmem:[#allocation4 + $0x70] sm:$0xff] %v10687_v60   ;;  %11326 = vmatmul.mubr.bf16.gmra.mxu0 %v16224_v7  ;;  %v11884_v12 = vld [vmem:[#allocation8 + $0x200] ss:$12 sps:$4 sm:$0xff]  }
 0x482   : > { %v10692_v28 = vpack.c.bf16 %v6841_v0, %v6840_v17  ;;  %v10697_v51 = vpack.c.bf16 %v6843_v9, %v6842_v8  ;;  %v16365_v13 = vld [vmem:[#allocation4 + $0x40] sm:$0xff]   ;;  %v11886_v0 = vld [vmem:[#allocation8 + $0x1e8] ss:$12 sps:$4 sm:$0xff]  }
 0x484   : > { %10729 = vst [vmem:[#allocation4 + $0x78] sm:$0xff] %v10692_v28   ;;  %10730 = vst [vmem:[#allocation4 + $0x80] sm:$0xff] %v10697_v51   ;;  %v11887_v28 = vld [vmem:[#allocation8 + $0x1d0] ss:$12 sps:$4 sm:$0xff]  }
 0x485   : > { %7679 = vmatmul.mubr.bf16.gmra.mxu1 %v16133_v48 }
 0x486   : > { %v16227_v16 = vld [vmem:[#allocation4 + $0x68] sm:$0xff]   ;;  %7688 = vmatprep.mubr.bf16.mxu1 %v18521_v25 }
 0x487   : > { %11329 = vmatprep.mubr.bf16.mxu0 %v16227_v16 }
 0x488   : > { %v16232_v34 = vld [vmem:[#allocation4 + $0x70] sm:$0xff]  }
 0x489   : > { %11330 = vmatmul.mubr.bf16.gmra.mxu0 %v16232_v34 }
 0x48b   : > { %v16235_v21 = vld [vmem:[#allocation4 + $0x78] sm:$0xff]   ;;  %v11843_v61 = vld [vmem:[#allocation4 + $0x80] sm:$0xff]  }
 0x48c   : > { %11333 = vmatprep.mubr.bf16.mxu0 %v16235_v21 }
 0x48d   : > { %7689 = vmatmul.mubr.bf16.gmra.mxu1 %v16174_v53 }
 0x48e   : > { %7698 = vmatprep.mubr.bf16.mxu1 %v18521_v25 }
 0x491   : > { %11334 = vmatmul.mubr.bf16.gmra.mxu0 %v11843_v61 }
 0x492   : > { %8096 = vmatprep.mubr.bf16.mxu0 %v18521_v25 }
 0x495   : > { %7699 = vmatmul.mubr.bf16.gmra.mxu1 %v16196_v6 }
 0x496   : > { %7708 = vmatprep.mubr.bf16.mxu1 %v18521_v25 }
 0x499   : > { %8097 = vmatmul.mubr.bf16.vlgmr.msra.gmra.mxu0 %v16241_v58 }
 0x49a   : > { %11338 = vmatpush3.bf16.msra.mxu0 %v16184_v43  ;;  %8106 = vmatprep.mubr.bf16.mxu0 %v18521_v25  ;;  %v11858_v43 = vld [vmem:[#allocation8 + $0x1f8] ss:$12 sps:$4 sm:$0xff]  }
 0x49b   : > { %11339 = vmatprep.subr.bf16.mxu0 %v15833_v3 }
 0x49d   : > { %7709 = vmatmul.mubr.bf16.gmra.mxu1 %v16218_v4 }
 0x49e   : > { %11340 = vmatpush3.bf16.msra.mxu0 %v15833_v3  ;;  %7718 = vmatprep.mubr.bf16.mxu1 %v18521_v25  ;;  %v18569_v3 = vld [vmem:[#allocation124_spill] sm:$0xff] }
 0x49f   : > { %11341 = vmatprep.subr.bf16.mxu0 %v18567_v29 }
 0x4a1   : > { %8107 = vmatmul.mubr.bf16.gmra.mxu0 %v18568_v37 }
 0x4a2   : > { %8116 = vmatprep.mubr.bf16.mxu0 %v18521_v25  ;;  %11342 = vmatpush3.bf16.msra.mxu0 %v18567_v29 }
 0x4a3   : > { %11343 = vmatprep.subr.bf16.mxu0 %v15903_v56 }
 0x4a5   : > { %7719 = vmatmul.mubr.bf16.gmra.mxu1 %v16224_v7 }
 0x4a6   : > { %7728 = vmatprep.mubr.bf16.mxu1 %v18521_v25  ;;  %11344 = vmatpush3.bf16.msra.mxu0 %v15903_v56  ;;  %v16273_v56 = vld [vmem:[#allocation8 + $0x230] ss:$12 sps:$4 sm:$0xff]  }
 0x4a7   : > { %11345 = vmatprep.subr.bf16.mxu0 %v16003_v33 }
 0x4a9   : > { %8117 = vmatmul.mubr.bf16.gmra.mxu0 %v18569_v3  ;;  %v11890_v3 = vld [vmem:[#allocation8 + $0x1a0] ss:$12 sps:$4 sm:$0xff]  }
 0x4aa   : > { %8126 = vmatprep.mubr.bf16.mxu0 %v18521_v25  ;;  %11346 = vmatpush3.bf16.msra.mxu0 %v16003_v33  ;;  %v11852_v33 = vld [vmem:[#allocation8 + $0x228] ss:$12 sps:$4 sm:$0xff]  }
 0x4ab   : > { %11347 = vmatprep.subr.bf16.mxu0 %v16022_v55 }
 0x4ad   : > { %7729 = vmatmul.mubr.bf16.gmra.mxu1 %v16227_v16 }
 0x4ae   : > { %7738 = vmatprep.mubr.bf16.mxu1 %v18521_v25  ;;  %11348 = vmatpush3.bf16.msra.mxu0 %v16022_v55  ;;  %v11857_v55 = vld [vmem:[#allocation8 + $0x214] ss:$12 sps:$4 sm:$0xff]  }
 0x4af   : > { %11349 = vmatprep.subr.bf16.mxu0 %v16079_v62 }
 0x4b1   : > { %8127 = vmatmul.mubr.bf16.gmra.mxu0 %v15923_v19 }
 0x4b2   : > { %8136 = vmatprep.mubr.bf16.mxu0 %v18521_v25  ;;  %11350 = vmatpush3.bf16.msra.mxu0 %v16079_v62  ;;  %v11855_v62 = vld [vmem:[#allocation8 + $0x210] ss:$12 sps:$4 sm:$0xff]  }
 0x4b3   : > { %11351 = vmatprep.subr.bf16.mxu0 %v16098_v38 }
 0x4b5   : > { %7739 = vmatmul.mubr.bf16.gmra.mxu1 %v16232_v34 }
 0x4b6   : > { %7748 = vmatprep.mubr.bf16.mxu1 %v18521_v25  ;;  %11352 = vmatpush3.bf16.msra.mxu0 %v16098_v38  ;;  %v11860_v38 = vld [vmem:[#allocation8 + $0x1fc] ss:$12 sps:$4 sm:$0xff]  }
 0x4b7   : > { %11385 = vmatprep.subr.bf16.mxu0 %v16273_v56 }
 0x4b9   : > { %8137 = vmatmul.mubr.bf16.gmra.mxu0 %v15968_v1 }
 0x4ba   : > { %8146 = vmatprep.mubr.bf16.mxu0 %v18521_v25 }
 0x4bd   : > { %7749 = vmatmul.mubr.bf16.gmra.mxu1 %v16235_v21 }
 0x4be   : > { %7758 = vmatprep.mubr.bf16.mxu1 %v18521_v25 }
 0x4c1   : > { %8147 = vmatmul.mubr.bf16.gmra.mxu0 %v16013_v35 }
 0x4c2   : > { %8156 = vmatprep.mubr.bf16.mxu0 %v18521_v25 }
 0x4c5   : > { %7759 = vmatmul.mubr.bf16.gmra.mxu1 %v11843_v61 }
 0x4c6   : > { %11369 = vmatprep.mubr.bf16.mxu1 %v16133_v48 }
 0x4c9   : > { %8157 = vmatmul.mubr.bf16.gmra.mxu0 %v16054_v30 }
 0x4ca   : > { %8166 = vmatprep.mubr.bf16.mxu0 %v18521_v25 }
 0x4cd   : > { %11370 = vmatmul.mubr.bf16.vlgmr.msra.gmra.mxu1 %v16174_v53 }
 0x4ce   : > { %11373 = vmatprep.mubr.bf16.mxu1 %v16196_v6  ;;  %8708 = vmatpush1.bf16.msra.mxu1 %v11852_v33  ;;  %v16407_v33 = vld [vmem:[#allocation4 + $0x50] sm:$0xff]  }
 0x4cf   : > { %8709 = vmatprep.subr.bf16.mxu1 %v11857_v55 }
 0x4d1   : > { %8167 = vmatmul.mubr.bf16.gmra.mxu0 %v16106_v32 }
 0x4d2   : > { %8176 = vmatprep.mubr.bf16.mxu0 %v18521_v25  ;;  %8710 = vmatpush1.bf16.msra.mxu1 %v11855_v62 }
 0x4d3   : > { %8711 = vmatprep.subr.bf16.mxu1 %v11860_v38 }
 0x4d5   : > { %11374 = vmatmul.mubr.bf16.gmra.mxu1 %v16218_v4 }
 0x4d6   : > { %11377 = vmatprep.mubr.bf16.mxu1 %v16224_v7  ;;  %8712 = vmatpush1.bf16.msra.mxu1 %v11858_v43 }
 0x4d7   : > { %8713 = vmatprep.subr.bf16.mxu1 %v11863_v63 }
 0x4d9   : > { %8177 = vmatmul.mubr.bf16.gmra.mxu0 %v16133_v48  ;;  %v11870_v48 = vld [vmem:[#allocation8 + $0x198] ss:$12 sps:$4 sm:$0xff]  }
 0x4da   : > { %8186 = vmatprep.mubr.bf16.mxu0 %v18521_v25  ;;  %8714 = vmatpush1.bf16.msra.mxu1 %v11861_v39 }
 0x4db   : > { %8715 = vmatprep.subr.bf16.mxu1 %v11866_v22  ;;  %v11893_v22 = vld [vmem:[#allocation4 + $0x58] sm:$0xff]  }
 0x4dd   : > { %11378 = vmatmul.mubr.bf16.gmra.mxu1 %v16227_v16 }
 0x4de   : > { %11381 = vmatprep.mubr.bf16.mxu1 %v16232_v34  ;;  %8716 = vmatpush1.bf16.msra.mxu1 %v11864_v50 }
 0x4df   : > { %8717 = vmatprep.subr.bf16.mxu1 %v11869_v49 }
 0x4e1   : > { %8187 = vmatmul.mubr.bf16.gmra.mxu0 %v16174_v53  ;;  %v16310_v53 = vld [vmem:[#allocation4 + $0x18] sm:$0xff]  }
 0x4e2   : > { %8196 = vmatprep.mubr.bf16.mxu0 %v18521_v25  ;;  %8718 = vmatpush1.bf16.msra.mxu1 %v11867_v23 }
 0x4e3   : > { %8719 = vmatprep.subr.bf16.mxu1 %v11872_v5 }
 0x4e5   : > { %11382 = vmatmul.mubr.bf16.gmra.mxu1 %v16235_v21 }
 0x4e6   : > { %8720 = vmatpush1.bf16.msra.mxu1 %v11870_v48  ;;  %8739 = vmatprep.mubr.bf16.mxu1 %v18521_v25 }
 0x4e7   : > { %8721 = vmatprep.subr.bf16.mxu1 %v11875_v10 }
 0x4e9   : > { %8197 = vmatmul.mubr.bf16.gmra.mxu0 %v16196_v6  ;;  %v16316_v6 = vld [vmem:[#allocation4 + $0x20] sm:$0xff]  }
 0x4ea   : > { %8206 = vmatprep.mubr.bf16.mxu0 %v18521_v25  ;;  %8722 = vmatpush1.bf16.msra.mxu1 %v11873_v2  ;;  %v11894_v2 = vld [vmem:[#allocation4 + $0x60] sm:$0xff]  }
 0x4ed   : > { %8740 = vmatmul.mubr.bf16.vlgmr.msra.gmra.mxu1 %v16304_v41 }
 0x4ee   : > { %8749 = vmatprep.mubr.bf16.mxu1 %v18521_v25 }
 0x4f1   : > { %8207 = vmatmul.mubr.bf16.gmra.mxu0 %v16218_v4 }
 0x4f2   : > { %8216 = vmatprep.mubr.bf16.mxu0 %v18521_v25 }
 0x4f5   : > { %8750 = vmatmul.mubr.bf16.gmra.mxu1 %v16310_v53 }
 0x4f6   : > { %8759 = vmatprep.mubr.bf16.mxu1 %v18521_v25 }
 0x4f9   : > { %8217 = vmatmul.mubr.bf16.gmra.mxu0 %v16224_v7 }
 0x4fa   : > { %8226 = vmatprep.mubr.bf16.mxu0 %v18521_v25 }
 0x4fd   : > { %8760 = vmatmul.mubr.bf16.gmra.mxu1 %v16316_v6 }
 0x4fe   : > { %8769 = vmatprep.mubr.bf16.mxu1 %v18521_v25 }
 0x501   : > { %8227 = vmatmul.mubr.bf16.gmra.mxu0 %v16227_v16  ;;  %v16385_v16 = vld [vmem:[#allocation4 + $0x48] sm:$0xff]  }
 0x502   : > { %8236 = vmatprep.mubr.bf16.mxu0 %v18521_v25 }
 0x505   : > { %8770 = vmatmul.mubr.bf16.gmra.mxu1 %v16322_v42 }
 0x506   : > { %8779 = vmatprep.mubr.bf16.mxu1 %v18521_v25 }
 0x509   : > { %8237 = vmatmul.mubr.bf16.gmra.mxu0 %v16232_v34 }
 0x50a   : > { %8246 = vmatprep.mubr.bf16.mxu0 %v18521_v25 }
 0x50b   : > { %v16330_v27 = vpop.f32.mrf.mxu1 }
 0x50d   : > { %8780 = vmatmul.mubr.bf16.gmra.mxu1 %v16328_v15  ;;  %v16334_v52 = vpop.f32.mrf.mxu1 }
 0x50e   : > { %8789 = vmatprep.mubr.bf16.mxu1 %v18521_v25 }
 0x50f   : > { %v16337_v20 = vpop.f32.mrf.mxu1 }
 0x510   : > { %v16340_v47 = vpop.f32.mrf.mxu0 }
 0x511   : > { %8247 = vmatmul.mubr.bf16.gmra.mxu0 %v16235_v21  ;;  %18570 = vst [vmem:[#allocation260_spill] sm:$0xff] %v16340_v47  ;;  %v16342_v26 = vpop.f32.mrf.mxu1 }
 0x512   : > { %11353 = vmatprep.mubr.bf16.mxu0 %v16241_v58  ;;  %v16346_v14 = vpop.f32.mrf.mxu0 }
 0x513   : > { %18571 = vst [vmem:[#allocation171_spill] sm:$0xff] %v16346_v14  ;;  %v16348_v46 = vpop.f32.mrf.mxu1 }
 0x514   : > { %v16351_v54 = vpop.f32.mrf.mxu0 }
 0x515   : > { %8790 = vmatmul.mubr.bf16.gmra.mxu1 %v16344_v11  ;;  %18572 = vst [vmem:[#allocation240_spill] sm:$0xff] %v16351_v54  ;;  %v16354_v45 = vpop.f32.mrf.mxu1 }
 0x516   : > { %8799 = vmatprep.mubr.bf16.mxu1 %v18521_v25  ;;  %v16356_v18 = vpop.f32.mrf.mxu0 }
 0x517   : > { %18573 = vst [vmem:[#allocation79_spill] sm:$0xff] %v16356_v18  ;;  %v16358_v4 = vpop.f32.mrf.mxu1 }
 0x519   : > { %11354 = vmatmul.mubr.bf16.vlgmr.msra.gmra.mxu0 %v11976_v31  ;;  %v16361_v40 = vpop.f32.mrf.mxu0  ;;  %v16363_v36 = vpop.f32.mrf.mxu1 }
 0x51a   : > { %11357 = vmatprep.mubr.bf16.mxu0 %v11977_v57  ;;  %11386 = vmatpush3.bf16.msra.mxu0 %v16273_v56  ;;  %18574 = vst [vmem:[#allocation85_spill] sm:$0xff] %v16361_v40 }
 0x51b   : > { %11387 = vmatprep.subr.bf16.mxu0 %v11883_v59  ;;  %v16367_v44 = vpop.f32.mrf.mxu0 }
 0x51c   : > { %18575 = vst [vmem:[#allocation172_spill] sm:$0xff] %v16367_v44  ;;  %v11897_v44 = vld [vmem:[#allocation4 + $0x78] sm:$0xff]  }
 0x51d   : > { %v16369_v17 = vpop.f32.mrf.mxu1  ;;  %8800 = vmatmul.mubr.bf16.gmra.mxu1 %v16365_v13  ;;  %v16373_v60 = vpop.f32.mrf.mxu0 }
 0x51e   : > { %11388 = vmatpush3.bf16.msra.mxu0 %v11883_v59  ;;  %8809 = vmatprep.mubr.bf16.mxu1 %v18521_v25  ;;  %18576 = vst [vmem:[#allocation242_spill] sm:$0xff] %v16373_v60 }
 0x51f   : > { %11389 = vmatprep.subr.bf16.mxu0 %v11884_v12  ;;  %v16375_v8 = vpop.f32.mrf.mxu1  ;;  %v16378_v9 = vpop.f32.mrf.mxu0 }
 0x520   : > { %18577 = vst [vmem:[#allocation174_spill] sm:$0xff] %v16378_v9 }
 0x521   : > { %11358 = vmatmul.mubr.bf16.gmra.mxu0 %v15923_v19  ;;  %v16380_v7 = vpop.f32.mrf.mxu1 }
 0x522   : > { %11361 = vmatprep.mubr.bf16.mxu0 %v15968_v1  ;;  %11390 = vmatpush3.bf16.msra.mxu0 %v11884_v12  ;;  %v16387_v34 = vpop.f32.mrf.mxu0  ;;  %v11889_v1 = vld [vmem:[#allocation8 + $0x1b8] ss:$12 sps:$4 sm:$0xff]  }
 0x523   : > { %11391 = vmatprep.subr.bf16.mxu0 %v11886_v0  ;;  %v16383_v51 = vpop.f32.mrf.mxu1  ;;  %18578 = vst [vmem:[#allocation244_spill] sm:$0xff] %v16387_v34 }
 0x524   : > { %v16392_v19 = vpop.f32.mrf.mxu0 }
 0x525   : > { %v16389_v21 = vpop.f32.mrf.mxu1  ;;  %8810 = vmatmul.mubr.bf16.gmra.mxu1 %v16385_v16  ;;  %18579 = vst [vmem:[#allocation90_spill] sm:$0xff] %v16392_v19 }
 0x526   : > { %11392 = vmatpush3.bf16.msra.mxu0 %v11886_v0  ;;  %8819 = vmatprep.mubr.bf16.mxu1 %v18521_v25  ;;  %v16397_v58 = vpop.f32.mrf.mxu0 }
 0x527   : > { %11393 = vmatprep.subr.bf16.mxu0 %v11887_v28  ;;  %v16395_v61 = vpop.f32.mrf.mxu1  ;;  %18580 = vst [vmem:[#allocation84_spill] sm:$0xff] %v16397_v58 }
 0x528   : > { %v16403_v37 = vpop.f32.mrf.mxu0 }
 0x529   : > { %11362 = vmatmul.mubr.bf16.gmra.mxu0 %v16013_v35  ;;  %v16400_v29 = vpop.f32.mrf.mxu1  ;;  %18581 = vst [vmem:[#allocation176_spill] sm:$0xff] %v16403_v37 }
 0x52a   : > { %11365 = vmatprep.mubr.bf16.mxu0 %v16054_v30  ;;  %11394 = vmatpush3.bf16.msra.mxu0 %v11887_v28  ;;  %v11892_v30 = vld [vmem:[#allocation8 + $0x188] ss:$12 sps:$4 sm:$0xff]  }
 0x52b   : > { %11395 = vmatprep.subr.bf16.mxu0 %v11889_v1  ;;  %v16405_v56 = vpop.f32.mrf.mxu1  ;;  %v11895_v28 = vld [vmem:[#allocation4 + $0x68] sm:$0xff]  }
 0x52d   : > { %v16409_v55 = vpop.f32.mrf.mxu0  ;;  %v16411_v62 = vpop.f32.mrf.mxu1  ;;  %8820 = vmatmul.mubr.bf16.gmra.mxu1 %v16407_v33 }
 0x52e   : > { %18582 = vst [vmem:[#allocation246_spill] sm:$0xff] %v16409_v55  ;;  %11396 = vmatpush3.bf16.msra.mxu0 %v11889_v1  ;;  %8829 = vmatprep.mubr.bf16.mxu1 %v18521_v25  ;;  %v11896_v55 = vld [vmem:[#allocation4 + $0x70] sm:$0xff]  }
 0x52f   : > { %11397 = vmatprep.subr.bf16.mxu0 %v11890_v3  ;;  %v16415_v35 = vpop.f32.mrf.mxu0  ;;  %v16417_v38 = vpop.f32.mrf.mxu1 }
 0x530   : > { %18583 = vst [vmem:[#allocation177_spill] sm:$0xff] %v16415_v35 }
 0x531   : > { %11366 = vmatmul.mubr.bf16.gmra.mxu0 %v16106_v32  ;;  %v16420_v43 = vpop.f32.mrf.mxu0  ;;  %v16422_v63 = vpop.f32.mrf.mxu1 }
 0x532   : > { %18584 = vst [vmem:[#allocation248_spill] sm:$0xff] %v16420_v43  ;;  %11398 = vmatpush3.bf16.msra.mxu0 %v11890_v3  ;;  %11401 = vmatprep.mubr.bf16.mxu0 %v16304_v41 }
 0x533   : > { %11399 = vmatprep.subr.bf16.mxu0 %v11892_v30  ;;  %v16425_v39 = vpop.f32.mrf.mxu1  ;;  %v16427_v50 = vpop.f32.mrf.mxu0 }
 0x534   : > { %18585 = vst [vmem:[#allocation89_spill] sm:$0xff] %v16427_v50 }
 0x535   : > { %v16429_v49 = vpop.f32.mrf.mxu1  ;;  %8830 = vmatmul.mubr.bf16.gmra.mxu1 %v11893_v22 }
 0x536   : > { %11400 = vmatpush3.bf16.msra.mxu0 %v11892_v30  ;;  %8839 = vmatprep.mubr.bf16.mxu1 %v18521_v25 }
 0x537   : > { %v16432_v32 = vpop.f32.mrf.mxu1  ;;  %v16434_v23 = vpop.f32.mrf.mxu0 }
 0x538   : > { %18586 = vst [vmem:[#allocation95_spill] sm:$0xff] %v16434_v23 }
 0x539   : > { %11402 = vmatmul.mubr.bf16.vlgmr.msra.gmra.mxu0 %v16310_v53  ;;  %v16437_v5 = vpop.f32.mrf.mxu1  ;;  %v16440_v48 = vpop.f32.mrf.mxu0 }
 0x53a   : > { %18587 = vst [vmem:[#allocation179_spill] sm:$0xff] %v16437_v5  ;;  %11405 = vmatprep.mubr.bf16.mxu0 %v16316_v6  ;;  %18588 = vst [vmem:[#allocation250_spill] sm:$0xff] %v16440_v48 }
 0x53b   : > { %v16442_v10 = vpop.f32.mrf.mxu1  ;;  %v16444_v41 = vpop.f32.mrf.mxu0 }
 0x53c   : > { %18589 = vst [vmem:[#allocation181_spill] sm:$0xff] %v16442_v10  ;;  %18590 = vst [vmem:[#allocation252_spill] sm:$0xff] %v16444_v41 }
 0x53d   : > { %v16446_v59 = vpop.f32.mrf.mxu1  ;;  %8840 = vmatmul.mubr.bf16.gmra.mxu1 %v11894_v2  ;;  %v16448_v31 = vpop.f32.mrf.mxu0 }
 0x53e   : > { %18591 = vst [vmem:[#allocation100_spill] sm:$0xff] %v16446_v59  ;;  %18592 = vst [vmem:[#allocation94_spill] sm:$0xff] %v16448_v31  ;;  %8849 = vmatprep.mubr.bf16.mxu1 %v18521_v25 }
 0x53f   : > { %v16451_v57 = vpop.f32.mrf.mxu1 }
 0x540   : > { %18593 = vst [vmem:[#allocation183_spill] sm:$0xff] %v16451_v57 }
 0x541   : > { %v16453_v53 = vpop.f32.mrf.mxu0  ;;  %11406 = vmatmul.mubr.bf16.gmra.mxu0 %v16322_v42  ;;  %v16456_v6 = vpop.f32.mrf.mxu1 }
 0x542   : > { %18594 = vst [vmem:[#allocation254_spill] sm:$0xff] %v16453_v53  ;;  %18595 = vst [vmem:[#allocation99_spill] sm:$0xff] %v16456_v6  ;;  %11409 = vmatprep.mubr.bf16.mxu0 %v16328_v15 }
 0x543   : > { %v16459_v12 = vpop.f32.mrf.mxu0  ;;  %v16461_v0 = vpop.f32.mrf.mxu1 }
 0x544   : > { %18596 = vst [vmem:[#allocation186_spill] sm:$0xff] %v16459_v12  ;;  %18597 = vst [vmem:[#allocation256_spill] sm:$0xff] %v16461_v0 }
 0x545   : > { %v16463_v1 = vpop.f32.mrf.mxu0  ;;  %v16465_v3 = vpop.f32.mrf.mxu1  ;;  %8850 = vmatmul.mubr.bf16.gmra.mxu1 %v11895_v28 }
 0x546   : > { %18598 = vst [vmem:[#allocation107_spill] sm:$0xff] %v16463_v1  ;;  %18599 = vst [vmem:[#allocation115_spill] sm:$0xff] %v16465_v3  ;;  %8859 = vmatprep.mubr.bf16.mxu1 %v18521_v25 }
 0x547   : > { %v16468_v30 = vpop.f32.mrf.mxu0  ;;  %v16470_v50 = vpop.f32.mrf.mxu1 }
 0x548   : > { %18600 = vst [vmem:[#allocation105_spill] sm:$0xff] %v16468_v30  ;;  %18601 = vst [vmem:[#allocation113_spill] sm:$0xff] %v16470_v50 }
 0x549   : > { %v16472_v42 = vpop.f32.mrf.mxu0  ;;  %11410 = vmatmul.mubr.bf16.gmra.mxu0 %v16344_v11  ;;  %v16475_v15 = vpop.f32.mrf.mxu1 }
 0x54a   : > { %18602 = vst [vmem:[#allocation123_spill] sm:$0xff] %v16472_v42  ;;  %18603 = vst [vmem:[#allocation130_spill] sm:$0xff] %v16475_v15  ;;  %11413 = vmatprep.mubr.bf16.mxu0 %v16365_v13 }
 0x54b   : > { %v16478_v43 = vpop.f32.mrf.mxu0  ;;  %v16480_v35 = vpop.f32.mrf.mxu1 }
 0x54c   : > { %18604 = vst [vmem:[#allocation145_spill] sm:$0xff] %v16478_v43  ;;  %18605 = vst [vmem:[#allocation150_spill] sm:$0xff] %v16480_v35  ;;  %v16597_v35 = vpop.permute.xlu0 %9326 }
 0x54d   : > { %v16482_v37 = vpop.f32.mrf.mxu0  ;;  %v16484_v58 = vpop.f32.mrf.mxu1  ;;  %8860 = vmatmul.mubr.bf16.gmra.mxu1 %v11896_v55  ;;  %18639 = vst [vmem:[#allocation102_spill] sm:$0xff] %v16597_v35 }
 0x54e   : > { %18606 = vst [vmem:[#allocation165_spill] sm:$0xff] %v16482_v37  ;;  %18607 = vst [vmem:[#allocation122_spill] sm:$0xff] %v16484_v58  ;;  %8869 = vmatprep.mubr.bf16.mxu1 %v18521_v25 }
 0x54f   : > { %v16487_v19 = vpop.f32.mrf.mxu0  ;;  %v16489_v34 = vpop.f32.mrf.mxu1 }
 0x550   : > { %18608 = vst [vmem:[#allocation31_spill] sm:$0xff] %v16487_v19  ;;  %18609 = vst [vmem:[#allocation125_spill] sm:$0xff] %v16489_v34  ;;  %v16613_v41 = vpop.permute.xlu0 %9336 }
 0x551   : > { %v16491_v11 = vpop.f32.mrf.mxu0  ;;  %11414 = vmatmul.mubr.bf16.gmra.mxu0 %v16385_v16  ;;  %v16494_v13 = vpop.f32.mrf.mxu1 }
 0x552   : > { %18610 = vst [vmem:[#allocation97_spill] sm:$0xff] %v16491_v11  ;;  %18611 = vst [vmem:[#allocation170_spill] sm:$0xff] %v16494_v13  ;;  %11417 = vmatprep.mubr.bf16.mxu0 %v16407_v33 }
 0x553   : > { %v16497_v9 = vpop.f32.mrf.mxu0  ;;  %v16499_v60 = vpop.f32.mrf.mxu1 }
 0x554   : > { %18612 = vst [vmem:[#allocation195_spill] sm:$0xff] %v16497_v9  ;;  %18613 = vst [vmem:[#allocation241_spill] sm:$0xff] %v16499_v60  ;;  %v16629_v23 = vpop.permute.xlu0 %9346 }
 0x555   : > { %v16501_v40 = vpop.f32.mrf.mxu0  ;;  %v16503_v18 = vpop.f32.mrf.mxu1  ;;  %8870 = vmatmul.mubr.bf16.gmra.mxu1 %v11897_v44 }
 0x556   : > { %18614 = vst [vmem:[#allocation207_spill] sm:$0xff] %v16501_v40  ;;  %18615 = vst [vmem:[#allocation98_spill] sm:$0xff] %v16503_v18  ;;  %8879 = vmatprep.mubr.bf16.mxu1 %v18521_v25  ;;  %v11898_v40 = vld [vmem:[#allocation4 + $0x80] sm:$0xff]  }
 0x557   : > { %v16506_v54 = vpop.f32.mrf.mxu0  ;;  %v16508_v14 = vpop.f32.mrf.mxu1 }
 0x558   : > { %18616 = vst [vmem:[#allocation68_spill] sm:$0xff] %v16506_v54  ;;  %18617 = vst [vmem:[#allocation63_spill] sm:$0xff] %v16508_v14 }
 0x559   : > { %v16510_v16 = vpop.f32.mrf.mxu0  ;;  %11418 = vmatmul.mubr.bf16.gmra.mxu0 %v11893_v22  ;;  %v16512_v33 = vpop.f32.mrf.mxu1 }
 0x55a   : > { %18618 = vst [vmem:[#allocation117_spill] sm:$0xff] %v16512_v33  ;;  %11421 = vmatprep.mubr.bf16.mxu0 %v11894_v2  ;;  %v11899_v33 = vld [vmem:[#allocation4 + $0x88] sm:$0xff]  }
 0x55b   : > { %v16514_v47 = vpop.f32.mrf.mxu0  ;;  %v16516_v9 = vpop.f32.mrf.mxu1 }
 0x55c   : > { %18619 = vst [vmem:[#allocation33_spill] sm:$0xff] %v16516_v9 }
 0x55d   : > { %v16518_v11 = vpop.f32.mrf.mxu0  ;;  %v16520_v19 = vpop.f32.mrf.mxu1  ;;  %8880 = vmatmul.mubr.bf16.gmra.mxu1 %v11898_v40 }
 0x55e   : > { %18620 = vst [vmem:[#allocation198_spill] sm:$0xff] %v16520_v19  ;;  %8889 = vmatprep.mubr.bf16.mxu1 %v18521_v25 }
 0x55f   : > { %v16523_v54 = vpop.f32.mrf.mxu0  ;;  %v16525_v37 = vpop.f32.mrf.mxu1 }
 0x560   : > { %18621 = vst [vmem:[#allocation243_spill] sm:$0xff] %v16525_v37 }
 0x561   : > { %v16527_v22 = vpop.f32.mrf.mxu0  ;;  %11422 = vmatmul.mubr.bf16.gmra.mxu0 %v11895_v28  ;;  %v16529_v2 = vpop.f32.mrf.mxu1 }
 0x562   : > { %18622 = vst [vmem:[#allocation132_spill] sm:$0xff] %v16529_v2  ;;  %11425 = vmatprep.mubr.bf16.mxu0 %v11896_v55 }
 0x563   : > { %v16531_v9 = vpop.f32.mrf.mxu0  ;;  %v16533_v14 = vpop.f32.mrf.mxu1 }
 0x564   : > { %18623 = vst [vmem:[#allocation101_spill] sm:$0xff] %v16533_v14 }
 0x565   : > { %v16535_v18 = vpop.f32.mrf.mxu0  ;;  %v16537_v19 = vpop.f32.mrf.mxu1  ;;  %8890 = vmatmul.mubr.bf16.gmra.mxu1 %v11899_v33 }
 0x566   : > { %18624 = vst [vmem:[#allocation201_spill] sm:$0xff] %v16537_v19 }
 0x567   : > { %v16539_v25 = vpop.f32.mrf.mxu0  ;;  %v16541_v43 = vpop.f32.mrf.mxu1 }
 0x568   : > { %18625 = vst [vmem:[#allocation245_spill] sm:$0xff] %v16541_v43 }
 0x569   : > { %v16543_v37 = vpop.f32.mrf.mxu0  ;;  %11426 = vmatmul.mubr.bf16.gmra.mxu0 %v11897_v44  ;;  %v16545_v28 = vpop.f32.mrf.mxu1 }
 0x56a   : > { %18626 = vst [vmem:[#allocation129_spill] sm:$0xff] %v16545_v28  ;;  %11429 = vmatprep.mubr.bf16.mxu0 %v11898_v40 }
 0x56b   : > { %v16547_v55 = vpop.f32.mrf.mxu0  ;;  %v16549_v2 = vpop.f32.mrf.mxu1 }
 0x56c   : > { %18627 = vst [vmem:[#allocation46_spill] sm:$0xff] %v16549_v2 }
 0x56d   : > { %v16551_v14 = vpop.f32.mrf.mxu0  ;;  %v16553_v42 = vpop.f32.mrf.mxu1 }
 0x56e   : > { %18628 = vst [vmem:[#allocation190_spill] sm:$0xff] %v16553_v42 }
 0x56f   : > { %v16555_v19 = vpop.f32.mrf.mxu0  ;;  %v16557_v60 = vpop.f32.mrf.mxu1 }
 0x570   : > { %18629 = vst [vmem:[#allocation96_spill] sm:$0xff] %v16557_v60 }
 0x571   : > { %v16559_v30 = vpop.f32.mrf.mxu0  ;;  %11430 = vmatmul.mubr.bf16.gmra.mxu0 %v11899_v33  ;;  %v16561_v43 = vpop.f32.mrf.mxu1 }
 0x572   : > { %18630 = vst [vmem:[#allocation137_spill] sm:$0xff] %v16561_v43 }
 0x573   : > { %v16563_v44 = vpop.f32.mrf.mxu0  ;;  %v16565_v40 = vpop.f32.mrf.mxu1 }
 0x574   : > { %18631 = vst [vmem:[#allocation38_spill] sm:$0xff] %v16565_v40 }
 0x575   : > { %v16567_v28 = vpop.f32.mrf.mxu0  ;;  %v16569_v2 = vpop.f32.mrf.mxu1 }
 0x576   : > { %18632 = vst [vmem:[#allocation71_spill] sm:$0xff] %v16569_v2 }
 0x577   : > { %v16571_v13 = vpop.f32.mrf.mxu0  ;;  %v16573_v42 = vpop.f32.mrf.mxu1 }
 0x578   : > { %18633 = vst [vmem:[#allocation36_spill] sm:$0xff] %v16573_v42  ;;  %v16595_v42 = vpop.permute.xlu1 %9331 }
 0x579   : > { %v16575_v1 = vpop.f32.mrf.mxu0  ;;  %v16577_v60 = vpop.f32.mrf.mxu1 }
 0x57a   : > { %18634 = vst [vmem:[#allocation211_spill] sm:$0xff] %v16577_v60 }
 0x57b   : > { %v16579_v34 = vpop.f32.mrf.mxu0  ;;  %v16581_v33 = vpop.f32.mrf.mxu1 }
 0x57c   : > { %18635 = vst [vmem:[#allocation239_spill] sm:$0xff] %v16581_v33 }
 0x57d   : > { %v16583_v43 = vpop.f32.mrf.mxu0  ;;  %v16585_v58 = vpop.f32.mrf.mxu1 }
 0x57e   : > { %18636 = vst [vmem:[#allocation139_spill] sm:$0xff] %v16585_v58 }
 0x57f   : > { %v16587_v40 = vpop.f32.mrf.mxu0  ;;  %v16589_v12 = vpop.f32.mrf.mxu1 }
 0x580   : > { %18637 = vst [vmem:[#allocation104_spill] sm:$0xff] %v16589_v12  ;;  %v16611_v12 = vpop.permute.xlu1 %9341 }
 0x581   : > { %v16591_v2 = vpop.f32.mrf.mxu0  ;;  %v16593_v53 = vpop.f32.mrf.mxu1 }
 0x582   : > { %18638 = vst [vmem:[#allocation131_spill] sm:$0xff] %v16593_v53 }
 0x583   : > { %v16599_v60 = vpop.f32.mrf.mxu0  ;;  %v16601_v15 = vpop.f32.mrf.mxu1 }
 0x584   : > { %18640 = vst [vmem:[#allocation119_spill] sm:$0xff] %v16601_v15 }
 0x585   : > { %v16603_v33 = vpop.f32.mrf.mxu0  ;;  %v16605_v31 = vpop.f32.mrf.mxu1 }
 0x586   : > { %18641 = vst [vmem:[#allocation108_spill] sm:$0xff] %v16603_v33  ;;  %18642 = vst [vmem:[#allocation205_spill] sm:$0xff] %v16605_v31  ;;  %v16627_v31 = vpop.permute.xlu1 %9351 }
 0x587   : > { %v16607_v58 = vpop.f32.mrf.mxu0  ;;  %v16609_v50 = vpop.f32.mrf.mxu1 }
 0x588   : > { %18643 = vst [vmem:[#allocation249_spill] sm:$0xff] %v16607_v58  ;;  %18644 = vst [vmem:[#allocation76_spill] sm:$0xff] %v16609_v50 }
 0x589   : > { %v16615_v53 = vpop.f32.mrf.mxu0  ;;  %v16617_v48 = vpop.f32.mrf.mxu1 }
 0x58a   : > { %18645 = vst [vmem:[#allocation35_spill] sm:$0xff] %v16615_v53  ;;  %18646 = vst [vmem:[#allocation77_spill] sm:$0xff] %v16617_v48 }
 0x58b   : > { %v16619_v35 = vpop.f32.mrf.mxu0  ;;  %v16621_v3 = vpop.f32.mrf.mxu1 }
 0x58c   : > { %18647 = vst [vmem:[#allocation251_spill] sm:$0xff] %v16619_v35  ;;  %18648 = vst [vmem:[#allocation219_spill] sm:$0xff] %v16621_v3  ;;  %v16643_v3 = vpop.permute.xlu1 %9361 }
 0x58d   : > { %v16623_v15 = vpop.f32.mrf.mxu0  ;;  %v16625_v0 = vpop.f32.mrf.mxu1 }
 0x58e   : > { %18649 = vst [vmem:[#allocation110_spill] sm:$0xff] %v16623_v15  ;;  %18650 = vst [vmem:[#allocation193_spill] sm:$0xff] %v16625_v0  ;;  %v16645_v15 = vpop.permute.xlu0 %9356 }
 0x58f   : > { %v16631_v50 = vpop.f32.mrf.mxu0  ;;  %v16633_v6 = vpop.f32.mrf.mxu1 }
 0x590   : > { %18651 = vst [vmem:[#allocation257_spill] sm:$0xff] %v16631_v50  ;;  %18652 = vst [vmem:[#allocation81_spill] sm:$0xff] %v16633_v6 }
 0x591   : > { %v16635_v57 = vpop.f32.mrf.mxu0  ;;  %v16637_v53 = vpop.f32.mrf.mxu1 }
 0x592   : > { %18653 = vst [vmem:[#allocation253_spill] sm:$0xff] %v16635_v57  ;;  %18654 = vst [vmem:[#allocation22_spill] sm:$0xff] %v16637_v53  ;;  %v16659_v53 = vpop.permute.xlu1 %9371 }
 0x593   : > { %v16639_v48 = vpop.f32.mrf.mxu0  ;;  %v16641_v35 = vpop.f32.mrf.mxu1  ;;  %18663 = vst [vmem:[#allocation227_spill] sm:$0xff] %v16659_v53 }
 0x594   : > { %18655 = vst [vmem:[#allocation116_spill] sm:$0xff] %v16639_v48  ;;  %18656 = vst [vmem:[#allocation187_spill] sm:$0xff] %v16641_v35  ;;  %v16661_v48 = vpop.permute.xlu0 %9366 }
 0x595   : > { %v16647_v0 = vpop.f32.mrf.mxu0  ;;  %v16649_v59 = vpop.f32.mrf.mxu1 }
 0x596   : > { %18657 = vst [vmem:[#allocation83_spill] sm:$0xff] %v16647_v0  ;;  %18658 = vst [vmem:[#allocation37_spill] sm:$0xff] %v16649_v59 }
 0x597   : > { %v16651_v58 = vpop.f32.mrf.mxu0  ;;  %v16653_v50 = vpop.f32.mrf.mxu1 }
 0x598   : > { %18659 = vst [vmem:[#allocation26_spill] sm:$0xff] %v16651_v58  ;;  %18660 = vst [vmem:[#allocation40_spill] sm:$0xff] %v16653_v50  ;;  %v16675_v50 = vpop.permute.xlu1 %9381 }
 0x599   : > { %v16655_v6 = vpop.f32.mrf.mxu0  ;;  %v16657_v57 = vpop.f32.mrf.mxu1  ;;  %18670 = vst [vmem:[#allocation45_spill] sm:$0xff] %v16675_v50 }
 0x59a   : > { %18661 = vst [vmem:[#allocation200_spill] sm:$0xff] %v16655_v6  ;;  %18662 = vst [vmem:[#allocation43_spill] sm:$0xff] %v16657_v57  ;;  %v16677_v6 = vpop.permute.xlu0 %9376 }
 0x59b   : > { %v16663_v35 = vpop.f32.mrf.mxu0  ;;  %v16665_v10 = vpop.f32.mrf.mxu1  ;;  %18671 = vst [vmem:[#allocation231_spill] sm:$0xff] %v16677_v6 }
 0x59c   : > { %18664 = vst [vmem:[#allocation42_spill] sm:$0xff] %v16663_v35  ;;  %18665 = vst [vmem:[#allocation229_spill] sm:$0xff] %v16665_v10 }
 0x59d   : > { %v16667_v33 = vpop.f32.mrf.mxu0  ;;  %v16669_v0 = vpop.f32.mrf.mxu1 }
 0x59e   : > { %18666 = vst [vmem:[#allocation118_spill] sm:$0xff] %v16667_v33  ;;  %18667 = vst [vmem:[#allocation194_spill] sm:$0xff] %v16669_v0  ;;  %v16691_v0 = vpop.permute.xlu1 %9391 }
 0x59f   : > { %v16671_v59 = vpop.f32.mrf.mxu0  ;;  %v16673_v58 = vpop.f32.mrf.mxu1  ;;  %18678 = vst [vmem:[#allocation127_spill] sm:$0xff] %v16691_v0 }
 0x5a0   : > { %18668 = vst [vmem:[#allocation258_spill] sm:$0xff] %v16671_v59  ;;  %18669 = vst [vmem:[#allocation134_spill] sm:$0xff] %v16673_v58  ;;  %v16693_v59 = vpop.permute.xlu0 %9386 }
 0x5a1   : > { %v16679_v57 = vpop.f32.mrf.mxu0  ;;  %v16681_v5 = vpop.f32.mrf.mxu1  ;;  %18679 = vst [vmem:[#allocation126_spill] sm:$0xff] %v16693_v59 }
 0x5a2   : > { %18672 = vst [vmem:[#allocation39_spill] sm:$0xff] %v16679_v57  ;;  %18673 = vst [vmem:[#allocation233_spill] sm:$0xff] %v16681_v5 }
 0x5a3   : > { %v16683_v53 = vpop.f32.mrf.mxu0  ;;  %v16685_v35 = vpop.f32.mrf.mxu1 }
 0x5a4   : > { %18674 = vst [vmem:[#allocation120_spill] sm:$0xff] %v16683_v53  ;;  %18675 = vst [vmem:[#allocation25_spill] sm:$0xff] %v16685_v35  ;;  %v16707_v35 = vpop.permute.xlu1 %9401 }
 0x5a5   : > { %v16687_v10 = vpop.f32.mrf.mxu0  ;;  %v16689_v33 = vpop.f32.mrf.mxu1  ;;  %18686 = vst [vmem:[#allocation103_spill] sm:$0xff] %v16707_v35 }
 0x5a6   : > { %18676 = vst [vmem:[#allocation259_spill] sm:$0xff] %v16687_v10  ;;  %18677 = vst [vmem:[#allocation92_spill] sm:$0xff] %v16689_v33  ;;  %v16709_v10 = vpop.permute.xlu0 %9396  ;;  %v8099_v33 = vadd.f32 %v16510_v16, %v16330_v27 }
 0x5a7   : > { %v16695_v58 = vpop.f32.mrf.mxu0  ;;  %v16697_v50 = vpop.f32.mrf.mxu1  ;;  %18687 = vst [vmem:[#allocation121_spill] sm:$0xff] %v16709_v10 }
 0x5a8   : > { %18680 = vst [vmem:[#allocation41_spill] sm:$0xff] %v16695_v58  ;;  %18681 = vst [vmem:[#allocation136_spill] sm:$0xff] %v16697_v50  ;;  %v8101_v50 = vadd.f32 %v16514_v47, %v16334_v52  ;;  %v16727_v27 = vpop.permute.xlu1 %9411  ;;  %v8105_v52 = vadd.f32 %v16523_v54, %v16342_v26  ;;  %v8111_v26 = vadd.f32 %v16531_v9, %v16354_v45 }
 0x5a9   : > { %v16699_v6 = vpop.f32.mrf.mxu0  ;;  %v16701_v57 = vpop.f32.mrf.mxu1  ;;  %18691 = vst [vmem:[#allocation182_spill] sm:$0xff] %v16727_v27  ;;  %v16743_v27 = vld [vmem:[%s17660_s8] ss:$0 sm:$0xff]  ;;  %v8113_v45 = vadd.f32 %v16535_v18, %v16358_v4 }
 0x5aa   : > { %18682 = vst [vmem:[#allocation106_spill] sm:$0xff] %v16699_v6  ;;  %18683 = vst [vmem:[#allocation27_spill] sm:$0xff] %v16701_v57  ;;  %v16729_v16 = vpop.permute.xlu0 %9406 }
 0x5ab   : > { %v16703_v5 = vpop.f32.mrf.mxu0  ;;  %v16705_v53 = vpop.f32.mrf.mxu1  ;;  %18692 = vst [vmem:[#allocation203_spill] sm:$0xff] %v16729_v16 }
 0x5ac   : > { %18684 = vst [vmem:[#allocation44_spill] sm:$0xff] %v16703_v5  ;;  %18685 = vst [vmem:[#allocation237_spill] sm:$0xff] %v16705_v53  ;;  %v8103_v53 = vadd.f32 %v16518_v11, %v16337_v20 }
 0x5ad   : > { %v16713_v0 = vpop.f32.mrf.mxu0  ;;  %v8741_v58 = vpop.f32.mrf.mxu1 }
 0x5ae   : > { %v16717_v6 = vadd.f32 %v8741_v58, %v8099_v33 }
 0x5af   : > { %v16719_v57 = vpop.f32.mrf.mxu0  ;;  %v8743_v5 = vpop.f32.mrf.mxu1 }
 0x5b0   : > { %18688 = vst [vmem:[#allocation199_spill] sm:$0xff] %v16717_v6  ;;  %18689 = vst [vmem:[#allocation247_spill] sm:$0xff] %v16719_v57  ;;  %v16723_v35 = vadd.f32 %v8743_v5, %v8101_v50  ;;  %v8109_v57 = vadd.f32 %v16527_v22, %v16348_v46  ;;  %v17682_v20 = vrot.slane %v16717_v6, 7 }
 0x5b1   : > { %v16725_v10 = vpop.f32.mrf.mxu0  ;;  %v8745_v59 = vpop.f32.mrf.mxu1 }
 0x5b2   : > { %18690 = vst [vmem:[#allocation202_spill] sm:$0xff] %v16723_v35  ;;  %v9064_v47 = vadd.f32 %v8745_v59, %v8103_v53 }
 0x5b3   : > { %v16733_v58 = vpop.f32.mrf.mxu0  ;;  %v8747_v33 = vpop.f32.mrf.mxu1 }
 0x5b4   : > { %v9261_v50 = vrot.slane %v9064_v47, 7  ;;  %v9065_v5 = vadd.f32 %v8747_v33, %v8105_v52  ;;  %v16755_v47 = vpop.permute.xlu1 %9421  ;;  %v16757_v33 = vpop.permute.xlu0 %9416 }
 0x5b5   : > { %v16738_v11 = vpop.f32.mrf.mxu0  ;;  %v8751_v16 = vpop.f32.mrf.mxu1  ;;  %18693 = vst [vmem:[#allocation192_spill] sm:$0xff] %v16755_v47 }
 0x5b6   : > { %v9322_v46 = vsel %vm2778_vm1, %v17682_v20, %v9261_v50  ;;  %v9229_v54 = vadd.f32 %v16743_v27, %v9065_v5  ;;  %v9067_v59 = vadd.f32 %v8751_v16, %v8109_v57  ;;  %v8115_v57 = vadd.f32 %v16539_v25, %v16363_v36 }
 0x5b7   : > { %v16752_v53 = vpop.f32.mrf.mxu0  ;;  %v9485_v22 = vmul.f32 %v16595_v42, %v9322_v46  ;;  %v8753_v52 = vpop.f32.mrf.mxu1 }
 0x5b8   : > { %v9262_v9 = vrot.slane %v9067_v59, 7  ;;  %v9068_v6 = vadd.f32 %v8753_v52, %v8111_v26  ;;  %v8119_v26 = vadd.f32 %v16543_v37, %v16369_v17  ;;  %v16779_v25 = vpop.permute.xlu1 %9431 }
 0x5b9   : > { %v16761_v35 = vpop.f32.mrf.mxu0  ;;  %v16763_v20 = vadd.f32 %v9485_v22, %v9229_v54  ;;  %v8755_v5 = vpop.f32.mrf.mxu1  ;;  %18696 = vst [vmem:[#allocation73_spill] sm:$0xff] %v16779_v25  ;;  %v18782_v25 = vld [vmem:[#allocation134_spill] sm:$0xff] }
 0x5ba   : > { %v9321_v42 = vsel %vm2778_vm1, %v9261_v50, %v9262_v9  ;;  %v9230_v16 = vadd.f32 %v16743_v27, %v9068_v6  ;;  %v9070_v46 = vadd.f32 %v8755_v5, %v8113_v45  ;;  %v16781_v50 = vpop.permute.xlu0 %9426  ;;  %v8121_v6 = vadd.f32 %v16547_v55, %v16375_v8 }
 0x5bb   : > { %18694 = vst [vmem:[#allocation209_spill] sm:$0xff] %v16763_v20  ;;  %v16770_v47 = vpop.f32.mrf.mxu0  ;;  %v9486_v18 = vmul.f32 %v16613_v41, %v9321_v42  ;;  %v8757_v4 = vpop.f32.mrf.mxu1  ;;  %18697 = vst [vmem:[#allocation128_spill] sm:$0xff] %v16781_v50  ;;  %v8123_v42 = vadd.f32 %v16551_v14, %v16380_v7  ;;  %v8125_v55 = vadd.f32 %v16555_v19, %v16383_v51 }
 0x5bc   : > { %v9263_v54 = vrot.slane %v9070_v46, 7  ;;  %v9071_v59 = vadd.f32 %v8757_v4, %v8115_v57 }
 0x5bd   : > { %v16775_v22 = vpop.f32.mrf.mxu0  ;;  %v16777_v52 = vadd.f32 %v9486_v18, %v9230_v16  ;;  %v8761_v36 = vpop.f32.mrf.mxu1 }
 0x5be   : > { %v9320_v41 = vsel %vm2778_vm1, %v9262_v9, %v9263_v54  ;;  %v9231_v45 = vadd.f32 %v16743_v27, %v9071_v59  ;;  %v9073_v17 = vadd.f32 %v8761_v36, %v8119_v26  ;;  %v16805_v36 = vpop.permute.xlu1 %9441 }
 0x5bf   : > { %18695 = vst [vmem:[#allocation72_spill] sm:$0xff] %v16777_v52  ;;  %v16788_v37 = vpop.f32.mrf.mxu0  ;;  %v9487_v5 = vmul.f32 %v16611_v12, %v9320_v41  ;;  %v8763_v57 = vpop.f32.mrf.mxu1  ;;  %18699 = vst [vmem:[#allocation204_spill] sm:$0xff] %v16805_v36  ;;  %v8129_v41 = vadd.f32 %v16559_v30, %v16389_v21 }
 0x5c0   : > { %v9264_v16 = vrot.slane %v9073_v17, 7  ;;  %v9074_v46 = vadd.f32 %v8763_v57, %v8121_v6  ;;  %v16807_v6 = vpop.permute.xlu0 %9436 }
 0x5c1   : > { %v16793_v18 = vpop.f32.mrf.mxu0  ;;  %v16795_v4 = vadd.f32 %v9487_v5, %v9231_v45  ;;  %v8765_v8 = vpop.f32.mrf.mxu1  ;;  %18700 = vst [vmem:[#allocation141_spill] sm:$0xff] %v16807_v6  ;;  %v8131_v5 = vadd.f32 %v16563_v44, %v16395_v61 }
 0x5c2   : > { %v9319_v9 = vsel %vm2778_vm1, %v9263_v54, %v9264_v16  ;;  %v9232_v26 = vadd.f32 %v16743_v27, %v9074_v46  ;;  %v9076_v12 = vadd.f32 %v8765_v8, %v8123_v42  ;;  %v8133_v8 = vadd.f32 %v16567_v28, %v16400_v29  ;;  %v16829_v44 = vpop.permute.xlu1 %9451 }
 0x5c3   : > { %18698 = vst [vmem:[#allocation213_spill] sm:$0xff] %v16795_v4  ;;  %v16802_v59 = vpop.f32.mrf.mxu0  ;;  %v9488_v14 = vmul.f32 %v16629_v23, %v9319_v9  ;;  %v8767_v7 = vpop.f32.mrf.mxu1  ;;  %18703 = vst [vmem:[#allocation215_spill] sm:$0xff] %v16829_v44  ;;  %v18730_v44 = vld [vmem:[#allocation193_spill] sm:$0xff] }
 0x5c4   : > { %v9265_v45 = vrot.slane %v9076_v12, 7  ;;  %v9077_v51 = vadd.f32 %v8767_v7, %v8125_v55  ;;  %v18781_v4 = vld [vmem:[#allocation145_spill] sm:$0xff] }
 0x5c5   : > { %v16811_v19 = vpop.f32.mrf.mxu0  ;;  %v16813_v54 = vadd.f32 %v9488_v14, %v9232_v26  ;;  %v8771_v17 = vpop.f32.mrf.mxu1  ;;  %v8135_v14 = vadd.f32 %v16571_v13, %v16405_v56  ;;  %v8141_v13 = vadd.f32 %v16579_v34, %v16417_v38 }
 0x5c6   : > { %v9318_v23 = vsel %vm2778_vm1, %v9264_v16, %v9265_v45  ;;  %v9233_v57 = vadd.f32 %v16743_v27, %v9077_v51  ;;  %v9079_v42 = vadd.f32 %v8771_v17, %v8129_v41  ;;  %v16831_v16 = vpop.permute.xlu0 %9446  ;;  %v8139_v17 = vadd.f32 %v16575_v1, %v16411_v62 }
 0x5c7   : > { %18701 = vst [vmem:[#allocation20_spill] sm:$0xff] %v16813_v54  ;;  %v16820_v46 = vpop.f32.mrf.mxu0  ;;  %v9489_v21 = vmul.f32 %v16627_v31, %v9318_v23  ;;  %v8773_v30 = vpop.f32.mrf.mxu1  ;;  %18704 = vst [vmem:[#allocation19_spill] sm:$0xff] %v16831_v16 }
 0x5c8   : > { %v9266_v55 = vrot.slane %v9079_v42, 7  ;;  %v9080_v9 = vadd.f32 %v8773_v30, %v8131_v5 }
 0x5c9   : > { %v16825_v26 = vpop.f32.mrf.mxu0  ;;  %v16827_v12 = vadd.f32 %v9489_v21, %v9233_v57  ;;  %v8775_v61 = vpop.f32.mrf.mxu1 }
 0x5ca   : > { %v9317_v31 = vsel %vm2778_vm1, %v9265_v45, %v9266_v55  ;;  %v9234_v7 = vadd.f32 %v16743_v27, %v9080_v9  ;;  %v9082_v29 = vadd.f32 %v8775_v61, %v8133_v8  ;;  %v16855_v8 = vpop.permute.xlu1 %9461  ;;  %v16857_v9 = vpop.permute.xlu0 %9456  ;;  %v8143_v61 = vadd.f32 %v16583_v43, %v16422_v63 }
 0x5cb   : > { %18702 = vst [vmem:[#allocation143_spill] sm:$0xff] %v16827_v12  ;;  %v16838_v28 = vpop.f32.mrf.mxu0  ;;  %v9490_v41 = vmul.f32 %v16645_v15, %v9317_v31  ;;  %v8777_v51 = vpop.f32.mrf.mxu1  ;;  %18706 = vst [vmem:[#allocation78_spill] sm:$0xff] %v16855_v8  ;;  %v18726_v8 = vld [vmem:[#allocation45_spill] sm:$0xff] }
 0x5cc   : > { %v9267_v5 = vrot.slane %v9082_v29, 7  ;;  %v9083_v23 = vadd.f32 %v8777_v51, %v8135_v14  ;;  %18707 = vst [vmem:[#allocation148_spill] sm:$0xff] %v16857_v9  ;;  %v18729_v9 = vld [vmem:[#allocation95_spill] sm:$0xff]  ;;  %v18756_v12 = vld [vmem:[#allocation37_spill] sm:$0xff] }
 0x5cd   : > { %v16843_v57 = vpop.f32.mrf.mxu0  ;;  %v16845_v42 = vadd.f32 %v9490_v41, %v9234_v7  ;;  %v8781_v56 = vpop.f32.mrf.mxu1  ;;  %v8145_v7 = vadd.f32 %v16587_v40, %v16425_v39 }
 0x5ce   : > { %v9316_v45 = vsel %vm2778_vm1, %v9266_v55, %v9267_v5  ;;  %v9235_v21 = vadd.f32 %v16743_v27, %v9083_v23  ;;  %v9085_v15 = vadd.f32 %v8781_v56, %v8139_v17  ;;  %v8149_v17 = vadd.f32 %v16591_v2, %v16429_v49  ;;  %v16879_v40 = vpop.permute.xlu1 %9471 }
 0x5cf   : > { %18705 = vst [vmem:[#allocation217_spill] sm:$0xff] %v16845_v42  ;;  %v16852_v30 = vpop.f32.mrf.mxu0  ;;  %v9491_v62 = vmul.f32 %v16643_v3, %v9316_v45  ;;  %v8783_v1 = vpop.f32.mrf.mxu1  ;;  %18710 = vst [vmem:[#allocation163_spill] sm:$0xff] %v16879_v40  ;;  %v18778_v42 = vld [vmem:[#allocation123_spill] sm:$0xff] }
 0x5d0   : > { %v9268_v14 = vrot.slane %v9085_v15, 7  ;;  %v9086_v34 = vadd.f32 %v8783_v1, %v8141_v13 }
 0x5d1   : > { %v16861_v38 = vpop.f32.mrf.mxu0  ;;  %v16863_v55 = vadd.f32 %v9491_v62, %v9235_v21  ;;  %v8785_v31 = vpop.f32.mrf.mxu1  ;;  %v8151_v21 = vadd.f32 %v16599_v60, %v16432_v32  ;;  %v18712_v62 = vld [vmem:[#allocation227_spill] sm:$0xff]  ;;  %v18716_v32 = vld [vmem:[#allocation181_spill] sm:$0xff] }
 0x5d2   : > { %v9315_v3 = vsel %vm2778_vm1, %v9267_v5, %v9268_v14  ;;  %v9236_v29 = vadd.f32 %v16743_v27, %v9086_v34  ;;  %v9088_v41 = vadd.f32 %v8785_v31, %v8143_v61  ;;  %v16881_v5 = vpop.permute.xlu0 %9466  ;;  %v18713_v34 = vld [vmem:[#allocation179_spill] sm:$0xff]  ;;  %v18714_v31 = vld [vmem:[#allocation108_spill] sm:$0xff] }
 0x5d3   : > { %18708 = vst [vmem:[#allocation142_spill] sm:$0xff] %v16863_v55  ;;  %v16870_v51 = vpop.f32.mrf.mxu0  ;;  %v9492_v43 = vmul.f32 %v16661_v48, %v9315_v3  ;;  %v8787_v63 = vpop.f32.mrf.mxu1  ;;  %18711 = vst [vmem:[#allocation221_spill] sm:$0xff] %v16881_v5  ;;  %v18753_v55 = vld [vmem:[#allocation150_spill] sm:$0xff] }
 0x5d4   : > { %v9269_v23 = vrot.slane %v9088_v41, 7  ;;  %v9089_v56 = vadd.f32 %v8787_v63, %v8145_v7  ;;  %v8153_v7 = vadd.f32 %v18714_v31, %v18713_v34 }
 0x5d5   : > { %v16875_v13 = vpop.f32.mrf.mxu0  ;;  %v16877_v45 = vadd.f32 %v9492_v43, %v9236_v29  ;;  %v8791_v39 = vpop.f32.mrf.mxu1 }
 0x5d6   : > { %v9314_v48 = vsel %vm2778_vm1, %v9268_v14, %v9269_v23  ;;  %v9237_v15 = vadd.f32 %v16743_v27, %v9089_v56  ;;  %v9091_v49 = vadd.f32 %v8791_v39, %v8149_v17  ;;  %v18717_v14 = vld [vmem:[#allocation249_spill] sm:$0xff] }
 0x5d7   : > { %18709 = vst [vmem:[#allocation206_spill] sm:$0xff] %v16877_v45  ;;  %v16888_v2 = vpop.f32.mrf.mxu0  ;;  %v9493_v1 = vmul.f32 %v18712_v62, %v9314_v48  ;;  %v8793_v61 = vpop.f32.mrf.mxu1  ;;  %v8155_v63 = vadd.f32 %v18717_v14, %v18716_v32  ;;  %v18718_v62 = vld [vmem:[#allocation231_spill] sm:$0xff] }
 0x5d8   : > { %v9270_v3 = vrot.slane %v9091_v49, 7  ;;  %v9092_v29 = vadd.f32 %v8793_v61, %v8151_v21  ;;  %v16905_v21 = vpop.permute.xlu1 %9481  ;;  %v16907_v61 = vpop.permute.xlu0 %9476 }
 0x5d9   : > { %v16893_v41 = vpop.f32.mrf.mxu0  ;;  %v16895_v43 = vadd.f32 %v9493_v1, %v9237_v15  ;;  %v8795_v60 = vpop.f32.mrf.mxu1  ;;  %18719 = vst [vmem:[#allocation223_spill] sm:$0xff] %v16905_v21  ;;  %18720 = vst [vmem:[#allocation225_spill] sm:$0xff] %v16907_v61  ;;  %v18721_v15 = vld [vmem:[#allocation100_spill] sm:$0xff]  ;;  %v18722_v1 = vld [vmem:[#allocation35_spill] sm:$0xff] }
 0x5da   : > { %v9313_v17 = vsel %vm2778_vm1, %v9269_v23, %v9270_v3  ;;  %v9238_v56 = vadd.f32 %v16743_v27, %v9092_v29  ;;  %v9094_v39 = vadd.f32 %v8795_v60, %v8153_v7  ;;  %v8159_v31 = vadd.f32 %v18722_v1, %v18721_v15  ;;  %v18724_v7 = vld [vmem:[#allocation183_spill] sm:$0xff] }
 0x5db   : > { %18715 = vst [vmem:[#allocation82_spill] sm:$0xff] %v16895_v43  ;;  %v16902_v48 = vpop.f32.mrf.mxu0  ;;  %v9494_v34 = vmul.f32 %v18718_v62, %v9313_v17  ;;  %v8797_v49 = vpop.f32.mrf.mxu1  ;;  %v18725_v60 = vld [vmem:[#allocation251_spill] sm:$0xff]  ;;  %v16927_v43 = vadd.f32 %v18730_v44, %v18729_v9  ;;  %v18738_v9 = vld [vmem:[#allocation253_spill] sm:$0xff] }
 0x5dc   : > { %v9271_v40 = vrot.slane %v9094_v39, 7  ;;  %v9095_v32 = vadd.f32 %v8797_v49, %v8155_v63  ;;  %v8161_v5 = vadd.f32 %v18725_v60, %v18724_v7  ;;  %v18727_v63 = vld [vmem:[#allocation99_spill] sm:$0xff]  ;;  %v18728_v49 = vld [vmem:[#allocation110_spill] sm:$0xff]  ;;  %v18736_v60 = vld [vmem:[#allocation257_spill] sm:$0xff] }
 0x5dd   : > { %v16911_v14 = vpop.f32.mrf.mxu0  ;;  %v16913_v23 = vadd.f32 %v9494_v34, %v9238_v56  ;;  %v8801_v29 = vpop.f32.mrf.mxu1  ;;  %v8163_v1 = vadd.f32 %v18728_v49, %v18727_v63  ;;  %18731 = vst [vmem:[#allocation21_spill] sm:$0xff] %v16927_v43  ;;  %v18737_v44 = vld [vmem:[#allocation115_spill] sm:$0xff]  ;;  %v18739_v49 = vld [vmem:[#allocation250_spill] sm:$0xff] }
 0x5de   : > { %v9312_v17 = vsel %vm2778_vm1, %v9270_v3, %v9271_v40  ;;  %v9239_v62 = vadd.f32 %v16743_v27, %v9095_v32  ;;  %v9097_v21 = vadd.f32 %v8801_v29, %v8159_v31  ;;  %v16933_v31 = vpop.permute.xlu1 %9619  ;;  %v16935_v29 = vpop.permute.xlu0 %9614  ;;  %v8169_v63 = vadd.f32 %v18738_v9, %v18737_v44  ;;  %v18743_v43 = vld [vmem:[#allocation22_spill] sm:$0xff] }
 0x5df   : > { %18723 = vst [vmem:[#allocation168_spill] sm:$0xff] %v16913_v23  ;;  %v16920_v61 = vpop.f32.mrf.mxu0  ;;  %v9495_v15 = vmul.f32 %v18726_v8, %v9312_v17  ;;  %v8803_v39 = vpop.f32.mrf.mxu1  ;;  %18733 = vst [vmem:[#allocation86_spill] sm:$0xff] %v16933_v31  ;;  %v18735_v8 = vld [vmem:[#allocation256_spill] sm:$0xff] }
 0x5e0   : > { %v9272_v56 = vrot.slane %v9097_v21, 7  ;;  %v9098_v34 = vadd.f32 %v8803_v39, %v8161_v5  ;;  %18734 = vst [vmem:[#allocation87_spill] sm:$0xff] %v16935_v29  ;;  %v8165_v17 = vadd.f32 %v18736_v60, %v18735_v8  ;;  %v18745_v8 = vld [vmem:[#allocation126_spill] sm:$0xff]  ;;  %v18747_v23 = vld [vmem:[#allocation116_spill] sm:$0xff] }
 0x5e1   : > { %v16929_v7 = vpop.f32.mrf.mxu0  ;;  %v16931_v3 = vadd.f32 %v9495_v15, %v9239_v62  ;;  %v8805_v32 = vpop.f32.mrf.mxu1  ;;  %v18740_v62 = vld [vmem:[#allocation81_spill] sm:$0xff] }
 0x5e2   : > { %v9311_v21 = vsel %vm2778_vm1, %v9271_v40, %v9272_v56  ;;  %v9240_v5 = vadd.f32 %v16743_v27, %v9098_v34  ;;  %v9100_v39 = vadd.f32 %v8805_v32, %v8163_v1  ;;  %v16946_v15 = vadd.f32 %v18740_v62, %v18739_v49  ;;  %v18746_v40 = vld [vmem:[#allocation113_spill] sm:$0xff]  ;;  %v18748_v1 = vld [vmem:[#allocation94_spill] sm:$0xff]  ;;  %v18749_v32 = vld [vmem:[#allocation187_spill] sm:$0xff] }
 0x5e3   : > { %18732 = vst [vmem:[#allocation24_spill] sm:$0xff] %v16931_v3  ;;  %v18742_v3 = vld [vmem:[#allocation252_spill] sm:$0xff]  ;;  %v16952_v29 = vpop.f32.mrf.mxu0  ;;  %v9496_v60 = vmul.f32 %v18745_v8, %v9311_v21  ;;  %v8807_v16 = vpop.f32.mrf.mxu1  ;;  %v8171_v34 = vadd.f32 %v18747_v23, %v18746_v40  ;;  %v16959_v36 = vadd.f32 %v18749_v32, %v18748_v1  ;;  %v18751_v49 = vld [vmem:[#allocation130_spill] sm:$0xff]  ;;  %v18752_v62 = vld [vmem:[#allocation83_spill] sm:$0xff] }
 0x5e4   : > { %18741 = vst [vmem:[#allocation88_spill] sm:$0xff] %v16946_v15  ;;  %v16950_v45 = vadd.f32 %v18743_v43, %v18742_v3  ;;  %v9273_v44 = vrot.slane %v9100_v39, 7  ;;  %v9101_v9 = vadd.f32 %v8807_v16, %v8165_v17  ;;  %v8173_v15 = vadd.f32 %v18752_v62, %v18751_v49  ;;  %v18754_v43 = vld [vmem:[#allocation26_spill] sm:$0xff]  ;;  %v18760_v1 = vld [vmem:[#allocation40_spill] sm:$0xff] }
 0x5e5   : > { %18750 = vst [vmem:[#allocation185_spill] sm:$0xff] %v16959_v36  ;;  %v8175_v3 = vadd.f32 %v18754_v43, %v18753_v55  ;;  %v16969_v21 = vpop.f32.mrf.mxu0  ;;  %v16971_v8 = vadd.f32 %v9496_v60, %v9240_v5  ;;  %v8811_v23 = vpop.f32.mrf.mxu1  ;;  %v18759_v40 = vld [vmem:[#allocation186_spill] sm:$0xff]  ;;  %v18763_v49 = vld [vmem:[#allocation200_spill] sm:$0xff]  ;;  %v18767_v5 = vld [vmem:[#allocation43_spill] sm:$0xff] }
 0x5e6   : > { %18744 = vst [vmem:[#allocation157_spill] sm:$0xff] %v16950_v45  ;;  %v18755_v45 = vld [vmem:[#allocation254_spill] sm:$0xff]  ;;  %v16975_v32 = vadd.f32 %v18760_v1, %v18759_v40  ;;  %v9310_v16 = vsel %vm2778_vm1, %v9272_v56, %v9273_v44  ;;  %v9241_v17 = vadd.f32 %v16743_v27, %v9101_v9  ;;  %v9103_v39 = vadd.f32 %v8811_v23, %v8169_v63  ;;  %v18769_v40 = vld [vmem:[#allocation127_spill] sm:$0xff]  ;;  %v16993_v56 = vpop.permute.xlu0 %9624 }
 0x5e7   : > { %v16967_v54 = vadd.f32 %v18756_v12, %v18755_v45  ;;  %18758 = vst [vmem:[#allocation58_spill] sm:$0xff] %v16971_v8  ;;  %v18762_v55 = vld [vmem:[#allocation122_spill] sm:$0xff]  ;;  %v18764_v12 = vld [vmem:[#allocation125_spill] sm:$0xff]  ;;  %v16988_v36 = vpop.f32.mrf.mxu0  ;;  %v9497_v1 = vmul.f32 %v18769_v40, %v9310_v16  ;;  %v16991_v8 = vpop.permute.xlu1 %9629 }
 0x5e8   : > { %18761 = vst [vmem:[#allocation188_spill] sm:$0xff] %v16975_v32  ;;  %v8179_v62 = vadd.f32 %v18763_v49, %v18762_v55  ;;  %v18765_v45 = vld [vmem:[#allocation42_spill] sm:$0xff]  ;;  %v8813_v32 = vpop.f32.mrf.mxu1  ;;  %18770 = vst [vmem:[#allocation57_spill] sm:$0xff] %v16991_v8  ;;  %v18773_v55 = vld [vmem:[#allocation105_spill] sm:$0xff]  ;;  %v17011_v8 = vadd.f32 %v18782_v25, %v18781_v4 }
 0x5e9   : > { %18757 = vst [vmem:[#allocation91_spill] sm:$0xff] %v16967_v54  ;;  %v8181_v43 = vadd.f32 %v18765_v45, %v18764_v12  ;;  %v18766_v54 = vld [vmem:[#allocation107_spill] sm:$0xff]  ;;  %v18771_v63 = vld [vmem:[#allocation170_spill] sm:$0xff]  ;;  %v18774_v49 = vld [vmem:[#allocation229_spill] sm:$0xff]  ;;  %v9274_v12 = vrot.slane %v9103_v39, 7  ;;  %v9104_v45 = vadd.f32 %v8813_v32, %v8171_v34  ;;  %v17013_v20 = vpop.f32.mrf.mxu0 }
 0x5ea   : > { %v16986_v60 = vadd.f32 %v18767_v5, %v18766_v54  ;;  %v18772_v9 = vld [vmem:[#allocation118_spill] sm:$0xff]  ;;  %v16999_v6 = vadd.f32 %v18774_v49, %v18773_v55  ;;  %v18776_v54 = vld [vmem:[#allocation241_spill] sm:$0xff]  ;;  %18783 = vst [vmem:[#allocation47_spill] sm:$0xff] %v17011_v8  ;;  %v18786_v39 = vld [vmem:[#allocation39_spill] sm:$0xff] }
 0x5eb   : > { %v8183_v23 = vadd.f32 %v18772_v9, %v18771_v63  ;;  %v18777_v5 = vld [vmem:[#allocation258_spill] sm:$0xff]  ;;  %v17015_v63 = vadd.f32 %v9497_v1, %v9241_v17  ;;  %v8815_v9 = vpop.f32.mrf.mxu1  ;;  %v9309_v32 = vsel %vm2778_vm1, %v9273_v44, %v9274_v12  ;;  %v9242_v49 = vadd.f32 %v16743_v27, %v9104_v45  ;;  %v18789_v25 = vld [vmem:[#allocation165_spill] sm:$0xff]  ;;  %v18792_v17 = vld [vmem:[#allocation31_spill] sm:$0xff] }
 0x5ec   : > { %18768 = vst [vmem:[#allocation23_spill] sm:$0xff] %v16986_v60  ;;  %18775 = vst [vmem:[#allocation30_spill] sm:$0xff] %v16999_v6  ;;  %v17003_v60 = vadd.f32 %v18777_v5, %v18776_v54  ;;  %v18779_v16 = vld [vmem:[#allocation194_spill] sm:$0xff]  ;;  %v18787_v54 = vld [vmem:[#allocation63_spill] sm:$0xff] }
 0x5ed   : > { %v17007_v40 = vadd.f32 %v18779_v16, %v18778_v42  ;;  %18784 = vst [vmem:[#allocation28_spill] sm:$0xff] %v17015_v63  ;;  %v18785_v55 = vld [vmem:[#allocation98_spill] sm:$0xff]  ;;  %v9106_v42 = vadd.f32 %v8815_v9, %v8173_v15  ;;  %v18788_v5 = vld [vmem:[#allocation120_spill] sm:$0xff]  ;;  %v18790_v4 = vld [vmem:[#allocation233_spill] sm:$0xff]  ;;  %v8817_v44 = vpop.f32.mrf.mxu1 }
 0x5ee   : > { %v17019_v34 = vadd.f32 %v18786_v39, %v18785_v55  ;;  %v17026_v16 = vadd.f32 %v18788_v5, %v18787_v54  ;;  %v17030_v8 = vadd.f32 %v18790_v4, %v18789_v25  ;;  %v18793_v1 = vld [vmem:[#allocation25_spill] sm:$0xff]  ;;  %v17036_v55 = vpop.f32.mrf.mxu0  ;;  %v18797_v45 = vld [vmem:[#allocation259_spill] sm:$0xff]  ;;  %v18799_v54 = vld [vmem:[#allocation92_spill] sm:$0xff]  ;;  %v9107_v25 = vadd.f32 %v8817_v44, %v8175_v3  ;;  %v17065_v3 = vpop.permute.xlu0 %9634 }
 0x5ef   : > { %18780 = vst [vmem:[#allocation154_spill] sm:$0xff] %v17007_v40  ;;  %v17034_v40 = vadd.f32 %v18793_v1, %v18792_v17  ;;  %v18795_v39 = vld [vmem:[#allocation121_spill] sm:$0xff]  ;;  %v9275_v50 = vrot.slane %v9106_v42, 7  ;;  %v18803_v17 = vld [vmem:[#allocation198_spill] sm:$0xff]  ;;  %18810 = vst [vmem:[#allocation64_spill] sm:$0xff] %v17065_v3 }
 0x5f0   : > { %18791 = vst [vmem:[#allocation112_spill] sm:$0xff] %v17030_v8  ;;  %v9498_v6 = vmul.f32 %v18795_v39, %v9309_v32  ;;  %v18796_v63 = vld [vmem:[#allocation117_spill] sm:$0xff]  ;;  %v18804_v1 = vld [vmem:[#allocation106_spill] sm:$0xff]  ;;  %v18805_v32 = vld [vmem:[#allocation195_spill] sm:$0xff] }
 0x5f1   : > { %18794 = vst [vmem:[#allocation235_spill] sm:$0xff] %v17034_v40  ;;  %v17041_v15 = vadd.f32 %v18797_v45, %v18796_v63  ;;  %v18798_v9 = vld [vmem:[#allocation97_spill] sm:$0xff]  ;;  %v17053_v40 = vadd.f32 %v18804_v1, %v18803_v17  ;;  %v18806_v39 = vld [vmem:[#allocation136_spill] sm:$0xff]  ;;  %v17059_v63 = vpop.f32.mrf.mxu0  ;;  %v18811_v42 = vld [vmem:[#allocation207_spill] sm:$0xff]  ;;  %v9243_v17 = vadd.f32 %v16743_v27, %v9107_v25 }
 0x5f2   : > { %v17045_v5 = vadd.f32 %v18799_v54, %v18798_v9  ;;  %v18801_v4 = vld [vmem:[#allocation33_spill] sm:$0xff]  ;;  %v17057_v52 = vadd.f32 %v18806_v39, %v18805_v32  ;;  %v17061_v45 = vadd.f32 %v9498_v6, %v9242_v49  ;;  %v8821_v9 = vpop.f32.mrf.mxu1  ;;  %v17063_v54 = vpop.permute.xlu1 %9639  ;;  %v18814_v32 = vld [vmem:[#allocation243_spill] sm:$0xff]  ;;  %v18815_v39 = vld [vmem:[#allocation44_spill] sm:$0xff] }
 0x5f3   : > { %v18802_v8 = vld [vmem:[#allocation41_spill] sm:$0xff]  ;;  %18809 = vst [vmem:[#allocation93_spill] sm:$0xff] %v17063_v54  ;;  %v9109_v1 = vadd.f32 %v8821_v9, %v8179_v62  ;;  %v18816_v6 = vld [vmem:[#allocation132_spill] sm:$0xff]  ;;  %v18823_v25 = vld [vmem:[#allocation247_spill] sm:$0xff] }
 0x5f4   : > { %18800 = vst [vmem:[#allocation226_spill] sm:$0xff] %v17045_v5  ;;  %v17049_v31 = vadd.f32 %v18802_v8, %v18801_v4  ;;  %18807 = vst [vmem:[#allocation29_spill] sm:$0xff] %v17057_v52  ;;  %v18812_v8 = vld [vmem:[#allocation27_spill] sm:$0xff]  ;;  %v9308_v4 = vsel %vm2778_vm1, %v9274_v12, %v9275_v50  ;;  %v17076_v52 = vadd.f32 %v18815_v39, %v18814_v32  ;;  %v18818_v5 = vld [vmem:[#allocation68_spill] sm:$0xff]  ;;  %v8823_v12 = vpop.f32.mrf.mxu1 }
 0x5f5   : > { %18808 = vst [vmem:[#allocation70_spill] sm:$0xff] %v17061_v45  ;;  %v17069_v44 = vadd.f32 %v18812_v8, %v18811_v42  ;;  %v17080_v49 = vadd.f32 %v16713_v0, %v18816_v6  ;;  %v18819_v45 = vld [vmem:[#allocation237_spill] sm:$0xff]  ;;  %v17086_v42 = vpop.f32.mrf.mxu0  ;;  %v18821_v8 = vld [vmem:[#allocation103_spill] sm:$0xff]  ;;  %v9276_v39 = vrot.slane %v9109_v1, 7  ;;  %v9110_v0 = vadd.f32 %v8823_v12, %v8181_v43  ;;  %v18831_v12 = vld [vmem:[#allocation190_spill] sm:$0xff] }
 0x5f6   : > { %v17084_v54 = vadd.f32 %v18819_v45, %v18818_v5  ;;  %v18822_v3 = vld [vmem:[#allocation101_spill] sm:$0xff] }
 0x5f7   : > { %18813 = vst [vmem:[#allocation191_spill] sm:$0xff] %v17069_v44  ;;  %18817 = vst [vmem:[#allocation162_spill] sm:$0xff] %v17080_v49  ;;  %v9499_v44 = vmul.f32 %v18821_v8, %v9308_v4  ;;  %v17091_v62 = vadd.f32 %v18823_v25, %v18822_v3  ;;  %v18824_v9 = vld [vmem:[#allocation201_spill] sm:$0xff]  ;;  %v18827_v4 = vld [vmem:[#allocation202_spill] sm:$0xff]  ;;  %v17109_v3 = vpop.f32.mrf.mxu0  ;;  %v9244_v1 = vadd.f32 %v16743_v27, %v9110_v0 }
 0x5f8   : > { %18820 = vst [vmem:[#allocation135_spill] sm:$0xff] %v17084_v54  ;;  %v17095_v32 = vadd.f32 %v16725_v10, %v18824_v9  ;;  %v18825_v6 = vld [vmem:[#allocation245_spill] sm:$0xff]  ;;  %v17107_v8 = vadd.f32 %v16743_v27, %v18827_v4  ;;  %v8825_v10 = vpop.f32.mrf.mxu1  ;;  %v18830_v9 = vld [vmem:[#allocation46_spill] sm:$0xff]  ;;  %v17135_v54 = vpop.permute.xlu1 %9649 }
 0x5f9   : > { %v17099_v49 = vadd.f32 %v16733_v58, %v18825_v6  ;;  %v18826_v5 = vld [vmem:[#allocation129_spill] sm:$0xff]  ;;  %v17111_v25 = vadd.f32 %v9499_v44, %v9243_v17  ;;  %v17115_v43 = vadd.f32 %v16752_v53, %v18830_v9  ;;  %v9307_v58 = vsel %vm2778_vm1, %v9275_v50, %v9276_v39  ;;  %v17132_v53 = vpop.f32.mrf.mxu0  ;;  %v18835_v9 = vld [vmem:[#allocation203_spill] sm:$0xff]  ;;  %v18836_v0 = vld [vmem:[#allocation38_spill] sm:$0xff] }
 0x5fa   : > { %v17103_v45 = vadd.f32 %v16738_v11, %v18826_v5  ;;  %18828 = vst [vmem:[#allocation34_spill] sm:$0xff] %v17107_v8  ;;  %v9112_v11 = vadd.f32 %v8825_v10, %v8183_v23  ;;  %v17122_v6 = vadd.f32 %v16761_v35, %v18831_v12  ;;  %v18832_v5 = vld [vmem:[#allocation96_spill] sm:$0xff]  ;;  %v18833_v44 = vld [vmem:[#allocation137_spill] sm:$0xff]  ;;  %v9500_v8 = vmul.f32 %v18835_v9, %v9307_v58  ;;  %v8827_v50 = vpop.f32.mrf.mxu1  ;;  %v17137_v23 = vpop.permute.xlu0 %9644  ;;  %v18837_v10 = vld [vmem:[#allocation71_spill] sm:$0xff] }
 0x5fb   : > { %18829 = vst [vmem:[#allocation32_spill] sm:$0xff] %v17111_v25  ;;  %v17126_v4 = vadd.f32 %v16770_v47, %v18832_v5  ;;  %v17130_v17 = vadd.f32 %v16775_v22, %v18833_v44  ;;  %v17141_v35 = vadd.f32 %v16788_v37, %v18836_v0  ;;  %v17145_v47 = vadd.f32 %v16793_v18, %v18837_v10  ;;  %v18838_v5 = vld [vmem:[#allocation36_spill] sm:$0xff]  ;;  %v18839_v58 = vld [vmem:[#allocation211_spill] sm:$0xff]  ;;  %v17160_v37 = vpop.f32.mrf.mxu0 }
 0x5fc   : > { %v9277_v12 = vrot.slane %v9112_v11, 7  ;;  %v9113_v22 = vadd.f32 %v8827_v50, %v17003_v60  ;;  %v17150_v44 = vadd.f32 %v16802_v59, %v18838_v5  ;;  %v17154_v9 = vadd.f32 %v16811_v19, %v18839_v58  ;;  %v18840_v25 = vld [vmem:[#allocation239_spill] sm:$0xff]  ;;  %v8831_v18 = vpop.f32.mrf.mxu1  ;;  %v18842_v10 = vld [vmem:[#allocation104_spill] sm:$0xff]  ;;  %v18847_v58 = vld [vmem:[#allocation182_spill] sm:$0xff] }
 0x5fd   : > { %18834 = vst [vmem:[#allocation114_spill] sm:$0xff] %v17130_v17  ;;  %v17158_v17 = vadd.f32 %v16820_v46, %v18840_v25  ;;  %v17162_v0 = vadd.f32 %v9500_v8, %v9244_v1  ;;  %v18841_v11 = vld [vmem:[#allocation139_spill] sm:$0xff]  ;;  %v9115_v19 = vadd.f32 %v8831_v18, %v17019_v34  ;;  %v17174_v46 = vadd.f32 %v16838_v28, %v18842_v10  ;;  %v18850_v18 = vld [vmem:[#allocation76_spill] sm:$0xff] }
 0x5fe   : > { %v17166_v60 = vadd.f32 %v16825_v26, %v18841_v11  ;;  %v9306_v59 = vsel %vm2778_vm1, %v9276_v39, %v9277_v12  ;;  %v9245_v50 = vadd.f32 %v16743_v27, %v9113_v22  ;;  %v18843_v25 = vld [vmem:[#allocation131_spill] sm:$0xff]  ;;  %v17184_v26 = vpop.f32.mrf.mxu0  ;;  %v8833_v11 = vpop.f32.mrf.mxu1  ;;  %v18848_v22 = vld [vmem:[#allocation205_spill] sm:$0xff]  ;;  %v17193_v28 = vadd.f32 %v16870_v51, %v18850_v18 }
 0x5ff   : > { %v17178_v8 = vadd.f32 %v16843_v57, %v18843_v25  ;;  %v18845_v1 = vld [vmem:[#allocation119_spill] sm:$0xff]  ;;  %v9501_v39 = vmul.f32 %v18847_v58, %v9306_v59  ;;  %v17189_v34 = vadd.f32 %v16861_v38, %v18848_v22  ;;  %v9278_v10 = vrot.slane %v9115_v19, 7  ;;  %v18852_v25 = vld [vmem:[#allocation77_spill] sm:$0xff]  ;;  %v18856_v59 = vld [vmem:[#allocation260_spill] sm:$0xff]  ;;  %v17208_v51 = vpop.permute.xlu1 %9659  ;;  %v17210_v19 = vpop.permute.xlu0 %9654 }
 0x600   : > { %v17182_v5 = vadd.f32 %v16852_v30, %v18845_v1  ;;  %18851 = vst [vmem:[#allocation54_spill] sm:$0xff] %v17193_v28  ;;  %v9116_v57 = vadd.f32 %v8833_v11, %v17026_v16  ;;  %v17198_v30 = vadd.f32 %v16875_v13, %v18852_v25  ;;  %v18854_v1 = vld [vmem:[#allocation219_spill] sm:$0xff]  ;;  %v8300_v58 = vadd.f32 %v16893_v41, %v18856_v59  ;;  %v11403_v38 = vpop.f32.mrf.mxu0  ;;  %v18858_v25 = vld [vmem:[#allocation240_spill] sm:$0xff] }
 0x601   : > { %18844 = vst [vmem:[#allocation52_spill] sm:$0xff] %v17178_v8  ;;  %18849 = vst [vmem:[#allocation189_spill] sm:$0xff] %v17189_v34  ;;  %v17206_v22 = vadd.f32 %v9501_v39, %v9245_v50  ;;  %v8835_v34 = vpop.f32.mrf.mxu1  ;;  %v18857_v16 = vld [vmem:[#allocation171_spill] sm:$0xff]  ;;  %v9305_v13 = vsel %vm2778_vm1, %v9277_v12, %v9278_v10  ;;  %v8303_v41 = vadd.f32 %v16911_v14, %v18858_v25  ;;  %v18863_v25 = vld [vmem:[#allocation174_spill] sm:$0xff] }
 0x602   : > { %18846 = vst [vmem:[#allocation50_spill] sm:$0xff] %v17182_v5  ;;  %18853 = vst [vmem:[#allocation133_spill] sm:$0xff] %v17198_v30  ;;  %v17202_v5 = vadd.f32 %v16888_v2, %v18854_v1  ;;  %v8292_v11 = vadd.f32 %v16902_v48, %v18857_v16  ;;  %v9246_v2 = vadd.f32 %v16743_v27, %v9116_v57  ;;  %v18859_v50 = vld [vmem:[#allocation79_spill] sm:$0xff]  ;;  %v18860_v1 = vld [vmem:[#allocation85_spill] sm:$0xff] }
 0x603   : > { %v9118_v18 = vadd.f32 %v8835_v34, %v17041_v15  ;;  %v8295_v39 = vadd.f32 %v16920_v61, %v18859_v50  ;;  %v8316_v59 = vadd.f32 %v16929_v7, %v18860_v1  ;;  %v9502_v30 = vmul.f32 %v16757_v33, %v9305_v13  ;;  %v8837_v48 = vpop.f32.mrf.mxu1  ;;  %v18861_v16 = vld [vmem:[#allocation172_spill] sm:$0xff]  ;;  %v18862_v34 = vld [vmem:[#allocation242_spill] sm:$0xff] }
 0x604   : > { %18855 = vst [vmem:[#allocation155_spill] sm:$0xff] %v17202_v5  ;;  %v8934_v5 = vpop.f32.mrf.mxu0  ;;  %v8308_v12 = vadd.f32 %v16952_v29, %v18861_v16  ;;  %v9069_v28 = vadd.f32 %v11403_v38, %v8300_v58  ;;  %v9119_v15 = vadd.f32 %v8837_v48, %v17049_v31  ;;  %v8319_v14 = vadd.f32 %v16969_v21, %v18862_v34  ;;  %v18864_v50 = vld [vmem:[#allocation244_spill] sm:$0xff]  ;;  %v18865_v29 = vld [vmem:[#allocation90_spill] sm:$0xff] }
 0x605   : > { %v9279_v57 = vrot.slane %v9118_v18, 7  ;;  %v8311_v61 = vadd.f32 %v16988_v36, %v18863_v25  ;;  %v17234_v7 = vadd.f32 %v17013_v20, %v18864_v50  ;;  %v17236_v13 = vadd.f32 %v9502_v30, %v9246_v2  ;;  %v8841_v1 = vpop.f32.mrf.mxu1  ;;  %v18866_v18 = vld [vmem:[#allocation84_spill] sm:$0xff]  ;;  %v17257_v25 = vpop.permute.xlu0 %9664 }
 0x606   : > { %v11404_v33 = vpop.f32.mrf.mxu0  ;;  %v17240_v58 = vadd.f32 %v17036_v55, %v18865_v29  ;;  %v9247_v21 = vadd.f32 %v16743_v27, %v9119_v15  ;;  %v17247_v36 = vadd.f32 %v17059_v63, %v18866_v18  ;;  %v18867_v20 = vld [vmem:[#allocation176_spill] sm:$0xff]  ;;  %v9121_v55 = vadd.f32 %v8841_v1, %v17053_v40 }
 0x607   : > { %v9072_v38 = vadd.f32 %v11404_v33, %v8303_v41  ;;  %v9304_v31 = vsel %vm2778_vm1, %v9278_v10, %v9279_v57  ;;  %v17251_v48 = vadd.f32 %v17086_v42, %v18867_v20  ;;  %v18868_v2 = vld [vmem:[#allocation192_spill] sm:$0xff]  ;;  %v8843_v34 = vpop.f32.mrf.mxu1  ;;  %v17255_v41 = vpop.permute.xlu1 %9669  ;;  %v9550_v10 = vrot.slane %v9069_v28, 1  ;;  %v18870_v33 = vld [vmem:[#allocation246_spill] sm:$0xff]  ;;  %v18872_v20 = vld [vmem:[#allocation177_spill] sm:$0xff] }
 0x608   : > { %v8937_v30 = vpop.f32.mrf.mxu0  ;;  %v9503_v16 = vmul.f32 %v18868_v2, %v9304_v31  ;;  %v9122_v63 = vadd.f32 %v8843_v34, %v17076_v52  ;;  %v17264_v42 = vadd.f32 %v17109_v3, %v18870_v33  ;;  %v17266_v29 = vadd.f32 %v8934_v5, %v8292_v11  ;;  %v18875_v34 = vld [vmem:[#allocation89_spill] sm:$0xff] }
 0x609   : > { %v9551_v15 = vrot.slane %v9072_v38, 1  ;;  %v17259_v50 = vadd.f32 %v8937_v30, %v8295_v39  ;;  %v9280_v40 = vrot.slane %v9121_v55, 7  ;;  %v8845_v1 = vpop.f32.mrf.mxu1  ;;  %v17272_v2 = vadd.f32 %v17132_v53, %v18872_v20  ;;  %v18874_v55 = vld [vmem:[#allocation248_spill] sm:$0xff] }
 0x60a   : > { %v11407_v31 = vpop.f32.mrf.mxu0  ;;  %v17268_v18 = vadd.f32 %v9503_v16, %v9247_v21  ;;  %v9248_v11 = vadd.f32 %v16743_v27, %v9122_v63  ;;  %v18873_v21 = vld [vmem:[#allocation162_spill] sm:$0xff]  ;;  %v17284_v53 = vadd.f32 %v17160_v37, %v18874_v55  ;;  %v17288_v33 = vadd.f32 %v17184_v26, %v18875_v34  ;;  %v18876_v63 = vld [vmem:[#allocation72_spill] sm:$0xff]  ;;  %v17300_v26 = vpop.permute.xlu0 %9674 }
 0x60b   : > { %18869 = vst [vmem:[#allocation51_spill] sm:$0xff] %v17259_v50  ;;  %v9608_v28 = vsel %vm3139_vm0, %v9550_v10, %v9551_v15  ;;  %v9549_v52 = vrot.slane %v17259_v50, 1  ;;  %v9081_v39 = vadd.f32 %v11407_v31, %v8316_v59  ;;  %v9303_v5 = vsel %vm2778_vm1, %v9279_v57, %v9280_v40  ;;  %v8847_v16 = vpop.f32.mrf.mxu1  ;;  %v18878_v37 = vld [vmem:[#allocation128_spill] sm:$0xff] }
 0x60c   : > { %18871 = vst [vmem:[#allocation144_spill] sm:$0xff] %v17268_v18  ;;  %v9774_v3 = vmul.f32 %v16993_v56, %v9608_v28  ;;  %v8950_v38 = vpop.f32.mrf.mxu0  ;;  %v9124_v30 = vadd.f32 %v8845_v1, %v18873_v21  ;;  %v9548_v57 = vrot.slane %v17266_v29, 1  ;;  %v18877_v1 = vld [vmem:[#allocation86_spill] sm:$0xff]  ;;  %v9504_v21 = vmul.f32 %v18878_v37, %v9303_v5  ;;  %v17298_v18 = vpop.permute.xlu1 %9679 }
 0x60d   : > { %v9609_v56 = vsel %vm3139_vm0, %v9549_v52, %v9550_v10  ;;  %v9075_v59 = vadd.f32 %v8950_v38, %v8308_v12  ;;  %v8851_v55 = vpop.f32.mrf.mxu1  ;;  %v9125_v12 = vadd.f32 %v8847_v16, %v17091_v62  ;;  %v18879_v10 = vld [vmem:[#allocation209_spill] sm:$0xff]  ;;  %v9554_v38 = vrot.slane %v9081_v39, 1 }
 0x60e   : > { %v9806_v31 = vadd.f32 %v9774_v3, %v18876_v63  ;;  %v9773_v20 = vmul.f32 %v18877_v1, %v9609_v56  ;;  %v11408_v28 = vpop.f32.mrf.mxu0  ;;  %v9281_v8 = vrot.slane %v9124_v30, 7  ;;  %v17306_v56 = vadd.f32 %v9504_v21, %v9248_v11  ;;  %v18880_v30 = vld [vmem:[#allocation57_spill] sm:$0xff] }
 0x60f   : > { %v9552_v34 = vrot.slane %v9075_v59, 1  ;;  %v9084_v50 = vadd.f32 %v11408_v28, %v8319_v14  ;;  %v17309_v5 = vadd.f32 %v8851_v55, %v17095_v32  ;;  %v8853_v1 = vpop.f32.mrf.mxu1  ;;  %v9249_v11 = vadd.f32 %v16743_v27, %v9125_v12  ;;  %v18882_v21 = vld [vmem:[#allocation213_spill] sm:$0xff] }
 0x610   : > { %9839 = vst.msk [vmem:[%s12218_s22 + $0x10] sm:$0xff] %vm9836_vm2, %v9806_v31  ;;  %v9805_v3 = vadd.f32 %v9773_v20, %v18879_v10  ;;  %v8953_v63 = vpop.f32.mrf.mxu0  ;;  %v9302_v62 = vsel %vm2778_vm1, %v9280_v40, %v9281_v8  ;;  %v18881_v31 = vld [vmem:[#allocation73_spill] sm:$0xff]  ;;  %v9128_v40 = vadd.f32 %v8853_v1, %v17099_v49 }
 0x611   : > { %v9607_v37 = vsel %vm3139_vm0, %v9551_v15, %v9552_v34  ;;  %v9555_v59 = vrot.slane %v9084_v50, 1  ;;  %v9078_v14 = vadd.f32 %v8953_v63, %v8311_v61  ;;  %v9505_v20 = vmul.f32 %v18881_v31, %v9302_v62  ;;  %v8855_v28 = vpop.f32.mrf.mxu1  ;;  %v17333_v62 = vpop.permute.xlu0 %9684 }
 0x612   : > { %9838 = vst.msk [vmem:[%s12218_s22 + $0x8] sm:$0xff] %vm9836_vm2, %v9805_v3  ;;  %v9775_v16 = vmul.f32 %v18880_v30, %v9607_v37  ;;  %v11411_v39 = vpop.f32.mrf.mxu0  ;;  %v9282_v32 = vrot.slane %v17309_v5, 7  ;;  %v17331_v37 = vpop.permute.xlu1 %9689 }
 0x613   : > { %v9604_v15 = vsel %vm3139_vm0, %v9554_v38, %v9555_v59  ;;  %v9553_v61 = vrot.slane %v9078_v14, 1  ;;  %v9093_v50 = vadd.f32 %v11411_v39, %v17234_v7  ;;  %v17327_v3 = vadd.f32 %v9505_v20, %v9249_v11  ;;  %v8857_v5 = vpop.f32.mrf.mxu1  ;;  %v18883_v14 = vld [vmem:[#allocation217_spill] sm:$0xff] }
 0x614   : > { %v9807_v55 = vadd.f32 %v9775_v16, %v18882_v21  ;;  %v9778_v10 = vmul.f32 %v17137_v23, %v9604_v15  ;;  %v8966_v12 = vpop.f32.mrf.mxu0  ;;  %v9301_v63 = vsel %vm2778_vm1, %v9281_v8, %v9282_v32  ;;  %v18884_v8 = vld [vmem:[#allocation64_spill] sm:$0xff]  ;;  %v18885_v39 = vld [vmem:[#allocation93_spill] sm:$0xff]  ;;  %v9250_v20 = vadd.f32 %v16743_v27, %v9128_v40 }
 0x615   : > { %v9605_v7 = vsel %vm3139_vm0, %v9553_v61, %v9554_v38  ;;  %v9606_v49 = vsel %vm3139_vm0, %v9552_v34, %v9553_v61  ;;  %v9558_v1 = vrot.slane %v9093_v50, 1  ;;  %v9087_v23 = vadd.f32 %v8966_v12, %v17240_v58  ;;  %v8861_v15 = vpop.f32.mrf.mxu1  ;;  %v18886_v61 = vld [vmem:[#allocation141_spill] sm:$0xff]  ;;  %v18887_v21 = vld [vmem:[#allocation20_spill] sm:$0xff] }
 0x616   : > { %9840 = vst.msk [vmem:[%s12218_s22 + $0x18] sm:$0xff] %vm9836_vm2, %v9807_v55  ;;  %v9810_v30 = vadd.f32 %v9778_v10, %v18883_v14  ;;  %v9776_v16 = vmul.f32 %v18884_v8, %v9606_v49  ;;  %v9777_v11 = vmul.f32 %v18885_v39, %v9605_v7  ;;  %v11412_v31 = vpop.f32.mrf.mxu0  ;;  %v9506_v58 = vmul.f32 %v18886_v61, %v9301_v63  ;;  %v18888_v10 = vld [vmem:[#allocation143_spill] sm:$0xff] }
 0x617   : > { %v9556_v38 = vrot.slane %v9087_v23, 1  ;;  %v17347_v34 = vadd.f32 %v11412_v31, %v17247_v36  ;;  %v9130_v50 = vadd.f32 %v8855_v28, %v17103_v45  ;;  %v9131_v40 = vadd.f32 %v8857_v5, %v17115_v43  ;;  %v8863_v23 = vpop.f32.mrf.mxu1  ;;  %v18889_v31 = vld [vmem:[#allocation142_spill] sm:$0xff] }
 0x618   : > { %9843 = vst.msk [vmem:[%s12218_s22 + $0x30] sm:$0xff] %vm9836_vm2, %v9810_v30  ;;  %v9808_v55 = vadd.f32 %v9776_v16, %v18887_v21  ;;  %v9809_v12 = vadd.f32 %v9777_v11, %v18888_v10  ;;  %v8969_v7 = vpop.f32.mrf.mxu0  ;;  %v17357_v49 = vadd.f32 %v8861_v15, %v17122_v6  ;;  %v17362_v14 = vadd.f32 %v9506_v58, %v9250_v20  ;;  %v17374_v16 = vpop.permute.xlu0 %9694 }
 0x619   : > { %v9603_v36 = vsel %vm3139_vm0, %v9555_v59, %v9556_v38  ;;  %v9559_v63 = vrot.slane %v17347_v34, 1  ;;  %v9090_v45 = vadd.f32 %v8969_v7, %v17251_v48  ;;  %v9283_v43 = vrot.slane %v9130_v50, 7  ;;  %v8865_v8 = vpop.f32.mrf.mxu1  ;;  %v17372_v59 = vpop.permute.xlu1 %9699 }
 0x61a   : > { %9841 = vst.msk [vmem:[%s12218_s22 + $0x20] sm:$0xff] %vm9836_vm2, %v9808_v55  ;;  %9842 = vst.msk [vmem:[%s12218_s22 + $0x28] sm:$0xff] %vm9836_vm2, %v9809_v12  ;;  %v9779_v28 = vmul.f32 %v17135_v54, %v9603_v36  ;;  %v11415_v5 = vpop.f32.mrf.mxu0  ;;  %v9251_v6 = vadd.f32 %v16743_v27, %v9131_v40  ;;  %v9284_v30 = vrot.slane %v17357_v49, 7  ;;  %v9134_v54 = vadd.f32 %v8863_v23, %v17126_v4  ;;  %v18890_v55 = vld [vmem:[#allocation204_spill] sm:$0xff] }
 0x61b   : > { %v9600_v48 = vsel %vm3139_vm0, %v9558_v1, %v9559_v63  ;;  %v9557_v39 = vrot.slane %v9090_v45, 1  ;;  %v9105_v11 = vadd.f32 %v11415_v5, %v17264_v42  ;;  %v9300_v34 = vsel %vm2778_vm1, %v9282_v32, %v9283_v43  ;;  %v8867_v50 = vpop.f32.mrf.mxu1  ;;  %v18892_v45 = vld [vmem:[#allocation19_spill] sm:$0xff] }
 0x61c   : > { %v9811_v20 = vadd.f32 %v9779_v28, %v18889_v31  ;;  %v9782_v15 = vmul.f32 %v17257_v25, %v9600_v48  ;;  %v8982_v61 = vpop.f32.mrf.mxu0  ;;  %v9299_v58 = vsel %vm2778_vm1, %v9283_v43, %v9284_v30  ;;  %v9507_v10 = vmul.f32 %v18890_v55, %v9300_v34  ;;  %v18891_v25 = vld [vmem:[#allocation168_spill] sm:$0xff] }
 0x61d   : > { %v9601_v21 = vsel %vm3139_vm0, %v9557_v39, %v9558_v1  ;;  %v9602_v42 = vsel %vm3139_vm0, %v9556_v38, %v9557_v39  ;;  %v9562_v4 = vrot.slane %v9105_v11, 1  ;;  %v9099_v40 = vadd.f32 %v8982_v61, %v17272_v2  ;;  %v8871_v23 = vpop.f32.mrf.mxu1  ;;  %v18895_v39 = vld [vmem:[#allocation114_spill] sm:$0xff]  ;;  %v17409_v31 = vpop.permute.xlu1 %9709 }
 0x61e   : > { %9844 = vst.msk [vmem:[%s12218_s22 + $0x38] sm:$0xff] %vm9836_vm2, %v9811_v20  ;;  %v9814_v12 = vadd.f32 %v9782_v15, %v18891_v25  ;;  %v9780_v32 = vmul.f32 %v17210_v19, %v9602_v42  ;;  %v9781_v7 = vmul.f32 %v17208_v51, %v9601_v21  ;;  %v11416_v49 = vpop.f32.mrf.mxu0  ;;  %v17397_v36 = vadd.f32 %v9507_v10, %v9251_v6  ;;  %v18893_v19 = vld [vmem:[#allocation206_spill] sm:$0xff] }
 0x61f   : > { %v17400_v1 = vadd.f32 %v11416_v49, %v17284_v53  ;;  %v9252_v38 = vadd.f32 %v16743_v27, %v9134_v54  ;;  %v9508_v28 = vmul.f32 %v18892_v45, %v9299_v58  ;;  %v18894_v51 = vld [vmem:[#allocation82_spill] sm:$0xff]  ;;  %v9560_v2 = vrot.slane %v9099_v40, 1  ;;  %v8873_v11 = vpop.f32.mrf.mxu1  ;;  %v17411_v53 = vpop.permute.xlu0 %9704  ;;  %v18897_v40 = vld [vmem:[#allocation24_spill] sm:$0xff] }
 0x620   : > { %9847 = vst.msk [vmem:[%s12218_s22 + $0x50] sm:$0xff] %vm9836_vm2, %v9814_v12  ;;  %v9812_v43 = vadd.f32 %v9780_v32, %v18893_v19  ;;  %v9813_v5 = vadd.f32 %v9781_v7, %v18894_v51  ;;  %v8985_v48 = vpop.f32.mrf.mxu0  ;;  %v9136_v6 = vadd.f32 %v8865_v8, %v18895_v39  ;;  %v9137_v34 = vadd.f32 %v8867_v50, %v17141_v35  ;;  %v18896_v50 = vld [vmem:[#allocation21_spill] sm:$0xff] }
 0x621   : > { %v9563_v54 = vrot.slane %v17400_v1, 1  ;;  %v17414_v20 = vadd.f32 %v9508_v28, %v9252_v38  ;;  %v9102_v15 = vadd.f32 %v8985_v48, %v17288_v33  ;;  %v9599_v8 = vsel %vm3139_vm0, %v9559_v63, %v9560_v2  ;;  %v8875_v55 = vpop.f32.mrf.mxu1  ;;  %v18898_v1 = vld [vmem:[#allocation70_spill] sm:$0xff]  ;;  %v18899_v28 = vld [vmem:[#allocation215_spill] sm:$0xff] }
 0x622   : > { %9845 = vst.msk [vmem:[%s12218_s22 + $0x40] sm:$0xff] %vm9836_vm2, %v9812_v43  ;;  %9846 = vst.msk [vmem:[%s12218_s22 + $0x48] sm:$0xff] %vm9836_vm2, %v9813_v5  ;;  %v9285_v61 = vrot.slane %v9136_v6, 7  ;;  %v11419_v58 = vpop.f32.mrf.mxu0  ;;  %v17425_v21 = vadd.f32 %v8871_v23, %v17145_v47  ;;  %v9140_v42 = vadd.f32 %v8873_v11, %v17150_v44  ;;  %v9783_v10 = vmul.f32 %v17255_v41, %v9599_v8  ;;  %v17446_v5 = vpop.permute.xlu1 %9719  ;;  %v18902_v11 = vld [vmem:[#allocation58_spill] sm:$0xff] }
 0x623   : > { %v9596_v35 = vsel %vm3139_vm0, %v9562_v4, %v9563_v54  ;;  %v9561_v33 = vrot.slane %v9102_v15, 1  ;;  %v9117_v25 = vadd.f32 %v11419_v58, %v18896_v50  ;;  %v9253_v32 = vadd.f32 %v16743_v27, %v9137_v34  ;;  %v8877_v7 = vpop.f32.mrf.mxu1  ;;  %v17448_v48 = vpop.permute.xlu0 %9714  ;;  %v18903_v34 = vld [vmem:[#allocation28_spill] sm:$0xff] }
 0x624   : > { %v9786_v12 = vmul.f32 %v17333_v62, %v9596_v35  ;;  %v9298_v63 = vsel %vm2778_vm1, %v9284_v30, %v9285_v61  ;;  %v8998_v47 = vpop.f32.mrf.mxu0  ;;  %v9286_v44 = vrot.slane %v17425_v21, 7  ;;  %v9815_v41 = vadd.f32 %v9783_v10, %v18897_v40  ;;  %v18904_v21 = vld [vmem:[#allocation148_spill] sm:$0xff] }
 0x625   : > { %v9597_v49 = vsel %vm3139_vm0, %v9561_v33, %v9562_v4  ;;  %v9598_v23 = vsel %vm3139_vm0, %v9560_v2, %v9561_v33  ;;  %v9566_v62 = vrot.slane %v9117_v25, 1  ;;  %v9509_v19 = vmul.f32 %v18899_v28, %v9298_v63  ;;  %v8881_v51 = vpop.f32.mrf.mxu1  ;;  %v18900_v4 = vld [vmem:[#allocation88_spill] sm:$0xff] }
 0x626   : > { %v9818_v38 = vadd.f32 %v9786_v12, %v18898_v1  ;;  %v9784_v30 = vmul.f32 %v17300_v26, %v9598_v23  ;;  %v9785_v45 = vmul.f32 %v17298_v18, %v9597_v49  ;;  %v11420_v43 = vpop.f32.mrf.mxu0  ;;  %9848 = vst.msk [vmem:[%s12218_s22 + $0x58] sm:$0xff] %vm9836_vm2, %v9815_v41  ;;  %v9111_v2 = vadd.f32 %v8998_v47, %v18900_v4  ;;  %v18901_v26 = vld [vmem:[#allocation157_spill] sm:$0xff]  ;;  %v18908_v4 = vld [vmem:[#allocation32_spill] sm:$0xff] }
 0x627   : > { %v9297_v39 = vsel %vm2778_vm1, %v9285_v61, %v9286_v44  ;;  %v9120_v6 = vadd.f32 %v11420_v43, %v18901_v26  ;;  %v9254_v18 = vadd.f32 %v16743_v27, %v9140_v42  ;;  %v17461_v58 = vadd.f32 %v9509_v19, %v9253_v32  ;;  %v8883_v33 = vpop.f32.mrf.mxu1  ;;  %v18905_v12 = vld [vmem:[#allocation185_spill] sm:$0xff]  ;;  %v9725_v28 = vpop.permute.xlu0 %9724  ;;  %v18907_v43 = vld [vmem:[#allocation188_spill] sm:$0xff] }
 0x628   : > { %9851 = vst.msk [vmem:[%s12218_s22 + $0x70] sm:$0xff] %vm9836_vm2, %v9818_v38  ;;  %v9816_v15 = vadd.f32 %v9784_v30, %v18902_v11  ;;  %v9817_v8 = vadd.f32 %v9785_v45, %v18903_v34  ;;  %v9510_v10 = vmul.f32 %v18904_v21, %v9297_v39  ;;  %v9001_v35 = vpop.f32.mrf.mxu0  ;;  %v9564_v50 = vrot.slane %v9111_v2, 1  ;;  %v18906_v30 = vld [vmem:[#allocation91_spill] sm:$0xff]  ;;  %v17490_v45 = vpop.permute.xlu1 %9729 }
 0x629   : > { %v9567_v25 = vrot.slane %v9120_v6, 1  ;;  %v9114_v61 = vadd.f32 %v9001_v35, %v18905_v12  ;;  %v9142_v63 = vadd.f32 %v8875_v55, %v17154_v9  ;;  %v9143_v32 = vadd.f32 %v8877_v7, %v17158_v17  ;;  %v8885_v41 = vpop.f32.mrf.mxu1  ;;  %v18910_v21 = vld [vmem:[#allocation23_spill] sm:$0xff] }
 0x62a   : > { %9849 = vst.msk [vmem:[%s12218_s22 + $0x60] sm:$0xff] %vm9836_vm2, %v9816_v15  ;;  %9850 = vst.msk [vmem:[%s12218_s22 + $0x68] sm:$0xff] %vm9836_vm2, %v9817_v8  ;;  %v17470_v27 = vadd.f32 %v9510_v10, %v9254_v18  ;;  %v11423_v42 = vpop.f32.mrf.mxu0  ;;  %v17474_v47 = vadd.f32 %v8881_v51, %v17166_v60  ;;  %v9146_v40 = vadd.f32 %v8883_v33, %v17174_v46  ;;  %v17487_v60 = vld [vmem:[%s17660_s8] ss:$0 sm:$0xff] }
 0x62b   : > { %v9595_v49 = vsel %vm3139_vm0, %v9563_v54, %v9564_v50  ;;  %v9592_v9 = vsel %vm3139_vm0, %v9566_v62, %v9567_v25  ;;  %v9565_v55 = vrot.slane %v9114_v61, 1  ;;  %v9287_v23 = vrot.slane %v9142_v63, 7  ;;  %v8887_v54 = vpop.f32.mrf.mxu1  ;;  %v18911_v63 = vld [vmem:[#allocation30_spill] sm:$0xff] }
 0x62c   : > { %v9787_v1 = vmul.f32 %v17331_v37, %v9595_v49  ;;  %v9790_v38 = vmul.f32 %v17411_v53, %v9592_v9  ;;  %v9129_v17 = vadd.f32 %v11423_v42, %v18906_v30  ;;  %v9255_v46 = vadd.f32 %v17487_v60, %v9143_v32  ;;  %v9014_v7 = vpop.f32.mrf.mxu0  ;;  %v18912_v32 = vld [vmem:[#allocation221_spill] sm:$0xff]  ;;  %v18915_v30 = vld [vmem:[#allocation50_spill] sm:$0xff] }
 0x62d   : > { %v9593_v37 = vsel %vm3139_vm0, %v9565_v55, %v9566_v62  ;;  %v9594_v53 = vsel %vm3139_vm0, %v9564_v50, %v9565_v55  ;;  %v9296_v19 = vsel %vm2778_vm1, %v9286_v44, %v9287_v23  ;;  %v9123_v51 = vadd.f32 %v9014_v7, %v18907_v43  ;;  %v8891_v11 = vpop.f32.mrf.mxu1  ;;  %v18909_v62 = vld [vmem:[#allocation78_spill] sm:$0xff]  ;;  %v9740_v55 = vpop.permute.xlu1 %9739 }
 0x62e   : > { %v9819_v2 = vadd.f32 %v9787_v1, %v18908_v4  ;;  %v9822_v39 = vadd.f32 %v9790_v38, %v17236_v13  ;;  %v9788_v26 = vmul.f32 %v17374_v16, %v9594_v53  ;;  %v9789_v6 = vmul.f32 %v17372_v59, %v9593_v37  ;;  %v11424_v18 = vpop.f32.mrf.mxu0  ;;  %v18917_v37 = vld [vmem:[#allocation144_spill] sm:$0xff] }
 0x62f   : > { %v9570_v15 = vrot.slane %v9129_v17, 1  ;;  %v9511_v34 = vmul.f32 %v18909_v62, %v9296_v19  ;;  %v9568_v8 = vrot.slane %v9123_v51, 1  ;;  %v9288_v44 = vrot.slane %v17474_v47, 7  ;;  %v8893_v33 = vpop.f32.mrf.mxu1 }
 0x630   : > { %9852 = vst.msk [vmem:[%s12218_s22 + $0x78] sm:$0xff] %vm9836_vm2, %v9819_v2  ;;  %9855 = vst.msk [vmem:[%s12218_s22 + $0x90] sm:$0xff] %vm9836_vm2, %v9822_v39  ;;  %v9820_v13 = vadd.f32 %v9788_v26, %v17162_v0  ;;  %v9821_v16 = vadd.f32 %v9789_v6, %v17206_v22  ;;  %v17512_v59 = vadd.f32 %v11424_v18, %v18910_v21  ;;  %v9017_v35 = vpop.f32.mrf.mxu0  ;;  %v18920_v21 = vld [vmem:[#allocation112_spill] sm:$0xff] }
 0x631   : > { %v9256_v10 = vadd.f32 %v17487_v60, %v9146_v40  ;;  %v17515_v50 = vadd.f32 %v9511_v34, %v9255_v46  ;;  %v9591_v12 = vsel %vm3139_vm0, %v9567_v25, %v9568_v8  ;;  %v9295_v61 = vsel %vm2778_vm1, %v9287_v23, %v9288_v44  ;;  %v18913_v40 = vld [vmem:[#allocation52_spill] sm:$0xff]  ;;  %v9735_v25 = vpop.permute.xlu0 %9734  ;;  %v18914_v23 = vld [vmem:[#allocation154_spill] sm:$0xff]  ;;  %v18916_v46 = vld [vmem:[#allocation189_spill] sm:$0xff]  ;;  %v8895_v51 = vpop.f32.mrf.mxu1 }
 0x632   : > { %v9126_v42 = vadd.f32 %v9017_v35, %v18911_v63  ;;  %9853 = vst.msk [vmem:[%s12218_s22 + $0x80] sm:$0xff] %vm9836_vm2, %v9820_v13  ;;  %9854 = vst.msk [vmem:[%s12218_s22 + $0x88] sm:$0xff] %vm9836_vm2, %v9821_v16  ;;  %v9791_v0 = vmul.f32 %v17409_v31, %v9591_v12  ;;  %v9571_v22 = vrot.slane %v17512_v59, 1  ;;  %v9512_v47 = vmul.f32 %v18912_v32, %v9295_v61  ;;  %v11427_v9 = vpop.f32.mrf.mxu0  ;;  %v18919_v13 = vld [vmem:[#allocation47_spill] sm:$0xff]  ;;  %v9750_v61 = vpop.permute.xlu1 %9749 }
 0x633   : > { %v9148_v49 = vadd.f32 %v8885_v41, %v18913_v40  ;;  %v9141_v38 = vadd.f32 %v11427_v9, %v18914_v23  ;;  %v9149_v17 = vadd.f32 %v8887_v54, %v18915_v30  ;;  %v9151_v7 = vadd.f32 %v8891_v11, %v18916_v46  ;;  %v8897_v12 = vpop.f32.mrf.mxu1  ;;  %v18926_v46 = vld [vmem:[#allocation155_spill] sm:$0xff] }
 0x634   : > { %v9569_v1 = vrot.slane %v9126_v42, 1  ;;  %v9823_v53 = vadd.f32 %v9791_v0, %v18917_v37  ;;  %v9588_v31 = vsel %vm3139_vm0, %v9570_v15, %v9571_v22  ;;  %v17536_v19 = vadd.f32 %v9512_v47, %v9256_v10  ;;  %v9030_v41 = vpop.f32.mrf.mxu0  ;;  %v18923_v47 = vld [vmem:[#allocation225_spill] sm:$0xff] }
 0x635   : > { %v9289_v43 = vrot.slane %v9148_v49, 7  ;;  %v9794_v4 = vmul.f32 %v9725_v28, %v9588_v31  ;;  %v9574_v54 = vrot.slane %v9141_v38, 1  ;;  %v9257_v11 = vadd.f32 %v17487_v60, %v9149_v17  ;;  %v18924_v49 = vld [vmem:[#allocation133_spill] sm:$0xff] }
 0x636   : > { %v9589_v2 = vsel %vm3139_vm0, %v9569_v1, %v9570_v15  ;;  %v9590_v39 = vsel %vm3139_vm0, %v9568_v8, %v9569_v1  ;;  %9856 = vst.msk [vmem:[%s12218_s22 + $0x98] sm:$0xff] %vm9836_vm2, %v9823_v53  ;;  %v11428_v28 = vpop.f32.mrf.mxu0  ;;  %v18918_v15 = vld [vmem:[#allocation163_spill] sm:$0xff]  ;;  %v9135_v8 = vadd.f32 %v9030_v41, %v18919_v13  ;;  %v9290_v16 = vrot.slane %v9151_v7, 7 }
 0x637   : > { %v9792_v26 = vmul.f32 %v17448_v48, %v9590_v39  ;;  %v9793_v6 = vmul.f32 %v17446_v5, %v9589_v2  ;;  %v9294_v18 = vsel %vm2778_vm1, %v9288_v44, %v9289_v43  ;;  %v9826_v62 = vadd.f32 %v9794_v4, %v17362_v14  ;;  %v18921_v44 = vld [vmem:[#allocation54_spill] sm:$0xff]  ;;  %v9745_v14 = vpop.permute.xlu0 %9744 }
 0x638   : > { %v9513_v34 = vmul.f32 %v18918_v15, %v9294_v18  ;;  %v17555_v59 = vadd.f32 %v11428_v28, %v18920_v21  ;;  %v9152_v10 = vadd.f32 %v8893_v33, %v18921_v44  ;;  %v9033_v35 = vpop.f32.mrf.mxu0  ;;  %v9572_v42 = vrot.slane %v9135_v8, 1  ;;  %v18933_v44 = vld [vmem:[#allocation191_spill] sm:$0xff] }
 0x639   : > { %v9824_v48 = vadd.f32 %v9792_v26, %v17306_v56  ;;  %v9825_v5 = vadd.f32 %v9793_v6, %v17327_v3  ;;  %9859 = vst.msk [vmem:[%s12218_s22 + $0xb0] sm:$0xff] %vm9836_vm2, %v9826_v62  ;;  %v9293_v0 = vsel %vm2778_vm1, %v9289_v43, %v9290_v16  ;;  %v18922_v56 = vld [vmem:[#allocation235_spill] sm:$0xff]  ;;  %v9154_v9 = vadd.f32 %v8895_v51, %v18924_v49 }
 0x63a   : > { %v17560_v63 = vadd.f32 %v9513_v34, %v9257_v11  ;;  %v9138_v32 = vadd.f32 %v9033_v35, %v18922_v56  ;;  %v9575_v3 = vrot.slane %v17555_v59, 1  ;;  %v9258_v33 = vadd.f32 %v17487_v60, %v9152_v10  ;;  %v11431_v1 = vpop.f32.mrf.mxu0  ;;  %v9760_v11 = vpop.permute.xlu1 %9759  ;;  %v18934_v35 = vld [vmem:[#allocation135_spill] sm:$0xff] }
 0x63b   : > { %9857 = vst.msk [vmem:[%s12218_s22 + $0xa0] sm:$0xff] %vm9836_vm2, %v9824_v48  ;;  %9858 = vst.msk [vmem:[%s12218_s22 + $0xa8] sm:$0xff] %vm9836_vm2, %v9825_v5  ;;  %v9514_v40 = vmul.f32 %v18923_v47, %v9293_v0  ;;  %v9610_v38 = vsel %vm3139_vm0, %v9548_v57, %v9549_v52  ;;  %v9587_v30 = vsel %vm3139_vm0, %v9571_v22, %v9572_v42  ;;  %v9291_v43 = vrot.slane %v9154_v9, 7  ;;  %v18927_v22 = vld [vmem:[#allocation226_spill] sm:$0xff]  ;;  %v9755_v28 = vpop.permute.xlu0 %9754  ;;  %v18932_v5 = vld [vmem:[#allocation29_spill] sm:$0xff] }
 0x63c   : > { %v9573_v17 = vrot.slane %v9138_v32, 1  ;;  %v9155_v7 = vadd.f32 %v8897_v12, %v18926_v46  ;;  %v9795_v37 = vmul.f32 %v17490_v45, %v9587_v30  ;;  %v9584_v53 = vsel %vm3139_vm0, %v9574_v54, %v9575_v3  ;;  %v9046_v41 = vpop.f32.mrf.mxu0  ;;  %v18935_v12 = vld [vmem:[#allocation87_spill] sm:$0xff] }
 0x63d   : > { %v9546_v31 = vadd.f32 %v9514_v40, %v9258_v33  ;;  %v9798_v51 = vmul.f32 %v9745_v14, %v9584_v53  ;;  %v9153_v2 = vadd.f32 %v11431_v1, %v18927_v22  ;;  %v9292_v6 = vsel %vm2778_vm1, %v9290_v16, %v9291_v43  ;;  %v18931_v16 = vld [vmem:[#allocation102_spill] sm:$0xff] }
 0x63e   : > { %v9585_v4 = vsel %vm3139_vm0, %v9573_v17, %v9574_v54  ;;  %v9586_v52 = vsel %vm3139_vm0, %v9572_v42, %v9573_v17  ;;  %v9827_v39 = vadd.f32 %v9795_v37, %v17397_v36  ;;  %v11432_v18 = vpop.f32.mrf.mxu0  ;;  %v18928_v54 = vld [vmem:[#allocation199_spill] sm:$0xff]  ;;  %v9259_v36 = vadd.f32 %v17487_v60, %v9155_v7  ;;  %v9770_v40 = vpop.permute.xlu1 %9769 }
 0x63f   : > { %v9796_v26 = vmul.f32 %v9735_v25, %v9586_v52  ;;  %v9797_v45 = vmul.f32 %v9740_v55, %v9585_v4  ;;  %v9830_v62 = vadd.f32 %v9798_v51, %v17470_v27  ;;  %v18929_v15 = vrot.slane %v18928_v54, 7  ;;  %v18930_v25 = vld [vmem:[#allocation223_spill] sm:$0xff]  ;;  %v9765_v49 = vpop.permute.xlu0 %9764 }
 0x640   : > { %v9515_v13 = vmul.f32 %v18930_v25, %v9292_v6  ;;  %9860 = vst.msk [vmem:[%s12218_s22 + $0xb8] sm:$0xff] %vm9836_vm2, %v9827_v39  ;;  %v9147_v27 = vadd.f32 %v9046_v41, %v18932_v5  ;;  %v9049_v21 = vpop.f32.mrf.mxu0  ;;  %v9156_v10 = vadd.f32 %v11432_v18, %v18933_v44  ;;  %v9772_v14 = vmul.f32 %v18935_v12, %v9610_v38 }
 0x641   : > { %v9323_v34 = vsel %vm2778_vm1, %v9291_v43, %v18929_v15  ;;  %v9828_v55 = vadd.f32 %v9796_v26, %v17414_v20  ;;  %v9829_v8 = vadd.f32 %v9797_v45, %v17461_v58  ;;  %9863 = vst.msk [vmem:[%s12218_s22 + $0xd0] sm:$0xff] %vm9836_vm2, %v9830_v62  ;;  %v9150_v60 = vadd.f32 %v9049_v21, %v18934_v35  ;;  %v18936_v20 = vld [vmem:[#allocation34_spill] sm:$0xff] }
 0x642   : > { %v9484_v48 = vmul.f32 %v18931_v16, %v9323_v34  ;;  %v9547_v59 = vadd.f32 %v9515_v13, %v9259_v36  ;;  %v9576_v42 = vrot.slane %v9147_v27, 1  ;;  %v9578_v0 = vrot.slane %v9153_v2, 1 }
 0x643   : > { %9861 = vst.msk [vmem:[%s12218_s22 + $0xc0] sm:$0xff] %vm9836_vm2, %v9828_v55  ;;  %9862 = vst.msk [vmem:[%s12218_s22 + $0xc8] sm:$0xff] %vm9836_vm2, %v9829_v8  ;;  %v9579_v56 = vrot.slane %v9156_v10, 1  ;;  %v9577_v32 = vrot.slane %v9150_v60, 1 }
 0x644   : > { %v9516_v58 = vadd.f32 %v9484_v48, %v18936_v20  ;;  %v9583_v47 = vsel %vm3139_vm0, %v9575_v3, %v9576_v42 }
 0x645   : > { %v9799_v9 = vmul.f32 %v9750_v61, %v9583_v47  ;;  %v9580_v1 = vsel %vm3139_vm0, %v9578_v0, %v9579_v56  ;;  %v9611_v23 = vsel %vm3139_vm0, %v9579_v56, %v9548_v57  ;;  %v9581_v38 = vsel %vm3139_vm0, %v9577_v32, %v9578_v0 }
 0x646   : > { %v9804_v33 = vadd.f32 %v9772_v14, %v9516_v58  ;;  %v9802_v3 = vmul.f32 %v9765_v49, %v9580_v1  ;;  %v9803_v30 = vmul.f32 %v9770_v40, %v9611_v23  ;;  %v9582_v61 = vsel %vm3139_vm0, %v9576_v42, %v9577_v32 }
 0x647   : > { %v9801_v17 = vmul.f32 %v9760_v11, %v9581_v38  ;;  %v9831_v46 = vadd.f32 %v9799_v9, %v17515_v50  ;;  %v9800_v29 = vmul.f32 %v9755_v28, %v9582_v61 }
 0x648   : > { %9837 = vst.msk [vmem:[%s12218_s22] sm:$0xff] %vm9836_vm2, %v9804_v33  ;;  %v9834_v7 = vadd.f32 %v9802_v3, %v9546_v31  ;;  %v9835_v37 = vadd.f32 %v9803_v30, %v9547_v59 }
 0x649   : > { %v9833_v57 = vadd.f32 %v9801_v17, %v17560_v63  ;;  %9864 = vst.msk [vmem:[%s12218_s22 + $0xd8] sm:$0xff] %vm9836_vm2, %v9831_v46  ;;  %v9832_v53 = vadd.f32 %v9800_v29, %v17536_v19 }
 0x64a   : > { %9867 = vst.msk [vmem:[%s12218_s22 + $0xf0] sm:$0xff] %vm9836_vm2, %v9834_v7  ;;  %9868 = vst.msk [vmem:[%s12218_s22 + $0xf8] sm:$0xff] %vm9836_vm2, %v9835_v37 }
 0x64b   : > { %9866 = vst.msk [vmem:[%s12218_s22 + $0xe8] sm:$0xff] %vm9836_vm2, %v9833_v57  ;;  %9865 = vst.msk [vmem:[%s12218_s22 + $0xe0] sm:$0xff] %vm9836_vm2, %v9832_v53 }
 0x64c PF: > { %s21_s11 = sadd.s32 1, %s12085_s11   ;;  %s18937_s30 = smov %s12081_s10 }
 0x64d   : > { %p18_p9 = scmp.ge.s32.totalorder %s21_s11, 4   ;;  %s18938_s10 = smov %s18940_s13 }
 0x64f   :  { %20 = sbr.rel (!%p18_p9) target bundleno = 3 (0x3), region = 117 }
 0x654   :  { %9899 = vsyncpa [#allocation7], 1 }
 0x655   :  { %9901 = vsyncpa [#allocation7 + $0x1], 1 }
 0x656   :  { %9902 = vsyncpa [#allocation9], 1 }
 0x657   :  { %9903 = vsyncmov [#allocation5] }
 0x65a   :  { %s9904_s14 = vpop.sfrf %9903 }
 0x65b   :  { %p10469_p11 = scmp.ne.s32.totalorder %s9904_s14, 0 }
 0x65d   :  { %9908 = shalt.err (%p10469_p11)  }
 0x65e   :  { %9910 = vsyncmov [#allocation5 + $0x1] }
 0x661   :  { %s9911_s22 = vpop.sfrf %9910 }
 0x662   :  { %p10470_p10 = scmp.ne.s32.totalorder %s9911_s22, 0 }
 0x664   :  { %9915 = shalt.err (%p10470_p10)  }

</bundles_post_ra>
